<compile_context>
chip_gen: v7x
topology: tpu7x:2x2x1
jax: 0.10.0
libtpu: 0.0.40
codegen_flags: <defaults>
</compile_context>

<pallas_src>
import jax
import jax.numpy as jnp
from jax.experimental import pallas as pl
from jax.experimental.pallas import tpu as pltpu


# ----------------------------------------------------------------------------
# Fused kernel: NC1 -> NC2 -> NC3_1/NC3_2 -> FC1(both heads), per batch block.
# ----------------------------------------------------------------------------
def _net_kernel(w1_ref, b1_ref, w2s_ref, w3s_ref, wfc_ref, cvec_ref, b3_ref,
                orgp_ref, pcol_ref, qp_ref, out_ref, tcol_ref):
    f32 = jnp.float32
    bt = out_ref.shape[1]                                   # samples per block

    # ---- NC1: Conv2d(1,1,k=3,s=1,p=1) + ReLU (batch-last, lane-dense) ------
    # orgp_ref is the zero-padded input (y=18, x=18, batch).  Each output row
    # (16, BT) is 9 shifted MACs on full-lane slabs; the row is split into its
    # two 8-wide NC2 patches and written straight into the im2col scratch
    # tcol[pos, ky*8+kx, b] (no HBM round trip, no in-kernel reshape).
    w1 = [[w1_ref[dy, dx] for dx in range(3)] for dy in range(3)]
    b1 = b1_ref[0]
    for y in range(16):
        oy, ky = y // 8, y % 8
        acc = None
        for dy in range(3):
            for dx in range(3):
                term = w1[dy][dx] * orgp_ref[y + dy, dx:dx + 16, :]
                acc = term if acc is None else acc + term
        row = jnp.maximum(acc + b1, 0.0)                    # (16, bt)
        tcol_ref[2 * oy + 0, ky * 8:(ky + 1) * 8, :] = row[0:8, :]
        tcol_ref[2 * oy + 1, ky * 8:(ky + 1) * 8, :] = row[8:16, :]

    # ---- NC2 (8x8/s8 conv == per-patch matmul) + NC3_1/NC3_2 (fused) -------
    b2 = cvec_ref[0]                                        # (4, 1)
    acc3 = jnp.zeros((18, bt), f32)
    for pos in range(4):                                    # pos = oy*2 + ox
        t2p = (jnp.dot(w2s_ref[0], tcol_ref[pos], preferred_element_type=f32)
               + jnp.dot(w2s_ref[1], pcol_ref[pos], preferred_element_type=f32)
               + b2)                                        # (4, bt)
        t2p = jnp.maximum(t2p, 0.0)
        # NC3 both heads at once: accumulate W3[pos] (18,4) @ t2[:, pos, :]
        acc3 = acc3 + jnp.dot(w3s_ref[pos], t2p, preferred_element_type=f32)
    t3 = jnp.maximum(acc3 + b3_ref[...], 0.0)               # (18, bt)

    # ---- FC1 applied to both heads via a block-diagonal weight -------------
    qps = qp_ref[...] * (1.0 / 64.0) - 0.5                  # (1, bt)
    x = jnp.dot(wfc_ref[...], t3, preferred_element_type=f32)   # (4, bt)
    out_ref[...] = x + cvec_ref[1] * qps + cvec_ref[2]      # rows: x1_0,x1_1,x2_0,x2_1


# ----------------------------------------------------------------------------
# Wrapper: batch-last layout plumbing + one-time weight repacking.
# ----------------------------------------------------------------------------
def net16x16_forward(org, pre, qp, params, *, block_b=256):
    assert block_b % 128 == 0, "batch block must be a multiple of 128 lanes"
    f32 = jnp.float32
    B = org.shape[0]
    bt = block_b
    bpad = pl.cdiv(B, bt) * bt
    pad_b = bpad - B

    # ---- data: batch-last, lane-dense, padded to Bpad -----------------------
    orgp = jnp.pad(org[:, 0].astype(f32), ((0, 0), (1, 1), (1, 1)))   # (B,18,18)
    orgp = jnp.pad(jnp.transpose(orgp, (1, 2, 0)),
                   ((0, 0), (0, 0), (0, pad_b)))                      # (18,18,Bpad)
    pcol = (pre[:, 0].astype(f32).reshape(B, 2, 8, 2, 8)              # b,oy,ky,ox,kx
            .transpose(1, 3, 2, 4, 0)                                 # oy,ox,ky,kx,b
            .reshape(4, 64, B))
    pcol = jnp.pad(pcol, ((0, 0), (0, 0), (0, pad_b)))                # (4,64,Bpad)
    qpt = jnp.pad(qp[:, 0].astype(f32), (0, pad_b)).reshape(1, bpad)  # (1,Bpad)

    # ---- weights: repacked once in XLA to matmul-friendly shapes ------------
    w1 = params["w1"].astype(f32).reshape(3, 3)
    b1 = params["b1"].astype(f32).reshape(1)
    # NC2 weight split by input channel (T, pre): (ic, oc, ky*8+kx)
    w2s = params["w2"].astype(f32).transpose(1, 0, 2, 3).reshape(2, 4, 64)
    # NC3 weights, both heads, split by patch position: (pos, j, oc)
    w31 = params["w31"].astype(f32).transpose(0, 2, 3, 1).reshape(9, 16)
    w32 = params["w32"].astype(f32).transpose(0, 2, 3, 1).reshape(9, 16)
    w3s = jnp.concatenate([w31, w32], axis=0).reshape(18, 4, 4).transpose(1, 0, 2)
    b3 = jnp.concatenate([params["b31"], params["b32"]]).astype(f32).reshape(18, 1)
    # FC1 block-diagonal (applied to head1 rows 0:9 and head2 rows 9:18)
    wfa = params["wfc1"].astype(f32)[:, :9]                            # (2,9)
    wfc = jnp.zeros((4, 18), f32).at[0:2, 0:9].set(wfa).at[2:4, 9:18].set(wfa)
    wq = jnp.tile(params["wfc1"].astype(f32)[:, 9:10], (2, 1))         # (4,1) qp column
    bf = jnp.tile(params["bfc1"].astype(f32).reshape(2, 1), (2, 1))    # (4,1) bias
    cvec = jnp.stack([params["b2"].astype(f32).reshape(4, 1), wq, bf], axis=0)  # (3,4,1)

    def const(*shape):
        return pl.BlockSpec(shape, lambda i: (0,) * len(shape))

    out = pl.pallas_call(
        _net_kernel,
        out_shape=jax.ShapeDtypeStruct((4, bpad), f32),
        grid=(bpad // bt,),
        in_specs=[
            pl.BlockSpec(memory_space=pltpu.MemorySpace.SMEM),     # w1 (3,3)
            pl.BlockSpec(memory_space=pltpu.MemorySpace.SMEM),     # b1 (1,)
            const(2, 4, 64),                                       # w2s  (constant idx map)
            const(4, 18, 4),                                       # w3s
            const(4, 18),                                          # wfc
            const(3, 4, 1),                                        # cvec = [b2, wq, bf]
            const(18, 1),                                          # b3
            pl.BlockSpec((18, 18, bt), lambda i: (0, 0, i)),       # padded org
            pl.BlockSpec((4, 64, bt), lambda i: (0, 0, i)),        # pre im2col
            pl.BlockSpec((1, bt), lambda i: (0, i)),               # qp
        ],
        out_specs=pl.BlockSpec((4, bt), lambda i: (0, i)),
        scratch_shapes=[pltpu.VMEM((4, 64, bt), f32)],             # NC1 im2col scratch
        compiler_params=pltpu.CompilerParams(dimension_semantics=("parallel",)),
    )(w1, b1, w2s, w3s, wfc, cvec, b3, orgp, pcol, qpt)

    x1 = out[0:2, :B].T                                            # (B, 2)
    x2 = out[2:4, :B].T                                            # (B, 2)
    return x1, x2


# ----------------------------------------------------------------------------
# Pure-JAX reference (mirrors the PyTorch forward) for correctness checking.
# ----------------------------------------------------------------------------
def reference_forward(org, pre, qp, params):
    def conv(x, w, b, stride, pad):
        y = jax.lax.conv_general_dilated(
            x, w, window_strides=(stride, stride),
            padding=[(pad, pad), (pad, pad)],
            dimension_numbers=("NCHW", "OIHW", "NCHW"))
        return y + b.reshape(1, -1, 1, 1)

    T = jax.nn.relu(conv(org, params["w1"].reshape(1, 1, 3, 3), params["b1"], 1, 1))
    T = jax.nn.relu(conv(jnp.concatenate([T, pre], axis=1), params["w2"], params["b2"], 8, 0))
    T1 = jax.nn.relu(conv(T, params["w31"], params["b31"], 2, 0))[:, :, 0, 0]
    T2 = jax.nn.relu(conv(T, params["w32"], params["b32"], 2, 0))[:, :, 0, 0]
    qps = qp / 64.0 - 0.5
    x1 = jnp.concatenate([T1, qps], axis=1) @ params["wfc1"].T + params["bfc1"]
    x2 = jnp.concatenate([T2, qps], axis=1) @ params["wfc1"].T + params["bfc1"]
    return x1, x2


if __name__ == "__main__":
    key = jax.random.PRNGKey(0)
    ks = jax.random.split(key, 20)
    params = dict(
        w1=jax.random.normal(ks[0], (3, 3), jnp.float32) * 0.2,
        b1=jax.random.normal(ks[1], (1,), jnp.float32) * 0.1,
        w2=jax.random.normal(ks[2], (4, 2, 8, 8), jnp.float32) * 0.1,
        b2=jax.random.normal(ks[3], (4,), jnp.float32) * 0.1,
        w31=jax.random.normal(ks[4], (9, 4, 2, 2), jnp.float32) * 0.2,
        b31=jax.random.normal(ks[5], (9,), jnp.float32) * 0.1,
        w32=jax.random.normal(ks[6], (9, 4, 2, 2), jnp.float32) * 0.2,
        b32=jax.random.normal(ks[7], (9,), jnp.float32) * 0.1,
        wfc1=jax.random.normal(ks[8], (2, 10), jnp.float32) * 0.3,
        bfc1=jax.random.normal(ks[9], (2,), jnp.float32) * 0.1,
        # FC2 is declared in the PyTorch __init__ but never used in forward().
        wfc2=jax.random.normal(ks[10], (2, 10), jnp.float32) * 0.3,
        bfc2=jax.random.normal(ks[11], (2,), jnp.float32) * 0.1,
    )

    fwd = jax.jit(net16x16_forward)

    def check(B, k0, k1, k2):
        org = jax.random.normal(k0, (B, 1, 16, 16), jnp.float32)
        pre = jax.random.normal(k1, (B, 1, 16, 16), jnp.float32)
        qp = jax.random.uniform(k2, (B, 1), jnp.float32, 0.0, 64.0)
        x1, x2 = fwd(org, pre, qp, params)
        jax.block_until_ready((x1, x2))
        r1, r2 = reference_forward(org, pre, qp, params)
        assert jnp.allclose(x1, r1, rtol=2e-4, atol=2e-4), ("x1 mismatch", B)
        assert jnp.allclose(x2, r2, rtol=2e-4, atol=2e-4), ("x2 mismatch", B)

    # Small required shape (batch=2, single padded batch block).
    check(2, ks[12], ks[13], ks[14])
    # Exercise batch padding + a multi-block grid (Bpad=512 -> grid=(2,)).
    check(260, ks[15], ks[16], ks[17])

    print("KERNEL_OK")
</pallas_src>

<mosaic_0001>
module attributes {stable_mosaic.version = 11 : i64} {
  func.func @_net_kernel(%arg0: i32, %arg1: memref<3x3xf32, #tpu.memory_space<smem>>, %arg2: memref<1xf32, #tpu.memory_space<smem>>, %arg3: memref<2x4x64xf32, #tpu.memory_space<vmem>>, %arg4: memref<4x18x4xf32, #tpu.memory_space<vmem>>, %arg5: memref<4x18xf32, #tpu.memory_space<vmem>>, %arg6: memref<3x4x1xf32, #tpu.memory_space<vmem>>, %arg7: memref<18x1xf32, #tpu.memory_space<vmem>>, %arg8: memref<18x18x256xf32, #tpu.memory_space<vmem>>, %arg9: memref<4x64x256xf32, #tpu.memory_space<vmem>>, %arg10: memref<1x256xf32, #tpu.memory_space<vmem>>, %arg11: memref<4x256xf32, #tpu.memory_space<vmem>>, %arg12: memref<4x64x256xf32, #tpu.memory_space<vmem>>) attributes {dimension_semantics = [#tpu.dimension_semantics<parallel>], iteration_bounds = array<i64: 1>, scalar_prefetch = 0 : i64, scratch_operands = 1 : i64, tpu.core_type = #tpu.core_type<tc>, window_params = [{transform_indices = @transform_0, window_bounds = array<i64: 3, 3>}, {transform_indices = @transform_1, window_bounds = array<i64: 1>}, {pipeline_mode = #tpu.pipeline_mode<synchronous>, transform_indices = @transform_2, window_bounds = array<i64: 2, 4, 64>}, {pipeline_mode = #tpu.pipeline_mode<synchronous>, transform_indices = @transform_3, window_bounds = array<i64: 4, 18, 4>}, {pipeline_mode = #tpu.pipeline_mode<synchronous>, transform_indices = @transform_4, window_bounds = array<i64: 4, 18>}, {pipeline_mode = #tpu.pipeline_mode<synchronous>, transform_indices = @transform_5, window_bounds = array<i64: 3, 4, 1>}, {pipeline_mode = #tpu.pipeline_mode<synchronous>, transform_indices = @transform_6, window_bounds = array<i64: 18, 1>}, {transform_indices = @transform_7, window_bounds = array<i64: 18, 18, 256>}, {transform_indices = @transform_8, window_bounds = array<i64: 4, 64, 256>}, {transform_indices = @transform_9, window_bounds = array<i64: 1, 256>}, {transform_indices = @transform_10, window_bounds = array<i64: 4, 256>}]} {
    %c0 = arith.constant 0 : index
    %c0_0 = arith.constant 0 : index
    %0 = memref.load %arg1[%c0, %c0_0] : memref<3x3xf32, #tpu.memory_space<smem>>
    %c0_1 = arith.constant 0 : index
    %c1 = arith.constant 1 : index
    %1 = memref.load %arg1[%c0_1, %c1] : memref<3x3xf32, #tpu.memory_space<smem>>
    %c0_2 = arith.constant 0 : index
    %c2 = arith.constant 2 : index
    %2 = memref.load %arg1[%c0_2, %c2] : memref<3x3xf32, #tpu.memory_space<smem>>
    %c1_3 = arith.constant 1 : index
    %c0_4 = arith.constant 0 : index
    %3 = memref.load %arg1[%c1_3, %c0_4] : memref<3x3xf32, #tpu.memory_space<smem>>
    %c1_5 = arith.constant 1 : index
    %c1_6 = arith.constant 1 : index
    %4 = memref.load %arg1[%c1_5, %c1_6] : memref<3x3xf32, #tpu.memory_space<smem>>
    %c1_7 = arith.constant 1 : index
    %c2_8 = arith.constant 2 : index
    %5 = memref.load %arg1[%c1_7, %c2_8] : memref<3x3xf32, #tpu.memory_space<smem>>
    %c2_9 = arith.constant 2 : index
    %c0_10 = arith.constant 0 : index
    %6 = memref.load %arg1[%c2_9, %c0_10] : memref<3x3xf32, #tpu.memory_space<smem>>
    %c2_11 = arith.constant 2 : index
    %c1_12 = arith.constant 1 : index
    %7 = memref.load %arg1[%c2_11, %c1_12] : memref<3x3xf32, #tpu.memory_space<smem>>
    %c2_13 = arith.constant 2 : index
    %c2_14 = arith.constant 2 : index
    %8 = memref.load %arg1[%c2_13, %c2_14] : memref<3x3xf32, #tpu.memory_space<smem>>
    %c0_15 = arith.constant 0 : index
    %9 = memref.load %arg2[%c0_15] : memref<1xf32, #tpu.memory_space<smem>>
    %c0_16 = arith.constant 0 : index
    %c0_17 = arith.constant 0 : index
    %c0_18 = arith.constant 0 : index
    %10 = vector.load %arg8[%c0_16, %c0_17, %c0_18] : memref<18x18x256xf32, #tpu.memory_space<vmem>>, vector<1x16x256xf32>
    %11 = vector.shape_cast %10 : vector<1x16x256xf32> to vector<16x256xf32>
    %12 = vector.broadcast %0 : f32 to vector<16x256xf32>
    %13 = arith.mulf %12, %11 : vector<16x256xf32>
    %c0_19 = arith.constant 0 : index
    %c1_20 = arith.constant 1 : index
    %c0_21 = arith.constant 0 : index
    %14 = vector.load %arg8[%c0_19, %c1_20, %c0_21] : memref<18x18x256xf32, #tpu.memory_space<vmem>>, vector<1x16x256xf32>
    %15 = vector.shape_cast %14 : vector<1x16x256xf32> to vector<16x256xf32>
    %16 = vector.broadcast %1 : f32 to vector<16x256xf32>
    %17 = arith.mulf %16, %15 : vector<16x256xf32>
    %18 = arith.addf %13, %17 : vector<16x256xf32>
    %c0_22 = arith.constant 0 : index
    %c2_23 = arith.constant 2 : index
    %c0_24 = arith.constant 0 : index
    %19 = vector.load %arg8[%c0_22, %c2_23, %c0_24] : memref<18x18x256xf32, #tpu.memory_space<vmem>>, vector<1x16x256xf32>
    %20 = vector.shape_cast %19 : vector<1x16x256xf32> to vector<16x256xf32>
    %21 = vector.broadcast %2 : f32 to vector<16x256xf32>
    %22 = arith.mulf %21, %20 : vector<16x256xf32>
    %23 = arith.addf %18, %22 : vector<16x256xf32>
    %c1_25 = arith.constant 1 : index
    %c0_26 = arith.constant 0 : index
    %c0_27 = arith.constant 0 : index
    %24 = vector.load %arg8[%c1_25, %c0_26, %c0_27] : memref<18x18x256xf32, #tpu.memory_space<vmem>>, vector<1x16x256xf32>
    %25 = vector.shape_cast %24 : vector<1x16x256xf32> to vector<16x256xf32>
    %26 = vector.broadcast %3 : f32 to vector<16x256xf32>
    %27 = arith.mulf %26, %25 : vector<16x256xf32>
    %28 = arith.addf %23, %27 : vector<16x256xf32>
    %c1_28 = arith.constant 1 : index
    %c1_29 = arith.constant 1 : index
    %c0_30 = arith.constant 0 : index
    %29 = vector.load %arg8[%c1_28, %c1_29, %c0_30] : memref<18x18x256xf32, #tpu.memory_space<vmem>>, vector<1x16x256xf32>
    %30 = vector.shape_cast %29 : vector<1x16x256xf32> to vector<16x256xf32>
    %31 = vector.broadcast %4 : f32 to vector<16x256xf32>
    %32 = arith.mulf %31, %30 : vector<16x256xf32>
    %33 = arith.addf %28, %32 : vector<16x256xf32>
    %c1_31 = arith.constant 1 : index
    %c2_32 = arith.constant 2 : index
    %c0_33 = arith.constant 0 : index
    %34 = vector.load %arg8[%c1_31, %c2_32, %c0_33] : memref<18x18x256xf32, #tpu.memory_space<vmem>>, vector<1x16x256xf32>
    %35 = vector.shape_cast %34 : vector<1x16x256xf32> to vector<16x256xf32>
    %36 = vector.broadcast %5 : f32 to vector<16x256xf32>
    %37 = arith.mulf %36, %35 : vector<16x256xf32>
    %38 = arith.addf %33, %37 : vector<16x256xf32>
    %c2_34 = arith.constant 2 : index
    %c0_35 = arith.constant 0 : index
    %c0_36 = arith.constant 0 : index
    %39 = vector.load %arg8[%c2_34, %c0_35, %c0_36] : memref<18x18x256xf32, #tpu.memory_space<vmem>>, vector<1x16x256xf32>
    %40 = vector.shape_cast %39 : vector<1x16x256xf32> to vector<16x256xf32>
    %41 = vector.broadcast %6 : f32 to vector<16x256xf32>
    %42 = arith.mulf %41, %40 : vector<16x256xf32>
    %43 = arith.addf %38, %42 : vector<16x256xf32>
    %c2_37 = arith.constant 2 : index
    %c1_38 = arith.constant 1 : index
    %c0_39 = arith.constant 0 : index
    %44 = vector.load %arg8[%c2_37, %c1_38, %c0_39] : memref<18x18x256xf32, #tpu.memory_space<vmem>>, vector<1x16x256xf32>
    %45 = vector.shape_cast %44 : vector<1x16x256xf32> to vector<16x256xf32>
    %46 = vector.broadcast %7 : f32 to vector<16x256xf32>
    %47 = arith.mulf %46, %45 : vector<16x256xf32>
    %48 = arith.addf %43, %47 : vector<16x256xf32>
    %c2_40 = arith.constant 2 : index
    %c2_41 = arith.constant 2 : index
    %c0_42 = arith.constant 0 : index
    %49 = vector.load %arg8[%c2_40, %c2_41, %c0_42] : memref<18x18x256xf32, #tpu.memory_space<vmem>>, vector<1x16x256xf32>
    %50 = vector.shape_cast %49 : vector<1x16x256xf32> to vector<16x256xf32>
    %51 = vector.broadcast %8 : f32 to vector<16x256xf32>
    %52 = arith.mulf %51, %50 : vector<16x256xf32>
    %53 = arith.addf %48, %52 : vector<16x256xf32>
    %54 = vector.broadcast %9 : f32 to vector<16x256xf32>
    %55 = arith.addf %53, %54 : vector<16x256xf32>
    %cst = arith.constant 0.000000e+00 : f32
    %56 = vector.broadcast %cst : f32 to vector<16x256xf32>
    %57 = arith.maximumf %55, %56 : vector<16x256xf32>
    %58 = vector.extract_strided_slice %57 {offsets = [0, 0], sizes = [8, 256], strides = [1, 1]} : vector<16x256xf32> to vector<8x256xf32>
    %c0_43 = arith.constant 0 : index
    %c0_44 = arith.constant 0 : index
    %c0_45 = arith.constant 0 : index
    %59 = vector.load %arg12[%c0_43, %c0_44, %c0_45] : memref<4x64x256xf32, #tpu.memory_space<vmem>>, vector<1x8x256xf32>
    %60 = vector.shape_cast %59 : vector<1x8x256xf32> to vector<8x256xf32>
    %61 = vector.shape_cast %58 : vector<8x256xf32> to vector<1x8x256xf32>
    tpu.vector_store %arg12[%c0_43, %c0_44, %c0_45], %61 {strides = array<i32>} : memref<4x64x256xf32, #tpu.memory_space<vmem>>, vector<1x8x256xf32>,
    %62 = vector.extract_strided_slice %57 {offsets = [8, 0], sizes = [8, 256], strides = [1, 1]} : vector<16x256xf32> to vector<8x256xf32>
    %c1_46 = arith.constant 1 : index
    %c0_47 = arith.constant 0 : index
    %c0_48 = arith.constant 0 : index
    %63 = vector.load %arg12[%c1_46, %c0_47, %c0_48] : memref<4x64x256xf32, #tpu.memory_space<vmem>>, vector<1x8x256xf32>
    %64 = vector.shape_cast %63 : vector<1x8x256xf32> to vector<8x256xf32>
    %65 = vector.shape_cast %62 : vector<8x256xf32> to vector<1x8x256xf32>
    tpu.vector_store %arg12[%c1_46, %c0_47, %c0_48], %65 {strides = array<i32>} : memref<4x64x256xf32, #tpu.memory_space<vmem>>, vector<1x8x256xf32>,
    %c1_49 = arith.constant 1 : index
    %c0_50 = arith.constant 0 : index
    %c0_51 = arith.constant 0 : index
    %66 = vector.load %arg8[%c1_49, %c0_50, %c0_51] : memref<18x18x256xf32, #tpu.memory_space<vmem>>, vector<1x16x256xf32>
    %67 = vector.shape_cast %66 : vector<1x16x256xf32> to vector<16x256xf32>
    %68 = vector.broadcast %0 : f32 to vector<16x256xf32>
    %69 = arith.mulf %68, %67 : vector<16x256xf32>
    %c1_52 = arith.constant 1 : index
    %c1_53 = arith.constant 1 : index
    %c0_54 = arith.constant 0 : index
    %70 = vector.load %arg8[%c1_52, %c1_53, %c0_54] : memref<18x18x256xf32, #tpu.memory_space<vmem>>, vector<1x16x256xf32>
    %71 = vector.shape_cast %70 : vector<1x16x256xf32> to vector<16x256xf32>
    %72 = vector.broadcast %1 : f32 to vector<16x256xf32>
    %73 = arith.mulf %72, %71 : vector<16x256xf32>
    %74 = arith.addf %69, %73 : vector<16x256xf32>
    %c1_55 = arith.constant 1 : index
    %c2_56 = arith.constant 2 : index
    %c0_57 = arith.constant 0 : index
    %75 = vector.load %arg8[%c1_55, %c2_56, %c0_57] : memref<18x18x256xf32, #tpu.memory_space<vmem>>, vector<1x16x256xf32>
    %76 = vector.shape_cast %75 : vector<1x16x256xf32> to vector<16x256xf32>
    %77 = vector.broadcast %2 : f32 to vector<16x256xf32>
    %78 = arith.mulf %77, %76 : vector<16x256xf32>
    %79 = arith.addf %74, %78 : vector<16x256xf32>
    %c2_58 = arith.constant 2 : index
    %c0_59 = arith.constant 0 : index
    %c0_60 = arith.constant 0 : index
    %80 = vector.load %arg8[%c2_58, %c0_59, %c0_60] : memref<18x18x256xf32, #tpu.memory_space<vmem>>, vector<1x16x256xf32>
    %81 = vector.shape_cast %80 : vector<1x16x256xf32> to vector<16x256xf32>
    %82 = vector.broadcast %3 : f32 to vector<16x256xf32>
    %83 = arith.mulf %82, %81 : vector<16x256xf32>
    %84 = arith.addf %79, %83 : vector<16x256xf32>
    %c2_61 = arith.constant 2 : index
    %c1_62 = arith.constant 1 : index
    %c0_63 = arith.constant 0 : index
    %85 = vector.load %arg8[%c2_61, %c1_62, %c0_63] : memref<18x18x256xf32, #tpu.memory_space<vmem>>, vector<1x16x256xf32>
    %86 = vector.shape_cast %85 : vector<1x16x256xf32> to vector<16x256xf32>
    %87 = vector.broadcast %4 : f32 to vector<16x256xf32>
    %88 = arith.mulf %87, %86 : vector<16x256xf32>
    %89 = arith.addf %84, %88 : vector<16x256xf32>
    %c2_64 = arith.constant 2 : index
    %c2_65 = arith.constant 2 : index
    %c0_66 = arith.constant 0 : index
    %90 = vector.load %arg8[%c2_64, %c2_65, %c0_66] : memref<18x18x256xf32, #tpu.memory_space<vmem>>, vector<1x16x256xf32>
    %91 = vector.shape_cast %90 : vector<1x16x256xf32> to vector<16x256xf32>
    %92 = vector.broadcast %5 : f32 to vector<16x256xf32>
    %93 = arith.mulf %92, %91 : vector<16x256xf32>
    %94 = arith.addf %89, %93 : vector<16x256xf32>
    %c3 = arith.constant 3 : index
    %c0_67 = arith.constant 0 : index
    %c0_68 = arith.constant 0 : index
    %95 = vector.load %arg8[%c3, %c0_67, %c0_68] : memref<18x18x256xf32, #tpu.memory_space<vmem>>, vector<1x16x256xf32>
    %96 = vector.shape_cast %95 : vector<1x16x256xf32> to vector<16x256xf32>
    %97 = vector.broadcast %6 : f32 to vector<16x256xf32>
    %98 = arith.mulf %97, %96 : vector<16x256xf32>
    %99 = arith.addf %94, %98 : vector<16x256xf32>
    %c3_69 = arith.constant 3 : index
    %c1_70 = arith.constant 1 : index
    %c0_71 = arith.constant 0 : index
    %100 = vector.load %arg8[%c3_69, %c1_70, %c0_71] : memref<18x18x256xf32, #tpu.memory_space<vmem>>, vector<1x16x256xf32>
    %101 = vector.shape_cast %100 : vector<1x16x256xf32> to vector<16x256xf32>
    %102 = vector.broadcast %7 : f32 to vector<16x256xf32>
    %103 = arith.mulf %102, %101 : vector<16x256xf32>
    %104 = arith.addf %99, %103 : vector<16x256xf32>
    %c3_72 = arith.constant 3 : index
    %c2_73 = arith.constant 2 : index
    %c0_74 = arith.constant 0 : index
    %105 = vector.load %arg8[%c3_72, %c2_73, %c0_74] : memref<18x18x256xf32, #tpu.memory_space<vmem>>, vector<1x16x256xf32>
    %106 = vector.shape_cast %105 : vector<1x16x256xf32> to vector<16x256xf32>
    %107 = vector.broadcast %8 : f32 to vector<16x256xf32>
    %108 = arith.mulf %107, %106 : vector<16x256xf32>
    %109 = arith.addf %104, %108 : vector<16x256xf32>
    %110 = vector.broadcast %9 : f32 to vector<16x256xf32>
    %111 = arith.addf %109, %110 : vector<16x256xf32>
    %cst_75 = arith.constant 0.000000e+00 : f32
    %112 = vector.broadcast %cst_75 : f32 to vector<16x256xf32>
    %113 = arith.maximumf %111, %112 : vector<16x256xf32>
    %114 = vector.extract_strided_slice %113 {offsets = [0, 0], sizes = [8, 256], strides = [1, 1]} : vector<16x256xf32> to vector<8x256xf32>
    %c0_76 = arith.constant 0 : index
    %c8 = arith.constant 8 : index
    %c0_77 = arith.constant 0 : index
    %115 = vector.load %arg12[%c0_76, %c8, %c0_77] : memref<4x64x256xf32, #tpu.memory_space<vmem>>, vector<1x8x256xf32>
    %116 = vector.shape_cast %115 : vector<1x8x256xf32> to vector<8x256xf32>
    %117 = vector.shape_cast %114 : vector<8x256xf32> to vector<1x8x256xf32>
    tpu.vector_store %arg12[%c0_76, %c8, %c0_77], %117 {strides = array<i32>} : memref<4x64x256xf32, #tpu.memory_space<vmem>>, vector<1x8x256xf32>,
    %118 = vector.extract_strided_slice %113 {offsets = [8, 0], sizes = [8, 256], strides = [1, 1]} : vector<16x256xf32> to vector<8x256xf32>
    %c1_78 = arith.constant 1 : index
    %c8_79 = arith.constant 8 : index
    %c0_80 = arith.constant 0 : index
    %119 = vector.load %arg12[%c1_78, %c8_79, %c0_80] : memref<4x64x256xf32, #tpu.memory_space<vmem>>, vector<1x8x256xf32>
    %120 = vector.shape_cast %119 : vector<1x8x256xf32> to vector<8x256xf32>
    %121 = vector.shape_cast %118 : vector<8x256xf32> to vector<1x8x256xf32>
    tpu.vector_store %arg12[%c1_78, %c8_79, %c0_80], %121 {strides = array<i32>} : memref<4x64x256xf32, #tpu.memory_space<vmem>>, vector<1x8x256xf32>,
    %c2_81 = arith.constant 2 : index
    %c0_82 = arith.constant 0 : index
    %c0_83 = arith.constant 0 : index
    %122 = vector.load %arg8[%c2_81, %c0_82, %c0_83] : memref<18x18x256xf32, #tpu.memory_space<vmem>>, vector<1x16x256xf32>
    %123 = vector.shape_cast %122 : vector<1x16x256xf32> to vector<16x256xf32>
    %124 = vector.broadcast %0 : f32 to vector<16x256xf32>
    %125 = arith.mulf %124, %123 : vector<16x256xf32>
    %c2_84 = arith.constant 2 : index
    %c1_85 = arith.constant 1 : index
    %c0_86 = arith.constant 0 : index
    %126 = vector.load %arg8[%c2_84, %c1_85, %c0_86] : memref<18x18x256xf32, #tpu.memory_space<vmem>>, vector<1x16x256xf32>
    %127 = vector.shape_cast %126 : vector<1x16x256xf32> to vector<16x256xf32>
    %128 = vector.broadcast %1 : f32 to vector<16x256xf32>
    %129 = arith.mulf %128, %127 : vector<16x256xf32>
    %130 = arith.addf %125, %129 : vector<16x256xf32>
    %c2_87 = arith.constant 2 : index
    %c2_88 = arith.constant 2 : index
    %c0_89 = arith.constant 0 : index
    %131 = vector.load %arg8[%c2_87, %c2_88, %c0_89] : memref<18x18x256xf32, #tpu.memory_space<vmem>>, vector<1x16x256xf32>
    %132 = vector.shape_cast %131 : vector<1x16x256xf32> to vector<16x256xf32>
    %133 = vector.broadcast %2 : f32 to vector<16x256xf32>
    %134 = arith.mulf %133, %132 : vector<16x256xf32>
    %135 = arith.addf %130, %134 : vector<16x256xf32>
    %c3_90 = arith.constant 3 : index
    %c0_91 = arith.constant 0 : index
    %c0_92 = arith.constant 0 : index
    %136 = vector.load %arg8[%c3_90, %c0_91, %c0_92] : memref<18x18x256xf32, #tpu.memory_space<vmem>>, vector<1x16x256xf32>
    %137 = vector.shape_cast %136 : vector<1x16x256xf32> to vector<16x256xf32>
    %138 = vector.broadcast %3 : f32 to vector<16x256xf32>
    %139 = arith.mulf %138, %137 : vector<16x256xf32>
    %140 = arith.addf %135, %139 : vector<16x256xf32>
    %c3_93 = arith.constant 3 : index
    %c1_94 = arith.constant 1 : index
    %c0_95 = arith.constant 0 : index
    %141 = vector.load %arg8[%c3_93, %c1_94, %c0_95] : memref<18x18x256xf32, #tpu.memory_space<vmem>>, vector<1x16x256xf32>
    %142 = vector.shape_cast %141 : vector<1x16x256xf32> to vector<16x256xf32>
    %143 = vector.broadcast %4 : f32 to vector<16x256xf32>
    %144 = arith.mulf %143, %142 : vector<16x256xf32>
    %145 = arith.addf %140, %144 : vector<16x256xf32>
    %c3_96 = arith.constant 3 : index
    %c2_97 = arith.constant 2 : index
    %c0_98 = arith.constant 0 : index
    %146 = vector.load %arg8[%c3_96, %c2_97, %c0_98] : memref<18x18x256xf32, #tpu.memory_space<vmem>>, vector<1x16x256xf32>
    %147 = vector.shape_cast %146 : vector<1x16x256xf32> to vector<16x256xf32>
    %148 = vector.broadcast %5 : f32 to vector<16x256xf32>
    %149 = arith.mulf %148, %147 : vector<16x256xf32>
    %150 = arith.addf %145, %149 : vector<16x256xf32>
    %c4 = arith.constant 4 : index
    %c0_99 = arith.constant 0 : index
    %c0_100 = arith.constant 0 : index
    %151 = vector.load %arg8[%c4, %c0_99, %c0_100] : memref<18x18x256xf32, #tpu.memory_space<vmem>>, vector<1x16x256xf32>
    %152 = vector.shape_cast %151 : vector<1x16x256xf32> to vector<16x256xf32>
    %153 = vector.broadcast %6 : f32 to vector<16x256xf32>
    %154 = arith.mulf %153, %152 : vector<16x256xf32>
    %155 = arith.addf %150, %154 : vector<16x256xf32>
    %c4_101 = arith.constant 4 : index
    %c1_102 = arith.constant 1 : index
    %c0_103 = arith.constant 0 : index
    %156 = vector.load %arg8[%c4_101, %c1_102, %c0_103] : memref<18x18x256xf32, #tpu.memory_space<vmem>>, vector<1x16x256xf32>
    %157 = vector.shape_cast %156 : vector<1x16x256xf32> to vector<16x256xf32>
    %158 = vector.broadcast %7 : f32 to vector<16x256xf32>
    %159 = arith.mulf %158, %157 : vector<16x256xf32>
    %160 = arith.addf %155, %159 : vector<16x256xf32>
    %c4_104 = arith.constant 4 : index
    %c2_105 = arith.constant 2 : index
    %c0_106 = arith.constant 0 : index
    %161 = vector.load %arg8[%c4_104, %c2_105, %c0_106] : memref<18x18x256xf32, #tpu.memory_space<vmem>>, vector<1x16x256xf32>
    %162 = vector.shape_cast %161 : vector<1x16x256xf32> to vector<16x256xf32>
    %163 = vector.broadcast %8 : f32 to vector<16x256xf32>
    %164 = arith.mulf %163, %162 : vector<16x256xf32>
    %165 = arith.addf %160, %164 : vector<16x256xf32>
    %166 = vector.broadcast %9 : f32 to vector<16x256xf32>
    %167 = arith.addf %165, %166 : vector<16x256xf32>
    %cst_107 = arith.constant 0.000000e+00 : f32
    %168 = vector.broadcast %cst_107 : f32 to vector<16x256xf32>
    %169 = arith.maximumf %167, %168 : vector<16x256xf32>
    %170 = vector.extract_strided_slice %169 {offsets = [0, 0], sizes = [8, 256], strides = [1, 1]} : vector<16x256xf32> to vector<8x256xf32>
    %c0_108 = arith.constant 0 : index
    %c16 = arith.constant 16 : index
    %c0_109 = arith.constant 0 : index
    %171 = vector.load %arg12[%c0_108, %c16, %c0_109] : memref<4x64x256xf32, #tpu.memory_space<vmem>>, vector<1x8x256xf32>
    %172 = vector.shape_cast %171 : vector<1x8x256xf32> to vector<8x256xf32>
    %173 = vector.shape_cast %170 : vector<8x256xf32> to vector<1x8x256xf32>
    tpu.vector_store %arg12[%c0_108, %c16, %c0_109], %173 {strides = array<i32>} : memref<4x64x256xf32, #tpu.memory_space<vmem>>, vector<1x8x256xf32>,
    %174 = vector.extract_strided_slice %169 {offsets = [8, 0], sizes = [8, 256], strides = [1, 1]} : vector<16x256xf32> to vector<8x256xf32>
    %c1_110 = arith.constant 1 : index
    %c16_111 = arith.constant 16 : index
    %c0_112 = arith.constant 0 : index
    %175 = vector.load %arg12[%c1_110, %c16_111, %c0_112] : memref<4x64x256xf32, #tpu.memory_space<vmem>>, vector<1x8x256xf32>
    %176 = vector.shape_cast %175 : vector<1x8x256xf32> to vector<8x256xf32>
    %177 = vector.shape_cast %174 : vector<8x256xf32> to vector<1x8x256xf32>
    tpu.vector_store %arg12[%c1_110, %c16_111, %c0_112], %177 {strides = array<i32>} : memref<4x64x256xf32, #tpu.memory_space<vmem>>, vector<1x8x256xf32>,
    %c3_113 = arith.constant 3 : index
    %c0_114 = arith.constant 0 : index
    %c0_115 = arith.constant 0 : index
    %178 = vector.load %arg8[%c3_113, %c0_114, %c0_115] : memref<18x18x256xf32, #tpu.memory_space<vmem>>, vector<1x16x256xf32>
    %179 = vector.shape_cast %178 : vector<1x16x256xf32> to vector<16x256xf32>
    %180 = vector.broadcast %0 : f32 to vector<16x256xf32>
    %181 = arith.mulf %180, %179 : vector<16x256xf32>
    %c3_116 = arith.constant 3 : index
    %c1_117 = arith.constant 1 : index
    %c0_118 = arith.constant 0 : index
    %182 = vector.load %arg8[%c3_116, %c1_117, %c0_118] : memref<18x18x256xf32, #tpu.memory_space<vmem>>, vector<1x16x256xf32>
    %183 = vector.shape_cast %182 : vector<1x16x256xf32> to vector<16x256xf32>
    %184 = vector.broadcast %1 : f32 to vector<16x256xf32>
    %185 = arith.mulf %184, %183 : vector<16x256xf32>
    %186 = arith.addf %181, %185 : vector<16x256xf32>
    %c3_119 = arith.constant 3 : index
    %c2_120 = arith.constant 2 : index
    %c0_121 = arith.constant 0 : index
    %187 = vector.load %arg8[%c3_119, %c2_120, %c0_121] : memref<18x18x256xf32, #tpu.memory_space<vmem>>, vector<1x16x256xf32>
    %188 = vector.shape_cast %187 : vector<1x16x256xf32> to vector<16x256xf32>
    %189 = vector.broadcast %2 : f32 to vector<16x256xf32>
    %190 = arith.mulf %189, %188 : vector<16x256xf32>
    %191 = arith.addf %186, %190 : vector<16x256xf32>
    %c4_122 = arith.constant 4 : index
    %c0_123 = arith.constant 0 : index
    %c0_124 = arith.constant 0 : index
    %192 = vector.load %arg8[%c4_122, %c0_123, %c0_124] : memref<18x18x256xf32, #tpu.memory_space<vmem>>, vector<1x16x256xf32>
    %193 = vector.shape_cast %192 : vector<1x16x256xf32> to vector<16x256xf32>
    %194 = vector.broadcast %3 : f32 to vector<16x256xf32>
    %195 = arith.mulf %194, %193 : vector<16x256xf32>
    %196 = arith.addf %191, %195 : vector<16x256xf32>
    %c4_125 = arith.constant 4 : index
    %c1_126 = arith.constant 1 : index
    %c0_127 = arith.constant 0 : index
    %197 = vector.load %arg8[%c4_125, %c1_126, %c0_127] : memref<18x18x256xf32, #tpu.memory_space<vmem>>, vector<1x16x256xf32>
    %198 = vector.shape_cast %197 : vector<1x16x256xf32> to vector<16x256xf32>
    %199 = vector.broadcast %4 : f32 to vector<16x256xf32>
    %200 = arith.mulf %199, %198 : vector<16x256xf32>
    %201 = arith.addf %196, %200 : vector<16x256xf32>
    %c4_128 = arith.constant 4 : index
    %c2_129 = arith.constant 2 : index
    %c0_130 = arith.constant 0 : index
    %202 = vector.load %arg8[%c4_128, %c2_129, %c0_130] : memref<18x18x256xf32, #tpu.memory_space<vmem>>, vector<1x16x256xf32>
    %203 = vector.shape_cast %202 : vector<1x16x256xf32> to vector<16x256xf32>
    %204 = vector.broadcast %5 : f32 to vector<16x256xf32>
    %205 = arith.mulf %204, %203 : vector<16x256xf32>
    %206 = arith.addf %201, %205 : vector<16x256xf32>
    %c5 = arith.constant 5 : index
    %c0_131 = arith.constant 0 : index
    %c0_132 = arith.constant 0 : index
    %207 = vector.load %arg8[%c5, %c0_131, %c0_132] : memref<18x18x256xf32, #tpu.memory_space<vmem>>, vector<1x16x256xf32>
    %208 = vector.shape_cast %207 : vector<1x16x256xf32> to vector<16x256xf32>
    %209 = vector.broadcast %6 : f32 to vector<16x256xf32>
    %210 = arith.mulf %209, %208 : vector<16x256xf32>
    %211 = arith.addf %206, %210 : vector<16x256xf32>
    %c5_133 = arith.constant 5 : index
    %c1_134 = arith.constant 1 : index
    %c0_135 = arith.constant 0 : index
    %212 = vector.load %arg8[%c5_133, %c1_134, %c0_135] : memref<18x18x256xf32, #tpu.memory_space<vmem>>, vector<1x16x256xf32>
    %213 = vector.shape_cast %212 : vector<1x16x256xf32> to vector<16x256xf32>
    %214 = vector.broadcast %7 : f32 to vector<16x256xf32>
    %215 = arith.mulf %214, %213 : vector<16x256xf32>
    %216 = arith.addf %211, %215 : vector<16x256xf32>
    %c5_136 = arith.constant 5 : index
    %c2_137 = arith.constant 2 : index
    %c0_138 = arith.constant 0 : index
    %217 = vector.load %arg8[%c5_136, %c2_137, %c0_138] : memref<18x18x256xf32, #tpu.memory_space<vmem>>, vector<1x16x256xf32>
    %218 = vector.shape_cast %217 : vector<1x16x256xf32> to vector<16x256xf32>
    %219 = vector.broadcast %8 : f32 to vector<16x256xf32>
    %220 = arith.mulf %219, %218 : vector<16x256xf32>
    %221 = arith.addf %216, %220 : vector<16x256xf32>
    %222 = vector.broadcast %9 : f32 to vector<16x256xf32>
    %223 = arith.addf %221, %222 : vector<16x256xf32>
    %cst_139 = arith.constant 0.000000e+00 : f32
    %224 = vector.broadcast %cst_139 : f32 to vector<16x256xf32>
    %225 = arith.maximumf %223, %224 : vector<16x256xf32>
    %226 = vector.extract_strided_slice %225 {offsets = [0, 0], sizes = [8, 256], strides = [1, 1]} : vector<16x256xf32> to vector<8x256xf32>
    %c0_140 = arith.constant 0 : index
    %c24 = arith.constant 24 : index
    %c0_141 = arith.constant 0 : index
    %227 = vector.load %arg12[%c0_140, %c24, %c0_141] : memref<4x64x256xf32, #tpu.memory_space<vmem>>, vector<1x8x256xf32>
    %228 = vector.shape_cast %227 : vector<1x8x256xf32> to vector<8x256xf32>
    %229 = vector.shape_cast %226 : vector<8x256xf32> to vector<1x8x256xf32>
    tpu.vector_store %arg12[%c0_140, %c24, %c0_141], %229 {strides = array<i32>} : memref<4x64x256xf32, #tpu.memory_space<vmem>>, vector<1x8x256xf32>,
    %230 = vector.extract_strided_slice %225 {offsets = [8, 0], sizes = [8, 256], strides = [1, 1]} : vector<16x256xf32> to vector<8x256xf32>
    %c1_142 = arith.constant 1 : index
    %c24_143 = arith.constant 24 : index
    %c0_144 = arith.constant 0 : index
    %231 = vector.load %arg12[%c1_142, %c24_143, %c0_144] : memref<4x64x256xf32, #tpu.memory_space<vmem>>, vector<1x8x256xf32>
    %232 = vector.shape_cast %231 : vector<1x8x256xf32> to vector<8x256xf32>
    %233 = vector.shape_cast %230 : vector<8x256xf32> to vector<1x8x256xf32>
    tpu.vector_store %arg12[%c1_142, %c24_143, %c0_144], %233 {strides = array<i32>} : memref<4x64x256xf32, #tpu.memory_space<vmem>>, vector<1x8x256xf32>,
    %c4_145 = arith.constant 4 : index
    %c0_146 = arith.constant 0 : index
    %c0_147 = arith.constant 0 : index
    %234 = vector.load %arg8[%c4_145, %c0_146, %c0_147] : memref<18x18x256xf32, #tpu.memory_space<vmem>>, vector<1x16x256xf32>
    %235 = vector.shape_cast %234 : vector<1x16x256xf32> to vector<16x256xf32>
    %236 = vector.broadcast %0 : f32 to vector<16x256xf32>
    %237 = arith.mulf %236, %235 : vector<16x256xf32>
    %c4_148 = arith.constant 4 : index
    %c1_149 = arith.constant 1 : index
    %c0_150 = arith.constant 0 : index
    %238 = vector.load %arg8[%c4_148, %c1_149, %c0_150] : memref<18x18x256xf32, #tpu.memory_space<vmem>>, vector<1x16x256xf32>
    %239 = vector.shape_cast %238 : vector<1x16x256xf32> to vector<16x256xf32>
    %240 = vector.broadcast %1 : f32 to vector<16x256xf32>
    %241 = arith.mulf %240, %239 : vector<16x256xf32>
    %242 = arith.addf %237, %241 : vector<16x256xf32>
    %c4_151 = arith.constant 4 : index
    %c2_152 = arith.constant 2 : index
    %c0_153 = arith.constant 0 : index
    %243 = vector.load %arg8[%c4_151, %c2_152, %c0_153] : memref<18x18x256xf32, #tpu.memory_space<vmem>>, vector<1x16x256xf32>
    %244 = vector.shape_cast %243 : vector<1x16x256xf32> to vector<16x256xf32>
    %245 = vector.broadcast %2 : f32 to vector<16x256xf32>
    %246 = arith.mulf %245, %244 : vector<16x256xf32>
    %247 = arith.addf %242, %246 : vector<16x256xf32>
    %c5_154 = arith.constant 5 : index
    %c0_155 = arith.constant 0 : index
    %c0_156 = arith.constant 0 : index
    %248 = vector.load %arg8[%c5_154, %c0_155, %c0_156] : memref<18x18x256xf32, #tpu.memory_space<vmem>>, vector<1x16x256xf32>
    %249 = vector.shape_cast %248 : vector<1x16x256xf32> to vector<16x256xf32>
    %250 = vector.broadcast %3 : f32 to vector<16x256xf32>
    %251 = arith.mulf %250, %249 : vector<16x256xf32>
    %252 = arith.addf %247, %251 : vector<16x256xf32>
    %c5_157 = arith.constant 5 : index
    %c1_158 = arith.constant 1 : index
    %c0_159 = arith.constant 0 : index
    %253 = vector.load %arg8[%c5_157, %c1_158, %c0_159] : memref<18x18x256xf32, #tpu.memory_space<vmem>>, vector<1x16x256xf32>
    %254 = vector.shape_cast %253 : vector<1x16x256xf32> to vector<16x256xf32>
    %255 = vector.broadcast %4 : f32 to vector<16x256xf32>
    %256 = arith.mulf %255, %254 : vector<16x256xf32>
    %257 = arith.addf %252, %256 : vector<16x256xf32>
    %c5_160 = arith.constant 5 : index
    %c2_161 = arith.constant 2 : index
    %c0_162 = arith.constant 0 : index
    %258 = vector.load %arg8[%c5_160, %c2_161, %c0_162] : memref<18x18x256xf32, #tpu.memory_space<vmem>>, vector<1x16x256xf32>
    %259 = vector.shape_cast %258 : vector<1x16x256xf32> to vector<16x256xf32>
    %260 = vector.broadcast %5 : f32 to vector<16x256xf32>
    %261 = arith.mulf %260, %259 : vector<16x256xf32>
    %262 = arith.addf %257, %261 : vector<16x256xf32>
    %c6 = arith.constant 6 : index
    %c0_163 = arith.constant 0 : index
    %c0_164 = arith.constant 0 : index
    %263 = vector.load %arg8[%c6, %c0_163, %c0_164] : memref<18x18x256xf32, #tpu.memory_space<vmem>>, vector<1x16x256xf32>
    %264 = vector.shape_cast %263 : vector<1x16x256xf32> to vector<16x256xf32>
    %265 = vector.broadcast %6 : f32 to vector<16x256xf32>
    %266 = arith.mulf %265, %264 : vector<16x256xf32>
    %267 = arith.addf %262, %266 : vector<16x256xf32>
    %c6_165 = arith.constant 6 : index
    %c1_166 = arith.constant 1 : index
    %c0_167 = arith.constant 0 : index
    %268 = vector.load %arg8[%c6_165, %c1_166, %c0_167] : memref<18x18x256xf32, #tpu.memory_space<vmem>>, vector<1x16x256xf32>
    %269 = vector.shape_cast %268 : vector<1x16x256xf32> to vector<16x256xf32>
    %270 = vector.broadcast %7 : f32 to vector<16x256xf32>
    %271 = arith.mulf %270, %269 : vector<16x256xf32>
    %272 = arith.addf %267, %271 : vector<16x256xf32>
    %c6_168 = arith.constant 6 : index
    %c2_169 = arith.constant 2 : index
    %c0_170 = arith.constant 0 : index
    %273 = vector.load %arg8[%c6_168, %c2_169, %c0_170] : memref<18x18x256xf32, #tpu.memory_space<vmem>>, vector<1x16x256xf32>
    %274 = vector.shape_cast %273 : vector<1x16x256xf32> to vector<16x256xf32>
    %275 = vector.broadcast %8 : f32 to vector<16x256xf32>
    %276 = arith.mulf %275, %274 : vector<16x256xf32>
    %277 = arith.addf %272, %276 : vector<16x256xf32>
    %278 = vector.broadcast %9 : f32 to vector<16x256xf32>
    %279 = arith.addf %277, %278 : vector<16x256xf32>
    %cst_171 = arith.constant 0.000000e+00 : f32
    %280 = vector.broadcast %cst_171 : f32 to vector<16x256xf32>
    %281 = arith.maximumf %279, %280 : vector<16x256xf32>
    %282 = vector.extract_strided_slice %281 {offsets = [0, 0], sizes = [8, 256], strides = [1, 1]} : vector<16x256xf32> to vector<8x256xf32>
    %c0_172 = arith.constant 0 : index
    %c32 = arith.constant 32 : index
    %c0_173 = arith.constant 0 : index
    %283 = vector.load %arg12[%c0_172, %c32, %c0_173] : memref<4x64x256xf32, #tpu.memory_space<vmem>>, vector<1x8x256xf32>
    %284 = vector.shape_cast %283 : vector<1x8x256xf32> to vector<8x256xf32>
    %285 = vector.shape_cast %282 : vector<8x256xf32> to vector<1x8x256xf32>
    tpu.vector_store %arg12[%c0_172, %c32, %c0_173], %285 {strides = array<i32>} : memref<4x64x256xf32, #tpu.memory_space<vmem>>, vector<1x8x256xf32>,
    %286 = vector.extract_strided_slice %281 {offsets = [8, 0], sizes = [8, 256], strides = [1, 1]} : vector<16x256xf32> to vector<8x256xf32>
    %c1_174 = arith.constant 1 : index
    %c32_175 = arith.constant 32 : index
    %c0_176 = arith.constant 0 : index
    %287 = vector.load %arg12[%c1_174, %c32_175, %c0_176] : memref<4x64x256xf32, #tpu.memory_space<vmem>>, vector<1x8x256xf32>
    %288 = vector.shape_cast %287 : vector<1x8x256xf32> to vector<8x256xf32>
    %289 = vector.shape_cast %286 : vector<8x256xf32> to vector<1x8x256xf32>
    tpu.vector_store %arg12[%c1_174, %c32_175, %c0_176], %289 {strides = array<i32>} : memref<4x64x256xf32, #tpu.memory_space<vmem>>, vector<1x8x256xf32>,
    %c5_177 = arith.constant 5 : index
    %c0_178 = arith.constant 0 : index
    %c0_179 = arith.constant 0 : index
    %290 = vector.load %arg8[%c5_177, %c0_178, %c0_179] : memref<18x18x256xf32, #tpu.memory_space<vmem>>, vector<1x16x256xf32>
    %291 = vector.shape_cast %290 : vector<1x16x256xf32> to vector<16x256xf32>
    %292 = vector.broadcast %0 : f32 to vector<16x256xf32>
    %293 = arith.mulf %292, %291 : vector<16x256xf32>
    %c5_180 = arith.constant 5 : index
    %c1_181 = arith.constant 1 : index
    %c0_182 = arith.constant 0 : index
    %294 = vector.load %arg8[%c5_180, %c1_181, %c0_182] : memref<18x18x256xf32, #tpu.memory_space<vmem>>, vector<1x16x256xf32>
    %295 = vector.shape_cast %294 : vector<1x16x256xf32> to vector<16x256xf32>
    %296 = vector.broadcast %1 : f32 to vector<16x256xf32>
    %297 = arith.mulf %296, %295 : vector<16x256xf32>
    %298 = arith.addf %293, %297 : vector<16x256xf32>
    %c5_183 = arith.constant 5 : index
    %c2_184 = arith.constant 2 : index
    %c0_185 = arith.constant 0 : index
    %299 = vector.load %arg8[%c5_183, %c2_184, %c0_185] : memref<18x18x256xf32, #tpu.memory_space<vmem>>, vector<1x16x256xf32>
    %300 = vector.shape_cast %299 : vector<1x16x256xf32> to vector<16x256xf32>
    %301 = vector.broadcast %2 : f32 to vector<16x256xf32>
    %302 = arith.mulf %301, %300 : vector<16x256xf32>
    %303 = arith.addf %298, %302 : vector<16x256xf32>
    %c6_186 = arith.constant 6 : index
    %c0_187 = arith.constant 0 : index
    %c0_188 = arith.constant 0 : index
    %304 = vector.load %arg8[%c6_186, %c0_187, %c0_188] : memref<18x18x256xf32, #tpu.memory_space<vmem>>, vector<1x16x256xf32>
    %305 = vector.shape_cast %304 : vector<1x16x256xf32> to vector<16x256xf32>
    %306 = vector.broadcast %3 : f32 to vector<16x256xf32>
    %307 = arith.mulf %306, %305 : vector<16x256xf32>
    %308 = arith.addf %303, %307 : vector<16x256xf32>
    %c6_189 = arith.constant 6 : index
    %c1_190 = arith.constant 1 : index
    %c0_191 = arith.constant 0 : index
    %309 = vector.load %arg8[%c6_189, %c1_190, %c0_191] : memref<18x18x256xf32, #tpu.memory_space<vmem>>, vector<1x16x256xf32>
    %310 = vector.shape_cast %309 : vector<1x16x256xf32> to vector<16x256xf32>
    %311 = vector.broadcast %4 : f32 to vector<16x256xf32>
    %312 = arith.mulf %311, %310 : vector<16x256xf32>
    %313 = arith.addf %308, %312 : vector<16x256xf32>
    %c6_192 = arith.constant 6 : index
    %c2_193 = arith.constant 2 : index
    %c0_194 = arith.constant 0 : index
    %314 = vector.load %arg8[%c6_192, %c2_193, %c0_194] : memref<18x18x256xf32, #tpu.memory_space<vmem>>, vector<1x16x256xf32>
    %315 = vector.shape_cast %314 : vector<1x16x256xf32> to vector<16x256xf32>
    %316 = vector.broadcast %5 : f32 to vector<16x256xf32>
    %317 = arith.mulf %316, %315 : vector<16x256xf32>
    %318 = arith.addf %313, %317 : vector<16x256xf32>
    %c7 = arith.constant 7 : index
    %c0_195 = arith.constant 0 : index
    %c0_196 = arith.constant 0 : index
    %319 = vector.load %arg8[%c7, %c0_195, %c0_196] : memref<18x18x256xf32, #tpu.memory_space<vmem>>, vector<1x16x256xf32>
    %320 = vector.shape_cast %319 : vector<1x16x256xf32> to vector<16x256xf32>
    %321 = vector.broadcast %6 : f32 to vector<16x256xf32>
    %322 = arith.mulf %321, %320 : vector<16x256xf32>
    %323 = arith.addf %318, %322 : vector<16x256xf32>
    %c7_197 = arith.constant 7 : index
    %c1_198 = arith.constant 1 : index
    %c0_199 = arith.constant 0 : index
    %324 = vector.load %arg8[%c7_197, %c1_198, %c0_199] : memref<18x18x256xf32, #tpu.memory_space<vmem>>, vector<1x16x256xf32>
    %325 = vector.shape_cast %324 : vector<1x16x256xf32> to vector<16x256xf32>
    %326 = vector.broadcast %7 : f32 to vector<16x256xf32>
    %327 = arith.mulf %326, %325 : vector<16x256xf32>
    %328 = arith.addf %323, %327 : vector<16x256xf32>
    %c7_200 = arith.constant 7 : index
    %c2_201 = arith.constant 2 : index
    %c0_202 = arith.constant 0 : index
    %329 = vector.load %arg8[%c7_200, %c2_201, %c0_202] : memref<18x18x256xf32, #tpu.memory_space<vmem>>, vector<1x16x256xf32>
    %330 = vector.shape_cast %329 : vector<1x16x256xf32> to vector<16x256xf32>
    %331 = vector.broadcast %8 : f32 to vector<16x256xf32>
    %332 = arith.mulf %331, %330 : vector<16x256xf32>
    %333 = arith.addf %328, %332 : vector<16x256xf32>
    %334 = vector.broadcast %9 : f32 to vector<16x256xf32>
    %335 = arith.addf %333, %334 : vector<16x256xf32>
    %cst_203 = arith.constant 0.000000e+00 : f32
    %336 = vector.broadcast %cst_203 : f32 to vector<16x256xf32>
    %337 = arith.maximumf %335, %336 : vector<16x256xf32>
    %338 = vector.extract_strided_slice %337 {offsets = [0, 0], sizes = [8, 256], strides = [1, 1]} : vector<16x256xf32> to vector<8x256xf32>
    %c0_204 = arith.constant 0 : index
    %c40 = arith.constant 40 : index
    %c0_205 = arith.constant 0 : index
    %339 = vector.load %arg12[%c0_204, %c40, %c0_205] : memref<4x64x256xf32, #tpu.memory_space<vmem>>, vector<1x8x256xf32>
    %340 = vector.shape_cast %339 : vector<1x8x256xf32> to vector<8x256xf32>
    %341 = vector.shape_cast %338 : vector<8x256xf32> to vector<1x8x256xf32>
    tpu.vector_store %arg12[%c0_204, %c40, %c0_205], %341 {strides = array<i32>} : memref<4x64x256xf32, #tpu.memory_space<vmem>>, vector<1x8x256xf32>,
    %342 = vector.extract_strided_slice %337 {offsets = [8, 0], sizes = [8, 256], strides = [1, 1]} : vector<16x256xf32> to vector<8x256xf32>
    %c1_206 = arith.constant 1 : index
    %c40_207 = arith.constant 40 : index
    %c0_208 = arith.constant 0 : index
    %343 = vector.load %arg12[%c1_206, %c40_207, %c0_208] : memref<4x64x256xf32, #tpu.memory_space<vmem>>, vector<1x8x256xf32>
    %344 = vector.shape_cast %343 : vector<1x8x256xf32> to vector<8x256xf32>
    %345 = vector.shape_cast %342 : vector<8x256xf32> to vector<1x8x256xf32>
    tpu.vector_store %arg12[%c1_206, %c40_207, %c0_208], %345 {strides = array<i32>} : memref<4x64x256xf32, #tpu.memory_space<vmem>>, vector<1x8x256xf32>,
    %c6_209 = arith.constant 6 : index
    %c0_210 = arith.constant 0 : index
    %c0_211 = arith.constant 0 : index
    %346 = vector.load %arg8[%c6_209, %c0_210, %c0_211] : memref<18x18x256xf32, #tpu.memory_space<vmem>>, vector<1x16x256xf32>
    %347 = vector.shape_cast %346 : vector<1x16x256xf32> to vector<16x256xf32>
    %348 = vector.broadcast %0 : f32 to vector<16x256xf32>
    %349 = arith.mulf %348, %347 : vector<16x256xf32>
    %c6_212 = arith.constant 6 : index
    %c1_213 = arith.constant 1 : index
    %c0_214 = arith.constant 0 : index
    %350 = vector.load %arg8[%c6_212, %c1_213, %c0_214] : memref<18x18x256xf32, #tpu.memory_space<vmem>>, vector<1x16x256xf32>
    %351 = vector.shape_cast %350 : vector<1x16x256xf32> to vector<16x256xf32>
    %352 = vector.broadcast %1 : f32 to vector<16x256xf32>
    %353 = arith.mulf %352, %351 : vector<16x256xf32>
    %354 = arith.addf %349, %353 : vector<16x256xf32>
    %c6_215 = arith.constant 6 : index
    %c2_216 = arith.constant 2 : index
    %c0_217 = arith.constant 0 : index
    %355 = vector.load %arg8[%c6_215, %c2_216, %c0_217] : memref<18x18x256xf32, #tpu.memory_space<vmem>>, vector<1x16x256xf32>
    %356 = vector.shape_cast %355 : vector<1x16x256xf32> to vector<16x256xf32>
    %357 = vector.broadcast %2 : f32 to vector<16x256xf32>
    %358 = arith.mulf %357, %356 : vector<16x256xf32>
    %359 = arith.addf %354, %358 : vector<16x256xf32>
    %c7_218 = arith.constant 7 : index
    %c0_219 = arith.constant 0 : index
    %c0_220 = arith.constant 0 : index
    %360 = vector.load %arg8[%c7_218, %c0_219, %c0_220] : memref<18x18x256xf32, #tpu.memory_space<vmem>>, vector<1x16x256xf32>
    %361 = vector.shape_cast %360 : vector<1x16x256xf32> to vector<16x256xf32>
    %362 = vector.broadcast %3 : f32 to vector<16x256xf32>
    %363 = arith.mulf %362, %361 : vector<16x256xf32>
    %364 = arith.addf %359, %363 : vector<16x256xf32>
    %c7_221 = arith.constant 7 : index
    %c1_222 = arith.constant 1 : index
    %c0_223 = arith.constant 0 : index
    %365 = vector.load %arg8[%c7_221, %c1_222, %c0_223] : memref<18x18x256xf32, #tpu.memory_space<vmem>>, vector<1x16x256xf32>
    %366 = vector.shape_cast %365 : vector<1x16x256xf32> to vector<16x256xf32>
    %367 = vector.broadcast %4 : f32 to vector<16x256xf32>
    %368 = arith.mulf %367, %366 : vector<16x256xf32>
    %369 = arith.addf %364, %368 : vector<16x256xf32>
    %c7_224 = arith.constant 7 : index
    %c2_225 = arith.constant 2 : index
    %c0_226 = arith.constant 0 : index
    %370 = vector.load %arg8[%c7_224, %c2_225, %c0_226] : memref<18x18x256xf32, #tpu.memory_space<vmem>>, vector<1x16x256xf32>
    %371 = vector.shape_cast %370 : vector<1x16x256xf32> to vector<16x256xf32>
    %372 = vector.broadcast %5 : f32 to vector<16x256xf32>
    %373 = arith.mulf %372, %371 : vector<16x256xf32>
    %374 = arith.addf %369, %373 : vector<16x256xf32>
    %c8_227 = arith.constant 8 : index
    %c0_228 = arith.constant 0 : index
    %c0_229 = arith.constant 0 : index
    %375 = vector.load %arg8[%c8_227, %c0_228, %c0_229] : memref<18x18x256xf32, #tpu.memory_space<vmem>>, vector<1x16x256xf32>
    %376 = vector.shape_cast %375 : vector<1x16x256xf32> to vector<16x256xf32>
    %377 = vector.broadcast %6 : f32 to vector<16x256xf32>
    %378 = arith.mulf %377, %376 : vector<16x256xf32>
    %379 = arith.addf %374, %378 : vector<16x256xf32>
    %c8_230 = arith.constant 8 : index
    %c1_231 = arith.constant 1 : index
    %c0_232 = arith.constant 0 : index
    %380 = vector.load %arg8[%c8_230, %c1_231, %c0_232] : memref<18x18x256xf32, #tpu.memory_space<vmem>>, vector<1x16x256xf32>
    %381 = vector.shape_cast %380 : vector<1x16x256xf32> to vector<16x256xf32>
    %382 = vector.broadcast %7 : f32 to vector<16x256xf32>
    %383 = arith.mulf %382, %381 : vector<16x256xf32>
    %384 = arith.addf %379, %383 : vector<16x256xf32>
    %c8_233 = arith.constant 8 : index
    %c2_234 = arith.constant 2 : index
    %c0_235 = arith.constant 0 : index
    %385 = vector.load %arg8[%c8_233, %c2_234, %c0_235] : memref<18x18x256xf32, #tpu.memory_space<vmem>>, vector<1x16x256xf32>
    %386 = vector.shape_cast %385 : vector<1x16x256xf32> to vector<16x256xf32>
    %387 = vector.broadcast %8 : f32 to vector<16x256xf32>
    %388 = arith.mulf %387, %386 : vector<16x256xf32>
    %389 = arith.addf %384, %388 : vector<16x256xf32>
    %390 = vector.broadcast %9 : f32 to vector<16x256xf32>
    %391 = arith.addf %389, %390 : vector<16x256xf32>
    %cst_236 = arith.constant 0.000000e+00 : f32
    %392 = vector.broadcast %cst_236 : f32 to vector<16x256xf32>
    %393 = arith.maximumf %391, %392 : vector<16x256xf32>
    %394 = vector.extract_strided_slice %393 {offsets = [0, 0], sizes = [8, 256], strides = [1, 1]} : vector<16x256xf32> to vector<8x256xf32>
    %c0_237 = arith.constant 0 : index
    %c48 = arith.constant 48 : index
    %c0_238 = arith.constant 0 : index
    %395 = vector.load %arg12[%c0_237, %c48, %c0_238] : memref<4x64x256xf32, #tpu.memory_space<vmem>>, vector<1x8x256xf32>
    %396 = vector.shape_cast %395 : vector<1x8x256xf32> to vector<8x256xf32>
    %397 = vector.shape_cast %394 : vector<8x256xf32> to vector<1x8x256xf32>
    tpu.vector_store %arg12[%c0_237, %c48, %c0_238], %397 {strides = array<i32>} : memref<4x64x256xf32, #tpu.memory_space<vmem>>, vector<1x8x256xf32>,
    %398 = vector.extract_strided_slice %393 {offsets = [8, 0], sizes = [8, 256], strides = [1, 1]} : vector<16x256xf32> to vector<8x256xf32>
    %c1_239 = arith.constant 1 : index
    %c48_240 = arith.constant 48 : index
    %c0_241 = arith.constant 0 : index
    %399 = vector.load %arg12[%c1_239, %c48_240, %c0_241] : memref<4x64x256xf32, #tpu.memory_space<vmem>>, vector<1x8x256xf32>
    %400 = vector.shape_cast %399 : vector<1x8x256xf32> to vector<8x256xf32>
    %401 = vector.shape_cast %398 : vector<8x256xf32> to vector<1x8x256xf32>
    tpu.vector_store %arg12[%c1_239, %c48_240, %c0_241], %401 {strides = array<i32>} : memref<4x64x256xf32, #tpu.memory_space<vmem>>, vector<1x8x256xf32>,
    %c7_242 = arith.constant 7 : index
    %c0_243 = arith.constant 0 : index
    %c0_244 = arith.constant 0 : index
    %402 = vector.load %arg8[%c7_242, %c0_243, %c0_244] : memref<18x18x256xf32, #tpu.memory_space<vmem>>, vector<1x16x256xf32>
    %403 = vector.shape_cast %402 : vector<1x16x256xf32> to vector<16x256xf32>
    %404 = vector.broadcast %0 : f32 to vector<16x256xf32>
    %405 = arith.mulf %404, %403 : vector<16x256xf32>
    %c7_245 = arith.constant 7 : index
    %c1_246 = arith.constant 1 : index
    %c0_247 = arith.constant 0 : index
    %406 = vector.load %arg8[%c7_245, %c1_246, %c0_247] : memref<18x18x256xf32, #tpu.memory_space<vmem>>, vector<1x16x256xf32>
    %407 = vector.shape_cast %406 : vector<1x16x256xf32> to vector<16x256xf32>
    %408 = vector.broadcast %1 : f32 to vector<16x256xf32>
    %409 = arith.mulf %408, %407 : vector<16x256xf32>
    %410 = arith.addf %405, %409 : vector<16x256xf32>
    %c7_248 = arith.constant 7 : index
    %c2_249 = arith.constant 2 : index
    %c0_250 = arith.constant 0 : index
    %411 = vector.load %arg8[%c7_248, %c2_249, %c0_250] : memref<18x18x256xf32, #tpu.memory_space<vmem>>, vector<1x16x256xf32>
    %412 = vector.shape_cast %411 : vector<1x16x256xf32> to vector<16x256xf32>
    %413 = vector.broadcast %2 : f32 to vector<16x256xf32>
    %414 = arith.mulf %413, %412 : vector<16x256xf32>
    %415 = arith.addf %410, %414 : vector<16x256xf32>
    %c8_251 = arith.constant 8 : index
    %c0_252 = arith.constant 0 : index
    %c0_253 = arith.constant 0 : index
    %416 = vector.load %arg8[%c8_251, %c0_252, %c0_253] : memref<18x18x256xf32, #tpu.memory_space<vmem>>, vector<1x16x256xf32>
    %417 = vector.shape_cast %416 : vector<1x16x256xf32> to vector<16x256xf32>
    %418 = vector.broadcast %3 : f32 to vector<16x256xf32>
    %419 = arith.mulf %418, %417 : vector<16x256xf32>
    %420 = arith.addf %415, %419 : vector<16x256xf32>
    %c8_254 = arith.constant 8 : index
    %c1_255 = arith.constant 1 : index
    %c0_256 = arith.constant 0 : index
    %421 = vector.load %arg8[%c8_254, %c1_255, %c0_256] : memref<18x18x256xf32, #tpu.memory_space<vmem>>, vector<1x16x256xf32>
    %422 = vector.shape_cast %421 : vector<1x16x256xf32> to vector<16x256xf32>
    %423 = vector.broadcast %4 : f32 to vector<16x256xf32>
    %424 = arith.mulf %423, %422 : vector<16x256xf32>
    %425 = arith.addf %420, %424 : vector<16x256xf32>
    %c8_257 = arith.constant 8 : index
    %c2_258 = arith.constant 2 : index
    %c0_259 = arith.constant 0 : index
    %426 = vector.load %arg8[%c8_257, %c2_258, %c0_259] : memref<18x18x256xf32, #tpu.memory_space<vmem>>, vector<1x16x256xf32>
    %427 = vector.shape_cast %426 : vector<1x16x256xf32> to vector<16x256xf32>
    %428 = vector.broadcast %5 : f32 to vector<16x256xf32>
    %429 = arith.mulf %428, %427 : vector<16x256xf32>
    %430 = arith.addf %425, %429 : vector<16x256xf32>
    %c9 = arith.constant 9 : index
    %c0_260 = arith.constant 0 : index
    %c0_261 = arith.constant 0 : index
    %431 = vector.load %arg8[%c9, %c0_260, %c0_261] : memref<18x18x256xf32, #tpu.memory_space<vmem>>, vector<1x16x256xf32>
    %432 = vector.shape_cast %431 : vector<1x16x256xf32> to vector<16x256xf32>
    %433 = vector.broadcast %6 : f32 to vector<16x256xf32>
    %434 = arith.mulf %433, %432 : vector<16x256xf32>
    %435 = arith.addf %430, %434 : vector<16x256xf32>
    %c9_262 = arith.constant 9 : index
    %c1_263 = arith.constant 1 : index
    %c0_264 = arith.constant 0 : index
    %436 = vector.load %arg8[%c9_262, %c1_263, %c0_264] : memref<18x18x256xf32, #tpu.memory_space<vmem>>, vector<1x16x256xf32>
    %437 = vector.shape_cast %436 : vector<1x16x256xf32> to vector<16x256xf32>
    %438 = vector.broadcast %7 : f32 to vector<16x256xf32>
    %439 = arith.mulf %438, %437 : vector<16x256xf32>
    %440 = arith.addf %435, %439 : vector<16x256xf32>
    %c9_265 = arith.constant 9 : index
    %c2_266 = arith.constant 2 : index
    %c0_267 = arith.constant 0 : index
    %441 = vector.load %arg8[%c9_265, %c2_266, %c0_267] : memref<18x18x256xf32, #tpu.memory_space<vmem>>, vector<1x16x256xf32>
    %442 = vector.shape_cast %441 : vector<1x16x256xf32> to vector<16x256xf32>
    %443 = vector.broadcast %8 : f32 to vector<16x256xf32>
    %444 = arith.mulf %443, %442 : vector<16x256xf32>
    %445 = arith.addf %440, %444 : vector<16x256xf32>
    %446 = vector.broadcast %9 : f32 to vector<16x256xf32>
    %447 = arith.addf %445, %446 : vector<16x256xf32>
    %cst_268 = arith.constant 0.000000e+00 : f32
    %448 = vector.broadcast %cst_268 : f32 to vector<16x256xf32>
    %449 = arith.maximumf %447, %448 : vector<16x256xf32>
    %450 = vector.extract_strided_slice %449 {offsets = [0, 0], sizes = [8, 256], strides = [1, 1]} : vector<16x256xf32> to vector<8x256xf32>
    %c0_269 = arith.constant 0 : index
    %c56 = arith.constant 56 : index
    %c0_270 = arith.constant 0 : index
    %451 = vector.load %arg12[%c0_269, %c56, %c0_270] : memref<4x64x256xf32, #tpu.memory_space<vmem>>, vector<1x8x256xf32>
    %452 = vector.shape_cast %451 : vector<1x8x256xf32> to vector<8x256xf32>
    %453 = vector.shape_cast %450 : vector<8x256xf32> to vector<1x8x256xf32>
    tpu.vector_store %arg12[%c0_269, %c56, %c0_270], %453 {strides = array<i32>} : memref<4x64x256xf32, #tpu.memory_space<vmem>>, vector<1x8x256xf32>,
    %454 = vector.extract_strided_slice %449 {offsets = [8, 0], sizes = [8, 256], strides = [1, 1]} : vector<16x256xf32> to vector<8x256xf32>
    %c1_271 = arith.constant 1 : index
    %c56_272 = arith.constant 56 : index
    %c0_273 = arith.constant 0 : index
    %455 = vector.load %arg12[%c1_271, %c56_272, %c0_273] : memref<4x64x256xf32, #tpu.memory_space<vmem>>, vector<1x8x256xf32>
    %456 = vector.shape_cast %455 : vector<1x8x256xf32> to vector<8x256xf32>
    %457 = vector.shape_cast %454 : vector<8x256xf32> to vector<1x8x256xf32>
    tpu.vector_store %arg12[%c1_271, %c56_272, %c0_273], %457 {strides = array<i32>} : memref<4x64x256xf32, #tpu.memory_space<vmem>>, vector<1x8x256xf32>,
    %c8_274 = arith.constant 8 : index
    %c0_275 = arith.constant 0 : index
    %c0_276 = arith.constant 0 : index
    %458 = vector.load %arg8[%c8_274, %c0_275, %c0_276] : memref<18x18x256xf32, #tpu.memory_space<vmem>>, vector<1x16x256xf32>
    %459 = vector.shape_cast %458 : vector<1x16x256xf32> to vector<16x256xf32>
    %460 = vector.broadcast %0 : f32 to vector<16x256xf32>
    %461 = arith.mulf %460, %459 : vector<16x256xf32>
    %c8_277 = arith.constant 8 : index
    %c1_278 = arith.constant 1 : index
    %c0_279 = arith.constant 0 : index
    %462 = vector.load %arg8[%c8_277, %c1_278, %c0_279] : memref<18x18x256xf32, #tpu.memory_space<vmem>>, vector<1x16x256xf32>
    %463 = vector.shape_cast %462 : vector<1x16x256xf32> to vector<16x256xf32>
    %464 = vector.broadcast %1 : f32 to vector<16x256xf32>
    %465 = arith.mulf %464, %463 : vector<16x256xf32>
    %466 = arith.addf %461, %465 : vector<16x256xf32>
    %c8_280 = arith.constant 8 : index
    %c2_281 = arith.constant 2 : index
    %c0_282 = arith.constant 0 : index
    %467 = vector.load %arg8[%c8_280, %c2_281, %c0_282] : memref<18x18x256xf32, #tpu.memory_space<vmem>>, vector<1x16x256xf32>
    %468 = vector.shape_cast %467 : vector<1x16x256xf32> to vector<16x256xf32>
    %469 = vector.broadcast %2 : f32 to vector<16x256xf32>
    %470 = arith.mulf %469, %468 : vector<16x256xf32>
    %471 = arith.addf %466, %470 : vector<16x256xf32>
    %c9_283 = arith.constant 9 : index
    %c0_284 = arith.constant 0 : index
    %c0_285 = arith.constant 0 : index
    %472 = vector.load %arg8[%c9_283, %c0_284, %c0_285] : memref<18x18x256xf32, #tpu.memory_space<vmem>>, vector<1x16x256xf32>
    %473 = vector.shape_cast %472 : vector<1x16x256xf32> to vector<16x256xf32>
    %474 = vector.broadcast %3 : f32 to vector<16x256xf32>
    %475 = arith.mulf %474, %473 : vector<16x256xf32>
    %476 = arith.addf %471, %475 : vector<16x256xf32>
    %c9_286 = arith.constant 9 : index
    %c1_287 = arith.constant 1 : index
    %c0_288 = arith.constant 0 : index
    %477 = vector.load %arg8[%c9_286, %c1_287, %c0_288] : memref<18x18x256xf32, #tpu.memory_space<vmem>>, vector<1x16x256xf32>
    %478 = vector.shape_cast %477 : vector<1x16x256xf32> to vector<16x256xf32>
    %479 = vector.broadcast %4 : f32 to vector<16x256xf32>
    %480 = arith.mulf %479, %478 : vector<16x256xf32>
    %481 = arith.addf %476, %480 : vector<16x256xf32>
    %c9_289 = arith.constant 9 : index
    %c2_290 = arith.constant 2 : index
    %c0_291 = arith.constant 0 : index
    %482 = vector.load %arg8[%c9_289, %c2_290, %c0_291] : memref<18x18x256xf32, #tpu.memory_space<vmem>>, vector<1x16x256xf32>
    %483 = vector.shape_cast %482 : vector<1x16x256xf32> to vector<16x256xf32>
    %484 = vector.broadcast %5 : f32 to vector<16x256xf32>
    %485 = arith.mulf %484, %483 : vector<16x256xf32>
    %486 = arith.addf %481, %485 : vector<16x256xf32>
    %c10 = arith.constant 10 : index
    %c0_292 = arith.constant 0 : index
    %c0_293 = arith.constant 0 : index
    %487 = vector.load %arg8[%c10, %c0_292, %c0_293] : memref<18x18x256xf32, #tpu.memory_space<vmem>>, vector<1x16x256xf32>
    %488 = vector.shape_cast %487 : vector<1x16x256xf32> to vector<16x256xf32>
    %489 = vector.broadcast %6 : f32 to vector<16x256xf32>
    %490 = arith.mulf %489, %488 : vector<16x256xf32>
    %491 = arith.addf %486, %490 : vector<16x256xf32>
    %c10_294 = arith.constant 10 : index
    %c1_295 = arith.constant 1 : index
    %c0_296 = arith.constant 0 : index
    %492 = vector.load %arg8[%c10_294, %c1_295, %c0_296] : memref<18x18x256xf32, #tpu.memory_space<vmem>>, vector<1x16x256xf32>
    %493 = vector.shape_cast %492 : vector<1x16x256xf32> to vector<16x256xf32>
    %494 = vector.broadcast %7 : f32 to vector<16x256xf32>
    %495 = arith.mulf %494, %493 : vector<16x256xf32>
    %496 = arith.addf %491, %495 : vector<16x256xf32>
    %c10_297 = arith.constant 10 : index
    %c2_298 = arith.constant 2 : index
    %c0_299 = arith.constant 0 : index
    %497 = vector.load %arg8[%c10_297, %c2_298, %c0_299] : memref<18x18x256xf32, #tpu.memory_space<vmem>>, vector<1x16x256xf32>
    %498 = vector.shape_cast %497 : vector<1x16x256xf32> to vector<16x256xf32>
    %499 = vector.broadcast %8 : f32 to vector<16x256xf32>
    %500 = arith.mulf %499, %498 : vector<16x256xf32>
    %501 = arith.addf %496, %500 : vector<16x256xf32>
    %502 = vector.broadcast %9 : f32 to vector<16x256xf32>
    %503 = arith.addf %501, %502 : vector<16x256xf32>
    %cst_300 = arith.constant 0.000000e+00 : f32
    %504 = vector.broadcast %cst_300 : f32 to vector<16x256xf32>
    %505 = arith.maximumf %503, %504 : vector<16x256xf32>
    %506 = vector.extract_strided_slice %505 {offsets = [0, 0], sizes = [8, 256], strides = [1, 1]} : vector<16x256xf32> to vector<8x256xf32>
    %c2_301 = arith.constant 2 : index
    %c0_302 = arith.constant 0 : index
    %c0_303 = arith.constant 0 : index
    %507 = vector.load %arg12[%c2_301, %c0_302, %c0_303] : memref<4x64x256xf32, #tpu.memory_space<vmem>>, vector<1x8x256xf32>
    %508 = vector.shape_cast %507 : vector<1x8x256xf32> to vector<8x256xf32>
    %509 = vector.shape_cast %506 : vector<8x256xf32> to vector<1x8x256xf32>
    tpu.vector_store %arg12[%c2_301, %c0_302, %c0_303], %509 {strides = array<i32>} : memref<4x64x256xf32, #tpu.memory_space<vmem>>, vector<1x8x256xf32>,
    %510 = vector.extract_strided_slice %505 {offsets = [8, 0], sizes = [8, 256], strides = [1, 1]} : vector<16x256xf32> to vector<8x256xf32>
    %c3_304 = arith.constant 3 : index
    %c0_305 = arith.constant 0 : index
    %c0_306 = arith.constant 0 : index
    %511 = vector.load %arg12[%c3_304, %c0_305, %c0_306] : memref<4x64x256xf32, #tpu.memory_space<vmem>>, vector<1x8x256xf32>
    %512 = vector.shape_cast %511 : vector<1x8x256xf32> to vector<8x256xf32>
    %513 = vector.shape_cast %510 : vector<8x256xf32> to vector<1x8x256xf32>
    tpu.vector_store %arg12[%c3_304, %c0_305, %c0_306], %513 {strides = array<i32>} : memref<4x64x256xf32, #tpu.memory_space<vmem>>, vector<1x8x256xf32>,
    %c9_307 = arith.constant 9 : index
    %c0_308 = arith.constant 0 : index
    %c0_309 = arith.constant 0 : index
    %514 = vector.load %arg8[%c9_307, %c0_308, %c0_309] : memref<18x18x256xf32, #tpu.memory_space<vmem>>, vector<1x16x256xf32>
    %515 = vector.shape_cast %514 : vector<1x16x256xf32> to vector<16x256xf32>
    %516 = vector.broadcast %0 : f32 to vector<16x256xf32>
    %517 = arith.mulf %516, %515 : vector<16x256xf32>
    %c9_310 = arith.constant 9 : index
    %c1_311 = arith.constant 1 : index
    %c0_312 = arith.constant 0 : index
    %518 = vector.load %arg8[%c9_310, %c1_311, %c0_312] : memref<18x18x256xf32, #tpu.memory_space<vmem>>, vector<1x16x256xf32>
    %519 = vector.shape_cast %518 : vector<1x16x256xf32> to vector<16x256xf32>
    %520 = vector.broadcast %1 : f32 to vector<16x256xf32>
    %521 = arith.mulf %520, %519 : vector<16x256xf32>
    %522 = arith.addf %517, %521 : vector<16x256xf32>
    %c9_313 = arith.constant 9 : index
    %c2_314 = arith.constant 2 : index
    %c0_315 = arith.constant 0 : index
    %523 = vector.load %arg8[%c9_313, %c2_314, %c0_315] : memref<18x18x256xf32, #tpu.memory_space<vmem>>, vector<1x16x256xf32>
    %524 = vector.shape_cast %523 : vector<1x16x256xf32> to vector<16x256xf32>
    %525 = vector.broadcast %2 : f32 to vector<16x256xf32>
    %526 = arith.mulf %525, %524 : vector<16x256xf32>
    %527 = arith.addf %522, %526 : vector<16x256xf32>
    %c10_316 = arith.constant 10 : index
    %c0_317 = arith.constant 0 : index
    %c0_318 = arith.constant 0 : index
    %528 = vector.load %arg8[%c10_316, %c0_317, %c0_318] : memref<18x18x256xf32, #tpu.memory_space<vmem>>, vector<1x16x256xf32>
    %529 = vector.shape_cast %528 : vector<1x16x256xf32> to vector<16x256xf32>
    %530 = vector.broadcast %3 : f32 to vector<16x256xf32>
    %531 = arith.mulf %530, %529 : vector<16x256xf32>
    %532 = arith.addf %527, %531 : vector<16x256xf32>
    %c10_319 = arith.constant 10 : index
    %c1_320 = arith.constant 1 : index
    %c0_321 = arith.constant 0 : index
    %533 = vector.load %arg8[%c10_319, %c1_320, %c0_321] : memref<18x18x256xf32, #tpu.memory_space<vmem>>, vector<1x16x256xf32>
    %534 = vector.shape_cast %533 : vector<1x16x256xf32> to vector<16x256xf32>
    %535 = vector.broadcast %4 : f32 to vector<16x256xf32>
    %536 = arith.mulf %535, %534 : vector<16x256xf32>
    %537 = arith.addf %532, %536 : vector<16x256xf32>
    %c10_322 = arith.constant 10 : index
    %c2_323 = arith.constant 2 : index
    %c0_324 = arith.constant 0 : index
    %538 = vector.load %arg8[%c10_322, %c2_323, %c0_324] : memref<18x18x256xf32, #tpu.memory_space<vmem>>, vector<1x16x256xf32>
    %539 = vector.shape_cast %538 : vector<1x16x256xf32> to vector<16x256xf32>
    %540 = vector.broadcast %5 : f32 to vector<16x256xf32>
    %541 = arith.mulf %540, %539 : vector<16x256xf32>
    %542 = arith.addf %537, %541 : vector<16x256xf32>
    %c11 = arith.constant 11 : index
    %c0_325 = arith.constant 0 : index
    %c0_326 = arith.constant 0 : index
    %543 = vector.load %arg8[%c11, %c0_325, %c0_326] : memref<18x18x256xf32, #tpu.memory_space<vmem>>, vector<1x16x256xf32>
    %544 = vector.shape_cast %543 : vector<1x16x256xf32> to vector<16x256xf32>
    %545 = vector.broadcast %6 : f32 to vector<16x256xf32>
    %546 = arith.mulf %545, %544 : vector<16x256xf32>
    %547 = arith.addf %542, %546 : vector<16x256xf32>
    %c11_327 = arith.constant 11 : index
    %c1_328 = arith.constant 1 : index
    %c0_329 = arith.constant 0 : index
    %548 = vector.load %arg8[%c11_327, %c1_328, %c0_329] : memref<18x18x256xf32, #tpu.memory_space<vmem>>, vector<1x16x256xf32>
    %549 = vector.shape_cast %548 : vector<1x16x256xf32> to vector<16x256xf32>
    %550 = vector.broadcast %7 : f32 to vector<16x256xf32>
    %551 = arith.mulf %550, %549 : vector<16x256xf32>
    %552 = arith.addf %547, %551 : vector<16x256xf32>
    %c11_330 = arith.constant 11 : index
    %c2_331 = arith.constant 2 : index
    %c0_332 = arith.constant 0 : index
    %553 = vector.load %arg8[%c11_330, %c2_331, %c0_332] : memref<18x18x256xf32, #tpu.memory_space<vmem>>, vector<1x16x256xf32>
    %554 = vector.shape_cast %553 : vector<1x16x256xf32> to vector<16x256xf32>
    %555 = vector.broadcast %8 : f32 to vector<16x256xf32>
    %556 = arith.mulf %555, %554 : vector<16x256xf32>
    %557 = arith.addf %552, %556 : vector<16x256xf32>
    %558 = vector.broadcast %9 : f32 to vector<16x256xf32>
    %559 = arith.addf %557, %558 : vector<16x256xf32>
    %cst_333 = arith.constant 0.000000e+00 : f32
    %560 = vector.broadcast %cst_333 : f32 to vector<16x256xf32>
    %561 = arith.maximumf %559, %560 : vector<16x256xf32>
    %562 = vector.extract_strided_slice %561 {offsets = [0, 0], sizes = [8, 256], strides = [1, 1]} : vector<16x256xf32> to vector<8x256xf32>
    %c2_334 = arith.constant 2 : index
    %c8_335 = arith.constant 8 : index
    %c0_336 = arith.constant 0 : index
    %563 = vector.load %arg12[%c2_334, %c8_335, %c0_336] : memref<4x64x256xf32, #tpu.memory_space<vmem>>, vector<1x8x256xf32>
    %564 = vector.shape_cast %563 : vector<1x8x256xf32> to vector<8x256xf32>
    %565 = vector.shape_cast %562 : vector<8x256xf32> to vector<1x8x256xf32>
    tpu.vector_store %arg12[%c2_334, %c8_335, %c0_336], %565 {strides = array<i32>} : memref<4x64x256xf32, #tpu.memory_space<vmem>>, vector<1x8x256xf32>,
    %566 = vector.extract_strided_slice %561 {offsets = [8, 0], sizes = [8, 256], strides = [1, 1]} : vector<16x256xf32> to vector<8x256xf32>
    %c3_337 = arith.constant 3 : index
    %c8_338 = arith.constant 8 : index
    %c0_339 = arith.constant 0 : index
    %567 = vector.load %arg12[%c3_337, %c8_338, %c0_339] : memref<4x64x256xf32, #tpu.memory_space<vmem>>, vector<1x8x256xf32>
    %568 = vector.shape_cast %567 : vector<1x8x256xf32> to vector<8x256xf32>
    %569 = vector.shape_cast %566 : vector<8x256xf32> to vector<1x8x256xf32>
    tpu.vector_store %arg12[%c3_337, %c8_338, %c0_339], %569 {strides = array<i32>} : memref<4x64x256xf32, #tpu.memory_space<vmem>>, vector<1x8x256xf32>,
    %c10_340 = arith.constant 10 : index
    %c0_341 = arith.constant 0 : index
    %c0_342 = arith.constant 0 : index
    %570 = vector.load %arg8[%c10_340, %c0_341, %c0_342] : memref<18x18x256xf32, #tpu.memory_space<vmem>>, vector<1x16x256xf32>
    %571 = vector.shape_cast %570 : vector<1x16x256xf32> to vector<16x256xf32>
    %572 = vector.broadcast %0 : f32 to vector<16x256xf32>
    %573 = arith.mulf %572, %571 : vector<16x256xf32>
    %c10_343 = arith.constant 10 : index
    %c1_344 = arith.constant 1 : index
    %c0_345 = arith.constant 0 : index
    %574 = vector.load %arg8[%c10_343, %c1_344, %c0_345] : memref<18x18x256xf32, #tpu.memory_space<vmem>>, vector<1x16x256xf32>
    %575 = vector.shape_cast %574 : vector<1x16x256xf32> to vector<16x256xf32>
    %576 = vector.broadcast %1 : f32 to vector<16x256xf32>
    %577 = arith.mulf %576, %575 : vector<16x256xf32>
    %578 = arith.addf %573, %577 : vector<16x256xf32>
    %c10_346 = arith.constant 10 : index
    %c2_347 = arith.constant 2 : index
    %c0_348 = arith.constant 0 : index
    %579 = vector.load %arg8[%c10_346, %c2_347, %c0_348] : memref<18x18x256xf32, #tpu.memory_space<vmem>>, vector<1x16x256xf32>
    %580 = vector.shape_cast %579 : vector<1x16x256xf32> to vector<16x256xf32>
    %581 = vector.broadcast %2 : f32 to vector<16x256xf32>
    %582 = arith.mulf %581, %580 : vector<16x256xf32>
    %583 = arith.addf %578, %582 : vector<16x256xf32>
    %c11_349 = arith.constant 11 : index
    %c0_350 = arith.constant 0 : index
    %c0_351 = arith.constant 0 : index
    %584 = vector.load %arg8[%c11_349, %c0_350, %c0_351] : memref<18x18x256xf32, #tpu.memory_space<vmem>>, vector<1x16x256xf32>
    %585 = vector.shape_cast %584 : vector<1x16x256xf32> to vector<16x256xf32>
    %586 = vector.broadcast %3 : f32 to vector<16x256xf32>
    %587 = arith.mulf %586, %585 : vector<16x256xf32>
    %588 = arith.addf %583, %587 : vector<16x256xf32>
    %c11_352 = arith.constant 11 : index
    %c1_353 = arith.constant 1 : index
    %c0_354 = arith.constant 0 : index
    %589 = vector.load %arg8[%c11_352, %c1_353, %c0_354] : memref<18x18x256xf32, #tpu.memory_space<vmem>>, vector<1x16x256xf32>
    %590 = vector.shape_cast %589 : vector<1x16x256xf32> to vector<16x256xf32>
    %591 = vector.broadcast %4 : f32 to vector<16x256xf32>
    %592 = arith.mulf %591, %590 : vector<16x256xf32>
    %593 = arith.addf %588, %592 : vector<16x256xf32>
    %c11_355 = arith.constant 11 : index
    %c2_356 = arith.constant 2 : index
    %c0_357 = arith.constant 0 : index
    %594 = vector.load %arg8[%c11_355, %c2_356, %c0_357] : memref<18x18x256xf32, #tpu.memory_space<vmem>>, vector<1x16x256xf32>
    %595 = vector.shape_cast %594 : vector<1x16x256xf32> to vector<16x256xf32>
    %596 = vector.broadcast %5 : f32 to vector<16x256xf32>
    %597 = arith.mulf %596, %595 : vector<16x256xf32>
    %598 = arith.addf %593, %597 : vector<16x256xf32>
    %c12 = arith.constant 12 : index
    %c0_358 = arith.constant 0 : index
    %c0_359 = arith.constant 0 : index
    %599 = vector.load %arg8[%c12, %c0_358, %c0_359] : memref<18x18x256xf32, #tpu.memory_space<vmem>>, vector<1x16x256xf32>
    %600 = vector.shape_cast %599 : vector<1x16x256xf32> to vector<16x256xf32>
    %601 = vector.broadcast %6 : f32 to vector<16x256xf32>
    %602 = arith.mulf %601, %600 : vector<16x256xf32>
    %603 = arith.addf %598, %602 : vector<16x256xf32>
    %c12_360 = arith.constant 12 : index
    %c1_361 = arith.constant 1 : index
    %c0_362 = arith.constant 0 : index
    %604 = vector.load %arg8[%c12_360, %c1_361, %c0_362] : memref<18x18x256xf32, #tpu.memory_space<vmem>>, vector<1x16x256xf32>
    %605 = vector.shape_cast %604 : vector<1x16x256xf32> to vector<16x256xf32>
    %606 = vector.broadcast %7 : f32 to vector<16x256xf32>
    %607 = arith.mulf %606, %605 : vector<16x256xf32>
    %608 = arith.addf %603, %607 : vector<16x256xf32>
    %c12_363 = arith.constant 12 : index
    %c2_364 = arith.constant 2 : index
    %c0_365 = arith.constant 0 : index
    %609 = vector.load %arg8[%c12_363, %c2_364, %c0_365] : memref<18x18x256xf32, #tpu.memory_space<vmem>>, vector<1x16x256xf32>
    %610 = vector.shape_cast %609 : vector<1x16x256xf32> to vector<16x256xf32>
    %611 = vector.broadcast %8 : f32 to vector<16x256xf32>
    %612 = arith.mulf %611, %610 : vector<16x256xf32>
    %613 = arith.addf %608, %612 : vector<16x256xf32>
    %614 = vector.broadcast %9 : f32 to vector<16x256xf32>
    %615 = arith.addf %613, %614 : vector<16x256xf32>
    %cst_366 = arith.constant 0.000000e+00 : f32
    %616 = vector.broadcast %cst_366 : f32 to vector<16x256xf32>
    %617 = arith.maximumf %615, %616 : vector<16x256xf32>
    %618 = vector.extract_strided_slice %617 {offsets = [0, 0], sizes = [8, 256], strides = [1, 1]} : vector<16x256xf32> to vector<8x256xf32>
    %c2_367 = arith.constant 2 : index
    %c16_368 = arith.constant 16 : index
    %c0_369 = arith.constant 0 : index
    %619 = vector.load %arg12[%c2_367, %c16_368, %c0_369] : memref<4x64x256xf32, #tpu.memory_space<vmem>>, vector<1x8x256xf32>
    %620 = vector.shape_cast %619 : vector<1x8x256xf32> to vector<8x256xf32>
    %621 = vector.shape_cast %618 : vector<8x256xf32> to vector<1x8x256xf32>
    tpu.vector_store %arg12[%c2_367, %c16_368, %c0_369], %621 {strides = array<i32>} : memref<4x64x256xf32, #tpu.memory_space<vmem>>, vector<1x8x256xf32>,
    %622 = vector.extract_strided_slice %617 {offsets = [8, 0], sizes = [8, 256], strides = [1, 1]} : vector<16x256xf32> to vector<8x256xf32>
    %c3_370 = arith.constant 3 : index
    %c16_371 = arith.constant 16 : index
    %c0_372 = arith.constant 0 : index
    %623 = vector.load %arg12[%c3_370, %c16_371, %c0_372] : memref<4x64x256xf32, #tpu.memory_space<vmem>>, vector<1x8x256xf32>
    %624 = vector.shape_cast %623 : vector<1x8x256xf32> to vector<8x256xf32>
    %625 = vector.shape_cast %622 : vector<8x256xf32> to vector<1x8x256xf32>
    tpu.vector_store %arg12[%c3_370, %c16_371, %c0_372], %625 {strides = array<i32>} : memref<4x64x256xf32, #tpu.memory_space<vmem>>, vector<1x8x256xf32>,
    %c11_373 = arith.constant 11 : index
    %c0_374 = arith.constant 0 : index
    %c0_375 = arith.constant 0 : index
    %626 = vector.load %arg8[%c11_373, %c0_374, %c0_375] : memref<18x18x256xf32, #tpu.memory_space<vmem>>, vector<1x16x256xf32>
    %627 = vector.shape_cast %626 : vector<1x16x256xf32> to vector<16x256xf32>
    %628 = vector.broadcast %0 : f32 to vector<16x256xf32>
    %629 = arith.mulf %628, %627 : vector<16x256xf32>
    %c11_376 = arith.constant 11 : index
    %c1_377 = arith.constant 1 : index
    %c0_378 = arith.constant 0 : index
    %630 = vector.load %arg8[%c11_376, %c1_377, %c0_378] : memref<18x18x256xf32, #tpu.memory_space<vmem>>, vector<1x16x256xf32>
    %631 = vector.shape_cast %630 : vector<1x16x256xf32> to vector<16x256xf32>
    %632 = vector.broadcast %1 : f32 to vector<16x256xf32>
    %633 = arith.mulf %632, %631 : vector<16x256xf32>
    %634 = arith.addf %629, %633 : vector<16x256xf32>
    %c11_379 = arith.constant 11 : index
    %c2_380 = arith.constant 2 : index
    %c0_381 = arith.constant 0 : index
    %635 = vector.load %arg8[%c11_379, %c2_380, %c0_381] : memref<18x18x256xf32, #tpu.memory_space<vmem>>, vector<1x16x256xf32>
    %636 = vector.shape_cast %635 : vector<1x16x256xf32> to vector<16x256xf32>
    %637 = vector.broadcast %2 : f32 to vector<16x256xf32>
    %638 = arith.mulf %637, %636 : vector<16x256xf32>
    %639 = arith.addf %634, %638 : vector<16x256xf32>
    %c12_382 = arith.constant 12 : index
    %c0_383 = arith.constant 0 : index
    %c0_384 = arith.constant 0 : index
    %640 = vector.load %arg8[%c12_382, %c0_383, %c0_384] : memref<18x18x256xf32, #tpu.memory_space<vmem>>, vector<1x16x256xf32>
    %641 = vector.shape_cast %640 : vector<1x16x256xf32> to vector<16x256xf32>
    %642 = vector.broadcast %3 : f32 to vector<16x256xf32>
    %643 = arith.mulf %642, %641 : vector<16x256xf32>
    %644 = arith.addf %639, %643 : vector<16x256xf32>
    %c12_385 = arith.constant 12 : index
    %c1_386 = arith.constant 1 : index
    %c0_387 = arith.constant 0 : index
    %645 = vector.load %arg8[%c12_385, %c1_386, %c0_387] : memref<18x18x256xf32, #tpu.memory_space<vmem>>, vector<1x16x256xf32>
    %646 = vector.shape_cast %645 : vector<1x16x256xf32> to vector<16x256xf32>
    %647 = vector.broadcast %4 : f32 to vector<16x256xf32>
    %648 = arith.mulf %647, %646 : vector<16x256xf32>
    %649 = arith.addf %644, %648 : vector<16x256xf32>
    %c12_388 = arith.constant 12 : index
    %c2_389 = arith.constant 2 : index
    %c0_390 = arith.constant 0 : index
    %650 = vector.load %arg8[%c12_388, %c2_389, %c0_390] : memref<18x18x256xf32, #tpu.memory_space<vmem>>, vector<1x16x256xf32>
    %651 = vector.shape_cast %650 : vector<1x16x256xf32> to vector<16x256xf32>
    %652 = vector.broadcast %5 : f32 to vector<16x256xf32>
    %653 = arith.mulf %652, %651 : vector<16x256xf32>
    %654 = arith.addf %649, %653 : vector<16x256xf32>
    %c13 = arith.constant 13 : index
    %c0_391 = arith.constant 0 : index
    %c0_392 = arith.constant 0 : index
    %655 = vector.load %arg8[%c13, %c0_391, %c0_392] : memref<18x18x256xf32, #tpu.memory_space<vmem>>, vector<1x16x256xf32>
    %656 = vector.shape_cast %655 : vector<1x16x256xf32> to vector<16x256xf32>
    %657 = vector.broadcast %6 : f32 to vector<16x256xf32>
    %658 = arith.mulf %657, %656 : vector<16x256xf32>
    %659 = arith.addf %654, %658 : vector<16x256xf32>
    %c13_393 = arith.constant 13 : index
    %c1_394 = arith.constant 1 : index
    %c0_395 = arith.constant 0 : index
    %660 = vector.load %arg8[%c13_393, %c1_394, %c0_395] : memref<18x18x256xf32, #tpu.memory_space<vmem>>, vector<1x16x256xf32>
    %661 = vector.shape_cast %660 : vector<1x16x256xf32> to vector<16x256xf32>
    %662 = vector.broadcast %7 : f32 to vector<16x256xf32>
    %663 = arith.mulf %662, %661 : vector<16x256xf32>
    %664 = arith.addf %659, %663 : vector<16x256xf32>
    %c13_396 = arith.constant 13 : index
    %c2_397 = arith.constant 2 : index
    %c0_398 = arith.constant 0 : index
    %665 = vector.load %arg8[%c13_396, %c2_397, %c0_398] : memref<18x18x256xf32, #tpu.memory_space<vmem>>, vector<1x16x256xf32>
    %666 = vector.shape_cast %665 : vector<1x16x256xf32> to vector<16x256xf32>
    %667 = vector.broadcast %8 : f32 to vector<16x256xf32>
    %668 = arith.mulf %667, %666 : vector<16x256xf32>
    %669 = arith.addf %664, %668 : vector<16x256xf32>
    %670 = vector.broadcast %9 : f32 to vector<16x256xf32>
    %671 = arith.addf %669, %670 : vector<16x256xf32>
    %cst_399 = arith.constant 0.000000e+00 : f32
    %672 = vector.broadcast %cst_399 : f32 to vector<16x256xf32>
    %673 = arith.maximumf %671, %672 : vector<16x256xf32>
    %674 = vector.extract_strided_slice %673 {offsets = [0, 0], sizes = [8, 256], strides = [1, 1]} : vector<16x256xf32> to vector<8x256xf32>
    %c2_400 = arith.constant 2 : index
    %c24_401 = arith.constant 24 : index
    %c0_402 = arith.constant 0 : index
    %675 = vector.load %arg12[%c2_400, %c24_401, %c0_402] : memref<4x64x256xf32, #tpu.memory_space<vmem>>, vector<1x8x256xf32>
    %676 = vector.shape_cast %675 : vector<1x8x256xf32> to vector<8x256xf32>
    %677 = vector.shape_cast %674 : vector<8x256xf32> to vector<1x8x256xf32>
    tpu.vector_store %arg12[%c2_400, %c24_401, %c0_402], %677 {strides = array<i32>} : memref<4x64x256xf32, #tpu.memory_space<vmem>>, vector<1x8x256xf32>,
    %678 = vector.extract_strided_slice %673 {offsets = [8, 0], sizes = [8, 256], strides = [1, 1]} : vector<16x256xf32> to vector<8x256xf32>
    %c3_403 = arith.constant 3 : index
    %c24_404 = arith.constant 24 : index
    %c0_405 = arith.constant 0 : index
    %679 = vector.load %arg12[%c3_403, %c24_404, %c0_405] : memref<4x64x256xf32, #tpu.memory_space<vmem>>, vector<1x8x256xf32>
    %680 = vector.shape_cast %679 : vector<1x8x256xf32> to vector<8x256xf32>
    %681 = vector.shape_cast %678 : vector<8x256xf32> to vector<1x8x256xf32>
    tpu.vector_store %arg12[%c3_403, %c24_404, %c0_405], %681 {strides = array<i32>} : memref<4x64x256xf32, #tpu.memory_space<vmem>>, vector<1x8x256xf32>,
    %c12_406 = arith.constant 12 : index
    %c0_407 = arith.constant 0 : index
    %c0_408 = arith.constant 0 : index
    %682 = vector.load %arg8[%c12_406, %c0_407, %c0_408] : memref<18x18x256xf32, #tpu.memory_space<vmem>>, vector<1x16x256xf32>
    %683 = vector.shape_cast %682 : vector<1x16x256xf32> to vector<16x256xf32>
    %684 = vector.broadcast %0 : f32 to vector<16x256xf32>
    %685 = arith.mulf %684, %683 : vector<16x256xf32>
    %c12_409 = arith.constant 12 : index
    %c1_410 = arith.constant 1 : index
    %c0_411 = arith.constant 0 : index
    %686 = vector.load %arg8[%c12_409, %c1_410, %c0_411] : memref<18x18x256xf32, #tpu.memory_space<vmem>>, vector<1x16x256xf32>
    %687 = vector.shape_cast %686 : vector<1x16x256xf32> to vector<16x256xf32>
    %688 = vector.broadcast %1 : f32 to vector<16x256xf32>
    %689 = arith.mulf %688, %687 : vector<16x256xf32>
    %690 = arith.addf %685, %689 : vector<16x256xf32>
    %c12_412 = arith.constant 12 : index
    %c2_413 = arith.constant 2 : index
    %c0_414 = arith.constant 0 : index
    %691 = vector.load %arg8[%c12_412, %c2_413, %c0_414] : memref<18x18x256xf32, #tpu.memory_space<vmem>>, vector<1x16x256xf32>
    %692 = vector.shape_cast %691 : vector<1x16x256xf32> to vector<16x256xf32>
    %693 = vector.broadcast %2 : f32 to vector<16x256xf32>
    %694 = arith.mulf %693, %692 : vector<16x256xf32>
    %695 = arith.addf %690, %694 : vector<16x256xf32>
    %c13_415 = arith.constant 13 : index
    %c0_416 = arith.constant 0 : index
    %c0_417 = arith.constant 0 : index
    %696 = vector.load %arg8[%c13_415, %c0_416, %c0_417] : memref<18x18x256xf32, #tpu.memory_space<vmem>>, vector<1x16x256xf32>
    %697 = vector.shape_cast %696 : vector<1x16x256xf32> to vector<16x256xf32>
    %698 = vector.broadcast %3 : f32 to vector<16x256xf32>
    %699 = arith.mulf %698, %697 : vector<16x256xf32>
    %700 = arith.addf %695, %699 : vector<16x256xf32>
    %c13_418 = arith.constant 13 : index
    %c1_419 = arith.constant 1 : index
    %c0_420 = arith.constant 0 : index
    %701 = vector.load %arg8[%c13_418, %c1_419, %c0_420] : memref<18x18x256xf32, #tpu.memory_space<vmem>>, vector<1x16x256xf32>
    %702 = vector.shape_cast %701 : vector<1x16x256xf32> to vector<16x256xf32>
    %703 = vector.broadcast %4 : f32 to vector<16x256xf32>
    %704 = arith.mulf %703, %702 : vector<16x256xf32>
    %705 = arith.addf %700, %704 : vector<16x256xf32>
    %c13_421 = arith.constant 13 : index
    %c2_422 = arith.constant 2 : index
    %c0_423 = arith.constant 0 : index
    %706 = vector.load %arg8[%c13_421, %c2_422, %c0_423] : memref<18x18x256xf32, #tpu.memory_space<vmem>>, vector<1x16x256xf32>
    %707 = vector.shape_cast %706 : vector<1x16x256xf32> to vector<16x256xf32>
    %708 = vector.broadcast %5 : f32 to vector<16x256xf32>
    %709 = arith.mulf %708, %707 : vector<16x256xf32>
    %710 = arith.addf %705, %709 : vector<16x256xf32>
    %c14 = arith.constant 14 : index
    %c0_424 = arith.constant 0 : index
    %c0_425 = arith.constant 0 : index
    %711 = vector.load %arg8[%c14, %c0_424, %c0_425] : memref<18x18x256xf32, #tpu.memory_space<vmem>>, vector<1x16x256xf32>
    %712 = vector.shape_cast %711 : vector<1x16x256xf32> to vector<16x256xf32>
    %713 = vector.broadcast %6 : f32 to vector<16x256xf32>
    %714 = arith.mulf %713, %712 : vector<16x256xf32>
    %715 = arith.addf %710, %714 : vector<16x256xf32>
    %c14_426 = arith.constant 14 : index
    %c1_427 = arith.constant 1 : index
    %c0_428 = arith.constant 0 : index
    %716 = vector.load %arg8[%c14_426, %c1_427, %c0_428] : memref<18x18x256xf32, #tpu.memory_space<vmem>>, vector<1x16x256xf32>
    %717 = vector.shape_cast %716 : vector<1x16x256xf32> to vector<16x256xf32>
    %718 = vector.broadcast %7 : f32 to vector<16x256xf32>
    %719 = arith.mulf %718, %717 : vector<16x256xf32>
    %720 = arith.addf %715, %719 : vector<16x256xf32>
    %c14_429 = arith.constant 14 : index
    %c2_430 = arith.constant 2 : index
    %c0_431 = arith.constant 0 : index
    %721 = vector.load %arg8[%c14_429, %c2_430, %c0_431] : memref<18x18x256xf32, #tpu.memory_space<vmem>>, vector<1x16x256xf32>
    %722 = vector.shape_cast %721 : vector<1x16x256xf32> to vector<16x256xf32>
    %723 = vector.broadcast %8 : f32 to vector<16x256xf32>
    %724 = arith.mulf %723, %722 : vector<16x256xf32>
    %725 = arith.addf %720, %724 : vector<16x256xf32>
    %726 = vector.broadcast %9 : f32 to vector<16x256xf32>
    %727 = arith.addf %725, %726 : vector<16x256xf32>
    %cst_432 = arith.constant 0.000000e+00 : f32
    %728 = vector.broadcast %cst_432 : f32 to vector<16x256xf32>
    %729 = arith.maximumf %727, %728 : vector<16x256xf32>
    %730 = vector.extract_strided_slice %729 {offsets = [0, 0], sizes = [8, 256], strides = [1, 1]} : vector<16x256xf32> to vector<8x256xf32>
    %c2_433 = arith.constant 2 : index
    %c32_434 = arith.constant 32 : index
    %c0_435 = arith.constant 0 : index
    %731 = vector.load %arg12[%c2_433, %c32_434, %c0_435] : memref<4x64x256xf32, #tpu.memory_space<vmem>>, vector<1x8x256xf32>
    %732 = vector.shape_cast %731 : vector<1x8x256xf32> to vector<8x256xf32>
    %733 = vector.shape_cast %730 : vector<8x256xf32> to vector<1x8x256xf32>
    tpu.vector_store %arg12[%c2_433, %c32_434, %c0_435], %733 {strides = array<i32>} : memref<4x64x256xf32, #tpu.memory_space<vmem>>, vector<1x8x256xf32>,
    %734 = vector.extract_strided_slice %729 {offsets = [8, 0], sizes = [8, 256], strides = [1, 1]} : vector<16x256xf32> to vector<8x256xf32>
    %c3_436 = arith.constant 3 : index
    %c32_437 = arith.constant 32 : index
    %c0_438 = arith.constant 0 : index
    %735 = vector.load %arg12[%c3_436, %c32_437, %c0_438] : memref<4x64x256xf32, #tpu.memory_space<vmem>>, vector<1x8x256xf32>
    %736 = vector.shape_cast %735 : vector<1x8x256xf32> to vector<8x256xf32>
    %737 = vector.shape_cast %734 : vector<8x256xf32> to vector<1x8x256xf32>
    tpu.vector_store %arg12[%c3_436, %c32_437, %c0_438], %737 {strides = array<i32>} : memref<4x64x256xf32, #tpu.memory_space<vmem>>, vector<1x8x256xf32>,
    %c13_439 = arith.constant 13 : index
    %c0_440 = arith.constant 0 : index
    %c0_441 = arith.constant 0 : index
    %738 = vector.load %arg8[%c13_439, %c0_440, %c0_441] : memref<18x18x256xf32, #tpu.memory_space<vmem>>, vector<1x16x256xf32>
    %739 = vector.shape_cast %738 : vector<1x16x256xf32> to vector<16x256xf32>
    %740 = vector.broadcast %0 : f32 to vector<16x256xf32>
    %741 = arith.mulf %740, %739 : vector<16x256xf32>
    %c13_442 = arith.constant 13 : index
    %c1_443 = arith.constant 1 : index
    %c0_444 = arith.constant 0 : index
    %742 = vector.load %arg8[%c13_442, %c1_443, %c0_444] : memref<18x18x256xf32, #tpu.memory_space<vmem>>, vector<1x16x256xf32>
    %743 = vector.shape_cast %742 : vector<1x16x256xf32> to vector<16x256xf32>
    %744 = vector.broadcast %1 : f32 to vector<16x256xf32>
    %745 = arith.mulf %744, %743 : vector<16x256xf32>
    %746 = arith.addf %741, %745 : vector<16x256xf32>
    %c13_445 = arith.constant 13 : index
    %c2_446 = arith.constant 2 : index
    %c0_447 = arith.constant 0 : index
    %747 = vector.load %arg8[%c13_445, %c2_446, %c0_447] : memref<18x18x256xf32, #tpu.memory_space<vmem>>, vector<1x16x256xf32>
    %748 = vector.shape_cast %747 : vector<1x16x256xf32> to vector<16x256xf32>
    %749 = vector.broadcast %2 : f32 to vector<16x256xf32>
    %750 = arith.mulf %749, %748 : vector<16x256xf32>
    %751 = arith.addf %746, %750 : vector<16x256xf32>
    %c14_448 = arith.constant 14 : index
    %c0_449 = arith.constant 0 : index
    %c0_450 = arith.constant 0 : index
    %752 = vector.load %arg8[%c14_448, %c0_449, %c0_450] : memref<18x18x256xf32, #tpu.memory_space<vmem>>, vector<1x16x256xf32>
    %753 = vector.shape_cast %752 : vector<1x16x256xf32> to vector<16x256xf32>
    %754 = vector.broadcast %3 : f32 to vector<16x256xf32>
    %755 = arith.mulf %754, %753 : vector<16x256xf32>
    %756 = arith.addf %751, %755 : vector<16x256xf32>
    %c14_451 = arith.constant 14 : index
    %c1_452 = arith.constant 1 : index
    %c0_453 = arith.constant 0 : index
    %757 = vector.load %arg8[%c14_451, %c1_452, %c0_453] : memref<18x18x256xf32, #tpu.memory_space<vmem>>, vector<1x16x256xf32>
    %758 = vector.shape_cast %757 : vector<1x16x256xf32> to vector<16x256xf32>
    %759 = vector.broadcast %4 : f32 to vector<16x256xf32>
    %760 = arith.mulf %759, %758 : vector<16x256xf32>
    %761 = arith.addf %756, %760 : vector<16x256xf32>
    %c14_454 = arith.constant 14 : index
    %c2_455 = arith.constant 2 : index
    %c0_456 = arith.constant 0 : index
    %762 = vector.load %arg8[%c14_454, %c2_455, %c0_456] : memref<18x18x256xf32, #tpu.memory_space<vmem>>, vector<1x16x256xf32>
    %763 = vector.shape_cast %762 : vector<1x16x256xf32> to vector<16x256xf32>
    %764 = vector.broadcast %5 : f32 to vector<16x256xf32>
    %765 = arith.mulf %764, %763 : vector<16x256xf32>
    %766 = arith.addf %761, %765 : vector<16x256xf32>
    %c15 = arith.constant 15 : index
    %c0_457 = arith.constant 0 : index
    %c0_458 = arith.constant 0 : index
    %767 = vector.load %arg8[%c15, %c0_457, %c0_458] : memref<18x18x256xf32, #tpu.memory_space<vmem>>, vector<1x16x256xf32>
    %768 = vector.shape_cast %767 : vector<1x16x256xf32> to vector<16x256xf32>
    %769 = vector.broadcast %6 : f32 to vector<16x256xf32>
    %770 = arith.mulf %769, %768 : vector<16x256xf32>
    %771 = arith.addf %766, %770 : vector<16x256xf32>
    %c15_459 = arith.constant 15 : index
    %c1_460 = arith.constant 1 : index
    %c0_461 = arith.constant 0 : index
    %772 = vector.load %arg8[%c15_459, %c1_460, %c0_461] : memref<18x18x256xf32, #tpu.memory_space<vmem>>, vector<1x16x256xf32>
    %773 = vector.shape_cast %772 : vector<1x16x256xf32> to vector<16x256xf32>
    %774 = vector.broadcast %7 : f32 to vector<16x256xf32>
    %775 = arith.mulf %774, %773 : vector<16x256xf32>
    %776 = arith.addf %771, %775 : vector<16x256xf32>
    %c15_462 = arith.constant 15 : index
    %c2_463 = arith.constant 2 : index
    %c0_464 = arith.constant 0 : index
    %777 = vector.load %arg8[%c15_462, %c2_463, %c0_464] : memref<18x18x256xf32, #tpu.memory_space<vmem>>, vector<1x16x256xf32>
    %778 = vector.shape_cast %777 : vector<1x16x256xf32> to vector<16x256xf32>
    %779 = vector.broadcast %8 : f32 to vector<16x256xf32>
    %780 = arith.mulf %779, %778 : vector<16x256xf32>
    %781 = arith.addf %776, %780 : vector<16x256xf32>
    %782 = vector.broadcast %9 : f32 to vector<16x256xf32>
    %783 = arith.addf %781, %782 : vector<16x256xf32>
    %cst_465 = arith.constant 0.000000e+00 : f32
    %784 = vector.broadcast %cst_465 : f32 to vector<16x256xf32>
    %785 = arith.maximumf %783, %784 : vector<16x256xf32>
    %786 = vector.extract_strided_slice %785 {offsets = [0, 0], sizes = [8, 256], strides = [1, 1]} : vector<16x256xf32> to vector<8x256xf32>
    %c2_466 = arith.constant 2 : index
    %c40_467 = arith.constant 40 : index
    %c0_468 = arith.constant 0 : index
    %787 = vector.load %arg12[%c2_466, %c40_467, %c0_468] : memref<4x64x256xf32, #tpu.memory_space<vmem>>, vector<1x8x256xf32>
    %788 = vector.shape_cast %787 : vector<1x8x256xf32> to vector<8x256xf32>
    %789 = vector.shape_cast %786 : vector<8x256xf32> to vector<1x8x256xf32>
    tpu.vector_store %arg12[%c2_466, %c40_467, %c0_468], %789 {strides = array<i32>} : memref<4x64x256xf32, #tpu.memory_space<vmem>>, vector<1x8x256xf32>,
    %790 = vector.extract_strided_slice %785 {offsets = [8, 0], sizes = [8, 256], strides = [1, 1]} : vector<16x256xf32> to vector<8x256xf32>
    %c3_469 = arith.constant 3 : index
    %c40_470 = arith.constant 40 : index
    %c0_471 = arith.constant 0 : index
    %791 = vector.load %arg12[%c3_469, %c40_470, %c0_471] : memref<4x64x256xf32, #tpu.memory_space<vmem>>, vector<1x8x256xf32>
    %792 = vector.shape_cast %791 : vector<1x8x256xf32> to vector<8x256xf32>
    %793 = vector.shape_cast %790 : vector<8x256xf32> to vector<1x8x256xf32>
    tpu.vector_store %arg12[%c3_469, %c40_470, %c0_471], %793 {strides = array<i32>} : memref<4x64x256xf32, #tpu.memory_space<vmem>>, vector<1x8x256xf32>,
    %c14_472 = arith.constant 14 : index
    %c0_473 = arith.constant 0 : index
    %c0_474 = arith.constant 0 : index
    %794 = vector.load %arg8[%c14_472, %c0_473, %c0_474] : memref<18x18x256xf32, #tpu.memory_space<vmem>>, vector<1x16x256xf32>
    %795 = vector.shape_cast %794 : vector<1x16x256xf32> to vector<16x256xf32>
    %796 = vector.broadcast %0 : f32 to vector<16x256xf32>
    %797 = arith.mulf %796, %795 : vector<16x256xf32>
    %c14_475 = arith.constant 14 : index
    %c1_476 = arith.constant 1 : index
    %c0_477 = arith.constant 0 : index
    %798 = vector.load %arg8[%c14_475, %c1_476, %c0_477] : memref<18x18x256xf32, #tpu.memory_space<vmem>>, vector<1x16x256xf32>
    %799 = vector.shape_cast %798 : vector<1x16x256xf32> to vector<16x256xf32>
    %800 = vector.broadcast %1 : f32 to vector<16x256xf32>
    %801 = arith.mulf %800, %799 : vector<16x256xf32>
    %802 = arith.addf %797, %801 : vector<16x256xf32>
    %c14_478 = arith.constant 14 : index
    %c2_479 = arith.constant 2 : index
    %c0_480 = arith.constant 0 : index
    %803 = vector.load %arg8[%c14_478, %c2_479, %c0_480] : memref<18x18x256xf32, #tpu.memory_space<vmem>>, vector<1x16x256xf32>
    %804 = vector.shape_cast %803 : vector<1x16x256xf32> to vector<16x256xf32>
    %805 = vector.broadcast %2 : f32 to vector<16x256xf32>
    %806 = arith.mulf %805, %804 : vector<16x256xf32>
    %807 = arith.addf %802, %806 : vector<16x256xf32>
    %c15_481 = arith.constant 15 : index
    %c0_482 = arith.constant 0 : index
    %c0_483 = arith.constant 0 : index
    %808 = vector.load %arg8[%c15_481, %c0_482, %c0_483] : memref<18x18x256xf32, #tpu.memory_space<vmem>>, vector<1x16x256xf32>
    %809 = vector.shape_cast %808 : vector<1x16x256xf32> to vector<16x256xf32>
    %810 = vector.broadcast %3 : f32 to vector<16x256xf32>
    %811 = arith.mulf %810, %809 : vector<16x256xf32>
    %812 = arith.addf %807, %811 : vector<16x256xf32>
    %c15_484 = arith.constant 15 : index
    %c1_485 = arith.constant 1 : index
    %c0_486 = arith.constant 0 : index
    %813 = vector.load %arg8[%c15_484, %c1_485, %c0_486] : memref<18x18x256xf32, #tpu.memory_space<vmem>>, vector<1x16x256xf32>
    %814 = vector.shape_cast %813 : vector<1x16x256xf32> to vector<16x256xf32>
    %815 = vector.broadcast %4 : f32 to vector<16x256xf32>
    %816 = arith.mulf %815, %814 : vector<16x256xf32>
    %817 = arith.addf %812, %816 : vector<16x256xf32>
    %c15_487 = arith.constant 15 : index
    %c2_488 = arith.constant 2 : index
    %c0_489 = arith.constant 0 : index
    %818 = vector.load %arg8[%c15_487, %c2_488, %c0_489] : memref<18x18x256xf32, #tpu.memory_space<vmem>>, vector<1x16x256xf32>
    %819 = vector.shape_cast %818 : vector<1x16x256xf32> to vector<16x256xf32>
    %820 = vector.broadcast %5 : f32 to vector<16x256xf32>
    %821 = arith.mulf %820, %819 : vector<16x256xf32>
    %822 = arith.addf %817, %821 : vector<16x256xf32>
    %c16_490 = arith.constant 16 : index
    %c0_491 = arith.constant 0 : index
    %c0_492 = arith.constant 0 : index
    %823 = vector.load %arg8[%c16_490, %c0_491, %c0_492] : memref<18x18x256xf32, #tpu.memory_space<vmem>>, vector<1x16x256xf32>
    %824 = vector.shape_cast %823 : vector<1x16x256xf32> to vector<16x256xf32>
    %825 = vector.broadcast %6 : f32 to vector<16x256xf32>
    %826 = arith.mulf %825, %824 : vector<16x256xf32>
    %827 = arith.addf %822, %826 : vector<16x256xf32>
    %c16_493 = arith.constant 16 : index
    %c1_494 = arith.constant 1 : index
    %c0_495 = arith.constant 0 : index
    %828 = vector.load %arg8[%c16_493, %c1_494, %c0_495] : memref<18x18x256xf32, #tpu.memory_space<vmem>>, vector<1x16x256xf32>
    %829 = vector.shape_cast %828 : vector<1x16x256xf32> to vector<16x256xf32>
    %830 = vector.broadcast %7 : f32 to vector<16x256xf32>
    %831 = arith.mulf %830, %829 : vector<16x256xf32>
    %832 = arith.addf %827, %831 : vector<16x256xf32>
    %c16_496 = arith.constant 16 : index
    %c2_497 = arith.constant 2 : index
    %c0_498 = arith.constant 0 : index
    %833 = vector.load %arg8[%c16_496, %c2_497, %c0_498] : memref<18x18x256xf32, #tpu.memory_space<vmem>>, vector<1x16x256xf32>
    %834 = vector.shape_cast %833 : vector<1x16x256xf32> to vector<16x256xf32>
    %835 = vector.broadcast %8 : f32 to vector<16x256xf32>
    %836 = arith.mulf %835, %834 : vector<16x256xf32>
    %837 = arith.addf %832, %836 : vector<16x256xf32>
    %838 = vector.broadcast %9 : f32 to vector<16x256xf32>
    %839 = arith.addf %837, %838 : vector<16x256xf32>
    %cst_499 = arith.constant 0.000000e+00 : f32
    %840 = vector.broadcast %cst_499 : f32 to vector<16x256xf32>
    %841 = arith.maximumf %839, %840 : vector<16x256xf32>
    %842 = vector.extract_strided_slice %841 {offsets = [0, 0], sizes = [8, 256], strides = [1, 1]} : vector<16x256xf32> to vector<8x256xf32>
    %c2_500 = arith.constant 2 : index
    %c48_501 = arith.constant 48 : index
    %c0_502 = arith.constant 0 : index
    %843 = vector.load %arg12[%c2_500, %c48_501, %c0_502] : memref<4x64x256xf32, #tpu.memory_space<vmem>>, vector<1x8x256xf32>
    %844 = vector.shape_cast %843 : vector<1x8x256xf32> to vector<8x256xf32>
    %845 = vector.shape_cast %842 : vector<8x256xf32> to vector<1x8x256xf32>
    tpu.vector_store %arg12[%c2_500, %c48_501, %c0_502], %845 {strides = array<i32>} : memref<4x64x256xf32, #tpu.memory_space<vmem>>, vector<1x8x256xf32>,
    %846 = vector.extract_strided_slice %841 {offsets = [8, 0], sizes = [8, 256], strides = [1, 1]} : vector<16x256xf32> to vector<8x256xf32>
    %c3_503 = arith.constant 3 : index
    %c48_504 = arith.constant 48 : index
    %c0_505 = arith.constant 0 : index
    %847 = vector.load %arg12[%c3_503, %c48_504, %c0_505] : memref<4x64x256xf32, #tpu.memory_space<vmem>>, vector<1x8x256xf32>
    %848 = vector.shape_cast %847 : vector<1x8x256xf32> to vector<8x256xf32>
    %849 = vector.shape_cast %846 : vector<8x256xf32> to vector<1x8x256xf32>
    tpu.vector_store %arg12[%c3_503, %c48_504, %c0_505], %849 {strides = array<i32>} : memref<4x64x256xf32, #tpu.memory_space<vmem>>, vector<1x8x256xf32>,
    %c15_506 = arith.constant 15 : index
    %c0_507 = arith.constant 0 : index
    %c0_508 = arith.constant 0 : index
    %850 = vector.load %arg8[%c15_506, %c0_507, %c0_508] : memref<18x18x256xf32, #tpu.memory_space<vmem>>, vector<1x16x256xf32>
    %851 = vector.shape_cast %850 : vector<1x16x256xf32> to vector<16x256xf32>
    %852 = vector.broadcast %0 : f32 to vector<16x256xf32>
    %853 = arith.mulf %852, %851 : vector<16x256xf32>
    %c15_509 = arith.constant 15 : index
    %c1_510 = arith.constant 1 : index
    %c0_511 = arith.constant 0 : index
    %854 = vector.load %arg8[%c15_509, %c1_510, %c0_511] : memref<18x18x256xf32, #tpu.memory_space<vmem>>, vector<1x16x256xf32>
    %855 = vector.shape_cast %854 : vector<1x16x256xf32> to vector<16x256xf32>
    %856 = vector.broadcast %1 : f32 to vector<16x256xf32>
    %857 = arith.mulf %856, %855 : vector<16x256xf32>
    %858 = arith.addf %853, %857 : vector<16x256xf32>
    %c15_512 = arith.constant 15 : index
    %c2_513 = arith.constant 2 : index
    %c0_514 = arith.constant 0 : index
    %859 = vector.load %arg8[%c15_512, %c2_513, %c0_514] : memref<18x18x256xf32, #tpu.memory_space<vmem>>, vector<1x16x256xf32>
    %860 = vector.shape_cast %859 : vector<1x16x256xf32> to vector<16x256xf32>
    %861 = vector.broadcast %2 : f32 to vector<16x256xf32>
    %862 = arith.mulf %861, %860 : vector<16x256xf32>
    %863 = arith.addf %858, %862 : vector<16x256xf32>
    %c16_515 = arith.constant 16 : index
    %c0_516 = arith.constant 0 : index
    %c0_517 = arith.constant 0 : index
    %864 = vector.load %arg8[%c16_515, %c0_516, %c0_517] : memref<18x18x256xf32, #tpu.memory_space<vmem>>, vector<1x16x256xf32>
    %865 = vector.shape_cast %864 : vector<1x16x256xf32> to vector<16x256xf32>
    %866 = vector.broadcast %3 : f32 to vector<16x256xf32>
    %867 = arith.mulf %866, %865 : vector<16x256xf32>
    %868 = arith.addf %863, %867 : vector<16x256xf32>
    %c16_518 = arith.constant 16 : index
    %c1_519 = arith.constant 1 : index
    %c0_520 = arith.constant 0 : index
    %869 = vector.load %arg8[%c16_518, %c1_519, %c0_520] : memref<18x18x256xf32, #tpu.memory_space<vmem>>, vector<1x16x256xf32>
    %870 = vector.shape_cast %869 : vector<1x16x256xf32> to vector<16x256xf32>
    %871 = vector.broadcast %4 : f32 to vector<16x256xf32>
    %872 = arith.mulf %871, %870 : vector<16x256xf32>
    %873 = arith.addf %868, %872 : vector<16x256xf32>
    %c16_521 = arith.constant 16 : index
    %c2_522 = arith.constant 2 : index
    %c0_523 = arith.constant 0 : index
    %874 = vector.load %arg8[%c16_521, %c2_522, %c0_523] : memref<18x18x256xf32, #tpu.memory_space<vmem>>, vector<1x16x256xf32>
    %875 = vector.shape_cast %874 : vector<1x16x256xf32> to vector<16x256xf32>
    %876 = vector.broadcast %5 : f32 to vector<16x256xf32>
    %877 = arith.mulf %876, %875 : vector<16x256xf32>
    %878 = arith.addf %873, %877 : vector<16x256xf32>
    %c17 = arith.constant 17 : index
    %c0_524 = arith.constant 0 : index
    %c0_525 = arith.constant 0 : index
    %879 = vector.load %arg8[%c17, %c0_524, %c0_525] : memref<18x18x256xf32, #tpu.memory_space<vmem>>, vector<1x16x256xf32>
    %880 = vector.shape_cast %879 : vector<1x16x256xf32> to vector<16x256xf32>
    %881 = vector.broadcast %6 : f32 to vector<16x256xf32>
    %882 = arith.mulf %881, %880 : vector<16x256xf32>
    %883 = arith.addf %878, %882 : vector<16x256xf32>
    %c17_526 = arith.constant 17 : index
    %c1_527 = arith.constant 1 : index
    %c0_528 = arith.constant 0 : index
    %884 = vector.load %arg8[%c17_526, %c1_527, %c0_528] : memref<18x18x256xf32, #tpu.memory_space<vmem>>, vector<1x16x256xf32>
    %885 = vector.shape_cast %884 : vector<1x16x256xf32> to vector<16x256xf32>
    %886 = vector.broadcast %7 : f32 to vector<16x256xf32>
    %887 = arith.mulf %886, %885 : vector<16x256xf32>
    %888 = arith.addf %883, %887 : vector<16x256xf32>
    %c17_529 = arith.constant 17 : index
    %c2_530 = arith.constant 2 : index
    %c0_531 = arith.constant 0 : index
    %889 = vector.load %arg8[%c17_529, %c2_530, %c0_531] : memref<18x18x256xf32, #tpu.memory_space<vmem>>, vector<1x16x256xf32>
    %890 = vector.shape_cast %889 : vector<1x16x256xf32> to vector<16x256xf32>
    %891 = vector.broadcast %8 : f32 to vector<16x256xf32>
    %892 = arith.mulf %891, %890 : vector<16x256xf32>
    %893 = arith.addf %888, %892 : vector<16x256xf32>
    %894 = vector.broadcast %9 : f32 to vector<16x256xf32>
    %895 = arith.addf %893, %894 : vector<16x256xf32>
    %cst_532 = arith.constant 0.000000e+00 : f32
    %896 = vector.broadcast %cst_532 : f32 to vector<16x256xf32>
    %897 = arith.maximumf %895, %896 : vector<16x256xf32>
    %898 = vector.extract_strided_slice %897 {offsets = [0, 0], sizes = [8, 256], strides = [1, 1]} : vector<16x256xf32> to vector<8x256xf32>
    %c2_533 = arith.constant 2 : index
    %c56_534 = arith.constant 56 : index
    %c0_535 = arith.constant 0 : index
    %899 = vector.load %arg12[%c2_533, %c56_534, %c0_535] : memref<4x64x256xf32, #tpu.memory_space<vmem>>, vector<1x8x256xf32>
    %900 = vector.shape_cast %899 : vector<1x8x256xf32> to vector<8x256xf32>
    %901 = vector.shape_cast %898 : vector<8x256xf32> to vector<1x8x256xf32>
    tpu.vector_store %arg12[%c2_533, %c56_534, %c0_535], %901 {strides = array<i32>} : memref<4x64x256xf32, #tpu.memory_space<vmem>>, vector<1x8x256xf32>,
    %902 = vector.extract_strided_slice %897 {offsets = [8, 0], sizes = [8, 256], strides = [1, 1]} : vector<16x256xf32> to vector<8x256xf32>
    %c3_536 = arith.constant 3 : index
    %c56_537 = arith.constant 56 : index
    %c0_538 = arith.constant 0 : index
    %903 = vector.load %arg12[%c3_536, %c56_537, %c0_538] : memref<4x64x256xf32, #tpu.memory_space<vmem>>, vector<1x8x256xf32>
    %904 = vector.shape_cast %903 : vector<1x8x256xf32> to vector<8x256xf32>
    %905 = vector.shape_cast %902 : vector<8x256xf32> to vector<1x8x256xf32>
    tpu.vector_store %arg12[%c3_536, %c56_537, %c0_538], %905 {strides = array<i32>} : memref<4x64x256xf32, #tpu.memory_space<vmem>>, vector<1x8x256xf32>,
    %c0_539 = arith.constant 0 : index
    %c0_540 = arith.constant 0 : index
    %c0_541 = arith.constant 0 : index
    %906 = vector.load %arg6[%c0_539, %c0_540, %c0_541] : memref<3x4x1xf32, #tpu.memory_space<vmem>>, vector<1x4x1xf32>
    %907 = vector.shape_cast %906 : vector<1x4x1xf32> to vector<4x1xf32>
    %cst_542 = arith.constant 0.000000e+00 : f32
    %908 = vector.broadcast %cst_542 : f32 to vector<18x256xf32>
    %c0_543 = arith.constant 0 : index
    %c0_544 = arith.constant 0 : index
    %c0_545 = arith.constant 0 : index
    %909 = vector.load %arg3[%c0_543, %c0_544, %c0_545] : memref<2x4x64xf32, #tpu.memory_space<vmem>>, vector<1x4x64xf32>
    %910 = vector.shape_cast %909 : vector<1x4x64xf32> to vector<4x64xf32>
    %c0_546 = arith.constant 0 : index
    %c0_547 = arith.constant 0 : index
    %c0_548 = arith.constant 0 : index
    %911 = vector.load %arg12[%c0_546, %c0_547, %c0_548] : memref<4x64x256xf32, #tpu.memory_space<vmem>>, vector<1x64x256xf32>
    %912 = vector.shape_cast %911 : vector<1x64x256xf32> to vector<64x256xf32>
    %cst_549 = arith.constant dense<0.000000e+00> : vector<4x256xf32>
    %913 = tpu.matmul %910, %912, %cst_549 {dimension_numbers = #tpu.dot_dimension_numbers<[1], [0], [0], [1], [0, 0, 1, 1], [], []>} : vector<4x64xf32>, vector<64x256xf32>, vector<4x256xf32> -> vector<4x256xf32>
    %c1_550 = arith.constant 1 : index
    %c0_551 = arith.constant 0 : index
    %c0_552 = arith.constant 0 : index
    %914 = vector.load %arg3[%c1_550, %c0_551, %c0_552] : memref<2x4x64xf32, #tpu.memory_space<vmem>>, vector<1x4x64xf32>
    %915 = vector.shape_cast %914 : vector<1x4x64xf32> to vector<4x64xf32>
    %c0_553 = arith.constant 0 : index
    %c0_554 = arith.constant 0 : index
    %c0_555 = arith.constant 0 : index
    %916 = vector.load %arg9[%c0_553, %c0_554, %c0_555] : memref<4x64x256xf32, #tpu.memory_space<vmem>>, vector<1x64x256xf32>
    %917 = vector.shape_cast %916 : vector<1x64x256xf32> to vector<64x256xf32>
    %cst_556 = arith.constant dense<0.000000e+00> : vector<4x256xf32>
    %918 = tpu.matmul %915, %917, %cst_556 {dimension_numbers = #tpu.dot_dimension_numbers<[1], [0], [0], [1], [0, 0, 1, 1], [], []>} : vector<4x64xf32>, vector<64x256xf32>, vector<4x256xf32> -> vector<4x256xf32>
    %919 = arith.addf %913, %918 : vector<4x256xf32>
    %920 = vector.broadcast %907 : vector<4x1xf32> to vector<4x256xf32>
    %921 = arith.addf %919, %920 : vector<4x256xf32>
    %cst_557 = arith.constant 0.000000e+00 : f32
    %922 = vector.broadcast %cst_557 : f32 to vector<4x256xf32>
    %923 = arith.maximumf %921, %922 : vector<4x256xf32>
    %c0_558 = arith.constant 0 : index
    %c0_559 = arith.constant 0 : index
    %c0_560 = arith.constant 0 : index
    %924 = vector.load %arg4[%c0_558, %c0_559, %c0_560] : memref<4x18x4xf32, #tpu.memory_space<vmem>>, vector<1x18x4xf32>
    %925 = vector.shape_cast %924 : vector<1x18x4xf32> to vector<18x4xf32>
    %cst_561 = arith.constant dense<0.000000e+00> : vector<18x256xf32>
    %926 = tpu.matmul %925, %923, %cst_561 {dimension_numbers = #tpu.dot_dimension_numbers<[1], [0], [0], [1], [0, 0, 1, 1], [], []>} : vector<18x4xf32>, vector<4x256xf32>, vector<18x256xf32> -> vector<18x256xf32>
    %927 = arith.addf %908, %926 : vector<18x256xf32>
    %c0_562 = arith.constant 0 : index
    %c0_563 = arith.constant 0 : index
    %c0_564 = arith.constant 0 : index
    %928 = vector.load %arg3[%c0_562, %c0_563, %c0_564] : memref<2x4x64xf32, #tpu.memory_space<vmem>>, vector<1x4x64xf32>
    %929 = vector.shape_cast %928 : vector<1x4x64xf32> to vector<4x64xf32>
    %c1_565 = arith.constant 1 : index
    %c0_566 = arith.constant 0 : index
    %c0_567 = arith.constant 0 : index
    %930 = vector.load %arg12[%c1_565, %c0_566, %c0_567] : memref<4x64x256xf32, #tpu.memory_space<vmem>>, vector<1x64x256xf32>
    %931 = vector.shape_cast %930 : vector<1x64x256xf32> to vector<64x256xf32>
    %cst_568 = arith.constant dense<0.000000e+00> : vector<4x256xf32>
    %932 = tpu.matmul %929, %931, %cst_568 {dimension_numbers = #tpu.dot_dimension_numbers<[1], [0], [0], [1], [0, 0, 1, 1], [], []>} : vector<4x64xf32>, vector<64x256xf32>, vector<4x256xf32> -> vector<4x256xf32>
    %c1_569 = arith.constant 1 : index
    %c0_570 = arith.constant 0 : index
    %c0_571 = arith.constant 0 : index
    %933 = vector.load %arg3[%c1_569, %c0_570, %c0_571] : memref<2x4x64xf32, #tpu.memory_space<vmem>>, vector<1x4x64xf32>
    %934 = vector.shape_cast %933 : vector<1x4x64xf32> to vector<4x64xf32>
    %c1_572 = arith.constant 1 : index
    %c0_573 = arith.constant 0 : index
    %c0_574 = arith.constant 0 : index
    %935 = vector.load %arg9[%c1_572, %c0_573, %c0_574] : memref<4x64x256xf32, #tpu.memory_space<vmem>>, vector<1x64x256xf32>
    %936 = vector.shape_cast %935 : vector<1x64x256xf32> to vector<64x256xf32>
    %cst_575 = arith.constant dense<0.000000e+00> : vector<4x256xf32>
    %937 = tpu.matmul %934, %936, %cst_575 {dimension_numbers = #tpu.dot_dimension_numbers<[1], [0], [0], [1], [0, 0, 1, 1], [], []>} : vector<4x64xf32>, vector<64x256xf32>, vector<4x256xf32> -> vector<4x256xf32>
    %938 = arith.addf %932, %937 : vector<4x256xf32>
    %939 = vector.broadcast %907 : vector<4x1xf32> to vector<4x256xf32>
    %940 = arith.addf %938, %939 : vector<4x256xf32>
    %cst_576 = arith.constant 0.000000e+00 : f32
    %941 = vector.broadcast %cst_576 : f32 to vector<4x256xf32>
    %942 = arith.maximumf %940, %941 : vector<4x256xf32>
    %c1_577 = arith.constant 1 : index
    %c0_578 = arith.constant 0 : index
    %c0_579 = arith.constant 0 : index
    %943 = vector.load %arg4[%c1_577, %c0_578, %c0_579] : memref<4x18x4xf32, #tpu.memory_space<vmem>>, vector<1x18x4xf32>
    %944 = vector.shape_cast %943 : vector<1x18x4xf32> to vector<18x4xf32>
    %cst_580 = arith.constant dense<0.000000e+00> : vector<18x256xf32>
    %945 = tpu.matmul %944, %942, %cst_580 {dimension_numbers = #tpu.dot_dimension_numbers<[1], [0], [0], [1], [0, 0, 1, 1], [], []>} : vector<18x4xf32>, vector<4x256xf32>, vector<18x256xf32> -> vector<18x256xf32>
    %946 = arith.addf %927, %945 : vector<18x256xf32>
    %c0_581 = arith.constant 0 : index
    %c0_582 = arith.constant 0 : index
    %c0_583 = arith.constant 0 : index
    %947 = vector.load %arg3[%c0_581, %c0_582, %c0_583] : memref<2x4x64xf32, #tpu.memory_space<vmem>>, vector<1x4x64xf32>
    %948 = vector.shape_cast %947 : vector<1x4x64xf32> to vector<4x64xf32>
    %c2_584 = arith.constant 2 : index
    %c0_585 = arith.constant 0 : index
    %c0_586 = arith.constant 0 : index
    %949 = vector.load %arg12[%c2_584, %c0_585, %c0_586] : memref<4x64x256xf32, #tpu.memory_space<vmem>>, vector<1x64x256xf32>
    %950 = vector.shape_cast %949 : vector<1x64x256xf32> to vector<64x256xf32>
    %cst_587 = arith.constant dense<0.000000e+00> : vector<4x256xf32>
    %951 = tpu.matmul %948, %950, %cst_587 {dimension_numbers = #tpu.dot_dimension_numbers<[1], [0], [0], [1], [0, 0, 1, 1], [], []>} : vector<4x64xf32>, vector<64x256xf32>, vector<4x256xf32> -> vector<4x256xf32>
    %c1_588 = arith.constant 1 : index
    %c0_589 = arith.constant 0 : index
    %c0_590 = arith.constant 0 : index
    %952 = vector.load %arg3[%c1_588, %c0_589, %c0_590] : memref<2x4x64xf32, #tpu.memory_space<vmem>>, vector<1x4x64xf32>
    %953 = vector.shape_cast %952 : vector<1x4x64xf32> to vector<4x64xf32>
    %c2_591 = arith.constant 2 : index
    %c0_592 = arith.constant 0 : index
    %c0_593 = arith.constant 0 : index
    %954 = vector.load %arg9[%c2_591, %c0_592, %c0_593] : memref<4x64x256xf32, #tpu.memory_space<vmem>>, vector<1x64x256xf32>
    %955 = vector.shape_cast %954 : vector<1x64x256xf32> to vector<64x256xf32>
    %cst_594 = arith.constant dense<0.000000e+00> : vector<4x256xf32>
    %956 = tpu.matmul %953, %955, %cst_594 {dimension_numbers = #tpu.dot_dimension_numbers<[1], [0], [0], [1], [0, 0, 1, 1], [], []>} : vector<4x64xf32>, vector<64x256xf32>, vector<4x256xf32> -> vector<4x256xf32>
    %957 = arith.addf %951, %956 : vector<4x256xf32>
    %958 = vector.broadcast %907 : vector<4x1xf32> to vector<4x256xf32>
    %959 = arith.addf %957, %958 : vector<4x256xf32>
    %cst_595 = arith.constant 0.000000e+00 : f32
    %960 = vector.broadcast %cst_595 : f32 to vector<4x256xf32>
    %961 = arith.maximumf %959, %960 : vector<4x256xf32>
    %c2_596 = arith.constant 2 : index
    %c0_597 = arith.constant 0 : index
    %c0_598 = arith.constant 0 : index
    %962 = vector.load %arg4[%c2_596, %c0_597, %c0_598] : memref<4x18x4xf32, #tpu.memory_space<vmem>>, vector<1x18x4xf32>
    %963 = vector.shape_cast %962 : vector<1x18x4xf32> to vector<18x4xf32>
    %cst_599 = arith.constant dense<0.000000e+00> : vector<18x256xf32>
    %964 = tpu.matmul %963, %961, %cst_599 {dimension_numbers = #tpu.dot_dimension_numbers<[1], [0], [0], [1], [0, 0, 1, 1], [], []>} : vector<18x4xf32>, vector<4x256xf32>, vector<18x256xf32> -> vector<18x256xf32>
    %965 = arith.addf %946, %964 : vector<18x256xf32>
    %c0_600 = arith.constant 0 : index
    %c0_601 = arith.constant 0 : index
    %c0_602 = arith.constant 0 : index
    %966 = vector.load %arg3[%c0_600, %c0_601, %c0_602] : memref<2x4x64xf32, #tpu.memory_space<vmem>>, vector<1x4x64xf32>
    %967 = vector.shape_cast %966 : vector<1x4x64xf32> to vector<4x64xf32>
    %c3_603 = arith.constant 3 : index
    %c0_604 = arith.constant 0 : index
    %c0_605 = arith.constant 0 : index
    %968 = vector.load %arg12[%c3_603, %c0_604, %c0_605] : memref<4x64x256xf32, #tpu.memory_space<vmem>>, vector<1x64x256xf32>
    %969 = vector.shape_cast %968 : vector<1x64x256xf32> to vector<64x256xf32>
    %cst_606 = arith.constant dense<0.000000e+00> : vector<4x256xf32>
    %970 = tpu.matmul %967, %969, %cst_606 {dimension_numbers = #tpu.dot_dimension_numbers<[1], [0], [0], [1], [0, 0, 1, 1], [], []>} : vector<4x64xf32>, vector<64x256xf32>, vector<4x256xf32> -> vector<4x256xf32>
    %c1_607 = arith.constant 1 : index
    %c0_608 = arith.constant 0 : index
    %c0_609 = arith.constant 0 : index
    %971 = vector.load %arg3[%c1_607, %c0_608, %c0_609] : memref<2x4x64xf32, #tpu.memory_space<vmem>>, vector<1x4x64xf32>
    %972 = vector.shape_cast %971 : vector<1x4x64xf32> to vector<4x64xf32>
    %c3_610 = arith.constant 3 : index
    %c0_611 = arith.constant 0 : index
    %c0_612 = arith.constant 0 : index
    %973 = vector.load %arg9[%c3_610, %c0_611, %c0_612] : memref<4x64x256xf32, #tpu.memory_space<vmem>>, vector<1x64x256xf32>
    %974 = vector.shape_cast %973 : vector<1x64x256xf32> to vector<64x256xf32>
    %cst_613 = arith.constant dense<0.000000e+00> : vector<4x256xf32>
    %975 = tpu.matmul %972, %974, %cst_613 {dimension_numbers = #tpu.dot_dimension_numbers<[1], [0], [0], [1], [0, 0, 1, 1], [], []>} : vector<4x64xf32>, vector<64x256xf32>, vector<4x256xf32> -> vector<4x256xf32>
    %976 = arith.addf %970, %975 : vector<4x256xf32>
    %977 = vector.broadcast %907 : vector<4x1xf32> to vector<4x256xf32>
    %978 = arith.addf %976, %977 : vector<4x256xf32>
    %cst_614 = arith.constant 0.000000e+00 : f32
    %979 = vector.broadcast %cst_614 : f32 to vector<4x256xf32>
    %980 = arith.maximumf %978, %979 : vector<4x256xf32>
    %c3_615 = arith.constant 3 : index
    %c0_616 = arith.constant 0 : index
    %c0_617 = arith.constant 0 : index
    %981 = vector.load %arg4[%c3_615, %c0_616, %c0_617] : memref<4x18x4xf32, #tpu.memory_space<vmem>>, vector<1x18x4xf32>
    %982 = vector.shape_cast %981 : vector<1x18x4xf32> to vector<18x4xf32>
    %cst_618 = arith.constant dense<0.000000e+00> : vector<18x256xf32>
    %983 = tpu.matmul %982, %980, %cst_618 {dimension_numbers = #tpu.dot_dimension_numbers<[1], [0], [0], [1], [0, 0, 1, 1], [], []>} : vector<18x4xf32>, vector<4x256xf32>, vector<18x256xf32> -> vector<18x256xf32>
    %984 = arith.addf %965, %983 : vector<18x256xf32>
    %c0_619 = arith.constant 0 : index
    %c0_620 = arith.constant 0 : index
    %985 = vector.load %arg7[%c0_619, %c0_620] : memref<18x1xf32, #tpu.memory_space<vmem>>, vector<18x1xf32>
    %986 = vector.broadcast %985 : vector<18x1xf32> to vector<18x256xf32>
    %987 = arith.addf %984, %986 : vector<18x256xf32>
    %cst_621 = arith.constant 0.000000e+00 : f32
    %988 = vector.broadcast %cst_621 : f32 to vector<18x256xf32>
    %989 = arith.maximumf %987, %988 : vector<18x256xf32>
    %c0_622 = arith.constant 0 : index
    %c0_623 = arith.constant 0 : index
    %990 = vector.load %arg10[%c0_622, %c0_623] : memref<1x256xf32, #tpu.memory_space<vmem>>, vector<1x256xf32>
    %cst_624 = arith.constant 1.562500e-02 : f32
    %991 = vector.broadcast %cst_624 : f32 to vector<1x256xf32>
    %992 = arith.mulf %990, %991 : vector<1x256xf32>
    %cst_625 = arith.constant 5.000000e-01 : f32
    %993 = vector.broadcast %cst_625 : f32 to vector<1x256xf32>
    %994 = arith.subf %992, %993 : vector<1x256xf32>
    %c0_626 = arith.constant 0 : index
    %c0_627 = arith.constant 0 : index
    %995 = vector.load %arg5[%c0_626, %c0_627] : memref<4x18xf32, #tpu.memory_space<vmem>>, vector<4x18xf32>
    %cst_628 = arith.constant dense<0.000000e+00> : vector<4x256xf32>
    %996 = tpu.matmul %995, %989, %cst_628 {dimension_numbers = #tpu.dot_dimension_numbers<[1], [0], [0], [1], [0, 0, 1, 1], [], []>} : vector<4x18xf32>, vector<18x256xf32>, vector<4x256xf32> -> vector<4x256xf32>
    %c1_629 = arith.constant 1 : index
    %c0_630 = arith.constant 0 : index
    %c0_631 = arith.constant 0 : index
    %997 = vector.load %arg6[%c1_629, %c0_630, %c0_631] : memref<3x4x1xf32, #tpu.memory_space<vmem>>, vector<1x4x1xf32>
    %998 = vector.shape_cast %997 : vector<1x4x1xf32> to vector<4x1xf32>
    %999 = vector.broadcast %998 : vector<4x1xf32> to vector<4x256xf32>
    %1000 = vector.broadcast %994 : vector<1x256xf32> to vector<4x256xf32>
    %1001 = arith.mulf %999, %1000 : vector<4x256xf32>
    %1002 = arith.addf %996, %1001 : vector<4x256xf32>
    %c2_632 = arith.constant 2 : index
    %c0_633 = arith.constant 0 : index
    %c0_634 = arith.constant 0 : index
    %1003 = vector.load %arg6[%c2_632, %c0_633, %c0_634] : memref<3x4x1xf32, #tpu.memory_space<vmem>>, vector<1x4x1xf32>
    %1004 = vector.shape_cast %1003 : vector<1x4x1xf32> to vector<4x1xf32>
    %1005 = vector.broadcast %1004 : vector<4x1xf32> to vector<4x256xf32>
    %1006 = arith.addf %1002, %1005 : vector<4x256xf32>
    %c0_635 = arith.constant 0 : index
    %c0_636 = arith.constant 0 : index
    %1007 = vector.load %arg11[%c0_635, %c0_636] : memref<4x256xf32, #tpu.memory_space<vmem>>, vector<4x256xf32>
    tpu.vector_store %arg11[%c0_635, %c0_636], %1006 {strides = array<i32>} : memref<4x256xf32, #tpu.memory_space<vmem>>, vector<4x256xf32>,
    return
  }
  func.func @transform_0(%arg0: i32) -> (i32, i32) {
    %c0_i32 = arith.constant 0 : i32
    %c0_i32_0 = arith.constant 0 : i32
    %c0_i32_1 = arith.constant 0 : i32
    return %c0_i32, %c0_i32_0 : i32, i32
  }
  func.func @transform_1(%arg0: i32) -> i32 {
    %c0_i32 = arith.constant 0 : i32
    %c0_i32_0 = arith.constant 0 : i32
    return %c0_i32 : i32
  }
  func.func @transform_2(%arg0: i32) -> (i32, i32, i32) {
    %c0_i32 = arith.constant 0 : i32
    %c0_i32_0 = arith.constant 0 : i32
    %c0_i32_1 = arith.constant 0 : i32
    %c0_i32_2 = arith.constant 0 : i32
    return %c0_i32, %c0_i32_0, %c0_i32_1 : i32, i32, i32
  }
  func.func @transform_3(%arg0: i32) -> (i32, i32, i32) {
    %c0_i32 = arith.constant 0 : i32
    %c0_i32_0 = arith.constant 0 : i32
    %c0_i32_1 = arith.constant 0 : i32
    %c0_i32_2 = arith.constant 0 : i32
    return %c0_i32, %c0_i32_0, %c0_i32_1 : i32, i32, i32
  }
  func.func @transform_4(%arg0: i32) -> (i32, i32) {
    %c0_i32 = arith.constant 0 : i32
    %c0_i32_0 = arith.constant 0 : i32
    %c0_i32_1 = arith.constant 0 : i32
    return %c0_i32, %c0_i32_0 : i32, i32
  }
  func.func @transform_5(%arg0: i32) -> (i32, i32, i32) {
    %c0_i32 = arith.constant 0 : i32
    %c0_i32_0 = arith.constant 0 : i32
    %c0_i32_1 = arith.constant 0 : i32
    %c0_i32_2 = arith.constant 0 : i32
    return %c0_i32, %c0_i32_0, %c0_i32_1 : i32, i32, i32
  }
  func.func @transform_6(%arg0: i32) -> (i32, i32) {
    %c0_i32 = arith.constant 0 : i32
    %c0_i32_0 = arith.constant 0 : i32
    %c0_i32_1 = arith.constant 0 : i32
    return %c0_i32, %c0_i32_0 : i32, i32
  }
  func.func @transform_7(%arg0: i32) -> (i32, i32, i32) {
    %c0_i32 = arith.constant 0 : i32
    %c0_i32_0 = arith.constant 0 : i32
    %c0_i32_1 = arith.constant 0 : i32
    return %c0_i32, %c0_i32_0, %arg0 : i32, i32, i32
  }
  func.func @transform_8(%arg0: i32) -> (i32, i32, i32) {
    %c0_i32 = arith.constant 0 : i32
    %c0_i32_0 = arith.constant 0 : i32
    %c0_i32_1 = arith.constant 0 : i32
    return %c0_i32, %c0_i32_0, %arg0 : i32, i32, i32
  }
  func.func @transform_9(%arg0: i32) -> (i32, i32) {
    %c0_i32 = arith.constant 0 : i32
    %c0_i32_0 = arith.constant 0 : i32
    return %c0_i32, %arg0 : i32, i32
  }
  func.func @transform_10(%arg0: i32) -> (i32, i32) {
    %c0_i32 = arith.constant 0 : i32
    %c0_i32_0 = arith.constant 0 : i32
    return %c0_i32, %arg0 : i32, i32
  }
}

</mosaic_0001>

<bundles_post_ra>
// kernel: squeeze.4
= control target key start
LH: loop header
LB: loop body
LE: loop exit
PB: predicated region body
PF: predicated region fallthrough
CT: control target
= control target key end

     0   :  { %vm3_vm0 = vcmask 64512   ;;  %s321_s12 = smov 120   ;;  %s456_s0 = inlined_call_operand.vmem [shape: f32[2,1,16,16], index: 0, kind: input, shape index: {}]   ;;  %s457_s1 = inlined_call_operand.vmem [shape: f32[2,2,8,2,8], index: 1, kind: output, shape index: {}]  }
   0x1   :  { %v287_v0 = vld [vmem:[%s456_s0 + $0x10] sm:$0xff]   ;;  %v27_v1 = vld [vmem:[%s456_s0] sm:$0xff]   ;;  %v288_v2 = vld [vmem:[%s456_s0 + $0x18] sm:$0xff]  }
   0x2   :  { %46 = vrot.lane.b32.xlu1 %v287_v0, %s321_s12  ;;  %28 = vrot.lane.b32.xlu0 %v27_v1, %s321_s12  ;;  %v286_v3 = vld [vmem:[%s456_s0 + $0x8] sm:$0xff]   ;;  %17 = vst.msk [vmem:[#allocation0 + $0x80] ss:$8 sm:$0xf] %vm3_vm0, %v287_v0  }
   0x3   :  { %19 = vst.msk [vmem:[#allocation0 + $0x80] ss:$8 sm:$0xf0] %vm3_vm0, %v287_v0   ;;  %4 = vst.msk [vmem:[#allocation0] ss:$8 sm:$0xf] %vm3_vm0, %v27_v1  }
   0x4   :  { %5 = vst.msk [vmem:[#allocation0] ss:$8 sm:$0xf0] %vm3_vm0, %v27_v1   ;;  %24 = vst.msk [vmem:[#allocation0 + $0xc0] ss:$8 sm:$0xf] %vm3_vm0, %v288_v2  }
   0x5   :  { %26 = vst.msk [vmem:[#allocation0 + $0xc0] ss:$8 sm:$0xf0] %vm3_vm0, %v288_v2   ;;  %10 = vst.msk [vmem:[#allocation0 + $0x40] ss:$8 sm:$0xf] %vm3_vm0, %v286_v3  }
   0x6   :  { %12 = vst.msk [vmem:[#allocation0 + $0x40] ss:$8 sm:$0xf0] %vm3_vm0, %v286_v3   ;;  %55 = vrot.lane.b32.xlu1 %v288_v2, %s321_s12  ;;  %37 = vrot.lane.b32.xlu0 %v286_v3, %s321_s12 }
  0x74   :  { %v47_v4 = vpop.permute.xlu1 %46   ;;  %v29_v5 = vpop.permute.xlu0 %28  }
  0x75   :  { %50 = vst.msk [vmem:[#allocation0 + $0x81] ss:$8 sm:$0xf] %vm3_vm0, %v47_v4   ;;  %52 = vst.msk [vmem:[#allocation0 + $0x81] ss:$8 sm:$0xf0] %vm3_vm0, %v47_v4  }
  0x76   :  { %32 = vst.msk [vmem:[#allocation0 + $0x1] ss:$8 sm:$0xf] %vm3_vm0, %v29_v5   ;;  %34 = vst.msk [vmem:[#allocation0 + $0x1] ss:$8 sm:$0xf0] %vm3_vm0, %v29_v5  }
  0x78   :  { %v56_v6 = vpop.permute.xlu1 %55   ;;  %v38_v7 = vpop.permute.xlu0 %37  }
  0x79   :  { %59 = vst.msk [vmem:[#allocation0 + $0xc1] ss:$8 sm:$0xf] %vm3_vm0, %v56_v6   ;;  %61 = vst.msk [vmem:[#allocation0 + $0xc1] ss:$8 sm:$0xf0] %vm3_vm0, %v56_v6  }
  0x7a   :  { %41 = vst.msk [vmem:[#allocation0 + $0x41] ss:$8 sm:$0xf] %vm3_vm0, %v38_v7   ;;  %43 = vst.msk [vmem:[#allocation0 + $0x41] ss:$8 sm:$0xf0] %vm3_vm0, %v38_v7  }
  0x7c   :  { %v158_v8 = vld [vmem:[#allocation0 + $0x80] sm:$0x3]  ;;  %v164_v9 = vld [vmem:[#allocation0 + $0x88] sm:$0x3]  ;;  %v170_v10 = vld [vmem:[#allocation0 + $0x90] sm:$0x3] }
  0x7d   :  { %304 = vst [vmem:[%s457_s1 + $0x20] sm:$0x3] %v158_v8  ;;  %305 = vst [vmem:[%s457_s1 + $0x22] sm:$0x3] %v164_v9  ;;  %v176_v11 = vld [vmem:[#allocation0 + $0x98] sm:$0x3] }
  0x7e   :  { %306 = vst [vmem:[%s457_s1 + $0x24] sm:$0x3] %v170_v10  ;;  %v182_v12 = vld [vmem:[#allocation0 + $0xa0] sm:$0x3]  ;;  %v188_v13 = vld [vmem:[#allocation0 + $0xa8] sm:$0x3] }
  0x7f   :  { %307 = vst [vmem:[%s457_s1 + $0x26] sm:$0x3] %v176_v11  ;;  %308 = vst [vmem:[%s457_s1 + $0x28] sm:$0x3] %v182_v12  ;;  %v194_v14 = vld [vmem:[#allocation0 + $0xb0] sm:$0x3] }
  0x80   :  { %309 = vst [vmem:[%s457_s1 + $0x2a] sm:$0x3] %v188_v13  ;;  %v200_v15 = vld [vmem:[#allocation0 + $0xb8] sm:$0x3]  ;;  %v65_v16 = vld [vmem:[#allocation0] sm:$0x3] }
  0x81   :  { %310 = vst [vmem:[%s457_s1 + $0x2c] sm:$0x3] %v194_v14  ;;  %311 = vst [vmem:[%s457_s1 + $0x2e] sm:$0x3] %v200_v15  ;;  %v69_v17 = vld [vmem:[#allocation0 + $0x8] sm:$0x3] }
  0x82   :  { %67 = vst [vmem:[%s457_s1] sm:$0x3] %v65_v16  ;;  %v74_v18 = vld [vmem:[#allocation0 + $0x10] sm:$0x3]  ;;  %v80_v19 = vld [vmem:[#allocation0 + $0x18] sm:$0x3] }
  0x83   :  { %289 = vst [vmem:[%s457_s1 + $0x2] sm:$0x3] %v69_v17  ;;  %290 = vst [vmem:[%s457_s1 + $0x4] sm:$0x3] %v74_v18  ;;  %v86_v20 = vld [vmem:[#allocation0 + $0x20] sm:$0x3] }
  0x84   :  { %291 = vst [vmem:[%s457_s1 + $0x6] sm:$0x3] %v80_v19  ;;  %v92_v21 = vld [vmem:[#allocation0 + $0x28] sm:$0x3]  ;;  %v98_v22 = vld [vmem:[#allocation0 + $0x30] sm:$0x3] }
  0x85   :  { %292 = vst [vmem:[%s457_s1 + $0x8] sm:$0x3] %v86_v20  ;;  %293 = vst [vmem:[%s457_s1 + $0xa] sm:$0x3] %v92_v21  ;;  %v104_v23 = vld [vmem:[#allocation0 + $0x38] sm:$0x3] }
  0x86   :  { %294 = vst [vmem:[%s457_s1 + $0xc] sm:$0x3] %v98_v22  ;;  %v206_v24 = vld [vmem:[#allocation0 + $0xc0] sm:$0x3]  ;;  %v212_v25 = vld [vmem:[#allocation0 + $0xc8] sm:$0x3] }
  0x87   :  { %295 = vst [vmem:[%s457_s1 + $0xe] sm:$0x3] %v104_v23  ;;  %312 = vst [vmem:[%s457_s1 + $0x30] sm:$0x3] %v206_v24  ;;  %v218_v26 = vld [vmem:[#allocation0 + $0xd0] sm:$0x3] }
  0x88   :  { %313 = vst [vmem:[%s457_s1 + $0x32] sm:$0x3] %v212_v25  ;;  %v224_v27 = vld [vmem:[#allocation0 + $0xd8] sm:$0x3]  ;;  %v230_v28 = vld [vmem:[#allocation0 + $0xe0] sm:$0x3] }
  0x89   :  { %314 = vst [vmem:[%s457_s1 + $0x34] sm:$0x3] %v218_v26  ;;  %315 = vst [vmem:[%s457_s1 + $0x36] sm:$0x3] %v224_v27  ;;  %v236_v29 = vld [vmem:[#allocation0 + $0xe8] sm:$0x3] }
  0x8a   :  { %316 = vst [vmem:[%s457_s1 + $0x38] sm:$0x3] %v230_v28  ;;  %v242_v30 = vld [vmem:[#allocation0 + $0xf0] sm:$0x3]  ;;  %v248_v31 = vld [vmem:[#allocation0 + $0xf8] sm:$0x3] }
  0x8b   :  { %317 = vst [vmem:[%s457_s1 + $0x3a] sm:$0x3] %v236_v29  ;;  %318 = vst [vmem:[%s457_s1 + $0x3c] sm:$0x3] %v242_v30  ;;  %v110_v32 = vld [vmem:[#allocation0 + $0x40] sm:$0x3] }
  0x8c   :  { %319 = vst [vmem:[%s457_s1 + $0x3e] sm:$0x3] %v248_v31  ;;  %v116_v33 = vld [vmem:[#allocation0 + $0x48] sm:$0x3]  ;;  %v122_v34 = vld [vmem:[#allocation0 + $0x50] sm:$0x3] }
  0x8d   :  { %296 = vst [vmem:[%s457_s1 + $0x10] sm:$0x3] %v110_v32  ;;  %297 = vst [vmem:[%s457_s1 + $0x12] sm:$0x3] %v116_v33  ;;  %v128_v35 = vld [vmem:[#allocation0 + $0x58] sm:$0x3] }
  0x8e   :  { %298 = vst [vmem:[%s457_s1 + $0x14] sm:$0x3] %v122_v34  ;;  %v134_v36 = vld [vmem:[#allocation0 + $0x60] sm:$0x3]  ;;  %v140_v37 = vld [vmem:[#allocation0 + $0x68] sm:$0x3] }
  0x8f   :  { %299 = vst [vmem:[%s457_s1 + $0x16] sm:$0x3] %v128_v35  ;;  %300 = vst [vmem:[%s457_s1 + $0x18] sm:$0x3] %v134_v36  ;;  %v146_v38 = vld [vmem:[#allocation0 + $0x70] sm:$0x3] }
  0x90   :  { %301 = vst [vmem:[%s457_s1 + $0x1a] sm:$0x3] %v140_v37  ;;  %v152_v39 = vld [vmem:[#allocation0 + $0x78] sm:$0x3]  ;;  %302 = vst [vmem:[%s457_s1 + $0x1c] sm:$0x3] %v146_v38 }
  0x91   :  { %303 = vst [vmem:[%s457_s1 + $0x1e] sm:$0x3] %v152_v39 }

// kernel: net16x16_forward.1
= control target key start
LH: loop header
LB: loop body
LE: loop exit
PB: predicated region body
PF: predicated region fallthrough
CT: control target
= control target key end

     0   :  { %16 = vsyncpa [#allocation5], 0  ;;  %s11523_s0 = inlined_call_operand.vmem [shape: f32[3,3], index: 0, kind: input, shape index: {}]   ;;  %s11524_s1 = inlined_call_operand.<no memory space> [shape: f32[1], index: 1, kind: input, shape index: {}]   ;;  %s11525_s2 = inlined_call_operand.vmem [shape: f32[2,4,64], index: 2, kind: input, shape index: {}]   ;;  %s11526_s3 = inlined_call_operand.vmem [shape: f32[4,18,4], index: 3, kind: input, shape index: {}]   ;;  %s11527_s4 = inlined_call_operand.vmem [shape: f32[4,18], index: 4, kind: input, shape index: {}]   ;;  %s11528_s5 = inlined_call_operand.vmem [shape: f32[3,4,1], index: 5, kind: input, shape index: {}]   ;;  %s11529_s6 = inlined_call_operand.vmem [shape: f32[18,1], index: 6, kind: input, shape index: {}]   ;;  %s11530_s7 = inlined_call_operand.vmem [shape: f32[18,18,256], index: 7, kind: input, shape index: {}]   ;;  %s11531_s8 = inlined_call_operand.vmem [shape: f32[4,64,256], index: 8, kind: input, shape index: {}]   ;;  %s11532_s9 = inlined_call_operand.vmem [shape: f32[1,256], index: 9, kind: input, shape index: {}]   ;;  %s11533_s10 = inlined_call_operand.vmem [shape: f32[4,256], index: 10, kind: output, shape index: {}]  }
   0x1   :  { %s23_s15 = sshll.u32 %s11523_s0, 4  ;;  %s24_s15 = int_to_ptr.vmem [resolvable:$true] %s23_s15 }
   0x2   :  { %s6222_s16 = scalar_lea.vmem %s24_s15, 64  ;;  %p6227_p1 = scmp.lt.s32.totalorder %s24_s15, %s24_s15 }
   0x3   :  { %p6223_p0 = scmp.ne.s32.totalorder %s24_s15, %s6222_s16  ;;  %p6228_p2 = scmp.lt.s32.totalorder %s6222_s16, %s6222_s16 }
   0x5   :  { %p6229_p3 = por %p6228_p2, %p6227_p1 }
   0x7   :  { %p6230_p4 = pnand %p6229_p3, %p6223_p0 }
   0x9   :  { %6233 = shalt.err (!%p6230_p4)
}
   0xa   :  { %s6236_s17 = smov [#allocation4]  }
   0xb   :  { %26 = dma.vmem_to_smem %s24_s15, 64, %s6236_s17, [#allocation5]  }
   0xc   :  { %6234 = dma.done.wait [#allocation5], 64  }
   0xd   :  { %6235 = vsyncadd [#allocation5], 4294967232 }
   0xe   :  { %48 = sfence }
   0xf   :  { %v4080_v0 = vld [vmem:[%s11531_s8 + $0x8] sm:$0xff]  ;;  %v4082_v1 = vld [vmem:[%s11531_s8 + $0x18] sm:$0xff]  ;;  %v4079_v2 = vld [vmem:[%s11531_s8] sm:$0xff]  ;;  %v11537_v7 = vmov 0.0   ;;  %s6316_s29 = sld [smem:[#allocation4]]  ;;  %s6328_s16 = sld [smem:[#allocation4 + $0x1]]  ;;  %v6386_v26 = vstv %s11524_s1 }
  0x10   :  { %v6030_v3 = vpack.c.bf16 %v4082_v1, %v4080_v0  ;;  %v4081_v4 = vld [vmem:[%s11531_s8 + $0x10] sm:$0xff]  ;;  %v4084_v5 = vld [vmem:[%s11531_s8 + $0x28] sm:$0xff]  ;;  %v4086_v6 = vld [vmem:[%s11531_s8 + $0x38] sm:$0xff]  ;;  %4163 = vmatprep.mubr.f32.mxu1 %v11537_v7  ;;  %4237 = vmatprep.mubr.f32.mxu0 %v11537_v7  ;;  %s6336_s21 = sld [smem:[#allocation4 + $0x2]]  ;;  %s6347_s27 = sld [smem:[#allocation4 + $0x80]]  ;;  %11835 = vst [vmem:[#allocation7_spill] sm:$0xff] %v6386_v26 }
  0x11   :  { %v6032_v8 = vpack.c.bf16 %v4081_v4, %v4079_v2  ;;  %v6034_v9 = vpack.c.bf16 %v4086_v6, %v4084_v5  ;;  %v4083_v10 = vld [vmem:[%s11531_s8 + $0x20] sm:$0xff]  ;;  %v4085_v11 = vld [vmem:[%s11531_s8 + $0x30] sm:$0xff]  ;;  %v4088_v12 = vld [vmem:[%s11531_s8 + $0x48] sm:$0xff]  ;;  %s6364_s15 = sld [smem:[#allocation4 + $0x81]]  ;;  %s6381_s23 = sld [smem:[#allocation4 + $0x82]]  ;;  %vm85_vm0 = vcmask 1046528  }
  0x12   :  { %6031 = vmatprep.subr.bf16.mxu1 %v6030_v3  ;;  %v4090_v13 = vld [vmem:[%s11531_s8 + $0x58] sm:$0xff]  ;;  %v4087_v14 = vld [vmem:[%s11531_s8 + $0x40] sm:$0xff]  ;;  %v6036_v15 = vpack.c.bf16 %v4085_v11, %v4083_v10  ;;  %v4089_v16 = vld [vmem:[%s11531_s8 + $0x50] sm:$0xff]  ;;  %s6403_s14 = sld [smem:[#allocation4 + $0x100]]  ;;  %vm4095_vm1 = vcmask 523264   ;;  %vm121_vm2 = vcmask 1045504  }
  0x13   :  { %6033 = vmatpush1.bf16.msra.mxu1 %v6032_v8  ;;  %v4092_v17 = vld [vmem:[%s11531_s8 + $0x68] sm:$0xff]  ;;  %v4094_v18 = vld [vmem:[%s11531_s8 + $0x78] sm:$0xff]  ;;  %v6038_v19 = vpack.c.bf16 %v4090_v13, %v4088_v12  ;;  %v6352_v20 = vld [vmem:[%s11531_s8 + $0x60] sm:$0xff]  ;;  %v6040_v31 = vpack.c.bf16 %v4089_v16, %v4087_v14  ;;  %s6482_s17 = sld [smem:[#allocation4 + $0x102]]  ;;  %vm4449_vm3 = vcmask 1043456   ;;  %vm4439_vm4 = vcmask 31744  }
  0x14   :  { %6035 = vmatprep.subr.bf16.mxu1 %v6034_v9  ;;  %v6357_v21 = vld [vmem:[%s11531_s8 + $0x70] sm:$0xff]  ;;  %v6362_v22 = vld [vmem:[%s11531_s8 + $0x88] sm:$0xff]  ;;  %v6369_v23 = vld [vmem:[%s11531_s8 + $0x98] sm:$0xff]  ;;  %v6042_v32 = vpack.c.bf16 %v4094_v18, %v4092_v17  ;;  %vm5269_vm5 = vcmask 1041408   ;;  %vm5265_vm6 = vcmask 146432  }
  0x15   :  { %v6374_v24 = vld [vmem:[%s11531_s8 + $0x80] sm:$0xff]  ;;  %v6379_v25 = vld [vmem:[%s11531_s8 + $0x90] sm:$0xff]  ;;  %v6391_v27 = vld [vmem:[%s11531_s8 + $0xa8] sm:$0xff]  ;;  %v6406_v30 = vstv %s6316_s29  ;;  %s6423_s29 = sld [smem:[#allocation4 + $0x101]]  ;;  %v6044_v37 = vpack.c.bf16 %v6357_v21, %v6352_v20  ;;  %v6062_v38 = vpack.c.bf16 %v6369_v23, %v6362_v22 }
  0x16   :  { %v6396_v28 = vld [vmem:[%s11531_s8 + $0xb8] sm:$0xff]  ;;  %v6401_v29 = vld [vmem:[%s11531_s8 + $0xa0] sm:$0xff]  ;;  %v6411_v33 = vld [vmem:[%s11531_s8 + $0xb0] sm:$0xff]  ;;  %v6426_v36 = vstv %s6328_s16  ;;  %v6064_v39 = vpack.c.bf16 %v6379_v25, %v6374_v24 }
  0x17   :  { %6037 = vmatpush1.bf16.msra.mxu1 %v6036_v15  ;;  %v6416_v34 = vld [vmem:[%s11531_s8 + $0xc8] sm:$0xff]  ;;  %v6421_v35 = vld [vmem:[%s11531_s8 + $0xd8] sm:$0xff]  ;;  %v6437_v40 = vld [vmem:[%s11531_s8 + $0xc0] sm:$0xff]  ;;  %v6450_v43 = vstv %s6336_s21  ;;  %v6066_v44 = vpack.c.bf16 %v6396_v28, %v6391_v27  ;;  %v6068_v45 = vpack.c.bf16 %v6411_v33, %v6401_v29 }
  0x18   :  { %6039 = vmatprep.subr.bf16.mxu1 %v6038_v19  ;;  %v6442_v41 = vld [vmem:[%s11531_s8 + $0xd0] sm:$0xff]  ;;  %v6447_v42 = vld [vmem:[%s11531_s8 + $0xe8] sm:$0xff]  ;;  %v6070_v46 = vpack.c.bf16 %v6421_v35, %v6416_v34  ;;  %v6461_v47 = vld [vmem:[%s11531_s8 + $0xf8] sm:$0xff]  ;;  %v6474_v50 = vstv %s6347_s27 }
  0x19   :  { %v6466_v48 = vld [vmem:[%s11531_s8 + $0xe0] sm:$0xff]  ;;  %v6471_v49 = vld [vmem:[%s11531_s8 + $0xf0] sm:$0xff]  ;;  %v6072_v51 = vpack.c.bf16 %v6442_v41, %v6437_v40  ;;  %v6074_v52 = vpack.c.bf16 %v6461_v47, %v6447_v42  ;;  %v60_v54 = vld [vmem:[%s11530_s7 + $0x8] sm:$0xff]  ;;  %v6496_v57 = vstv %s6364_s15 }
  0x1a   :  { %v6076_v53 = vpack.c.bf16 %v6471_v49, %v6466_v48  ;;  %v6490_v55 = vld [vmem:[%s11530_s7 + $0x18] sm:$0xff]  ;;  %v69_v56 = vld [vmem:[%s11530_s7 + $0x8] sm:$0xfe]  ;;  %v65_v58 = vmul.f32 %v6406_v30, %v60_v54  ;;  %v6532_v6 = vstv %s6381_s23  ;;  %v6549_v17 = vld [vmem:[%s11525_s2 + $0x4] sm:$0xf] }
  0x1b   :  { %6041 = vmatpush1.bf16.msra.mxu1 %v6040_v31  ;;  %v74_v59 = vmul.f32 %v6426_v36, %v69_v56  ;;  %v6502_v60 = vmul.f32 %v6426_v36, %v6490_v55  ;;  %v105_v61 = vld [vmem:[%s11530_s7 + $0x8] sm:$0xfc]  ;;  %v6509_v62 = vmul.f32 %v6450_v43, %v6490_v55  ;;  %v5375_v63 = vld [vmem:[%s11530_s7 + $0x38] sm:$0xff]  ;;  %v6555_v20 = vstv %s6403_s14  ;;  %v68_v42 = vld [vmem:[%s11530_s7] sm:$0xfe] }
  0x1c   :  { %v6517_v0 = vld [vmem:[%s11530_s7 + $0x48] sm:$0xff]  ;;  %6043 = vmatprep.subr.bf16.mxu1 %v6042_v32  ;;  %v110_v1 = vmul.f32 %v6450_v43, %v105_v61  ;;  %v147_v2 = vmul.f32 %v5375_v63, %v6474_v50  ;;  %v5379_v3 = vld [vmem:[%s11530_s7 + $0x38] sm:$0xfe]  ;;  %v6558_v21 = vstv %s6423_s29 }
  0x1d   :  { %v6526_v4 = vmul.f32 %v6517_v0, %v6496_v57  ;;  %v5383_v5 = vld [vmem:[%s11530_s7 + $0x38] sm:$0xfc]  ;;  %v89_v8 = vrot.slane %v74_v59, 1  ;;  %v11554_v9 = vrot.slane %v6502_v60, 1  ;;  %v11553_v10 = vrot.slane %v6509_v62, 2 }
  0x1e   :  { %v160_v11 = vmul.f32 %v5379_v3, %v6496_v57  ;;  %v125_v12 = vrot.slane %v110_v1, 2  ;;  %v195_v14 = vmul.f32 %v5383_v5, %v6532_v6  ;;  %v6541_v15 = vmul.f32 %v6517_v0, %v6532_v6  ;;  %v5391_v16 = vld [vmem:[%s11530_s7 + $0x68] sm:$0xfe]  ;;  %v6572_v54 = vld [vmem:[%s11530_s7 + $0x78] sm:$0xff] }
  0x1f   :  { %v11549_v13 = vrot.slane %v6526_v4, 1  ;;  %6045 = vmatpush1.bf16.msra.mxu1 %v6044_v37  ;;  %v91_v18 = vsel %vm85_vm0, %v89_v8, %v11554_v9  ;;  %v6567_v37 = vld [vmem:[%s11530_s7 + $0x68] sm:$0xff]  ;;  %v244_v59 = vmul.f32 %v5391_v16, %v6558_v21  ;;  %v6585_v61 = vmul.f32 %v6572_v54, %v6558_v21  ;;  %v5403_v1 = vld [vmem:[%s11530_s7 + $0x38] sm:$0xfe] }
  0x20   :  { %v174_v19 = vrot.slane %v160_v11, 1  ;;  %6063 = vmatprep.subr.bf16.mxu1 %v6062_v38  ;;  %v101_v22 = vadd.f32 %v91_v18, %v65_v58  ;;  %v127_v23 = vsel %vm121_vm2, %v125_v12, %v11553_v10  ;;  %v209_v31 = vrot.slane %v195_v14, 2  ;;  %v5395_v38 = vld [vmem:[%s11530_s7 + $0x68] sm:$0xfc]  ;;  %v5407_v3 = vld [vmem:[%s11530_s7 + $0x38] sm:$0xfc] }
  0x21   :  { %v11548_v32 = vrot.slane %v6541_v15, 2  ;;  %v231_v58 = vmul.f32 %v6567_v37, %v6555_v20  ;;  %v6599_v11 = vstv %s6482_s17  ;;  %v327_v12 = vmul.f32 %v5375_v63, %v6406_v30 }
  0x22   :  { %v176_v56 = vsel %vm85_vm0, %v174_v19, %v11549_v13  ;;  %5939 = vmatmul.mubr.msk.f32.vlgmr.msra.gmra.mrb[0].mxu1 %vm4095_vm1, %v6549_v17  ;;  %v137_v5 = vadd.f32 %v127_v23, %v101_v22  ;;  %v258_v14 = vrot.slane %v244_v59, 1  ;;  %v11546_v16 = vrot.slane %v6585_v61, 1 }
  0x23   :  { %v211_v8 = vsel %vm121_vm2, %v209_v31, %v11548_v32  ;;  %6065 = vmatpush1.bf16.msra.mxu1 %v6064_v39  ;;  %v279_v18 = vmul.f32 %v5395_v38, %v6599_v11  ;;  %v6609_v19 = vmul.f32 %v6572_v54, %v6599_v11  ;;  %4353 = vmatprep.mubr.f32.mxu1 %v11537_v7  ;;  %v5415_v39 = vld [vmem:[%s11530_s7 + $0x68] sm:$0xfe] }
  0x24   :  { %6067 = vmatprep.subr.bf16.mxu1 %v6066_v44  ;;  %v151_v63 = vadd.f32 %v147_v2, %v137_v5  ;;  %v335_v22 = vmul.f32 %v5403_v1, %v6426_v36  ;;  %v6618_v24 = vmul.f32 %v6517_v0, %v6426_v36  ;;  %v369_v25 = vmul.f32 %v5407_v3, %v6450_v43  ;;  %v5419_v44 = vld [vmem:[%s11530_s7 + $0x68] sm:$0xfc] }
  0x25   :  { %v260_v23 = vsel %vm85_vm0, %v258_v14, %v11546_v16  ;;  %v293_v31 = vrot.slane %v279_v18, 2  ;;  %v11545_v27 = vrot.slane %v6609_v19, 2  ;;  %v6630_v28 = vmul.f32 %v6517_v0, %v6450_v43 }
  0x26   :  { %v186_v2 = vadd.f32 %v176_v56, %v151_v63  ;;  %v349_v38 = vrot.slane %v335_v22, 1  ;;  %v11543_v59 = vrot.slane %v6618_v24, 1  ;;  %v383_v1 = vrot.slane %v369_v25, 2  ;;  %v5427_v63 = vld [vmem:[%s11530_s7 + $0x98] sm:$0xfe] }
  0x27   :  { %6069 = vmatpush1.bf16.msra.mxu1 %v6068_v45  ;;  %v295_v3 = vsel %vm121_vm2, %v293_v31, %v11545_v27  ;;  %v11542_v5 = vrot.slane %v6630_v28, 2  ;;  %v403_v14 = vmul.f32 %v6567_v37, %v6474_v50  ;;  %v415_v18 = vmul.f32 %v5415_v39, %v6496_v57  ;;  %v5431_v25 = vld [vmem:[%s11530_s7 + $0x98] sm:$0xfc] }
  0x28   :  { %6071 = vmatprep.subr.bf16.mxu1 %v6070_v46  ;;  %v221_v56 = vadd.f32 %v211_v8, %v186_v2  ;;  %v351_v29 = vsel %vm85_vm0, %v349_v38, %v11543_v59  ;;  %v6654_v33 = vmul.f32 %v6572_v54, %v6496_v57  ;;  %v449_v45 = vmul.f32 %v5419_v44, %v6532_v6  ;;  %v6670_v8 = vld [vmem:[%s11530_s7 + $0x98] sm:$0xff]  ;;  %v6679_v44 = vld [vmem:[%s11530_s7 + $0xa8] sm:$0xff] }
  0x29   :  { %v361_v22 = vadd.f32 %v351_v29, %v327_v12  ;;  %v385_v34 = vsel %vm121_vm2, %v383_v1, %v11542_v5  ;;  %v429_v35 = vrot.slane %v415_v18, 1  ;;  %v6665_v46 = vmul.f32 %v6572_v54, %v6532_v6  ;;  %11836 = vst [vmem:[#allocation8_spill] sm:$0xff] %v6670_v8 }
  0x2a   :  { %v235_v39 = vadd.f32 %v231_v58, %v221_v56  ;;  %v11541_v12 = vrot.slane %v6654_v33, 1  ;;  %v463_v31 = vrot.slane %v449_v45, 2  ;;  %v484_v2 = vmul.f32 %v6670_v8, %v6555_v20  ;;  %v59_v56 = vld [vmem:[%s11530_s7] sm:$0xff]  ;;  %v6709_v45 = vld [vmem:[%s11530_s7 + $0x10] sm:$0xff] }
  0x2b   :  { %6073 = vmatpush1.bf16.msra.mxu1 %v6072_v51  ;;  %v395_v38 = vadd.f32 %v385_v34, %v361_v22  ;;  %v11536_v1 = vrot.slane %v6665_v46, 2  ;;  %v496_v58 = vmul.f32 %v5427_v63, %v6558_v21  ;;  %v6690_v18 = vmul.f32 %v6679_v44, %v6558_v21  ;;  %v104_v22 = vld [vmem:[%s11530_s7] sm:$0xfc] }
  0x2c   :  { %6075 = vmatprep.subr.bf16.mxu1 %v6074_v52  ;;  %v270_v29 = vadd.f32 %v260_v23, %v235_v39  ;;  %v431_v40 = vsel %vm85_vm0, %v429_v35, %v11541_v12  ;;  %v530_v41 = vmul.f32 %v5431_v25, %v6599_v11  ;;  %v6704_v51 = vmul.f32 %v6679_v44, %v6599_v11 }
  0x2d   :  { %v407_v47 = vadd.f32 %v403_v14, %v395_v38  ;;  %v465_v52 = vsel %vm121_vm2, %v463_v31, %v11536_v1  ;;  %v510_v23 = vrot.slane %v496_v58, 1  ;;  %v11535_v63 = vrot.slane %v6690_v18, 1 }
  0x2e   :  { %v305_v34 = vadd.f32 %v295_v3, %v270_v29  ;;  %v544_v35 = vrot.slane %v530_v41, 2  ;;  %v11534_v25 = vrot.slane %v6704_v51, 2  ;;  %v64_v39 = vmul.f32 %v6406_v30, %v59_v56  ;;  %v5378_v29 = vld [vmem:[%s11530_s7 + $0x30] sm:$0xfe] }
  0x2f   :  { %6077 = vmatpush1.bf16.msra.mxu1 %v6076_v53  ;;  %v441_v14 = vadd.f32 %v431_v40, %v407_v47  ;;  %v512_v31 = vsel %vm85_vm0, %v510_v23, %v11535_v63  ;;  %v73_v38 = vmul.f32 %v6426_v36, %v68_v42  ;;  %v6732_v58 = vmul.f32 %v6426_v36, %v6709_v45  ;;  %v5374_v53 = vld [vmem:[%s11530_s7 + $0x30] sm:$0xff]  ;;  %v6755_v47 = vld [vmem:[%s11530_s7 + $0x40] sm:$0xff] }
  0x30   :  { %v6735_v3 = vadd.f32 %v6386_v26, %v305_v34  ;;  %v546_v56 = vsel %vm121_vm2, %v544_v35, %v11534_v25  ;;  %v109_v48 = vmul.f32 %v6450_v43, %v104_v22  ;;  %v6743_v49 = vmul.f32 %v6450_v43, %v6709_v45  ;;  %v5382_v22 = vld [vmem:[%s11530_s7 + $0x30] sm:$0xfc] }
  0x31   :  { %v475_v40 = vadd.f32 %v465_v52, %v441_v14  ;;  %v86_v41 = vrot.slane %v73_v38, 1  ;;  %v11540_v42 = vrot.slane %v6732_v58, 1  ;;  %v146_v23 = vmul.f32 %v5374_v53, %v6474_v50 }
  0x32   :  { %v314_v34 = vmax.f32 %v6735_v3, 0.0  ;;  %v122_v35 = vrot.slane %v109_v48, 2  ;;  %v11539_v25 = vrot.slane %v6743_v49, 2  ;;  %v6765_v52 = vmul.f32 %v6755_v47, %v6474_v50  ;;  %5957 = vmatmul.mubr.msk.f32.vlgmr.msra.gmra.mrb[2].mxu1 %vm4095_vm1, %v6549_v17 }
  0x33   :  { %v488_v14 = vadd.f32 %v484_v2, %v475_v40  ;;  %v88_v38 = vsel %vm85_vm0, %v86_v41, %v11540_v42  ;;  %v159_v63 = vmul.f32 %v5378_v29, %v6496_v57  ;;  %v6775_v3 = vmul.f32 %v6755_v47, %v6496_v57  ;;  %4424 = vmatprep.mubr.f32.mxu1 %v11537_v7  ;;  %v6789_v29 = vld [vmem:[%s11530_s7 + $0x60] sm:$0xff] }
  0x34   :  { %v100_v48 = vadd.f32 %v88_v38, %v64_v39  ;;  %v124_v1 = vsel %vm121_vm2, %v122_v35, %v11539_v25  ;;  %v194_v17 = vmul.f32 %v5382_v22, %v6532_v6  ;;  %v6784_v2 = vmul.f32 %v6755_v47, %v6532_v6  ;;  %11837 = vst [vmem:[#allocation9_spill] sm:$0xff] %v6789_v29  ;;  %v5390_v40 = vld [vmem:[%s11530_s7 + $0x60] sm:$0xfe]  ;;  %v6798_v22 = vld [vmem:[%s11530_s7 + $0x70] sm:$0xff] }
  0x35   :  { %v522_v39 = vadd.f32 %v512_v31, %v488_v14  ;;  %v171_v41 = vrot.slane %v159_v63, 1  ;;  %v11544_v38 = vrot.slane %v6775_v3, 1  ;;  %11838 = vst [vmem:[#allocation10_spill] sm:$0xff] %v6798_v22  ;;  %v230_v35 = vmul.f32 %v6789_v29, %v6555_v20  ;;  %v5394_v7 = vld [vmem:[%s11530_s7 + $0x60] sm:$0xfc] }
  0x36   :  { %v136_v25 = vadd.f32 %v124_v1, %v100_v48  ;;  %v206_v42 = vrot.slane %v194_v17, 2  ;;  %v11547_v12 = vrot.slane %v6784_v2, 2  ;;  %v6808_v63 = vmul.f32 %v6798_v22, %v6555_v20  ;;  %v5402_v1 = vld [vmem:[%s11530_s7 + $0x30] sm:$0xfe] }
  0x37   :  { %v556_v31 = vadd.f32 %v546_v56, %v522_v39  ;;  %v173_v14 = vsel %vm85_vm0, %v171_v41, %v11544_v38  ;;  %v243_v5 = vmul.f32 %v5390_v40, %v6558_v21  ;;  %v6816_v59 = vmul.f32 %v6798_v22, %v6558_v21  ;;  %v5406_v40 = vld [vmem:[%s11530_s7 + $0x30] sm:$0xfc] }
  0x38   :  { %11839 = vst [vmem:[#allocation11_spill] sm:$0xff] %v6808_v63  ;;  %v150_v48 = vadd.f32 %v146_v23, %v136_v25  ;;  %v208_v17 = vsel %vm121_vm2, %v206_v42, %v11547_v12  ;;  %v278_v56 = vmul.f32 %v5394_v7, %v6599_v11  ;;  %v6827_v39 = vmul.f32 %v6798_v22, %v6599_v11  ;;  %v5397_v63 = vld [vmem:[%s11530_s7 + $0x88] sm:$0x3] }
  0x39   :  { %v560_v41 = vadd.f32 %v556_v31, %v6386_v26  ;;  %v255_v38 = vrot.slane %v243_v5, 1  ;;  %v11550_v27 = vrot.slane %v6816_v59, 1  ;;  %v326_v25 = vmul.f32 %v5374_v53, %v6406_v30  ;;  %v5414_v53 = vld [vmem:[%s11530_s7 + $0x60] sm:$0xfe] }
  0x3a   :  { %v185_v23 = vadd.f32 %v173_v14, %v150_v48  ;;  %v290_v16 = vrot.slane %v278_v56, 2  ;;  %v11552_v42 = vrot.slane %v6827_v39, 2  ;;  %v334_v7 = vmul.f32 %v5402_v1, %v6426_v36 }
  0x3b   :  { %v564_v12 = vmax.f32 %v560_v41, 0.0  ;;  %v257_v32 = vsel %vm85_vm0, %v255_v38, %v11550_v27  ;;  %v6842_v13 = vmul.f32 %v6755_v47, %v6426_v36  ;;  %v368_v5 = vmul.f32 %v5406_v40, %v6450_v43  ;;  %v5418_v38 = vld [vmem:[%s11530_s7 + $0x60] sm:$0xfc] }
  0x3c   :  { %v220_v31 = vadd.f32 %v208_v17, %v185_v23  ;;  %v292_v14 = vsel %vm121_vm2, %v290_v16, %v11552_v42  ;;  %v346_v1 = vrot.slane %v334_v7, 1  ;;  %v6853_v48 = vmul.f32 %v6755_v47, %v6450_v43  ;;  %v6888_v42 = vld [vmem:[%s11530_s7 + $0x90] sm:$0xff] }
  0x3d   :  { %v6046_v56 = vpack.c.bf16 %v564_v12, %v314_v34  ;;  %v11551_v40 = vrot.slane %v6842_v13, 1  ;;  %v380_v41 = vrot.slane %v368_v5, 2  ;;  %v402_v17 = vmul.f32 %v6789_v29, %v6474_v50  ;;  %11841 = vst [vmem:[#allocation13_spill] sm:$0xff] %v6888_v42 }
  0x3e   :  { %v234_v23 = vadd.f32 %v230_v35, %v220_v31  ;;  %v11555_v27 = vrot.slane %v6853_v48, 2  ;;  %v6864_v16 = vmul.f32 %v6798_v22, %v6474_v50  ;;  %v414_v7 = vmul.f32 %v5414_v53, %v6496_v57  ;;  %v5426_v31 = vld [vmem:[%s11530_s7 + $0x90] sm:$0xfe] }
  0x3f   :  { %6047 = vmatprep.subr.bf16.mxu0 %v6046_v56  ;;  %v348_v12 = vsel %vm85_vm0, %v346_v1, %v11551_v40  ;;  %v6872_v34 = vmul.f32 %v6798_v22, %v6496_v57  ;;  %v448_v5 = vmul.f32 %v5418_v38, %v6532_v6  ;;  %v6877_v35 = vmul.f32 %v6798_v22, %v6532_v6  ;;  %v5430_v38 = vld [vmem:[%s11530_s7 + $0x90] sm:$0xfc] }
  0x40   :  { %11840 = vst [vmem:[#allocation12_spill] sm:$0xff] %v6864_v16  ;;  %v269_v53 = vadd.f32 %v257_v32, %v234_v23  ;;  %v360_v56 = vadd.f32 %v348_v12, %v326_v25  ;;  %v382_v1 = vsel %vm121_vm2, %v380_v41, %v11555_v27  ;;  %v426_v40 = vrot.slane %v414_v7, 1  ;;  %v6898_v25 = vld [vmem:[%s11530_s7 + $0xa0] sm:$0xff] }
  0x41   :  { %v11561_v10 = vrot.slane %v6872_v34, 1  ;;  %v460_v9 = vrot.slane %v448_v5, 2  ;;  %11842 = vst [vmem:[#allocation14_spill] sm:$0xff] %v6898_v25  ;;  %v483_v41 = vmul.f32 %v6888_v42, %v6555_v20  ;;  %v6904_v12 = vmul.f32 %v6898_v25, %v6555_v20  ;;  %v71_v5 = vld [vmem:[%s11530_s7 + $0x28] sm:$0x1] }
  0x42   :  { %v304_v23 = vadd.f32 %v292_v14, %v269_v53  ;;  %v394_v7 = vadd.f32 %v382_v1, %v360_v56  ;;  %v495_v27 = vmul.f32 %v5426_v31, %v6558_v21  ;;  %v11844_v22 = vrot.slane %v6877_v35, 2  ;;  %v107_v31 = vld [vmem:[%s11530_s7 + $0x28] sm:$0x3] }
  0x43   :  { %11843 = vst [vmem:[#allocation15_spill] sm:$0xff] %v6904_v12  ;;  %v428_v32 = vsel %vm85_vm0, %v426_v40, %v11561_v10  ;;  %v6918_v14 = vmul.f32 %v6898_v25, %v6558_v21  ;;  %v529_v53 = vmul.f32 %v5430_v38, %v6599_v11  ;;  %v6929_v40 = vmul.f32 %v6898_v25, %v6599_v11 }
  0x44   :  { %v462_v42 = vsel %vm121_vm2, %v460_v9, %v11844_v22  ;;  %v6925_v56 = vadd.f32 %v6386_v26, %v304_v23  ;;  %v406_v1 = vadd.f32 %v402_v17, %v394_v7  ;;  %v507_v29 = vrot.slane %v495_v27, 1  ;;  %v5381_v9 = vld [vmem:[%s11530_s7 + $0x58] sm:$0x1] }
  0x45   :  { %11845 = vst [vmem:[#allocation16_spill] sm:$0xff] %v6929_v40  ;;  %v11566_v22 = vrot.slane %v6918_v14, 1  ;;  %v541_v38 = vrot.slane %v529_v53, 2  ;;  %v67_v10 = vmul.f32 %v6406_v30, %v6490_v55  ;;  %v78_v12 = vmul.f32 %v6426_v36, %v71_v5  ;;  %v5385_v27 = vld [vmem:[%s11530_s7 + $0x58] sm:$0x3] }
  0x46   :  { %v440_v23 = vadd.f32 %v428_v32, %v406_v1  ;;  %v11567_v7 = vrot.slane %v6929_v40, 2  ;;  %v114_v25 = vmul.f32 %v6450_v43, %v107_v31  ;;  %v5393_v53 = vld [vmem:[%s11530_s7 + $0x88] sm:$0x1]  ;;  %v149_v8 = vmul.f32 %v6517_v0, %v6474_v50 }
  0x47   :  { %v509_v55 = vsel %vm85_vm0, %v507_v29, %v11566_v22  ;;  %v94_v5 = vrot.slane %v78_v12, 1  ;;  %v164_v16 = vmul.f32 %v5381_v9, %v6496_v57  ;;  %v199_v1 = vmul.f32 %v5385_v27, %v6532_v6 }
  0x48   :  { %v474_v17 = vadd.f32 %v462_v42, %v440_v23  ;;  %v543_v32 = vsel %vm121_vm2, %v541_v38, %v11567_v7  ;;  %v130_v31 = vrot.slane %v114_v25, 2  ;;  %v11846_v29 = vrot.slane %v6502_v60, 1  ;;  %v5405_v25 = vld [vmem:[%s11530_s7 + $0x58] sm:$0x1] }
  0x49   :  { %v179_v22 = vrot.slane %v164_v16, 1  ;;  %v233_v9 = vmul.f32 %v6572_v54, %v6555_v20  ;;  %v248_v42 = vmul.f32 %v5393_v53, %v6558_v21  ;;  %v11847_v23 = vrot.slane %v6509_v62, 2  ;;  %v5409_v60 = vld [vmem:[%s11530_s7 + $0x58] sm:$0x3]  ;;  %v5417_v62 = vld [vmem:[%s11530_s7 + $0x88] sm:$0x1] }
  0x4a   :  { %v95_v12 = vsel %vm85_vm0, %v11846_v29, %v94_v5  ;;  %v487_v38 = vadd.f32 %v483_v41, %v474_v17  ;;  %v214_v40 = vrot.slane %v199_v1, 2  ;;  %v11848_v16 = vrot.slane %v6526_v4, 1 }
  0x4b   :  { %v103_v27 = vadd.f32 %v95_v12, %v67_v10  ;;  %v131_v7 = vsel %vm121_vm2, %v11847_v23, %v130_v31  ;;  %v263_v53 = vrot.slane %v248_v42, 1  ;;  %v283_v29 = vmul.f32 %v5397_v63, %v6599_v11 }
  0x4c   :  { %v180_v5 = vsel %vm85_vm0, %v11848_v16, %v179_v22  ;;  %v329_v41 = vmul.f32 %v6517_v0, %v6406_v30  ;;  %v521_v10 = vadd.f32 %v509_v55, %v487_v38  ;;  %v11849_v31 = vrot.slane %v6541_v15, 2  ;;  %v5421_v22 = vld [vmem:[%s11530_s7 + $0x88] sm:$0x3] }
  0x4d   :  { %v139_v17 = vadd.f32 %v131_v7, %v103_v27  ;;  %v339_v4 = vmul.f32 %v5405_v25, %v6426_v36  ;;  %v11850_v63 = vrot.slane %v6585_v61, 1  ;;  %v298_v12 = vrot.slane %v283_v29, 2  ;;  %v5429_v25 = vld [vmem:[%s11530_s7 + $0xb8] sm:$0x1] }
  0x4e   :  { %v215_v1 = vsel %vm121_vm2, %v11849_v31, %v214_v40  ;;  %v373_v42 = vmul.f32 %v5409_v60, %v6450_v43  ;;  %v405_v7 = vmul.f32 %v6572_v54, %v6474_v50  ;;  %v555_v55 = vadd.f32 %v543_v32, %v521_v10 }
  0x4f   :  { %v264_v0 = vsel %vm85_vm0, %v11850_v63, %v263_v53  ;;  %v153_v15 = vadd.f32 %v149_v8, %v139_v17  ;;  %v354_v38 = vrot.slane %v339_v4, 1  ;;  %v419_v40 = vmul.f32 %v5417_v62, %v6496_v57  ;;  %v5433_v8 = vld [vmem:[%s11530_s7 + $0xb8] sm:$0x3]  ;;  %v70_v63 = vld [vmem:[%s11530_s7 + $0x20] sm:$0x1] }
  0x50   :  { %v11851_v27 = vrot.slane %v6609_v19, 2  ;;  %v388_v23 = vrot.slane %v373_v42, 2  ;;  %v453_v16 = vmul.f32 %v5421_v22, %v6532_v6  ;;  %v486_v60 = vmul.f32 %v6679_v44, %v6555_v20 }
  0x51   :  { %v559_v32 = vadd.f32 %v555_v55, %v6386_v26  ;;  %v188_v53 = vadd.f32 %v180_v5, %v153_v15  ;;  %v11852_v29 = vrot.slane %v6618_v24, 1  ;;  %v434_v19 = vrot.slane %v419_v40, 1 }
  0x52   :  { %v299_v61 = vsel %vm121_vm2, %v11851_v27, %v298_v12  ;;  %v11853_v17 = vrot.slane %v6630_v28, 2  ;;  %v468_v4 = vrot.slane %v453_v16, 2  ;;  %v500_v22 = vmul.f32 %v5429_v25, %v6558_v21  ;;  %v106_v28 = vld [vmem:[%s11530_s7 + $0x20] sm:$0x3]  ;;  %v5384_v25 = vld [vmem:[%s11530_s7 + $0x50] sm:$0x3] }
  0x53   :  { %v355_v62 = vsel %vm85_vm0, %v11852_v29, %v354_v38  ;;  %v563_v12 = vmax.f32 %v559_v32, 0.0  ;;  %v223_v42 = vadd.f32 %v215_v1, %v188_v53  ;;  %v11854_v5 = vrot.slane %v6654_v33, 1 }
  0x54   :  { %v363_v10 = vadd.f32 %v355_v62, %v329_v41  ;;  %v389_v31 = vsel %vm121_vm2, %v11853_v17, %v388_v23  ;;  %v534_v55 = vmul.f32 %v5433_v8, %v6599_v11  ;;  %v5380_v41 = vld [vmem:[%s11530_s7 + $0x50] sm:$0x1]  ;;  %v11855_v38 = vrot.slane %v6665_v46, 2  ;;  %v5392_v46 = vld [vmem:[%s11530_s7 + $0x80] sm:$0x1] }
  0x55   :  { %v435_v24 = vsel %vm85_vm0, %v11854_v5, %v434_v19  ;;  %v515_v1 = vrot.slane %v500_v22, 1  ;;  %v66_v33 = vmul.f32 %v6406_v30, %v6709_v45  ;;  %v11856_v27 = vmax.f32 %v6925_v56, 0.0  ;;  %v5396_v56 = vld [vmem:[%s11530_s7 + $0x80] sm:$0x3] }
  0x56   :  { %v397_v15 = vadd.f32 %v389_v31, %v363_v10  ;;  %v469_v40 = vsel %vm121_vm2, %v11855_v38, %v468_v4  ;;  %v237_v16 = vadd.f32 %v233_v9, %v223_v42  ;;  %v549_v8 = vrot.slane %v534_v55, 2 }
  0x57   :  { %v6048_v23 = vpack.c.bf16 %v563_v12, %v11856_v27  ;;  %v77_v32 = vmul.f32 %v6426_v36, %v70_v63  ;;  %v11857_v29 = vrot.slane %v6690_v18, 1  ;;  %v113_v62 = vmul.f32 %v6450_v43, %v106_v28 }
  0x58   :  { %v409_v53 = vadd.f32 %v405_v7, %v397_v15  ;;  %v163_v19 = vmul.f32 %v5380_v41, %v6496_v57  ;;  %v272_v9 = vadd.f32 %v264_v0, %v237_v16  ;;  %v11858_v10 = vrot.slane %v6704_v51, 2  ;;  %v5404_v51 = vld [vmem:[%s11530_s7 + $0x50] sm:$0x1] }
  0x59   :  { %v516_v45 = vsel %vm85_vm0, %v11857_v29, %v515_v1  ;;  %6049 = vmatpush1.bf16.msra.mxu0 %v6048_v23  ;;  %v92_v31 = vrot.slane %v77_v32, 1  ;;  %v198_v7 = vmul.f32 %v5384_v25, %v6532_v6  ;;  %v128_v4 = vrot.slane %v113_v62, 2  ;;  %v5420_v32 = vld [vmem:[%s11530_s7 + $0x80] sm:$0x3] }
  0x5a   :  { %v550_v17 = vsel %vm121_vm2, %v11858_v10, %v549_v8  ;;  %v443_v18 = vadd.f32 %v435_v24, %v409_v53  ;;  %v177_v22 = vrot.slane %v163_v19, 1  ;;  %v247_v63 = vmul.f32 %v5392_v46, %v6558_v21  ;;  %v5432_v46 = vld [vmem:[%s11530_s7 + $0xb0] sm:$0x3] }
  0x5b   :  { %v307_v12 = vadd.f32 %v299_v61, %v272_v9  ;;  %v11859_v42 = vrot.slane %v6732_v58, 1  ;;  %v212_v55 = vrot.slane %v198_v7, 2  ;;  %v282_v0 = vmul.f32 %v5396_v56, %v6599_v11  ;;  %v5408_v58 = vld [vmem:[%s11530_s7 + $0x50] sm:$0x3] }
  0x5c   :  { %v477_v28 = vadd.f32 %v469_v40, %v443_v18  ;;  %v11860_v24 = vrot.slane %v6743_v49, 2  ;;  %v11861_v38 = vrot.slane %v6775_v3, 1  ;;  %v11862_v25 = vrot.slane %v6784_v2, 2  ;;  %v5416_v49 = vld [vmem:[%s11530_s7 + $0x80] sm:$0x1] }
  0x5d   :  { %v93_v5 = vsel %vm85_vm0, %v11859_v42, %v92_v31  ;;  %v312_v1 = vadd.f32 %v6386_v26, %v307_v12  ;;  %v261_v40 = vrot.slane %v247_v63, 1  ;;  %v328_v16 = vmul.f32 %v6755_v47, %v6406_v30  ;;  %v5428_v2 = vld [vmem:[%s11530_s7 + $0xb0] sm:$0x1] }
  0x5e   :  { %v102_v41 = vadd.f32 %v93_v5, %v66_v33  ;;  %v129_v15 = vsel %vm121_vm2, %v11860_v24, %v128_v4  ;;  %v178_v61 = vsel %vm85_vm0, %v11861_v38, %v177_v22  ;;  %v213_v27 = vsel %vm121_vm2, %v11862_v25, %v212_v55 }
  0x5f   :  { %v296_v33 = vrot.slane %v282_v0, 2  ;;  %v490_v23 = vadd.f32 %v486_v60, %v477_v28  ;;  %v338_v8 = vmul.f32 %v5404_v51, %v6426_v36  ;;  %v316_v53 = vmax.f32 %v312_v1, 0.0  ;;  %v5439_v51 = vld [vmem:[%s11530_s7 + $0x68] sm:$0xfe] }
  0x60   :  { %v138_v3 = vadd.f32 %v129_v15, %v102_v41  ;;  %v11863_v60 = vrot.slane %v6816_v59, 1  ;;  %v11864_v47 = vrot.slane %v6827_v39, 2  ;;  %v372_v19 = vmul.f32 %v5408_v58, %v6450_v43 }
  0x61   :  { %v524_v56 = vadd.f32 %v516_v45, %v490_v23  ;;  %v352_v10 = vrot.slane %v338_v8, 1  ;;  %v418_v31 = vmul.f32 %v5416_v49, %v6496_v57  ;;  %v452_v18 = vmul.f32 %v5420_v32, %v6532_v6  ;;  %v5451_v32 = vld [vmem:[%s11530_s7 + $0x98] sm:$0xfe] }
  0x62   :  { %v262_v29 = vsel %vm85_vm0, %v11863_v60, %v261_v40  ;;  %v297_v62 = vsel %vm121_vm2, %v11864_v47, %v296_v33  ;;  %v152_v9 = vadd.f32 %v6765_v52, %v138_v3  ;;  %v386_v7 = vrot.slane %v372_v19, 2  ;;  %v11871_v33 = vld [vmem:[#allocation16_spill] sm:$0xff] }
  0x63   :  { %v499_v4 = vmul.f32 %v5428_v2, %v6558_v21  ;;  %v533_v59 = vmul.f32 %v5432_v46, %v6599_v11  ;;  %v558_v22 = vadd.f32 %v550_v17, %v524_v56  ;;  %v11865_v39 = vrot.slane %v6842_v13, 1  ;;  %v5455_v2 = vld [vmem:[%s11530_s7 + $0x98] sm:$0xfc]  ;;  %v11874_v19 = vld [vmem:[#allocation8_spill] sm:$0xff] }
  0x64   :  { %v187_v63 = vadd.f32 %v178_v61, %v152_v9  ;;  %v432_v42 = vrot.slane %v418_v31, 1  ;;  %v11866_v52 = vrot.slane %v6853_v48, 2  ;;  %v466_v55 = vrot.slane %v452_v18, 2  ;;  %v5443_v48 = vld [vmem:[%s11530_s7 + $0x68] sm:$0xfc] }
  0x65   :  { %v353_v12 = vsel %vm85_vm0, %v11865_v39, %v352_v10  ;;  %v513_v0 = vrot.slane %v499_v4, 1  ;;  %v562_v28 = vadd.f32 %v558_v22, %v6386_v26  ;;  %v11867_v41 = vrot.slane %v6872_v34, 1 }
  0x66   :  { %v362_v45 = vadd.f32 %v353_v12, %v328_v16  ;;  %v387_v5 = vsel %vm121_vm2, %v11866_v52, %v386_v7  ;;  %v222_v17 = vadd.f32 %v213_v27, %v187_v63  ;;  %v547_v24 = vrot.slane %v533_v59, 2  ;;  %v11870_v27 = vld [vmem:[#allocation11_spill] sm:$0xff]  ;;  %v11873_v16 = vld [vmem:[#allocation12_spill] sm:$0xff] }
  0x67   :  { %v433_v13 = vsel %vm85_vm0, %v11867_v41, %v432_v42  ;;  %v11868_v38 = vrot.slane %v6877_v35, 2  ;;  %v11869_v58 = vrot.slane %v6918_v14, 1  ;;  %v576_v25 = vmul.f32 %v6567_v37, %v6406_v30  ;;  %v5463_v63 = vld [vmem:[%s11530_s7 + $0xc8] sm:$0xfe] }
  0x68   :  { %v396_v15 = vadd.f32 %v387_v5, %v362_v45  ;;  %v566_v34 = vmax.f32 %v562_v28, 0.0  ;;  %v236_v40 = vadd.f32 %v11870_v27, %v222_v17  ;;  %v11872_v49 = vrot.slane %v11871_v33, 2  ;;  %v7178_v52 = vld [vmem:[%s11530_s7 + $0xc8] sm:$0xff]  ;;  %v5479_v27 = vld [vmem:[%s11530_s7 + $0x98] sm:$0xfc] }
  0x69   :  { %v467_v61 = vsel %vm121_vm2, %v11868_v38, %v466_v55  ;;  %v514_v1 = vsel %vm85_vm0, %v11869_v58, %v513_v0  ;;  %v584_v3 = vmul.f32 %v5439_v51, %v6426_v36  ;;  %v7137_v8 = vmul.f32 %v6572_v54, %v6426_v36  ;;  %v5467_v5 = vld [vmem:[%s11530_s7 + $0xc8] sm:$0xfc]  ;;  %v11875_v55 = vld [vmem:[#allocation15_spill] sm:$0xff]  ;;  %v5475_v38 = vld [vmem:[%s11530_s7 + $0x98] sm:$0xfe] }
  0x6a   :  { %v548_v23 = vsel %vm121_vm2, %v11872_v49, %v547_v24  ;;  %v408_v35 = vadd.f32 %v11873_v16, %v396_v15  ;;  %v618_v14 = vmul.f32 %v5443_v48, %v6450_v43  ;;  %v7142_v37 = vmul.f32 %v6572_v54, %v6450_v43  ;;  %v7193_v48 = vld [vmem:[%s11530_s7 + $0xd8] sm:$0xff] }
  0x6b   :  { %v6078_v46 = vpack.c.bf16 %v566_v34, %v316_v53  ;;  %v271_v60 = vadd.f32 %v262_v29, %v236_v40  ;;  %v598_v47 = vrot.slane %v584_v3, 1  ;;  %v652_v56 = vmul.f32 %v11874_v19, %v6474_v50 }
  0x6c   :  { %v442_v9 = vadd.f32 %v433_v13, %v408_v35  ;;  %v11588_v10 = vrot.slane %v7137_v8, 1  ;;  %v632_v31 = vrot.slane %v618_v14, 2  ;;  %v11587_v54 = vrot.slane %v7142_v37, 2 }
  0x6d   :  { %6079 = vmatprep.subr.bf16.mxu1 %v6078_v46  ;;  %v306_v7 = vadd.f32 %v297_v62, %v271_v60  ;;  %v664_v18 = vmul.f32 %v5451_v32, %v6496_v57  ;;  %v7157_v4 = vmul.f32 %v6679_v44, %v6496_v57  ;;  %v698_v53 = vmul.f32 %v5455_v2, %v6532_v6 }
  0x6e   :  { %v476_v29 = vadd.f32 %v467_v61, %v442_v9  ;;  %v600_v59 = vsel %vm85_vm0, %v598_v47, %v11588_v10  ;;  %v634_v22 = vsel %vm121_vm2, %v632_v31, %v11587_v54  ;;  %v7168_v62 = vmul.f32 %v6679_v44, %v6532_v6  ;;  %v5487_v47 = vld [vmem:[%s11530_s7 + $0xc8] sm:$0xfe] }
  0x6f   :  { %v311_v39 = vadd.f32 %v6386_v26, %v306_v7  ;;  %v610_v12 = vadd.f32 %v600_v59, %v576_v25  ;;  %v678_v42 = vrot.slane %v664_v18, 1  ;;  %v11585_v45 = vrot.slane %v7157_v4, 1  ;;  %v5491_v31 = vld [vmem:[%s11530_s7 + $0xc8] sm:$0xfc] }
  0x70   :  { %v489_v0 = vadd.f32 %v11875_v55, %v476_v29  ;;  %v712_v51 = vrot.slane %v698_v53, 2  ;;  %v11583_v28 = vrot.slane %v7168_v62, 2  ;;  %v733_v17 = vmul.f32 %v7178_v52, %v6555_v20 }
  0x71   :  { %v315_v41 = vmax.f32 %v311_v39, 0.0  ;;  %v644_v13 = vadd.f32 %v634_v22, %v610_v12  ;;  %v680_v24 = vsel %vm85_vm0, %v678_v42, %v11585_v45  ;;  %v745_v15 = vmul.f32 %v5463_v63, %v6558_v21 }
  0x72   :  { %v523_v61 = vadd.f32 %v514_v1, %v489_v0  ;;  %v714_v58 = vsel %vm121_vm2, %v712_v51, %v11583_v28  ;;  %v7204_v25 = vmul.f32 %v7193_v48, %v6558_v21  ;;  %v779_v34 = vmul.f32 %v5467_v5, %v6599_v11  ;;  %v5499_v0 = vld [vmem:[%s11530_s7 + $0xf8] sm:$0xfe] }
  0x73   :  { %v656_v40 = vadd.f32 %v652_v56, %v644_v13  ;;  %v759_v33 = vrot.slane %v745_v15, 1  ;;  %v7212_v49 = vmul.f32 %v7193_v48, %v6599_v11  ;;  %v825_v1 = vmul.f32 %v11874_v19, %v6406_v30  ;;  %v5503_v15 = vld [vmem:[%s11530_s7 + $0xf8] sm:$0xfc] }
  0x74   :  { %v557_v3 = vadd.f32 %v548_v23, %v523_v61  ;;  %v11579_v16 = vrot.slane %v7204_v25, 1  ;;  %v793_v35 = vrot.slane %v779_v34, 2  ;;  %v833_v14 = vmul.f32 %v5475_v38, %v6426_v36 }
  0x75   :  { %v690_v32 = vadd.f32 %v680_v24, %v656_v40  ;;  %v11578_v2 = vrot.slane %v7212_v49, 2  ;;  %v7221_v46 = vmul.f32 %v6679_v44, %v6426_v36  ;;  %v867_v60 = vmul.f32 %v5479_v27, %v6450_v43  ;;  %v7276_v27 = vld [vmem:[%s11530_s7 + $0x108] sm:$0xff] }
  0x76   :  { %v561_v23 = vadd.f32 %v557_v3, %v6386_v26  ;;  %v761_v19 = vsel %vm85_vm0, %v759_v33, %v11579_v16  ;;  %v847_v56 = vrot.slane %v833_v14, 1  ;;  %v7233_v9 = vmul.f32 %v6679_v44, %v6450_v43 }
  0x77   :  { %v724_v7 = vadd.f32 %v714_v58, %v690_v32  ;;  %v795_v18 = vsel %vm121_vm2, %v793_v35, %v11578_v2  ;;  %v11574_v53 = vrot.slane %v7221_v46, 1  ;;  %v881_v29 = vrot.slane %v867_v60, 2 }
  0x78   :  { %v565_v59 = vmax.f32 %v561_v23, 0.0  ;;  %v11573_v22 = vrot.slane %v7233_v9, 2  ;;  %v901_v63 = vmul.f32 %v7178_v52, %v6474_v50  ;;  %v913_v39 = vmul.f32 %v5487_v47, %v6496_v57  ;;  %v5438_v47 = vld [vmem:[%s11530_s7 + $0x60] sm:$0xfe] }
  0x79   :  { %v737_v12 = vadd.f32 %v733_v17, %v724_v7  ;;  %v849_v42 = vsel %vm85_vm0, %v847_v56, %v11574_v53  ;;  %v7251_v5 = vmul.f32 %v7193_v48, %v6496_v57  ;;  %v947_v55 = vmul.f32 %v5491_v31, %v6532_v6  ;;  %v5442_v7 = vld [vmem:[%s11530_s7 + $0x60] sm:$0xfc]  ;;  %v7370_v53 = vld [vmem:[%s11530_s7 + $0xd0] sm:$0xff] }
  0x7a   :  { %v6080_v51 = vpack.c.bf16 %v565_v59, %v315_v41  ;;  %v859_v13 = vadd.f32 %v849_v42, %v825_v1  ;;  %v883_v17 = vsel %vm121_vm2, %v881_v29, %v11573_v22  ;;  %v927_v24 = vrot.slane %v913_v39, 1  ;;  %v7271_v41 = vld [vmem:[%s11530_s7 + $0xf8] sm:$0xff] }
  0x7b   :  { %v771_v38 = vadd.f32 %v761_v19, %v737_v12  ;;  %v11572_v61 = vrot.slane %v7251_v5, 1  ;;  %v7266_v58 = vmul.f32 %v7193_v48, %v6532_v6  ;;  %v961_v34 = vrot.slane %v947_v55, 2  ;;  %11876 = vst [vmem:[#allocation11_spill] sm:$0xff] %v7271_v41 }
  0x7c   :  { %6081 = vmatpush1.bf16.msra.mxu1 %v6080_v51  ;;  %v893_v40 = vadd.f32 %v883_v17, %v859_v13  ;;  %v982_v33 = vmul.f32 %v7271_v41, %v6555_v20  ;;  %v994_v1 = vmul.f32 %v5499_v0, %v6558_v21  ;;  %v7283_v3 = vmul.f32 %v7276_v27, %v6558_v21  ;;  %v5450_v51 = vld [vmem:[%s11530_s7 + $0x90] sm:$0xfe]  ;;  %v11878_v17 = vld [vmem:[#allocation10_spill] sm:$0xff] }
  0x7d   :  { %v805_v35 = vadd.f32 %v795_v18, %v771_v38  ;;  %v929_v14 = vsel %vm85_vm0, %v927_v24, %v11572_v61  ;;  %v11571_v32 = vrot.slane %v7266_v58, 2  ;;  %v1028_v60 = vmul.f32 %v5503_v15, %v6599_v11 }
  0x7e   :  { %v905_v23 = vadd.f32 %v901_v63, %v893_v40  ;;  %v1008_v19 = vrot.slane %v994_v1, 1  ;;  %v11569_v56 = vrot.slane %v7283_v3, 1  ;;  %v7296_v31 = vmul.f32 %v7276_v27, %v6599_v11  ;;  %v11877_v63 = vld [vmem:[#allocation9_spill] sm:$0xff] }
  0x7f   :  { %v7302_v18 = vadd.f32 %v805_v35, %v6386_v26  ;;  %v963_v29 = vsel %vm121_vm2, %v961_v34, %v11571_v32  ;;  %v1042_v59 = vrot.slane %v1028_v60, 2  ;;  %v575_v39 = vmul.f32 %v11877_v63, %v6406_v30  ;;  %v5454_v34 = vld [vmem:[%s11530_s7 + $0x90] sm:$0xfc]  ;;  %v11880_v63 = vld [vmem:[#allocation14_spill] sm:$0xff] }
  0x80   :  { %v939_v12 = vadd.f32 %v929_v14, %v905_v23  ;;  %v1010_v42 = vsel %vm85_vm0, %v1008_v19, %v11569_v56  ;;  %v11570_v55 = vrot.slane %v7296_v31, 2  ;;  %v583_v0 = vmul.f32 %v5438_v47, %v6426_v36  ;;  %v11879_v14 = vld [vmem:[#allocation13_spill] sm:$0xff] }
  0x81   :  { %v813_v13 = vmax.f32 %v7302_v18, 0.0  ;;  %v7320_v24 = vmul.f32 %v11878_v17, %v6426_v36  ;;  %v617_v15 = vmul.f32 %v5442_v7, %v6450_v43  ;;  %v7325_v38 = vmul.f32 %v11878_v17, %v6450_v43 }
  0x82   :  { %v973_v40 = vadd.f32 %v963_v29, %v939_v12  ;;  %v1044_v1 = vsel %vm121_vm2, %v1042_v59, %v11570_v55  ;;  %v595_v35 = vrot.slane %v583_v0, 1  ;;  %v651_v60 = vmul.f32 %v11879_v14, %v6474_v50  ;;  %v7350_v12 = vld [vmem:[%s11530_s7 + $0xc0] sm:$0xff] }
  0x83   :  { %v11575_v47 = vrot.slane %v7320_v24, 1  ;;  %v629_v23 = vrot.slane %v617_v15, 2  ;;  %v11577_v19 = vrot.slane %v7325_v38, 2  ;;  %v663_v7 = vmul.f32 %v5450_v51, %v6496_v57  ;;  %11881 = vst [vmem:[#allocation16_spill] sm:$0xff] %v7350_v12  ;;  %v5462_v0 = vld [vmem:[%s11530_s7 + $0xc0] sm:$0xfe] }
  0x84   :  { %v986_v18 = vadd.f32 %v982_v33, %v973_v40  ;;  %v7340_v56 = vmul.f32 %v11880_v63, %v6496_v57  ;;  %v697_v29 = vmul.f32 %v5454_v34, %v6532_v6  ;;  %v7345_v59 = vmul.f32 %v11880_v63, %v6532_v6  ;;  %v5466_v33 = vld [vmem:[%s11530_s7 + $0xc0] sm:$0xfc] }
  0x85   :  { %v597_v51 = vsel %vm85_vm0, %v595_v35, %v11575_v47  ;;  %v631_v15 = vsel %vm121_vm2, %v629_v23, %v11577_v19  ;;  %v675_v34 = vrot.slane %v663_v7, 1  ;;  %v732_v40 = vmul.f32 %v7350_v12, %v6555_v20 }
  0x86   :  { %v1020_v55 = vadd.f32 %v1010_v42, %v986_v18  ;;  %v609_v32 = vadd.f32 %v597_v51, %v575_v39  ;;  %v11576_v61 = vrot.slane %v7340_v56, 1  ;;  %v709_v22 = vrot.slane %v697_v29, 2  ;;  %v5478_v51 = vld [vmem:[%s11530_s7 + $0x90] sm:$0xfc] }
  0x87   :  { %v11581_v35 = vrot.slane %v7345_v59, 2  ;;  %v744_v47 = vmul.f32 %v5462_v0, %v6558_v21  ;;  %v7376_v23 = vmul.f32 %v7370_v53, %v6558_v21  ;;  %v778_v7 = vmul.f32 %v5466_v33, %v6599_v11  ;;  %v5474_v0 = vld [vmem:[%s11530_s7 + $0x90] sm:$0xfe] }
  0x88   :  { %v1054_v42 = vadd.f32 %v1044_v1, %v1020_v55  ;;  %v643_v39 = vadd.f32 %v631_v15, %v609_v32  ;;  %v677_v18 = vsel %vm85_vm0, %v675_v34, %v11576_v61  ;;  %v7384_v29 = vmul.f32 %v7370_v53, %v6599_v11 }
  0x89   :  { %v711_v32 = vsel %vm121_vm2, %v709_v22, %v11581_v35  ;;  %v756_v55 = vrot.slane %v744_v47, 1  ;;  %v11580_v1 = vrot.slane %v7376_v23, 1  ;;  %v790_v33 = vrot.slane %v778_v7, 2 }
  0x8a   :  { %v1058_v15 = vadd.f32 %v1054_v42, %v6386_v26  ;;  %v655_v34 = vadd.f32 %v651_v60, %v643_v39  ;;  %v11582_v61 = vrot.slane %v7384_v29, 2  ;;  %v824_v19 = vmul.f32 %v11879_v14, %v6406_v30  ;;  %v5486_v60 = vld [vmem:[%s11530_s7 + $0xc0] sm:$0xfe] }
  0x8b   :  { %v758_v2 = vsel %vm85_vm0, %v756_v55, %v11580_v1  ;;  %v832_v16 = vmul.f32 %v5474_v0, %v6426_v36  ;;  %v7406_v22 = vmul.f32 %v11880_v63, %v6426_v36  ;;  %v866_v47 = vmul.f32 %v5478_v51, %v6450_v43  ;;  %v5490_v0 = vld [vmem:[%s11530_s7 + $0xc0] sm:$0xfc] }
  0x8c   :  { %v1062_v7 = vmax.f32 %v1058_v15, 0.0  ;;  %v689_v42 = vadd.f32 %v677_v18, %v655_v34  ;;  %v792_v14 = vsel %vm121_vm2, %v790_v33, %v11582_v61  ;;  %v7417_v39 = vmul.f32 %v11880_v63, %v6450_v43 }
  0x8d   :  { %v844_v55 = vrot.slane %v832_v16, 1  ;;  %v11584_v51 = vrot.slane %v7406_v22, 1  ;;  %v878_v1 = vrot.slane %v866_v47, 2  ;;  %v900_v15 = vmul.f32 %v7350_v12, %v6474_v50 }
  0x8e   :  { %v6050_v18 = vpack.c.bf16 %v1062_v7, %v813_v13  ;;  %v723_v34 = vadd.f32 %v711_v32, %v689_v42  ;;  %v11586_v35 = vrot.slane %v7417_v39, 2  ;;  %v912_v33 = vmul.f32 %v5486_v60, %v6496_v57  ;;  %v5498_v13 = vld [vmem:[%s11530_s7 + $0xf0] sm:$0xfe] }
  0x8f   :  { %v846_v61 = vsel %vm85_vm0, %v844_v55, %v11584_v51  ;;  %v7432_v28 = vmul.f32 %v7370_v53, %v6496_v57  ;;  %v946_v16 = vmul.f32 %v5490_v0, %v6532_v6  ;;  %v7437_v47 = vmul.f32 %v7370_v53, %v6532_v6  ;;  %v7448_v0 = vld [vmem:[%s11530_s7 + $0xf0] sm:$0xff] }
  0x90   :  { %6051 = vmatprep.subr.bf16.mxu0 %v6050_v18  ;;  %v736_v32 = vadd.f32 %v732_v40, %v723_v34  ;;  %v858_v60 = vadd.f32 %v846_v61, %v824_v19  ;;  %v880_v7 = vsel %vm121_vm2, %v878_v1, %v11586_v35  ;;  %v924_v42 = vrot.slane %v912_v33, 1  ;;  %11882 = vst [vmem:[#allocation12_spill] sm:$0xff] %v7448_v0  ;;  %v5502_v55 = vld [vmem:[%s11530_s7 + $0xf0] sm:$0xfc]  ;;  %v7458_v61 = vld [vmem:[%s11530_s7 + $0x100] sm:$0xff] }
  0x91   :  { %v11592_v51 = vrot.slane %v7432_v28, 1  ;;  %v958_v45 = vrot.slane %v946_v16, 2  ;;  %v11591_v40 = vrot.slane %v7437_v47, 2  ;;  %v981_v19 = vmul.f32 %v7448_v0, %v6555_v20  ;;  %v5441_v16 = vld [vmem:[%s11530_s7 + $0x88] sm:$0x1] }
  0x92   :  { %v770_v1 = vadd.f32 %v758_v2, %v736_v32  ;;  %v892_v18 = vadd.f32 %v880_v7, %v858_v60  ;;  %v993_v34 = vmul.f32 %v5498_v13, %v6558_v21  ;;  %v7465_v33 = vmul.f32 %v7458_v61, %v6558_v21  ;;  %v5445_v32 = vld [vmem:[%s11530_s7 + $0x88] sm:$0x3] }
  0x93   :  { %v926_v35 = vsel %vm85_vm0, %v924_v42, %v11592_v51  ;;  %v960_v54 = vsel %vm121_vm2, %v958_v45, %v11591_v40  ;;  %v1027_v2 = vmul.f32 %v5502_v55, %v6599_v11  ;;  %v7479_v13 = vmul.f32 %v7458_v61, %v6599_v11  ;;  %v5453_v42 = vld [vmem:[%s11530_s7 + $0xb8] sm:$0x1] }
  0x94   :  { %v804_v60 = vadd.f32 %v792_v14, %v770_v1  ;;  %v904_v7 = vadd.f32 %v900_v15, %v892_v18  ;;  %v1005_v10 = vrot.slane %v993_v34, 1  ;;  %v11596_v0 = vrot.slane %v7465_v33, 1  ;;  %v6193_v40 = vld [vmem:[%s11530_s7 + $0x78] sm:$0xff] }
  0x95   :  { %11883 = vst [vmem:[#allocation8_spill] sm:$0xff] %v7479_v13  ;;  %v1039_v45 = vrot.slane %v1027_v2, 2  ;;  %v11598_v55 = vrot.slane %v7479_v13, 2  ;;  %v578_v51 = vmul.f32 %v6193_v40, %v6406_v30  ;;  %v588_v12 = vmul.f32 %v5441_v16, %v6426_v36  ;;  %v5457_v14 = vld [vmem:[%s11530_s7 + $0xb8] sm:$0x3] }
  0x96   :  { %v7498_v15 = vadd.f32 %v804_v60, %v6386_v26  ;;  %v938_v1 = vadd.f32 %v926_v35, %v904_v7  ;;  %v1007_v18 = vsel %vm85_vm0, %v1005_v10, %v11596_v0  ;;  %v622_v34 = vmul.f32 %v5445_v32, %v6450_v43  ;;  %v5465_v40 = vld [vmem:[%s11530_s7 + $0xe8] sm:$0x1] }
  0x97   :  { %v1041_v16 = vsel %vm121_vm2, %v1039_v45, %v11598_v55  ;;  %v603_v2 = vrot.slane %v588_v12, 1  ;;  %v654_v60 = vmul.f32 %v6679_v44, %v6474_v50  ;;  %v668_v35 = vmul.f32 %v5453_v42, %v6496_v57  ;;  %v5469_v0 = vld [vmem:[%s11530_s7 + $0xe8] sm:$0x3] }
  0x98   :  { %v812_v7 = vmax.f32 %v7498_v15, 0.0  ;;  %v972_v41 = vadd.f32 %v960_v54, %v938_v1  ;;  %v637_v10 = vrot.slane %v622_v34, 2  ;;  %v702_v32 = vmul.f32 %v5457_v14, %v6532_v6  ;;  %v5477_v54 = vld [vmem:[%s11530_s7 + $0xb8] sm:$0x1] }
  0x99   :  { %v11884_v13 = vrot.slane %v7137_v8, 1  ;;  %v683_v12 = vrot.slane %v668_v35, 1  ;;  %v735_v44 = vmul.f32 %v7193_v48, %v6555_v20  ;;  %v749_v42 = vmul.f32 %v5465_v40, %v6558_v21  ;;  %v5481_v8 = vld [vmem:[%s11530_s7 + $0xb8] sm:$0x3] }
  0x9a   :  { %v985_v15 = vadd.f32 %v981_v19, %v972_v41  ;;  %v11885_v1 = vrot.slane %v7142_v37, 2  ;;  %v717_v55 = vrot.slane %v702_v32, 2  ;;  %v783_v35 = vmul.f32 %v5469_v0, %v6599_v11  ;;  %v6194_v41 = vld [vmem:[%s11530_s7 + $0xa8] sm:$0xff] }
  0x9b   :  { %v604_v45 = vsel %vm85_vm0, %v11884_v13, %v603_v2  ;;  %v11886_v13 = vrot.slane %v7157_v4, 1  ;;  %v764_v40 = vrot.slane %v749_v42, 1  ;;  %v827_v37 = vmul.f32 %v6194_v41, %v6406_v30  ;;  %v5493_v0 = vld [vmem:[%s11530_s7 + $0xe8] sm:$0x3] }
  0x9c   :  { %v612_v14 = vadd.f32 %v604_v45, %v578_v51  ;;  %v638_v34 = vsel %vm121_vm2, %v11885_v1, %v637_v10  ;;  %v5489_v51 = vld [vmem:[%s11530_s7 + $0xe8] sm:$0x1]  ;;  %v1019_v19 = vadd.f32 %v1007_v18, %v985_v15  ;;  %v11887_v32 = vrot.slane %v7168_v62, 2 }
  0x9d   :  { %v684_v2 = vsel %vm85_vm0, %v11886_v13, %v683_v12  ;;  %v837_v45 = vmul.f32 %v5477_v54, %v6426_v36  ;;  %v11888_v12 = vrot.slane %v7204_v25, 1  ;;  %v798_v1 = vrot.slane %v783_v35, 2  ;;  %v5501_v54 = vld [vmem:[%s11530_s7 + $0x118] sm:$0x1] }
  0x9e   :  { %v646_v10 = vadd.f32 %v638_v34, %v612_v14  ;;  %v718_v4 = vsel %vm121_vm2, %v11887_v32, %v717_v55  ;;  %v871_v13 = vmul.f32 %v5481_v8, %v6450_v43  ;;  %v903_v18 = vmul.f32 %v7193_v48, %v6474_v50 }
  0x9f   :  { %v765_v42 = vsel %vm85_vm0, %v11888_v12, %v764_v40  ;;  %v1053_v15 = vadd.f32 %v1041_v16, %v1019_v19  ;;  %v852_v14 = vrot.slane %v837_v45, 1  ;;  %v917_v55 = vmul.f32 %v5489_v51, %v6496_v57  ;;  %v5505_v16 = vld [vmem:[%s11530_s7 + $0x118] sm:$0x3] }
  0xa0   :  { %v658_v62 = vadd.f32 %v654_v60, %v646_v10  ;;  %v11889_v34 = vrot.slane %v7212_v49, 2  ;;  %v886_v40 = vrot.slane %v871_v13, 2  ;;  %v951_v35 = vmul.f32 %v5493_v0, %v6532_v6 }
  0xa1   :  { %v984_v8 = vmul.f32 %v7276_v27, %v6555_v20  ;;  %v1057_v60 = vadd.f32 %v1053_v15, %v6386_v26  ;;  %v11890_v51 = vrot.slane %v7221_v46, 1  ;;  %v932_v49 = vrot.slane %v917_v55, 1 }
  0xa2   :  { %v799_v25 = vsel %vm121_vm2, %v11889_v34, %v798_v1  ;;  %v692_v41 = vadd.f32 %v684_v2, %v658_v62  ;;  %v11891_v32 = vrot.slane %v7233_v9, 2  ;;  %v966_v0 = vrot.slane %v951_v35, 2  ;;  %v5440_v1 = vld [vmem:[%s11530_s7 + $0x80] sm:$0x1] }
  0xa3   :  { %v853_v19 = vsel %vm85_vm0, %v11890_v51, %v852_v14  ;;  %v998_v12 = vmul.f32 %v5501_v54, %v6558_v21  ;;  %v1061_v13 = vmax.f32 %v1057_v60, 0.0  ;;  %v11892_v2 = vrot.slane %v7251_v5, 1  ;;  %v5444_v9 = vld [vmem:[%s11530_s7 + $0x80] sm:$0x3]  ;;  %v5452_v5 = vld [vmem:[%s11530_s7 + $0xb0] sm:$0x1] }
  0xa4   :  { %v861_v10 = vadd.f32 %v853_v19, %v827_v37  ;;  %v887_v45 = vsel %vm121_vm2, %v11891_v32, %v886_v40  ;;  %v726_v15 = vadd.f32 %v718_v4, %v692_v41  ;;  %v1032_v62 = vmul.f32 %v5505_v16, %v6599_v11  ;;  %v5456_v60 = vld [vmem:[%s11530_s7 + $0xb0] sm:$0x3] }
  0xa5   :  { %v933_v46 = vsel %vm85_vm0, %v11892_v2, %v932_v49  ;;  %v11893_v14 = vrot.slane %v7266_v58, 2  ;;  %v1013_v54 = vrot.slane %v998_v12, 1  ;;  %v577_v34 = vmul.f32 %v11878_v17, %v6406_v30 }
  0xa6   :  { %v895_v37 = vadd.f32 %v887_v45, %v861_v10  ;;  %v6052_v4 = vpack.c.bf16 %v1061_v13, %v812_v7  ;;  %v739_v40 = vadd.f32 %v735_v44, %v726_v15  ;;  %v1047_v35 = vrot.slane %v1032_v62, 2  ;;  %v5464_v7 = vld [vmem:[%s11530_s7 + $0xe0] sm:$0x1] }
  0xa7   :  { %v967_v55 = vsel %vm121_vm2, %v11893_v14, %v966_v0  ;;  %v587_v16 = vmul.f32 %v5440_v1, %v6426_v36  ;;  %v11894_v41 = vrot.slane %v7283_v3, 1  ;;  %v621_v17 = vmul.f32 %v5444_v9, %v6450_v43  ;;  %v5468_v1 = vld [vmem:[%s11530_s7 + $0xe0] sm:$0x3] }
  0xa8   :  { %v907_v58 = vadd.f32 %v903_v18, %v895_v37  ;;  %v653_v19 = vmul.f32 %v11880_v63, %v6474_v50  ;;  %6053 = vmatpush1.bf16.msra.mxu0 %v6052_v4  ;;  %v773_v44 = vadd.f32 %v765_v42, %v739_v40  ;;  %v11895_v49 = vrot.slane %v7296_v31, 2 }
  0xa9   :  { %v1014_v51 = vsel %vm85_vm0, %v11894_v41, %v1013_v54  ;;  %v601_v18 = vrot.slane %v587_v16, 1  ;;  %v667_v3 = vmul.f32 %v5452_v5, %v6496_v57  ;;  %v635_v45 = vrot.slane %v621_v17, 2  ;;  %v5476_v54 = vld [vmem:[%s11530_s7 + $0xb0] sm:$0x1] }
  0xaa   :  { %v1048_v10 = vsel %vm121_vm2, %v11895_v49, %v1047_v35  ;;  %v941_v32 = vadd.f32 %v933_v46, %v907_v58  ;;  %v701_v0 = vmul.f32 %v5456_v60, %v6532_v6  ;;  %v734_v12 = vmul.f32 %v7370_v53, %v6555_v20  ;;  %v5492_v58 = vld [vmem:[%s11530_s7 + $0xe0] sm:$0x3] }
  0xab   :  { %v807_v13 = vadd.f32 %v799_v25, %v773_v44  ;;  %v11896_v42 = vrot.slane %v7320_v24, 1  ;;  %v681_v15 = vrot.slane %v667_v3, 1  ;;  %v748_v2 = vmul.f32 %v5464_v7, %v6558_v21  ;;  %v5500_v3 = vld [vmem:[%s11530_s7 + $0x110] sm:$0x1] }
  0xac   :  { %v975_v62 = vadd.f32 %v967_v55, %v941_v32  ;;  %v11897_v9 = vrot.slane %v7325_v38, 2  ;;  %v715_v14 = vrot.slane %v701_v0, 2  ;;  %v11898_v24 = vrot.slane %v7340_v56, 1  ;;  %v5480_v38 = vld [vmem:[%s11530_s7 + $0xb0] sm:$0x3] }
  0xad   :  { %v602_v31 = vsel %vm85_vm0, %v11896_v42, %v601_v18  ;;  %v811_v25 = vadd.f32 %v807_v13, %v6386_v26  ;;  %v762_v4 = vrot.slane %v748_v2, 1  ;;  %v782_v40 = vmul.f32 %v5468_v1, %v6599_v11  ;;  %v5488_v56 = vld [vmem:[%s11530_s7 + $0xe0] sm:$0x1] }
  0xae   :  { %v611_v46 = vadd.f32 %v602_v31, %v577_v34  ;;  %v636_v37 = vsel %vm121_vm2, %v11897_v9, %v635_v45  ;;  %v682_v5 = vsel %vm85_vm0, %v11898_v24, %v681_v15  ;;  %v988_v55 = vadd.f32 %v984_v8, %v975_v62  ;;  %v5504_v31 = vld [vmem:[%s11530_s7 + $0x110] sm:$0x3] }
  0xaf   :  { %v11899_v35 = vrot.slane %v7345_v59, 2  ;;  %v826_v60 = vmul.f32 %v11880_v63, %v6406_v30  ;;  %v815_v41 = vmax.f32 %v811_v25, 0.0  ;;  %v11900_v17 = vrot.slane %v7376_v23, 1  ;;  %v5511_v25 = vld [vmem:[%s11530_s7 + $0xc8] sm:$0xfe] }
  0xb0   :  { %v645_v34 = vadd.f32 %v636_v37, %v611_v46  ;;  %v796_v7 = vrot.slane %v782_v40, 2  ;;  %v836_v59 = vmul.f32 %v5476_v54, %v6426_v36  ;;  %v1022_v44 = vadd.f32 %v1014_v51, %v988_v55 }
  0xb1   :  { %v716_v16 = vsel %vm121_vm2, %v11899_v35, %v715_v14  ;;  %v763_v8 = vsel %vm85_vm0, %v11900_v17, %v762_v4  ;;  %v870_v63 = vmul.f32 %v5480_v38, %v6450_v43  ;;  %v902_v18 = vmul.f32 %v7370_v53, %v6474_v50 }
  0xb2   :  { %v657_v49 = vadd.f32 %v653_v19, %v645_v34  ;;  %v11901_v32 = vrot.slane %v7384_v29, 2  ;;  %v850_v45 = vrot.slane %v836_v59, 1  ;;  %v916_v0 = vmul.f32 %v5488_v56, %v6496_v57 }
  0xb3   :  { %v950_v1 = vmul.f32 %v5492_v58, %v6532_v6  ;;  %v1056_v51 = vadd.f32 %v1048_v10, %v1022_v44  ;;  %v884_v13 = vrot.slane %v870_v63, 2  ;;  %v983_v42 = vmul.f32 %v7458_v61, %v6555_v20  ;;  %v11907_v44 = vld [vmem:[#allocation8_spill] sm:$0xff] }
  0xb4   :  { %v797_v23 = vsel %vm121_vm2, %v11901_v32, %v796_v7  ;;  %v691_v19 = vadd.f32 %v682_v5, %v657_v49  ;;  %v11902_v15 = vrot.slane %v7406_v22, 1  ;;  %v930_v2 = vrot.slane %v916_v0, 1  ;;  %v11909_v0 = vld [vmem:[#allocation11_spill] sm:$0xff] }
  0xb5   :  { %v964_v62 = vrot.slane %v950_v1, 2  ;;  %v997_v46 = vmul.f32 %v5500_v3, %v6558_v21  ;;  %v1060_v9 = vadd.f32 %v1056_v51, %v6386_v26  ;;  %v11903_v14 = vrot.slane %v7417_v39, 2  ;;  %v5515_v39 = vld [vmem:[%s11530_s7 + $0xc8] sm:$0xfc] }
  0xb6   :  { %v851_v29 = vsel %vm85_vm0, %v11902_v15, %v850_v45  ;;  %v725_v10 = vadd.f32 %v716_v16, %v691_v19  ;;  %v11904_v22 = vrot.slane %v7432_v28, 1  ;;  %v11905_v5 = vrot.slane %v7437_v47, 2 }
  0xb7   :  { %v860_v37 = vadd.f32 %v851_v29, %v826_v60  ;;  %v885_v54 = vsel %vm121_vm2, %v11903_v14, %v884_v13  ;;  %v1011_v40 = vrot.slane %v997_v46, 1  ;;  %v1031_v38 = vmul.f32 %v5504_v31, %v6599_v11 }
  0xb8   :  { %v931_v24 = vsel %vm85_vm0, %v11904_v22, %v930_v2  ;;  %v965_v4 = vsel %vm121_vm2, %v11905_v5, %v964_v62  ;;  %v1064_v55 = vmax.f32 %v1060_v9, 0.0  ;;  %v738_v34 = vadd.f32 %v734_v12, %v725_v10  ;;  %v5535_v2 = vld [vmem:[%s11530_s7 + $0x128] sm:$0xfe] }
  0xb9   :  { %v894_v35 = vadd.f32 %v885_v54, %v860_v37  ;;  %v1074_v16 = vmul.f32 %v7178_v52, %v6406_v30  ;;  %v11906_v28 = vrot.slane %v7465_v33, 1  ;;  %v1045_v47 = vrot.slane %v1031_v38, 2  ;;  %v5523_v52 = vld [vmem:[%s11530_s7 + $0xf8] sm:$0xfe]  ;;  %v5539_v37 = vld [vmem:[%s11530_s7 + $0x128] sm:$0xfc] }
  0xba   :  { %v1082_v56 = vmul.f32 %v5511_v25, %v6426_v36  ;;  %v7697_v58 = vmul.f32 %v7193_v48, %v6426_v36  ;;  %v6082_v17 = vpack.c.bf16 %v1064_v55, %v815_v41  ;;  %v772_v7 = vadd.f32 %v763_v8, %v738_v34  ;;  %v5527_v41 = vld [vmem:[%s11530_s7 + $0xf8] sm:$0xfc] }
  0xbb   :  { %v1012_v60 = vsel %vm85_vm0, %v11906_v28, %v1011_v40  ;;  %v906_v59 = vadd.f32 %v902_v18, %v894_v35  ;;  %v1116_v12 = vmul.f32 %v5515_v39, %v6450_v43  ;;  %v11908_v33 = vrot.slane %v11907_v44, 2  ;;  %v7753_v40 = vld [vmem:[%s11530_s7 + $0x138] sm:$0xff] }
  0xbc   :  { %v1096_v63 = vrot.slane %v1082_v56, 1  ;;  %v11618_v3 = vrot.slane %v7697_v58, 1  ;;  %v7709_v32 = vmul.f32 %v7193_v48, %v6450_v43  ;;  %6083 = vmatprep.subr.bf16.mxu1 %v6082_v17  ;;  %v806_v8 = vadd.f32 %v797_v23, %v772_v7  ;;  %v5551_v28 = vld [vmem:[%s11530_s7 + $0xf8] sm:$0xfc] }
  0xbd   :  { %v1046_v49 = vsel %vm121_vm2, %v11908_v33, %v1045_v47  ;;  %v940_v18 = vadd.f32 %v931_v24, %v906_v59  ;;  %v1130_v45 = vrot.slane %v1116_v12, 2  ;;  %v1150_v1 = vmul.f32 %v11909_v0, %v6474_v50  ;;  %v7744_v24 = vld [vmem:[%s11530_s7 + $0x128] sm:$0xff] }
  0xbe   :  { %v1098_v51 = vsel %vm85_vm0, %v1096_v63, %v11618_v3  ;;  %v11617_v19 = vrot.slane %v7709_v32, 2  ;;  %v1162_v48 = vmul.f32 %v5523_v52, %v6496_v57  ;;  %v7723_v13 = vmul.f32 %v7276_v27, %v6496_v57 }
  0xbf   :  { %v810_v31 = vadd.f32 %v806_v8, %v6386_v26  ;;  %v974_v23 = vadd.f32 %v965_v4, %v940_v18  ;;  %v1108_v15 = vadd.f32 %v1098_v51, %v1074_v16  ;;  %v1196_v29 = vmul.f32 %v5527_v41, %v6532_v6  ;;  %v5547_v16 = vld [vmem:[%s11530_s7 + $0xf8] sm:$0xfe] }
  0xc0   :  { %v1132_v62 = vsel %vm121_vm2, %v1130_v45, %v11617_v19  ;;  %v1176_v46 = vrot.slane %v1162_v48, 1  ;;  %v11614_v9 = vrot.slane %v7723_v13, 1  ;;  %v7736_v10 = vmul.f32 %v7276_v27, %v6532_v6 }
  0xc1   :  { %v814_v14 = vmax.f32 %v810_v31, 0.0  ;;  %v987_v54 = vadd.f32 %v983_v42, %v974_v23  ;;  %v1142_v25 = vadd.f32 %v1132_v62, %v1108_v15  ;;  %v1210_v22 = vrot.slane %v1196_v29, 2 }
  0xc2   :  { %v1178_v5 = vsel %vm85_vm0, %v1176_v46, %v11614_v9  ;;  %v11610_v4 = vrot.slane %v7736_v10, 2  ;;  %v1231_v42 = vmul.f32 %v7744_v24, %v6555_v20  ;;  %v1243_v38 = vmul.f32 %v5535_v2, %v6558_v21 }
  0xc3   :  { %v1021_v39 = vadd.f32 %v1012_v60, %v987_v54  ;;  %v1154_v55 = vadd.f32 %v1150_v1, %v1142_v25  ;;  %v7760_v34 = vmul.f32 %v7753_v40, %v6558_v21  ;;  %v1277_v35 = vmul.f32 %v5539_v37, %v6599_v11  ;;  %v5563_v1 = vld [vmem:[%s11530_s7 + $0x128] sm:$0xfc] }
  0xc4   :  { %v1212_v47 = vsel %vm121_vm2, %v1210_v22, %v11610_v4  ;;  %v1257_v60 = vrot.slane %v1243_v38, 1  ;;  %v7774_v56 = vmul.f32 %v7753_v40, %v6599_v11  ;;  %v1323_v17 = vmul.f32 %v11909_v0, %v6406_v30  ;;  %v5559_v0 = vld [vmem:[%s11530_s7 + $0x128] sm:$0xfe]  ;;  %v5571_v22 = vld [vmem:[%s11530_s7 + $0x158] sm:$0xfe] }
  0xc5   :  { %v1055_v7 = vadd.f32 %v1046_v49, %v1021_v39  ;;  %v1188_v59 = vadd.f32 %v1178_v5, %v1154_v55  ;;  %v11609_v12 = vrot.slane %v7760_v34, 1  ;;  %v1291_v52 = vrot.slane %v1277_v35, 2  ;;  %v5575_v55 = vld [vmem:[%s11530_s7 + $0x158] sm:$0xfc] }
  0xc6   :  { %v11605_v44 = vrot.slane %v7774_v56, 2  ;;  %v1331_v33 = vmul.f32 %v5547_v16, %v6426_v36  ;;  %v7783_v63 = vmul.f32 %v7276_v27, %v6426_v36  ;;  %v1365_v41 = vmul.f32 %v5551_v28, %v6450_v43 }
  0xc7   :  { %v1059_v8 = vadd.f32 %v1055_v7, %v6386_v26  ;;  %v1222_v18 = vadd.f32 %v1212_v47, %v1188_v59  ;;  %v1259_v49 = vsel %vm85_vm0, %v1257_v60, %v11609_v12  ;;  %v7792_v45 = vmul.f32 %v7276_v27, %v6450_v43  ;;  %v7838_v7 = vld [vmem:[%s11530_s7 + $0x168] sm:$0xff] }
  0xc8   :  { %v1293_v51 = vsel %vm121_vm2, %v1291_v52, %v11605_v44  ;;  %v1345_v48 = vrot.slane %v1331_v33, 1  ;;  %v11604_v31 = vrot.slane %v7783_v63, 1  ;;  %v1379_v23 = vrot.slane %v1365_v41, 2  ;;  %v7932_v44 = vld [vmem:[%s11530_s7 + $0x130] sm:$0xff] }
  0xc9   :  { %v1063_v15 = vmax.f32 %v1059_v8, 0.0  ;;  %v1235_v29 = vadd.f32 %v1231_v42, %v1222_v18  ;;  %v11603_v2 = vrot.slane %v7792_v45, 2  ;;  %v1399_v62 = vmul.f32 %v7744_v24, %v6474_v50 }
  0xca   :  { %v1347_v46 = vsel %vm85_vm0, %v1345_v48, %v11604_v31  ;;  %v1411_v37 = vmul.f32 %v5559_v0, %v6496_v57  ;;  %v7813_v54 = vmul.f32 %v7753_v40, %v6496_v57  ;;  %v1445_v25 = vmul.f32 %v5563_v1, %v6532_v6 }
  0xcb   :  { %v6084_v5 = vpack.c.bf16 %v1063_v15, %v814_v14  ;;  %v1269_v42 = vadd.f32 %v1259_v49, %v1235_v29  ;;  %v1357_v38 = vadd.f32 %v1347_v46, %v1323_v17  ;;  %v1381_v39 = vsel %vm121_vm2, %v1379_v23, %v11603_v2  ;;  %v7833_v14 = vld [vmem:[%s11530_s7 + $0x158] sm:$0xff]  ;;  %v5510_v49 = vld [vmem:[%s11530_s7 + $0xc0] sm:$0xfe] }
  0xcc   :  { %v1425_v35 = vrot.slane %v1411_v37, 1  ;;  %v11602_v16 = vrot.slane %v7813_v54, 1  ;;  %v7828_v28 = vmul.f32 %v7753_v40, %v6532_v6  ;;  %v1459_v47 = vrot.slane %v1445_v25, 2  ;;  %11910 = vst [vmem:[#allocation15_spill] sm:$0xff] %v7833_v14  ;;  %v5514_v23 = vld [vmem:[%s11530_s7 + $0xc0] sm:$0xfc] }
  0xcd   :  { %6085 = vmatpush1.bf16.msra.mxu1 %v6084_v5  ;;  %v1303_v60 = vadd.f32 %v1293_v51, %v1269_v42  ;;  %v1391_v17 = vadd.f32 %v1381_v39, %v1357_v38  ;;  %v1480_v59 = vmul.f32 %v7833_v14, %v6555_v20  ;;  %v1492_v52 = vmul.f32 %v5571_v22, %v6558_v21  ;;  %v11911_v37 = vld [vmem:[#allocation16_spill] sm:$0xff]  ;;  %v5522_v38 = vld [vmem:[%s11530_s7 + $0xf0] sm:$0xfe] }
  0xce   :  { %v1427_v33 = vsel %vm85_vm0, %v1425_v35, %v11602_v16  ;;  %v11600_v41 = vrot.slane %v7828_v28, 2  ;;  %v7849_v8 = vmul.f32 %v7838_v7, %v6558_v21  ;;  %v1526_v18 = vmul.f32 %v5575_v55, %v6599_v11 }
  0xcf   :  { %v7856_v0 = vadd.f32 %v1303_v60, %v6386_v26  ;;  %v1403_v1 = vadd.f32 %v1399_v62, %v1391_v17  ;;  %v1506_v51 = vrot.slane %v1492_v52, 1  ;;  %v7860_v48 = vmul.f32 %v7838_v7, %v6599_v11  ;;  %v5526_v60 = vld [vmem:[%s11530_s7 + $0xf0] sm:$0xfc] }
  0xd0   :  { %v1461_v15 = vsel %vm121_vm2, %v1459_v47, %v11600_v41  ;;  %v11599_v29 = vrot.slane %v7849_v8, 1  ;;  %v1540_v46 = vrot.slane %v1526_v18, 2  ;;  %v1073_v25 = vmul.f32 %v11911_v37, %v6406_v30  ;;  %v11912_v18 = vld [vmem:[#allocation12_spill] sm:$0xff] }
  0xd1   :  { %v1311_v62 = vmax.f32 %v7856_v0, 0.0  ;;  %v1437_v22 = vadd.f32 %v1427_v33, %v1403_v1  ;;  %v11601_v5 = vrot.slane %v7860_v48, 2  ;;  %v1081_v42 = vmul.f32 %v5510_v49, %v6426_v36  ;;  %v5570_v0 = vld [vmem:[%s11530_s7 + $0x150] sm:$0xfe] }
  0xd2   :  { %v1508_v39 = vsel %vm85_vm0, %v1506_v51, %v11599_v29  ;;  %v7882_v55 = vmul.f32 %v7370_v53, %v6426_v36  ;;  %v1115_v35 = vmul.f32 %v5514_v23, %v6450_v43  ;;  %v7887_v47 = vmul.f32 %v7370_v53, %v6450_v43 }
  0xd3   :  { %v1471_v17 = vadd.f32 %v1461_v15, %v1437_v22  ;;  %v1542_v52 = vsel %vm121_vm2, %v1540_v46, %v11601_v5  ;;  %v1093_v33 = vrot.slane %v1081_v42, 1  ;;  %v1149_v49 = vmul.f32 %v11912_v18, %v6474_v50  ;;  %v7912_v22 = vld [vmem:[%s11530_s7 + $0x120] sm:$0xff] }
  0xd4   :  { %v11606_v1 = vrot.slane %v7882_v55, 1  ;;  %v1127_v51 = vrot.slane %v1115_v35, 2  ;;  %v11608_v23 = vrot.slane %v7887_v47, 2  ;;  %v1161_v37 = vmul.f32 %v5522_v38, %v6496_v57  ;;  %11913 = vst [vmem:[#allocation9_spill] sm:$0xff] %v7912_v22  ;;  %v5534_v42 = vld [vmem:[%s11530_s7 + $0x120] sm:$0xfe] }
  0xd5   :  { %v1484_v29 = vadd.f32 %v1480_v59, %v1471_v17  ;;  %v7902_v41 = vmul.f32 %v7458_v61, %v6496_v57  ;;  %v1195_v15 = vmul.f32 %v5526_v60, %v6532_v6  ;;  %v7907_v46 = vmul.f32 %v7458_v61, %v6532_v6  ;;  %v5538_v59 = vld [vmem:[%s11530_s7 + $0x120] sm:$0xfc] }
  0xd6   :  { %v1095_v38 = vsel %vm85_vm0, %v1093_v33, %v11606_v1  ;;  %v1129_v35 = vsel %vm121_vm2, %v1127_v51, %v11608_v23  ;;  %v1173_v60 = vrot.slane %v1161_v37, 1  ;;  %v1230_v17 = vmul.f32 %v7912_v22, %v6555_v20 }
  0xd7   :  { %v1518_v5 = vadd.f32 %v1508_v39, %v1484_v29  ;;  %v1107_v16 = vadd.f32 %v1095_v38, %v1073_v25  ;;  %v11607_v2 = vrot.slane %v7902_v41, 1  ;;  %v1207_v31 = vrot.slane %v1195_v15, 2  ;;  %v5550_v38 = vld [vmem:[%s11530_s7 + $0xf0] sm:$0xfc] }
  0xd8   :  { %v11613_v33 = vrot.slane %v7907_v46, 2  ;;  %v1242_v1 = vmul.f32 %v5534_v42, %v6558_v21  ;;  %v7938_v51 = vmul.f32 %v7932_v44, %v6558_v21  ;;  %v1276_v37 = vmul.f32 %v5538_v59, %v6599_v11  ;;  %v5546_v42 = vld [vmem:[%s11530_s7 + $0xf0] sm:$0xfe] }
  0xd9   :  { %v1552_v29 = vadd.f32 %v1542_v52, %v1518_v5  ;;  %v1141_v25 = vadd.f32 %v1129_v35, %v1107_v16  ;;  %v1175_v39 = vsel %vm85_vm0, %v1173_v60, %v11607_v2  ;;  %v7946_v15 = vmul.f32 %v7932_v44, %v6599_v11 }
  0xda   :  { %v1209_v16 = vsel %vm121_vm2, %v1207_v31, %v11613_v33  ;;  %v1254_v5 = vrot.slane %v1242_v1, 1  ;;  %v11611_v52 = vrot.slane %v7938_v51, 1  ;;  %v1288_v59 = vrot.slane %v1276_v37, 2 }
  0xdb   :  { %v1556_v35 = vadd.f32 %v1552_v29, %v6386_v26  ;;  %v1153_v60 = vadd.f32 %v1149_v49, %v1141_v25  ;;  %v11612_v2 = vrot.slane %v7946_v15, 2  ;;  %v1322_v23 = vmul.f32 %v11912_v18, %v6406_v30  ;;  %v5558_v49 = vld [vmem:[%s11530_s7 + $0x120] sm:$0xfe] }
  0xdc   :  { %v1256_v12 = vsel %vm85_vm0, %v1254_v5, %v11611_v52  ;;  %v1330_v4 = vmul.f32 %v5546_v42, %v6426_v36  ;;  %v7968_v31 = vmul.f32 %v7458_v61, %v6426_v36  ;;  %v1364_v1 = vmul.f32 %v5550_v38, %v6450_v43  ;;  %v5562_v42 = vld [vmem:[%s11530_s7 + $0x120] sm:$0xfc] }
  0xdd   :  { %v1560_v37 = vmax.f32 %v1556_v35, 0.0  ;;  %v1187_v29 = vadd.f32 %v1175_v39, %v1153_v60  ;;  %v1290_v18 = vsel %vm121_vm2, %v1288_v59, %v11612_v2  ;;  %v7979_v25 = vmul.f32 %v7458_v61, %v6450_v43 }
  0xde   :  { %v1342_v5 = vrot.slane %v1330_v4, 1  ;;  %v11615_v38 = vrot.slane %v7968_v31, 1  ;;  %v1376_v52 = vrot.slane %v1364_v1, 2  ;;  %v1398_v35 = vmul.f32 %v7912_v22, %v6474_v50 }
  0xdf   :  { %v6054_v39 = vpack.c.bf16 %v1560_v37, %v1311_v62  ;;  %v1221_v60 = vadd.f32 %v1209_v16, %v1187_v29  ;;  %v11616_v59 = vrot.slane %v7979_v25, 2  ;;  %v1410_v2 = vmul.f32 %v5558_v49, %v6496_v57  ;;  %v8012_v29 = vld [vmem:[%s11530_s7 + $0x150] sm:$0xff] }
  0xe0   :  { %v1344_v33 = vsel %vm85_vm0, %v1342_v5, %v11615_v38  ;;  %v7996_v4 = vmul.f32 %v7932_v44, %v6496_v57  ;;  %v1444_v1 = vmul.f32 %v5562_v42, %v6532_v6  ;;  %v8001_v9 = vmul.f32 %v7932_v44, %v6532_v6  ;;  %11914 = vst [vmem:[#allocation10_spill] sm:$0xff] %v8012_v29  ;;  %v5574_v42 = vld [vmem:[%s11530_s7 + $0x150] sm:$0xfc] }
  0xe1   :  { %6055 = vmatprep.subr.bf16.mxu0 %v6054_v39  ;;  %v1234_v62 = vadd.f32 %v1230_v17, %v1221_v60  ;;  %v1356_v16 = vadd.f32 %v1344_v33, %v1322_v23  ;;  %v1378_v49 = vsel %vm121_vm2, %v1376_v52, %v11616_v59  ;;  %v1422_v37 = vrot.slane %v1410_v2, 1  ;;  %v8022_v23 = vld [vmem:[%s11530_s7 + $0x160] sm:$0xff] }
  0xe2   :  { %v11622_v5 = vrot.slane %v7996_v4, 1  ;;  %v1456_v38 = vrot.slane %v1444_v1, 2  ;;  %v11621_v17 = vrot.slane %v8001_v9, 2  ;;  %v1479_v2 = vmul.f32 %v8012_v29, %v6555_v20  ;;  %v5513_v1 = vld [vmem:[%s11530_s7 + $0xe8] sm:$0x1] }
  0xe3   :  { %v1268_v33 = vadd.f32 %v1256_v12, %v1234_v62  ;;  %v1390_v52 = vadd.f32 %v1378_v49, %v1356_v16  ;;  %v1491_v39 = vmul.f32 %v5570_v0, %v6558_v21  ;;  %v8029_v60 = vmul.f32 %v8022_v23, %v6558_v21  ;;  %v5517_v62 = vld [vmem:[%s11530_s7 + $0xe8] sm:$0x3] }
  0xe4   :  { %v1424_v59 = vsel %vm85_vm0, %v1422_v37, %v11622_v5  ;;  %v1458_v19 = vsel %vm121_vm2, %v1456_v38, %v11621_v17  ;;  %v1525_v12 = vmul.f32 %v5574_v42, %v6599_v11  ;;  %v8043_v0 = vmul.f32 %v8022_v23, %v6599_v11  ;;  %v5525_v37 = vld [vmem:[%s11530_s7 + $0x118] sm:$0x1] }
  0xe5   :  { %v1302_v16 = vadd.f32 %v1290_v18, %v1268_v33  ;;  %v1402_v49 = vadd.f32 %v1398_v35, %v1390_v52  ;;  %v1503_v3 = vrot.slane %v1491_v39, 1  ;;  %v11626_v29 = vrot.slane %v8029_v60, 1  ;;  %v6195_v17 = vld [vmem:[%s11530_s7 + $0xd8] sm:$0xff] }
  0xe6   :  { %11915 = vst [vmem:[#allocation13_spill] sm:$0xff] %v8043_v0  ;;  %v1537_v38 = vrot.slane %v1525_v12, 2  ;;  %v11628_v42 = vrot.slane %v8043_v0, 2  ;;  %v1076_v5 = vmul.f32 %v6195_v17, %v6406_v30  ;;  %v1086_v22 = vmul.f32 %v5513_v1, %v6426_v36  ;;  %v5529_v18 = vld [vmem:[%s11530_s7 + $0x118] sm:$0x3] }
  0xe7   :  { %v8062_v35 = vadd.f32 %v1302_v16, %v6386_v26  ;;  %v1436_v33 = vadd.f32 %v1424_v59, %v1402_v49  ;;  %v1505_v52 = vsel %vm85_vm0, %v1503_v3, %v11626_v29  ;;  %v1120_v39 = vmul.f32 %v5517_v62, %v6450_v43  ;;  %v5537_v17 = vld [vmem:[%s11530_s7 + $0x148] sm:$0x1] }
  0xe8   :  { %v1539_v1 = vsel %vm121_vm2, %v1537_v38, %v11628_v42  ;;  %v1101_v12 = vrot.slane %v1086_v22, 1  ;;  %v1152_v16 = vmul.f32 %v7276_v27, %v6474_v50  ;;  %v1166_v59 = vmul.f32 %v5525_v37, %v6496_v57  ;;  %v5541_v29 = vld [vmem:[%s11530_s7 + $0x148] sm:$0x3] }
  0xe9   :  { %v1310_v49 = vmax.f32 %v8062_v35, 0.0  ;;  %v1470_v14 = vadd.f32 %v1458_v19, %v1436_v33  ;;  %v1135_v3 = vrot.slane %v1120_v39, 2  ;;  %v1200_v62 = vmul.f32 %v5529_v18, %v6532_v6  ;;  %v5549_v19 = vld [vmem:[%s11530_s7 + $0x118] sm:$0x1] }
  0xea   :  { %v11916_v0 = vrot.slane %v7697_v58, 1  ;;  %v1181_v22 = vrot.slane %v1166_v59, 1  ;;  %v1233_v27 = vmul.f32 %v7753_v40, %v6555_v20  ;;  %v1247_v37 = vmul.f32 %v5537_v17, %v6558_v21  ;;  %v5553_v58 = vld [vmem:[%s11530_s7 + $0x118] sm:$0x3] }
  0xeb   :  { %v1483_v35 = vadd.f32 %v1479_v2, %v1470_v14  ;;  %v11917_v33 = vrot.slane %v7709_v32, 2  ;;  %v1215_v42 = vrot.slane %v1200_v62, 2  ;;  %v1281_v59 = vmul.f32 %v5541_v29, %v6599_v11  ;;  %v6196_v14 = vld [vmem:[%s11530_s7 + $0x108] sm:$0xff] }
  0xec   :  { %v1102_v38 = vsel %vm85_vm0, %v11916_v0, %v1101_v12  ;;  %v11918_v0 = vrot.slane %v7723_v13, 1  ;;  %v1262_v17 = vrot.slane %v1247_v37, 1  ;;  %v1325_v32 = vmul.f32 %v6196_v14, %v6406_v30  ;;  %v5565_v29 = vld [vmem:[%s11530_s7 + $0x148] sm:$0x3] }
  0xed   :  { %v1110_v18 = vadd.f32 %v1102_v38, %v1076_v5  ;;  %v1136_v39 = vsel %vm121_vm2, %v11917_v33, %v1135_v3  ;;  %v5561_v5 = vld [vmem:[%s11530_s7 + $0x148] sm:$0x1]  ;;  %v1517_v2 = vadd.f32 %v1505_v52, %v1483_v35  ;;  %v11919_v62 = vrot.slane %v7736_v10, 2 }
  0xee   :  { %v1182_v12 = vsel %vm85_vm0, %v11918_v0, %v1181_v22  ;;  %v1335_v38 = vmul.f32 %v5549_v19, %v6426_v36  ;;  %v11920_v22 = vrot.slane %v7760_v34, 1  ;;  %v1296_v33 = vrot.slane %v1281_v59, 2  ;;  %v5573_v19 = vld [vmem:[%s11530_s7 + $0x178] sm:$0x1] }
  0xef   :  { %v1144_v3 = vadd.f32 %v1136_v39, %v1110_v18  ;;  %v1216_v13 = vsel %vm121_vm2, %v11919_v62, %v1215_v42  ;;  %v1369_v0 = vmul.f32 %v5553_v58, %v6450_v43  ;;  %v1401_v52 = vmul.f32 %v7753_v40, %v6474_v50 }
  0xf0   :  { %v1263_v37 = vsel %vm85_vm0, %v11920_v22, %v1262_v17  ;;  %v1551_v35 = vadd.f32 %v1539_v1, %v1517_v2  ;;  %v1350_v18 = vrot.slane %v1335_v38, 1  ;;  %v1415_v42 = vmul.f32 %v5561_v5, %v6496_v57  ;;  %v5577_v1 = vld [vmem:[%s11530_s7 + $0x178] sm:$0x3] }
  0xf1   :  { %v1156_v10 = vadd.f32 %v1152_v16, %v1144_v3  ;;  %v11921_v39 = vrot.slane %v7774_v56, 2  ;;  %v1384_v17 = vrot.slane %v1369_v0, 2  ;;  %v1449_v59 = vmul.f32 %v5565_v29, %v6532_v6 }
  0xf2   :  { %v1482_v58 = vmul.f32 %v7838_v7, %v6555_v20  ;;  %v1555_v16 = vadd.f32 %v1551_v35, %v6386_v26  ;;  %v11922_v5 = vrot.slane %v7783_v63, 1  ;;  %v1430_v56 = vrot.slane %v1415_v42, 1 }
  0xf3   :  { %v1297_v34 = vsel %vm121_vm2, %v11921_v39, %v1296_v33  ;;  %v1190_v14 = vadd.f32 %v1182_v12, %v1156_v10  ;;  %v11923_v62 = vrot.slane %v7792_v45, 2  ;;  %v1464_v29 = vrot.slane %v1449_v59, 2  ;;  %v5512_v33 = vld [vmem:[%s11530_s7 + $0xe0] sm:$0x1] }
  0xf4   :  { %v1351_v2 = vsel %vm85_vm0, %v11922_v5, %v1350_v18  ;;  %v1496_v22 = vmul.f32 %v5573_v19, %v6558_v21  ;;  %v1559_v0 = vmax.f32 %v1555_v16, 0.0  ;;  %v11924_v12 = vrot.slane %v7813_v54, 1  ;;  %v5516_v45 = vld [vmem:[%s11530_s7 + $0xe0] sm:$0x3]  ;;  %v5524_v54 = vld [vmem:[%s11530_s7 + $0x110] sm:$0x1] }
  0xf5   :  { %v1359_v3 = vadd.f32 %v1351_v2, %v1325_v32  ;;  %v1385_v38 = vsel %vm121_vm2, %v11923_v62, %v1384_v17  ;;  %v1224_v35 = vadd.f32 %v1216_v13, %v1190_v14  ;;  %v1530_v10 = vmul.f32 %v5577_v1, %v6599_v11  ;;  %v5528_v16 = vld [vmem:[%s11530_s7 + $0x110] sm:$0x3] }
  0xf6   :  { %v1431_v63 = vsel %vm85_vm0, %v11924_v12, %v1430_v56  ;;  %v11925_v18 = vrot.slane %v7828_v28, 2  ;;  %v1511_v19 = vrot.slane %v1496_v22, 1  ;;  %v1075_v39 = vmul.f32 %v7370_v53, %v6406_v30 }
  0xf7   :  { %v1393_v32 = vadd.f32 %v1385_v38, %v1359_v3  ;;  %v6056_v13 = vpack.c.bf16 %v1559_v0, %v1310_v49  ;;  %v1237_v17 = vadd.f32 %v1233_v27, %v1224_v35  ;;  %v1545_v59 = vrot.slane %v1530_v10, 2  ;;  %v5536_v49 = vld [vmem:[%s11530_s7 + $0x140] sm:$0x1] }
  0xf8   :  { %v1465_v42 = vsel %vm121_vm2, %v11925_v18, %v1464_v29  ;;  %v1085_v1 = vmul.f32 %v5512_v33, %v6426_v36  ;;  %v11926_v14 = vrot.slane %v7849_v8, 1  ;;  %v1119_v53 = vmul.f32 %v5516_v45, %v6450_v43  ;;  %v5540_v33 = vld [vmem:[%s11530_s7 + $0x140] sm:$0x3] }
  0xf9   :  { %v1405_v28 = vadd.f32 %v1401_v52, %v1393_v32  ;;  %v1151_v2 = vmul.f32 %v7458_v61, %v6474_v50  ;;  %6057 = vmatpush1.bf16.msra.mxu0 %v6056_v13  ;;  %v1271_v27 = vadd.f32 %v1263_v37, %v1237_v17  ;;  %v11927_v56 = vrot.slane %v7860_v48, 2 }
  0xfa   :  { %v1512_v5 = vsel %vm85_vm0, %v11926_v14, %v1511_v19  ;;  %v1099_v52 = vrot.slane %v1085_v1, 1  ;;  %v1165_v8 = vmul.f32 %v5524_v54, %v6496_v57  ;;  %v1133_v38 = vrot.slane %v1119_v53, 2  ;;  %v5548_v19 = vld [vmem:[%s11530_s7 + $0x110] sm:$0x1] }
  0xfb   :  { %v1546_v3 = vsel %vm121_vm2, %v11927_v56, %v1545_v59  ;;  %v1439_v62 = vadd.f32 %v1431_v63, %v1405_v28  ;;  %v1199_v29 = vmul.f32 %v5528_v16, %v6532_v6  ;;  %v1232_v22 = vmul.f32 %v7932_v44, %v6555_v20  ;;  %v5564_v28 = vld [vmem:[%s11530_s7 + $0x140] sm:$0x3] }
  0xfc   :  { %v1305_v0 = vadd.f32 %v1297_v34, %v1271_v27  ;;  %v11928_v37 = vrot.slane %v7882_v55, 1  ;;  %v1179_v35 = vrot.slane %v1165_v8, 1  ;;  %v1246_v12 = vmul.f32 %v5536_v49, %v6558_v21  ;;  %v5572_v8 = vld [vmem:[%s11530_s7 + $0x170] sm:$0x1] }
  0xfd   :  { %v1473_v10 = vadd.f32 %v1465_v42, %v1439_v62  ;;  %v11929_v45 = vrot.slane %v7887_v47, 2  ;;  %v1213_v18 = vrot.slane %v1199_v29, 2  ;;  %v11930_v55 = vrot.slane %v7902_v41, 1  ;;  %v5552_v47 = vld [vmem:[%s11530_s7 + $0x110] sm:$0x3] }
  0xfe   :  { %v1100_v48 = vsel %vm85_vm0, %v11928_v37, %v1099_v52  ;;  %v1309_v34 = vadd.f32 %v1305_v0, %v6386_v26  ;;  %v1260_v13 = vrot.slane %v1246_v12, 1  ;;  %v1280_v17 = vmul.f32 %v5540_v33, %v6599_v11  ;;  %v5560_v41 = vld [vmem:[%s11530_s7 + $0x140] sm:$0x1] }
  0xff   :  { %v1109_v63 = vadd.f32 %v1100_v48, %v1075_v39  ;;  %v1134_v32 = vsel %vm121_vm2, %v11929_v45, %v1133_v38  ;;  %v1180_v54 = vsel %vm85_vm0, %v11930_v55, %v1179_v35  ;;  %v1486_v42 = vadd.f32 %v1482_v58, %v1473_v10  ;;  %v5576_v48 = vld [vmem:[%s11530_s7 + $0x170] sm:$0x3] }
 0x100   :  { %v11931_v59 = vrot.slane %v7907_v46, 2  ;;  %v1324_v16 = vmul.f32 %v7458_v61, %v6406_v30  ;;  %v1313_v14 = vmax.f32 %v1309_v34, 0.0  ;;  %v11932_v53 = vrot.slane %v7938_v51, 1  ;;  %v5583_v34 = vld [vmem:[%s11530_s7 + $0x128] sm:$0xfe] }
 0x101   :  { %v1143_v39 = vadd.f32 %v1134_v32, %v1109_v63  ;;  %v1294_v49 = vrot.slane %v1280_v17, 2  ;;  %v1334_v46 = vmul.f32 %v5548_v19, %v6426_v36  ;;  %v1520_v27 = vadd.f32 %v1512_v5, %v1486_v42 }
 0x102   :  { %v1214_v1 = vsel %vm121_vm2, %v11931_v59, %v1213_v18  ;;  %v1261_v58 = vsel %vm85_vm0, %v11932_v53, %v1260_v13  ;;  %v1368_v61 = vmul.f32 %v5552_v47, %v6450_v43  ;;  %v1400_v52 = vmul.f32 %v7932_v44, %v6474_v50 }
 0x103   :  { %v1155_v56 = vadd.f32 %v1151_v2, %v1143_v39  ;;  %v11933_v62 = vrot.slane %v7946_v15, 2  ;;  %v1348_v38 = vrot.slane %v1334_v46, 1  ;;  %v1414_v29 = vmul.f32 %v5560_v41, %v6496_v57 }
 0x104   :  { %v1448_v33 = vmul.f32 %v5564_v28, %v6532_v6  ;;  %v1554_v5 = vadd.f32 %v1546_v3, %v1520_v27  ;;  %v1382_v0 = vrot.slane %v1368_v61, 2  ;;  %v1481_v37 = vmul.f32 %v8022_v23, %v6555_v20  ;;  %v11939_v27 = vld [vmem:[#allocation13_spill] sm:$0xff] }
 0x105   :  { %v1295_v51 = vsel %vm121_vm2, %v11933_v62, %v1294_v49  ;;  %v1189_v2 = vadd.f32 %v1180_v54, %v1155_v56  ;;  %v11934_v35 = vrot.slane %v7968_v31, 1  ;;  %v1428_v12 = vrot.slane %v1414_v29, 1  ;;  %v11941_v29 = vld [vmem:[#allocation15_spill] sm:$0xff] }
 0x106   :  { %v1462_v10 = vrot.slane %v1448_v33, 2  ;;  %v1495_v63 = vmul.f32 %v5572_v8, %v6558_v21  ;;  %v1558_v45 = vadd.f32 %v1554_v5, %v6386_v26  ;;  %v11935_v18 = vrot.slane %v7979_v25, 2  ;;  %v5587_v25 = vld [vmem:[%s11530_s7 + $0x128] sm:$0xfc] }
 0x107   :  { %v1349_v15 = vsel %vm85_vm0, %v11934_v35, %v1348_v38  ;;  %v1223_v3 = vadd.f32 %v1214_v1, %v1189_v2  ;;  %v11936_v31 = vrot.slane %v7996_v4, 1  ;;  %v11937_v54 = vrot.slane %v8001_v9, 2 }
 0x108   :  { %v1358_v32 = vadd.f32 %v1349_v15, %v1324_v16  ;;  %v1383_v19 = vsel %vm121_vm2, %v11935_v18, %v1382_v0  ;;  %v1509_v17 = vrot.slane %v1495_v63, 1  ;;  %v1529_v47 = vmul.f32 %v5576_v48, %v6599_v11 }
 0x109   :  { %v1429_v55 = vsel %vm85_vm0, %v11936_v31, %v1428_v12  ;;  %v1463_v13 = vsel %vm121_vm2, %v11937_v54, %v1462_v10  ;;  %v1562_v42 = vmax.f32 %v1558_v45, 0.0  ;;  %v1236_v39 = vadd.f32 %v1232_v22, %v1223_v3  ;;  %v5607_v12 = vld [vmem:[%s11530_s7 + $0x188] sm:$0xfe] }
 0x10a   :  { %v1392_v59 = vadd.f32 %v1383_v19, %v1358_v32  ;;  %v1572_v1 = vmul.f32 %v7744_v24, %v6406_v30  ;;  %v11938_v4 = vrot.slane %v8029_v60, 1  ;;  %v1543_v9 = vrot.slane %v1529_v47, 2  ;;  %v5595_v24 = vld [vmem:[%s11530_s7 + $0x158] sm:$0xfe]  ;;  %v5611_v32 = vld [vmem:[%s11530_s7 + $0x188] sm:$0xfc] }
 0x10b   :  { %v1580_v41 = vmul.f32 %v5583_v34, %v6426_v36  ;;  %v8261_v28 = vmul.f32 %v7753_v40, %v6426_v36  ;;  %v6086_v53 = vpack.c.bf16 %v1562_v42, %v1313_v14  ;;  %v1270_v49 = vadd.f32 %v1261_v58, %v1236_v39  ;;  %v5599_v14 = vld [vmem:[%s11530_s7 + $0x158] sm:$0xfc] }
 0x10c   :  { %v1510_v16 = vsel %vm85_vm0, %v11938_v4, %v1509_v17  ;;  %v1404_v46 = vadd.f32 %v1400_v52, %v1392_v59  ;;  %v1614_v22 = vmul.f32 %v5587_v25, %v6450_v43  ;;  %v11940_v60 = vrot.slane %v11939_v27, 2  ;;  %v8317_v17 = vld [vmem:[%s11530_s7 + $0x198] sm:$0xff] }
 0x10d   :  { %v1594_v61 = vrot.slane %v1580_v41, 1  ;;  %v11647_v8 = vrot.slane %v8261_v28, 1  ;;  %v8273_v62 = vmul.f32 %v7753_v40, %v6450_v43  ;;  %6087 = vmatprep.subr.bf16.mxu1 %v6086_v53  ;;  %v1304_v58 = vadd.f32 %v1295_v51, %v1270_v49  ;;  %v5623_v4 = vld [vmem:[%s11530_s7 + $0x158] sm:$0xfc] }
 0x10e   :  { %v1544_v56 = vsel %vm121_vm2, %v11940_v60, %v1543_v9  ;;  %v1438_v52 = vadd.f32 %v1429_v55, %v1404_v46  ;;  %v1628_v38 = vrot.slane %v1614_v22, 2  ;;  %v1648_v33 = vmul.f32 %v11941_v29, %v6474_v50  ;;  %v8308_v55 = vld [vmem:[%s11530_s7 + $0x188] sm:$0xff] }
 0x10f   :  { %v1596_v5 = vsel %vm85_vm0, %v1594_v61, %v11647_v8  ;;  %v11646_v2 = vrot.slane %v8273_v62, 2  ;;  %v1660_v40 = vmul.f32 %v5595_v24, %v6496_v57  ;;  %v8287_v0 = vmul.f32 %v7838_v7, %v6496_v57  ;;  %11942 = vst [vmem:[#allocation14_spill] sm:$0xff] %v8308_v55 }
 0x110   :  { %v1308_v48 = vadd.f32 %v1304_v58, %v6386_v26  ;;  %v1472_v51 = vadd.f32 %v1463_v13, %v1438_v52  ;;  %v1606_v35 = vadd.f32 %v1596_v5, %v1572_v1  ;;  %v1694_v15 = vmul.f32 %v5599_v14, %v6532_v6  ;;  %v5619_v1 = vld [vmem:[%s11530_s7 + $0x158] sm:$0xfe] }
 0x111   :  { %v1630_v10 = vsel %vm121_vm2, %v1628_v38, %v11646_v2  ;;  %v1674_v63 = vrot.slane %v1660_v40, 1  ;;  %v11645_v45 = vrot.slane %v8287_v0, 1  ;;  %v8300_v3 = vmul.f32 %v7838_v7, %v6532_v6 }
 0x112   :  { %v1312_v18 = vmax.f32 %v1308_v48, 0.0  ;;  %v1485_v19 = vadd.f32 %v1481_v37, %v1472_v51  ;;  %v1640_v34 = vadd.f32 %v1630_v10, %v1606_v35  ;;  %v1708_v31 = vrot.slane %v1694_v15, 2 }
 0x113   :  { %v1676_v54 = vsel %vm85_vm0, %v1674_v63, %v11645_v45  ;;  %v11640_v13 = vrot.slane %v8300_v3, 2  ;;  %v1729_v37 = vmul.f32 %v8308_v55, %v6555_v20  ;;  %v1741_v47 = vmul.f32 %v5607_v12, %v6558_v21 }
 0x114   :  { %v1519_v25 = vadd.f32 %v1510_v16, %v1485_v19  ;;  %v1652_v42 = vadd.f32 %v1648_v33, %v1640_v34  ;;  %v8324_v39 = vmul.f32 %v8317_v17, %v6558_v21  ;;  %v1775_v59 = vmul.f32 %v5611_v32, %v6599_v11  ;;  %v5635_v33 = vld [vmem:[%s11530_s7 + $0x188] sm:$0xfc] }
 0x115   :  { %v1710_v9 = vsel %vm121_vm2, %v1708_v31, %v11640_v13  ;;  %v1755_v16 = vrot.slane %v1741_v47, 1  ;;  %v8338_v41 = vmul.f32 %v8317_v17, %v6599_v11  ;;  %v1821_v53 = vmul.f32 %v11941_v29, %v6406_v30  ;;  %v5631_v29 = vld [vmem:[%s11530_s7 + $0x188] sm:$0xfe]  ;;  %v8383_v31 = vld [vmem:[%s11530_s7 + $0x1b8] sm:$0xff] }
 0x116   :  { %v1553_v49 = vadd.f32 %v1544_v56, %v1519_v25  ;;  %v1686_v46 = vadd.f32 %v1676_v54, %v1652_v42  ;;  %v11639_v22 = vrot.slane %v8324_v39, 1  ;;  %v1789_v24 = vrot.slane %v1775_v59, 2  ;;  %11943 = vst [vmem:[#allocation8_spill] sm:$0xff] %v8383_v31  ;;  %v5643_v54 = vld [vmem:[%s11530_s7 + $0x1b8] sm:$0xfe]  ;;  %v8394_v59 = vld [vmem:[%s11530_s7 + $0x1c8] sm:$0xff] }
 0x117   :  { %v11635_v27 = vrot.slane %v8338_v41, 2  ;;  %v1829_v60 = vmul.f32 %v5619_v1, %v6426_v36  ;;  %v8347_v61 = vmul.f32 %v7838_v7, %v6426_v36  ;;  %v1863_v14 = vmul.f32 %v5623_v4, %v6450_v43  ;;  %v5647_v1 = vld [vmem:[%s11530_s7 + $0x1b8] sm:$0xfc] }
 0x118   :  { %v1557_v58 = vadd.f32 %v1553_v49, %v6386_v26  ;;  %v1720_v52 = vadd.f32 %v1710_v9, %v1686_v46  ;;  %v1757_v56 = vsel %vm85_vm0, %v1755_v16, %v11639_v22  ;;  %v8356_v38 = vmul.f32 %v7838_v7, %v6450_v43 }
 0x119   :  { %v1791_v5 = vsel %vm121_vm2, %v1789_v24, %v11635_v27  ;;  %v1843_v40 = vrot.slane %v1829_v60, 1  ;;  %v11634_v48 = vrot.slane %v8347_v61, 1  ;;  %v1877_v51 = vrot.slane %v1863_v14, 2  ;;  %v8496_v27 = vld [vmem:[%s11530_s7 + $0x190] sm:$0xff] }
 0x11a   :  { %v1561_v35 = vmax.f32 %v1557_v58, 0.0  ;;  %v1733_v15 = vadd.f32 %v1729_v37, %v1720_v52  ;;  %v11633_v12 = vrot.slane %v8356_v38, 2  ;;  %v1897_v10 = vmul.f32 %v8308_v55, %v6474_v50 }
 0x11b   :  { %v1845_v63 = vsel %vm85_vm0, %v1843_v40, %v11634_v48  ;;  %v1909_v32 = vmul.f32 %v5631_v29, %v6496_v57  ;;  %v8377_v19 = vmul.f32 %v8317_v17, %v6496_v57  ;;  %v1943_v34 = vmul.f32 %v5635_v33, %v6532_v6 }
 0x11c   :  { %v6088_v37 = vpack.c.bf16 %v1561_v35, %v1312_v18  ;;  %v1767_v47 = vadd.f32 %v1757_v56, %v1733_v15  ;;  %v1855_v25 = vadd.f32 %v1845_v63, %v1821_v53  ;;  %v1879_v42 = vsel %vm121_vm2, %v1877_v51, %v11633_v12  ;;  %v5582_v56 = vld [vmem:[%s11530_s7 + $0x120] sm:$0xfe] }
 0x11d   :  { %v1923_v4 = vrot.slane %v1909_v32, 1  ;;  %v11632_v9 = vrot.slane %v8377_v19, 1  ;;  %v8402_v18 = vmul.f32 %v8317_v17, %v6532_v6  ;;  %v1957_v16 = vrot.slane %v1943_v34, 2  ;;  %v5586_v51 = vld [vmem:[%s11530_s7 + $0x120] sm:$0xfc]  ;;  %v11944_v32 = vld [vmem:[#allocation9_spill] sm:$0xff] }
 0x11e   :  { %6089 = vmatpush1.bf16.msra.mxu1 %v6088_v37  ;;  %v1801_v53 = vadd.f32 %v1791_v5, %v1767_v47  ;;  %v1889_v49 = vadd.f32 %v1879_v42, %v1855_v25  ;;  %v1978_v46 = vmul.f32 %v8383_v31, %v6555_v20  ;;  %v1990_v24 = vmul.f32 %v5643_v54, %v6558_v21  ;;  %v5594_v25 = vld [vmem:[%s11530_s7 + $0x150] sm:$0xfe] }
 0x11f   :  { %v1925_v60 = vsel %vm85_vm0, %v1923_v4, %v11632_v9  ;;  %v11630_v14 = vrot.slane %v8402_v18, 2  ;;  %v8413_v58 = vmul.f32 %v8394_v59, %v6558_v21  ;;  %v2024_v52 = vmul.f32 %v5647_v1, %v6599_v11 }
 0x120   :  { %v8420_v29 = vadd.f32 %v1801_v53, %v6386_v26  ;;  %v1901_v33 = vadd.f32 %v1897_v10, %v1889_v49  ;;  %v2004_v5 = vrot.slane %v1990_v24, 1  ;;  %v8424_v40 = vmul.f32 %v8394_v59, %v6599_v11  ;;  %v5598_v53 = vld [vmem:[%s11530_s7 + $0x150] sm:$0xfc] }
 0x121   :  { %v1959_v35 = vsel %vm121_vm2, %v1957_v16, %v11630_v14  ;;  %v11629_v15 = vrot.slane %v8413_v58, 1  ;;  %v2038_v63 = vrot.slane %v2024_v52, 2  ;;  %v1571_v34 = vmul.f32 %v11944_v32, %v6406_v30  ;;  %v11945_v52 = vld [vmem:[#allocation10_spill] sm:$0xff] }
 0x122   :  { %v1809_v10 = vmax.f32 %v8420_v29, 0.0  ;;  %v1935_v54 = vadd.f32 %v1925_v60, %v1901_v33  ;;  %v11631_v37 = vrot.slane %v8424_v40, 2  ;;  %v1579_v47 = vmul.f32 %v5582_v56, %v6426_v36 }
 0x123   :  { %v2006_v42 = vsel %vm85_vm0, %v2004_v5, %v11629_v15  ;;  %v8446_v1 = vmul.f32 %v7932_v44, %v6426_v36  ;;  %v1613_v4 = vmul.f32 %v5586_v51, %v6450_v43  ;;  %v8451_v16 = vmul.f32 %v7932_v44, %v6450_v43 }
 0x124   :  { %v1969_v49 = vadd.f32 %v1959_v35, %v1935_v54  ;;  %v2040_v24 = vsel %vm121_vm2, %v2038_v63, %v11631_v37  ;;  %v1591_v60 = vrot.slane %v1579_v47, 1  ;;  %v1647_v56 = vmul.f32 %v11945_v52, %v6474_v50  ;;  %v8476_v54 = vld [vmem:[%s11530_s7 + $0x180] sm:$0xff] }
 0x125   :  { %v11636_v33 = vrot.slane %v8446_v1, 1  ;;  %v1625_v5 = vrot.slane %v1613_v4, 2  ;;  %v11638_v51 = vrot.slane %v8451_v16, 2  ;;  %v1659_v32 = vmul.f32 %v5594_v25, %v6496_v57  ;;  %11946 = vst [vmem:[#allocation11_spill] sm:$0xff] %v8476_v54  ;;  %v5606_v47 = vld [vmem:[%s11530_s7 + $0x180] sm:$0xfe] }
 0x126   :  { %v1982_v15 = vadd.f32 %v1978_v46, %v1969_v49  ;;  %v8466_v14 = vmul.f32 %v8022_v23, %v6496_v57  ;;  %v1693_v35 = vmul.f32 %v5598_v53, %v6532_v6  ;;  %v8471_v63 = vmul.f32 %v8022_v23, %v6532_v6  ;;  %v5610_v46 = vld [vmem:[%s11530_s7 + $0x180] sm:$0xfc] }
 0x127   :  { %v1593_v25 = vsel %vm85_vm0, %v1591_v60, %v11636_v33  ;;  %v1627_v4 = vsel %vm121_vm2, %v1625_v5, %v11638_v51  ;;  %v1671_v53 = vrot.slane %v1659_v32, 1  ;;  %v1728_v49 = vmul.f32 %v8476_v54, %v6555_v20 }
 0x128   :  { %v2016_v37 = vadd.f32 %v2006_v42, %v1982_v15  ;;  %v1605_v9 = vadd.f32 %v1593_v25, %v1571_v34  ;;  %v11637_v12 = vrot.slane %v8466_v14, 1  ;;  %v1705_v48 = vrot.slane %v1693_v35, 2  ;;  %v5622_v25 = vld [vmem:[%s11530_s7 + $0x150] sm:$0xfc] }
 0x129   :  { %v11643_v60 = vrot.slane %v8471_v63, 2  ;;  %v1740_v33 = vmul.f32 %v5606_v47, %v6558_v21  ;;  %v8502_v5 = vmul.f32 %v8496_v27, %v6558_v21  ;;  %v1774_v32 = vmul.f32 %v5610_v46, %v6599_v11  ;;  %v5618_v47 = vld [vmem:[%s11530_s7 + $0x150] sm:$0xfe] }
 0x12a   :  { %v2050_v15 = vadd.f32 %v2040_v24, %v2016_v37  ;;  %v1639_v34 = vadd.f32 %v1627_v4, %v1605_v9  ;;  %v1673_v42 = vsel %vm85_vm0, %v1671_v53, %v11637_v12  ;;  %v8510_v35 = vmul.f32 %v8496_v27, %v6599_v11 }
 0x12b   :  { %v1707_v9 = vsel %vm121_vm2, %v1705_v48, %v11643_v60  ;;  %v1752_v37 = vrot.slane %v1740_v33, 1  ;;  %v11641_v24 = vrot.slane %v8502_v5, 1  ;;  %v1786_v46 = vrot.slane %v1774_v32, 2  ;;  %v8558_v60 = vld [vmem:[%s11530_s7 + $0x1b0] sm:$0xff] }
 0x12c   :  { %v2054_v4 = vadd.f32 %v2050_v15, %v6386_v26  ;;  %v1651_v53 = vadd.f32 %v1647_v56, %v1639_v34  ;;  %v11642_v12 = vrot.slane %v8510_v35, 2  ;;  %v1820_v51 = vmul.f32 %v11945_v52, %v6406_v30  ;;  %v5630_v56 = vld [vmem:[%s11530_s7 + $0x180] sm:$0xfe]  ;;  %11947 = vst [vmem:[#allocation16_spill] sm:$0xff] %v8558_v60 }
 0x12d   :  { %v1754_v22 = vsel %vm85_vm0, %v1752_v37, %v11641_v24  ;;  %v1828_v13 = vmul.f32 %v5618_v47, %v6426_v36  ;;  %v8532_v48 = vmul.f32 %v8022_v23, %v6426_v36  ;;  %v1862_v33 = vmul.f32 %v5622_v25, %v6450_v43  ;;  %v5634_v47 = vld [vmem:[%s11530_s7 + $0x180] sm:$0xfc] }
 0x12e   :  { %v2058_v32 = vmax.f32 %v2054_v4, 0.0  ;;  %v1685_v15 = vadd.f32 %v1673_v42, %v1651_v53  ;;  %v1788_v52 = vsel %vm121_vm2, %v1786_v46, %v11642_v12  ;;  %v8543_v34 = vmul.f32 %v8022_v23, %v6450_v43 }
 0x12f   :  { %v1840_v37 = vrot.slane %v1828_v13, 1  ;;  %v11644_v25 = vrot.slane %v8532_v48, 1  ;;  %v1874_v24 = vrot.slane %v1862_v33, 2  ;;  %v1896_v4 = vmul.f32 %v8476_v54, %v6474_v50 }
 0x130   :  { %v6058_v42 = vpack.c.bf16 %v2058_v32, %v1809_v10  ;;  %v1719_v53 = vadd.f32 %v1707_v9, %v1685_v15  ;;  %v11649_v46 = vrot.slane %v8543_v34, 2  ;;  %v1908_v12 = vmul.f32 %v5630_v56, %v6496_v57  ;;  %v8575_v9 = vld [vmem:[%s11530_s7 + $0x1c0] sm:$0xff]  ;;  %v5642_v56 = vld [vmem:[%s11530_s7 + $0x1b0] sm:$0xfe] }
 0x131   :  { %v1842_v13 = vsel %vm85_vm0, %v1840_v37, %v11644_v25  ;;  %v8565_v33 = vmul.f32 %v8496_v27, %v6496_v57  ;;  %v1942_v29 = vmul.f32 %v5634_v47, %v6532_v6  ;;  %v8570_v10 = vmul.f32 %v8496_v27, %v6532_v6  ;;  %v5646_v25 = vld [vmem:[%s11530_s7 + $0x1b0] sm:$0xfc] }
 0x132   :  { %6059 = vmatprep.subr.bf16.mxu0 %v6058_v42  ;;  %v1732_v32 = vadd.f32 %v1728_v49, %v1719_v53  ;;  %v1854_v15 = vadd.f32 %v1842_v13, %v1820_v51  ;;  %v1876_v47 = vsel %vm121_vm2, %v1874_v24, %v11649_v46  ;;  %v1920_v37 = vrot.slane %v1908_v12, 1  ;;  %v5585_v12 = vld [vmem:[%s11530_s7 + $0x148] sm:$0x1] }
 0x133   :  { %v11651_v45 = vrot.slane %v8565_v33, 1  ;;  %v1954_v2 = vrot.slane %v1942_v29, 2  ;;  %v11650_v8 = vrot.slane %v8570_v10, 2  ;;  %v1977_v54 = vmul.f32 %v8558_v60, %v6555_v20 }
 0x134   :  { %v1766_v42 = vadd.f32 %v1754_v22, %v1732_v32  ;;  %v1888_v49 = vadd.f32 %v1876_v47, %v1854_v15  ;;  %v1989_v51 = vmul.f32 %v5642_v56, %v6558_v21  ;;  %v8593_v24 = vmul.f32 %v8575_v9, %v6558_v21  ;;  %v5589_v56 = vld [vmem:[%s11530_s7 + $0x148] sm:$0x3] }
 0x135   :  { %v1922_v53 = vsel %vm85_vm0, %v1920_v37, %v11651_v45  ;;  %v1956_v13 = vsel %vm121_vm2, %v1954_v2, %v11650_v8  ;;  %v2023_v22 = vmul.f32 %v5646_v25, %v6599_v11  ;;  %v8607_v29 = vmul.f32 %v8575_v9, %v6599_v11  ;;  %v5597_v37 = vld [vmem:[%s11530_s7 + $0x178] sm:$0x1] }
 0x136   :  { %v1800_v32 = vadd.f32 %v1788_v52, %v1766_v42  ;;  %v1900_v15 = vadd.f32 %v1896_v4, %v1888_v49  ;;  %v2001_v47 = vrot.slane %v1989_v51, 1  ;;  %v11656_v46 = vrot.slane %v8593_v24, 1  ;;  %v6197_v8 = vld [vmem:[%s11530_s7 + $0x138] sm:$0xff] }
 0x137   :  { %11948 = vst [vmem:[#allocation12_spill] sm:$0xff] %v8607_v29  ;;  %v2035_v2 = vrot.slane %v2023_v22, 2  ;;  %v11658_v25 = vrot.slane %v8607_v29, 2  ;;  %v1574_v45 = vmul.f32 %v6197_v8, %v6406_v30  ;;  %v1584_v60 = vmul.f32 %v5585_v12, %v6426_v36  ;;  %v5601_v52 = vld [vmem:[%s11530_s7 + $0x178] sm:$0x3] }
 0x138   :  { %v8626_v4 = vadd.f32 %v1800_v32, %v6386_v26  ;;  %v1934_v42 = vadd.f32 %v1922_v53, %v1900_v15  ;;  %v2003_v49 = vsel %vm85_vm0, %v2001_v47, %v11656_v46  ;;  %v1618_v51 = vmul.f32 %v5589_v56, %v6450_v43  ;;  %v5609_v8 = vld [vmem:[%s11530_s7 + $0x1a8] sm:$0x1] }
 0x139   :  { %v2037_v12 = vsel %vm121_vm2, %v2035_v2, %v11658_v25  ;;  %v1599_v22 = vrot.slane %v1584_v60, 1  ;;  %v1650_v32 = vmul.f32 %v7838_v7, %v6474_v50  ;;  %v1664_v53 = vmul.f32 %v5597_v37, %v6496_v57  ;;  %v5613_v46 = vld [vmem:[%s11530_s7 + $0x1a8] sm:$0x3] }
 0x13a   :  { %v1808_v15 = vmax.f32 %v8626_v4, 0.0  ;;  %v1968_v31 = vadd.f32 %v1956_v13, %v1934_v42  ;;  %v1633_v47 = vrot.slane %v1618_v51, 2  ;;  %v1698_v56 = vmul.f32 %v5601_v52, %v6532_v6  ;;  %v5621_v13 = vld [vmem:[%s11530_s7 + $0x178] sm:$0x1] }
 0x13b   :  { %v11949_v55 = vrot.slane %v8261_v28, 1  ;;  %v1679_v60 = vrot.slane %v1664_v53, 1  ;;  %v1731_v25 = vmul.f32 %v8317_v17, %v6555_v20  ;;  %v1745_v37 = vmul.f32 %v5609_v8, %v6558_v21  ;;  %v5625_v28 = vld [vmem:[%s11530_s7 + $0x178] sm:$0x3] }
 0x13c   :  { %v1981_v4 = vadd.f32 %v1977_v54, %v1968_v31  ;;  %v11950_v42 = vrot.slane %v8273_v62, 2  ;;  %v1713_v29 = vrot.slane %v1698_v56, 2  ;;  %v1779_v53 = vmul.f32 %v5613_v46, %v6599_v11  ;;  %v5633_v62 = vld [vmem:[%s11530_s7 + $0x1a8] sm:$0x1] }
 0x13d   :  { %v1600_v2 = vsel %vm85_vm0, %v11949_v55, %v1599_v22  ;;  %v11951_v55 = vrot.slane %v8287_v0, 1  ;;  %v1760_v8 = vrot.slane %v1745_v37, 1  ;;  %v1823_v31 = vmul.f32 %v7838_v7, %v6406_v30 }
 0x13e   :  { %v1608_v52 = vadd.f32 %v1600_v2, %v1574_v45  ;;  %v1634_v51 = vsel %vm121_vm2, %v11950_v42, %v1633_v47  ;;  %v2015_v45 = vadd.f32 %v2003_v49, %v1981_v4  ;;  %v11952_v47 = vrot.slane %v8300_v3, 2  ;;  %v5637_v2 = vld [vmem:[%s11530_s7 + $0x1a8] sm:$0x3] }
 0x13f   :  { %v1680_v22 = vsel %vm85_vm0, %v11951_v55, %v1679_v60  ;;  %v1833_v0 = vmul.f32 %v5621_v13, %v6426_v36  ;;  %v11953_v46 = vrot.slane %v8324_v39, 1  ;;  %v1794_v60 = vrot.slane %v1779_v53, 2  ;;  %v5645_v13 = vld [vmem:[%s11530_s7 + $0x1d8] sm:$0x1] }
 0x140   :  { %v1642_v54 = vadd.f32 %v1634_v51, %v1608_v52  ;;  %v1714_v56 = vsel %vm121_vm2, %v11952_v47, %v1713_v29  ;;  %v1867_v37 = vmul.f32 %v5625_v28, %v6450_v43  ;;  %v1899_v49 = vmul.f32 %v8317_v17, %v6474_v50 }
 0x141   :  { %v1761_v7 = vsel %vm85_vm0, %v11953_v46, %v1760_v8  ;;  %v2049_v4 = vadd.f32 %v2037_v12, %v2015_v45  ;;  %v1848_v52 = vrot.slane %v1833_v0, 1  ;;  %v1913_v29 = vmul.f32 %v5633_v62, %v6496_v57  ;;  %v5649_v12 = vld [vmem:[%s11530_s7 + $0x1d8] sm:$0x3]  ;;  %v5584_v46 = vld [vmem:[%s11530_s7 + $0x140] sm:$0x1] }
 0x142   :  { %v1654_v3 = vadd.f32 %v1650_v32, %v1642_v54  ;;  %v11954_v42 = vrot.slane %v8338_v41, 2  ;;  %v1882_v51 = vrot.slane %v1867_v37, 2  ;;  %v1947_v55 = vmul.f32 %v5637_v2, %v6532_v6 }
 0x143   :  { %v1980_v28 = vmul.f32 %v8394_v59, %v6555_v20  ;;  %v2053_v32 = vadd.f32 %v2049_v4, %v6386_v26  ;;  %v11955_v53 = vrot.slane %v8347_v61, 1  ;;  %v1928_v41 = vrot.slane %v1913_v29, 1 }
 0x144   :  { %v1795_v39 = vsel %vm121_vm2, %v11954_v42, %v1794_v60  ;;  %v1688_v8 = vadd.f32 %v1680_v22, %v1654_v3  ;;  %v11956_v54 = vrot.slane %v8356_v38, 2  ;;  %v1962_v0 = vrot.slane %v1947_v55, 2  ;;  %v5588_v38 = vld [vmem:[%s11530_s7 + $0x140] sm:$0x3] }
 0x145   :  { %v1849_v62 = vsel %vm85_vm0, %v11955_v53, %v1848_v52  ;;  %v1994_v2 = vmul.f32 %v5645_v13, %v6558_v21  ;;  %v2057_v60 = vmax.f32 %v2053_v32, 0.0  ;;  %v11957_v22 = vrot.slane %v8377_v19, 1  ;;  %v5596_v19 = vld [vmem:[%s11530_s7 + $0x170] sm:$0x1] }
 0x146   :  { %v1857_v45 = vadd.f32 %v1849_v62, %v1823_v31  ;;  %v1883_v47 = vsel %vm121_vm2, %v11956_v54, %v1882_v51  ;;  %v1722_v37 = vadd.f32 %v1714_v56, %v1688_v8  ;;  %v2028_v4 = vmul.f32 %v5649_v12, %v6599_v11  ;;  %v5600_v12 = vld [vmem:[%s11530_s7 + $0x170] sm:$0x3] }
 0x147   :  { %v1929_v61 = vsel %vm85_vm0, %v11957_v22, %v1928_v41  ;;  %v11958_v3 = vrot.slane %v8402_v18, 2  ;;  %v2009_v29 = vrot.slane %v1994_v2, 1  ;;  %v1573_v13 = vmul.f32 %v7932_v44, %v6406_v30 }
 0x148   :  { %v1891_v31 = vadd.f32 %v1883_v47, %v1857_v45  ;;  %v6060_v56 = vpack.c.bf16 %v2057_v60, %v1808_v15  ;;  %v1735_v42 = vadd.f32 %v1731_v25, %v1722_v37  ;;  %v2043_v51 = vrot.slane %v2028_v4, 2  ;;  %v5608_v25 = vld [vmem:[%s11530_s7 + $0x1a0] sm:$0x1] }
 0x149   :  { %v1963_v52 = vsel %vm121_vm2, %v11958_v3, %v1962_v0  ;;  %v1583_v55 = vmul.f32 %v5584_v46, %v6426_v36  ;;  %v11959_v32 = vrot.slane %v8413_v58, 1  ;;  %v1617_v44 = vmul.f32 %v5588_v38, %v6450_v43  ;;  %v8742_v45 = vld [vmem:[%s11525_s2] sm:$0xf] }
 0x14a   :  { %v1903_v18 = vadd.f32 %v1899_v49, %v1891_v31  ;;  %v1649_v53 = vmul.f32 %v8022_v23, %v6474_v50  ;;  %6061 = vmatpush1.bf16.msra.mxu0 %v6060_v56  ;;  %v1769_v15 = vadd.f32 %v1761_v7, %v1735_v42  ;;  %v11960_v62 = vrot.slane %v8424_v40, 2  ;;  %v5612_v40 = vld [vmem:[%s11530_s7 + $0x1a0] sm:$0x3] }
 0x14b   :  { %v2010_v8 = vsel %vm85_vm0, %v11959_v32, %v2009_v29  ;;  %v1597_v49 = vrot.slane %v1583_v55, 1  ;;  %v1663_v58 = vmul.f32 %v5596_v19, %v6496_v57  ;;  %v1631_v47 = vrot.slane %v1617_v44, 2  ;;  %v5620_v29 = vld [vmem:[%s11530_s7 + $0x170] sm:$0x1]  ;;  %v5636_v32 = vld [vmem:[%s11530_s7 + $0x1a0] sm:$0x3] }
 0x14c   :  { %v2044_v41 = vsel %vm121_vm2, %v11960_v62, %v2043_v51  ;;  %v1937_v54 = vadd.f32 %v1929_v61, %v1903_v18  ;;  %v1697_v0 = vmul.f32 %v5600_v12, %v6532_v6  ;;  %v8747_v2 = vmul.f32 %v8496_v27, %v6555_v20  ;;  %v5624_v19 = vld [vmem:[%s11530_s7 + $0x170] sm:$0x3]  ;;  %v5632_v18 = vld [vmem:[%s11530_s7 + $0x1a0] sm:$0x1] }
 0x14d   :  { %v1803_v7 = vadd.f32 %v1795_v39, %v1769_v15  ;;  %v11961_v46 = vrot.slane %v8446_v1, 1  ;;  %v1677_v37 = vrot.slane %v1663_v58, 1  ;;  %v1744_v22 = vmul.f32 %v5608_v25, %v6558_v21  ;;  %5940 = vmatmul.mubr.msk.f32.vlgmr.msra.gmra.mrb[0].mxu0 %vm4095_vm1, %v8742_v45 }
 0x14e   :  { %v1971_v61 = vadd.f32 %v1963_v52, %v1937_v54  ;;  %v11962_v38 = vrot.slane %v8451_v16, 2  ;;  %v1711_v3 = vrot.slane %v1697_v0, 2  ;;  %v11963_v39 = vrot.slane %v8466_v14, 1  ;;  %v5644_v54 = vld [vmem:[%s11530_s7 + $0x1d0] sm:$0x1] }
 0x14f   :  { %v1598_v60 = vsel %vm85_vm0, %v11961_v46, %v1597_v49  ;;  %v8765_v1 = vadd.f32 %v1803_v7, %v6386_v26  ;;  %v1778_v16 = vmul.f32 %v5612_v40, %v6599_v11  ;;  %v11964_v56 = vmov 0.0  }
 0x150   :  { %v1607_v4 = vadd.f32 %v1598_v60, %v1573_v13  ;;  %v1632_v31 = vsel %vm121_vm2, %v11962_v38, %v1631_v47  ;;  %v1678_v52 = vsel %vm85_vm0, %v11963_v39, %v1677_v37  ;;  %v1758_v13 = vrot.slane %v1744_v22, 1  ;;  %4520 = vmatprep.mubr.f32.mxu0 %v11964_v56  ;;  %v5648_v37 = vld [vmem:[%s11530_s7 + $0x1d0] sm:$0x3]  ;;  %v8817_v22 = vld [vmem:[%s11531_s8 + $0x118] sm:$0xff] }
 0x151   :  { %v1984_v42 = vadd.f32 %v1980_v28, %v1971_v61  ;;  %v11965_v55 = vrot.slane %v8471_v63, 2  ;;  %v1822_v14 = vmul.f32 %v8022_v23, %v6406_v30  ;;  %v1811_v44 = vmax.f32 %v8765_v1, 0.0 }
 0x152   :  { %v1641_v51 = vadd.f32 %v1632_v31, %v1607_v4  ;;  %v11966_v28 = vrot.slane %v8502_v5, 1  ;;  %v1792_v63 = vrot.slane %v1778_v16, 2  ;;  %v1832_v15 = vmul.f32 %v5620_v29, %v6426_v36  ;;  %v8831_v29 = vld [vmem:[%s11531_s8 + $0x110] sm:$0xff] }
 0x153   :  { %v1712_v12 = vsel %vm121_vm2, %v11965_v55, %v1711_v3  ;;  %v2018_v62 = vadd.f32 %v2010_v8, %v1984_v42  ;;  %v1866_v23 = vmul.f32 %v5624_v19, %v6450_v43  ;;  %v1898_v58 = vmul.f32 %v8496_v27, %v6474_v50  ;;  %v8826_v3 = vld [vmem:[%s11531_s8 + $0x100] sm:$0xff]  ;;  %v8845_v19 = vld [vmem:[%s11531_s8 + $0x138] sm:$0xff] }
 0x154   :  { %v1759_v25 = vsel %vm85_vm0, %v11966_v28, %v1758_v13  ;;  %v1653_v49 = vadd.f32 %v1649_v53, %v1641_v51  ;;  %v11967_v47 = vrot.slane %v8510_v35, 2  ;;  %v1846_v0 = vrot.slane %v1832_v15, 1  ;;  %v8812_v35 = vld [vmem:[%s11531_s8 + $0x108] sm:$0xff]  ;;  %v8850_v42 = vld [vmem:[%s11531_s8 + $0x120] sm:$0xff]  ;;  %v8855_v51 = vld [vmem:[%s11531_s8 + $0x130] sm:$0xff] }
 0x155   :  { %v1912_v40 = vmul.f32 %v5632_v18, %v6496_v57  ;;  %v1946_v7 = vmul.f32 %v5636_v32, %v6532_v6  ;;  %v2052_v8 = vadd.f32 %v2044_v41, %v2018_v62  ;;  %v1880_v46 = vrot.slane %v1866_v23, 2  ;;  %v8867_v28 = vld [vmem:[%s11531_s8 + $0x148] sm:$0xff]  ;;  %v8885_v23 = vld [vmem:[%s11531_s8 + $0x150] sm:$0xff] }
 0x156   :  { %v1793_v5 = vsel %vm121_vm2, %v11967_v47, %v1792_v63  ;;  %v1687_v53 = vadd.f32 %v1678_v52, %v1653_v49  ;;  %v8804_v60 = vmul.f32 %v8575_v9, %v6555_v20  ;;  %v11968_v41 = vrot.slane %v8532_v48, 1  ;;  %v8836_v48 = vld [vmem:[%s11531_s8 + $0x128] sm:$0xff]  ;;  %v8872_v63 = vld [vmem:[%s11531_s8 + $0x158] sm:$0xff] }
 0x157   :  { %v1926_v4 = vrot.slane %v1912_v40, 1  ;;  %v1960_v38 = vrot.slane %v1946_v7, 2  ;;  %v1993_v31 = vmul.f32 %v5644_v54, %v6558_v21  ;;  %v2056_v1 = vadd.f32 %v2052_v8, %v6386_v26  ;;  %v8890_v54 = vld [vmem:[%s11531_s8 + $0x168] sm:$0xff]  ;;  %v8895_v47 = vld [vmem:[%s11531_s8 + $0x178] sm:$0xff] }
 0x158   :  { %v1847_v61 = vsel %vm85_vm0, %v11968_v41, %v1846_v0  ;;  %v1721_v39 = vadd.f32 %v1712_v12, %v1687_v53  ;;  %v11969_v13 = vrot.slane %v8543_v34, 2  ;;  %v11970_v55 = vrot.slane %v8565_v33, 1  ;;  %v8877_v33 = vld [vmem:[%s11531_s8 + $0x140] sm:$0xff] }
 0x159   :  { %v1856_v52 = vadd.f32 %v1847_v61, %v1822_v14  ;;  %v11971_v12 = vrot.slane %v8570_v10, 2  ;;  %v2007_v18 = vrot.slane %v1993_v31, 1  ;;  %v2027_v32 = vmul.f32 %v5648_v37, %v6599_v11  ;;  %v8907_v53 = vld [vmem:[%s11531_s8 + $0x160] sm:$0xff]  ;;  %v11973_v31 = vld [vmem:[#allocation12_spill] sm:$0xff] }
 0x15a   :  { %v1881_v16 = vsel %vm121_vm2, %v11969_v13, %v1880_v46  ;;  %v1927_v34 = vsel %vm85_vm0, %v11970_v55, %v1926_v4  ;;  %v2060_v10 = vmax.f32 %v2056_v1, 0.0  ;;  %v1734_v15 = vadd.f32 %v8747_v2, %v1721_v39  ;;  %v8912_v46 = vld [vmem:[%s11531_s8 + $0x170] sm:$0xff]  ;;  %v5655_v4 = vld [vmem:[%s11530_s7 + $0x188] sm:$0xfe] }
 0x15b   :  { %v1961_v14 = vsel %vm121_vm2, %v11971_v12, %v1960_v38  ;;  %v1890_v62 = vadd.f32 %v1881_v16, %v1856_v52  ;;  %v6094_v49 = vpack.c.bf16 %v8817_v22, %v8812_v35  ;;  %v11972_v2 = vrot.slane %v8593_v24, 1  ;;  %v5659_v38 = vld [vmem:[%s11530_s7 + $0x188] sm:$0xfc]  ;;  %v5667_v52 = vld [vmem:[%s11530_s7 + $0x1b8] sm:$0xfe] }
 0x15c   :  { %v2041_v40 = vrot.slane %v2027_v32, 2  ;;  %v6090_v24 = vpack.c.bf16 %v2060_v10, %v1811_v44  ;;  %v1768_v37 = vadd.f32 %v1759_v25, %v1734_v15  ;;  %v11974_v1 = vrot.slane %v11973_v31, 2  ;;  %v11975_v12 = vld [vmem:[#allocation14_spill] sm:$0xff] }
 0x15d   :  { %v2008_v0 = vsel %vm85_vm0, %v11972_v2, %v2007_v18  ;;  %v1902_v41 = vadd.f32 %v1898_v58, %v1890_v62  ;;  %v2070_v18 = vmul.f32 %v11975_v12, %v6406_v30  ;;  %v2078_v32 = vmul.f32 %v5655_v4, %v6426_v36  ;;  %v11976_v2 = vld [vmem:[#allocation8_spill] sm:$0xff] }
 0x15e   :  { %v2042_v39 = vsel %vm121_vm2, %v11974_v1, %v2041_v40  ;;  %6091 = vmatprep.subr.bf16.mxu1 %v6090_v24  ;;  %v1802_v13 = vadd.f32 %v1793_v5, %v1768_v37  ;;  %v8941_v10 = vmul.f32 %v8317_v17, %v6426_v36  ;;  %v2112_v15 = vmul.f32 %v5659_v38, %v6450_v43  ;;  %v5671_v37 = vld [vmem:[%s11530_s7 + $0x1b8] sm:$0xfc] }
 0x15f   :  { %v1936_v16 = vadd.f32 %v1927_v34, %v1902_v41  ;;  %v8946_v62 = vmul.f32 %v8317_v17, %v6450_v43  ;;  %v2146_v40 = vmul.f32 %v11976_v2, %v6474_v50  ;;  %v2158_v24 = vmul.f32 %v5667_v52, %v6496_v57  ;;  %v5679_v52 = vld [vmem:[%s11530_s7 + $0x1e8] sm:$0xfe] }
 0x160   :  { %v1806_v5 = vadd.f32 %v1802_v13, %v6386_v26  ;;  %v2092_v41 = vrot.slane %v2078_v32, 1  ;;  %v11661_v4 = vrot.slane %v8941_v10, 1  ;;  %v2126_v38 = vrot.slane %v2112_v15, 2  ;;  %v8979_v15 = vld [vmem:[%s11530_s7 + $0x1e8] sm:$0xff] }
 0x161   :  { %v1970_v34 = vadd.f32 %v1961_v14, %v1936_v16  ;;  %v11660_v31 = vrot.slane %v8946_v62, 2  ;;  %v8960_v14 = vmul.f32 %v8394_v59, %v6496_v57  ;;  %v2172_v13 = vrot.slane %v2158_v24, 1 }
 0x162   :  { %v1810_v17 = vmax.f32 %v1806_v5, 0.0  ;;  %v2094_v16 = vsel %vm85_vm0, %v2092_v41, %v11661_v4  ;;  %v2192_v32 = vmul.f32 %v5671_v37, %v6532_v6  ;;  %v5683_v5 = vld [vmem:[%s11530_s7 + $0x1e8] sm:$0xfc]  ;;  %v8988_v37 = vld [vmem:[%s11530_s7 + $0x1f8] sm:$0xff]  ;;  %v2239_v55 = vmul.f32 %v5679_v52, %v6558_v21 }
 0x163   :  { %v1983_v1 = vadd.f32 %v8804_v60, %v1970_v34  ;;  %v2128_v12 = vsel %vm121_vm2, %v2126_v38, %v11660_v31  ;;  %v8974_v60 = vmul.f32 %v8394_v59, %v6532_v6  ;;  %v2104_v24 = vadd.f32 %v2094_v16, %v2070_v18 }
 0x164   :  { %v11663_v41 = vrot.slane %v8960_v14, 1  ;;  %v2227_v38 = vmul.f32 %v8979_v15, %v6555_v20  ;;  %v2206_v31 = vrot.slane %v2192_v32, 2  ;;  %v8996_v58 = vmul.f32 %v8988_v37, %v6558_v21  ;;  %v5691_v32 = vld [vmem:[%s11530_s7 + $0x1b8] sm:$0xfe] }
 0x165   :  { %v2017_v34 = vadd.f32 %v2008_v0, %v1983_v1  ;;  %v11662_v4 = vrot.slane %v8974_v60, 2  ;;  %v2138_v18 = vadd.f32 %v2128_v12, %v2104_v24  ;;  %v2273_v16 = vmul.f32 %v5683_v5, %v6599_v11 }
 0x166   :  { %v2174_v1 = vsel %vm85_vm0, %v2172_v13, %v11663_v41  ;;  %v2253_v25 = vrot.slane %v2239_v55, 1  ;;  %v11664_v44 = vrot.slane %v8996_v58, 1  ;;  %v5695_v13 = vld [vmem:[%s11530_s7 + $0x1b8] sm:$0xfc]  ;;  %v2321_v24 = vmul.f32 %v11976_v2, %v6406_v30  ;;  %v5707_v2 = vld [vmem:[%s11530_s7 + $0x1e8] sm:$0xfc] }
 0x167   :  { %v2051_v0 = vadd.f32 %v2042_v39, %v2017_v34  ;;  %v2208_v52 = vsel %vm121_vm2, %v2206_v31, %v11662_v4  ;;  %v9011_v39 = vmul.f32 %v8988_v37, %v6599_v11  ;;  %v2150_v5 = vadd.f32 %v2146_v40, %v2138_v18 }
 0x168   :  { %v2287_v34 = vrot.slane %v2273_v16, 2  ;;  %v2255_v55 = vsel %vm85_vm0, %v2253_v25, %v11664_v44  ;;  %v2329_v4 = vmul.f32 %v5691_v32, %v6426_v36  ;;  %v9026_v41 = vmul.f32 %v8394_v59, %v6426_v36  ;;  %v5703_v25 = vld [vmem:[%s11530_s7 + $0x1e8] sm:$0xfe] }
 0x169   :  { %11977 = vst [vmem:[#allocation13_spill] sm:$0xff] %v9011_v39  ;;  %v2055_v12 = vadd.f32 %v2051_v0, %v6386_v26  ;;  %v11665_v31 = vrot.slane %v9011_v39, 2  ;;  %v2184_v8 = vadd.f32 %v2174_v1, %v2150_v5  ;;  %v2363_v40 = vmul.f32 %v5695_v13, %v6450_v43 }
 0x16a   :  { %v9031_v0 = vmul.f32 %v8394_v59, %v6450_v43  ;;  %v2343_v16 = vrot.slane %v2329_v4, 1  ;;  %v11683_v1 = vrot.slane %v9026_v41, 1  ;;  %v2397_v32 = vmul.f32 %v8979_v15, %v6474_v50 }
 0x16b   :  { %v2059_v61 = vmax.f32 %v2055_v12, 0.0  ;;  %v2289_v18 = vsel %vm121_vm2, %v2287_v34, %v11665_v31  ;;  %v2218_v13 = vadd.f32 %v2208_v52, %v2184_v8  ;;  %v2377_v12 = vrot.slane %v2363_v40, 2  ;;  %v9083_v31 = vld [vmem:[%s11530_s7 + $0x228] sm:$0xff] }
 0x16c   :  { %v11666_v5 = vrot.slane %v9031_v0, 2  ;;  %v2345_v44 = vsel %vm85_vm0, %v2343_v16, %v11683_v1  ;;  %v2409_v7 = vmul.f32 %v5703_v25, %v6496_v57  ;;  %v9052_v34 = vmul.f32 %v8988_v37, %v6496_v57  ;;  %v9068_v25 = vld [vmem:[%s11530_s7 + $0x218] sm:$0xff] }
 0x16d   :  { %v6092_v59 = vpack.c.bf16 %v2059_v61, %v1810_v17  ;;  %v2443_v4 = vmul.f32 %v5707_v2, %v6532_v6  ;;  %v5715_v61 = vld [vmem:[%s11530_s7 + $0x218] sm:$0xfe]  ;;  %v2231_v8 = vadd.f32 %v2227_v38, %v2218_v13  ;;  %v2355_v17 = vadd.f32 %v2345_v44, %v2321_v24 }
 0x16e   :  { %v2379_v52 = vsel %vm121_vm2, %v2377_v12, %v11666_v5  ;;  %v9063_v40 = vmul.f32 %v8988_v37, %v6532_v6  ;;  %v5719_v2 = vld [vmem:[%s11530_s7 + $0x218] sm:$0xfc]  ;;  %v2423_v44 = vrot.slane %v2409_v7, 1  ;;  %v11677_v38 = vrot.slane %v9052_v34, 1 }
 0x16f   :  { %6093 = vmatpush1.bf16.msra.mxu1 %v6092_v59  ;;  %v2457_v24 = vrot.slane %v2443_v4, 2  ;;  %v2478_v16 = vmul.f32 %v9068_v25, %v6555_v20  ;;  %v2265_v59 = vadd.f32 %v2255_v55, %v2231_v8  ;;  %v2389_v13 = vadd.f32 %v2379_v52, %v2355_v17  ;;  %v5654_v55 = vld [vmem:[%s11530_s7 + $0x180] sm:$0xfe] }
 0x170   :  { %6095 = vmatprep.subr.bf16.mxu1 %v6094_v49  ;;  %v11669_v12 = vrot.slane %v9063_v40, 2  ;;  %v2490_v5 = vmul.f32 %v5715_v61, %v6558_v21  ;;  %v2425_v35 = vsel %vm85_vm0, %v2423_v44, %v11677_v38  ;;  %v9093_v22 = vmul.f32 %v9083_v31, %v6558_v21  ;;  %v5658_v52 = vld [vmem:[%s11530_s7 + $0x180] sm:$0xfc] }
 0x171   :  { %v2524_v49 = vmul.f32 %v5719_v2, %v6599_v11  ;;  %v9098_v7 = vmul.f32 %v9083_v31, %v6599_v11  ;;  %v2299_v4 = vadd.f32 %v2289_v18, %v2265_v59  ;;  %v2401_v61 = vadd.f32 %v2397_v32, %v2389_v13  ;;  %v11981_v18 = vld [vmem:[#allocation11_spill] sm:$0xff] }
 0x172   :  { %5958 = vmatmul.mubr.msk.f32.vlgmr.msra.gmra.mrb[2].mxu1 %vm4095_vm1, %v8742_v45  ;;  %v11979_v45 = vpack.c.bf16 %v8831_v29, %v8826_v3  ;;  %v2459_v8 = vsel %vm121_vm2, %v2457_v24, %v11669_v12  ;;  %v2504_v17 = vrot.slane %v2490_v5, 1  ;;  %v11980_v2 = vpack.c.bf16 %v8845_v19, %v8836_v48  ;;  %v5666_v48 = vld [vmem:[%s11530_s7 + $0x1b0] sm:$0xfe] }
 0x173   :  { %11978 = vst [vmem:[#allocation15_spill] sm:$0xff] %v9098_v7  ;;  %4734 = vmatprep.mubr.f32.mxu1 %v11964_v56  ;;  %v11668_v3 = vrot.slane %v9093_v22, 1  ;;  %v2538_v29 = vrot.slane %v2524_v49, 2  ;;  %v11667_v44 = vrot.slane %v9098_v7, 2  ;;  %v2069_v32 = vmul.f32 %v11981_v18, %v6406_v30 }
 0x174   :  { %6097 = vmatpush1.bf16.msra.mxu1 %v11979_v45  ;;  %v9121_v59 = vadd.f32 %v2299_v4, %v6386_v26  ;;  %v2435_v5 = vadd.f32 %v2425_v35, %v2401_v61  ;;  %v2077_v24 = vmul.f32 %v5654_v55, %v6426_v36  ;;  %v9126_v13 = vmul.f32 %v8496_v27, %v6426_v36  ;;  %v5670_v45 = vld [vmem:[%s11530_s7 + $0x1b0] sm:$0xfc] }
 0x175   :  { %6099 = vmatprep.subr.bf16.mxu1 %v11980_v2  ;;  %v2506_v19 = vsel %vm85_vm0, %v2504_v17, %v11668_v3  ;;  %v2540_v49 = vsel %vm121_vm2, %v2538_v29, %v11667_v44  ;;  %v2111_v35 = vmul.f32 %v5658_v52, %v6450_v43  ;;  %v9140_v55 = vmul.f32 %v8496_v27, %v6450_v43  ;;  %v11984_v44 = vld [vmem:[#allocation16_spill] sm:$0xff] }
 0x176   :  { %v11982_v4 = vpack.c.bf16 %v8855_v51, %v8850_v42  ;;  %v2307_v61 = vmax.f32 %v9121_v59, 0.0  ;;  %v2469_v17 = vadd.f32 %v2459_v8, %v2435_v5  ;;  %v2089_v2 = vrot.slane %v2077_v24, 1 }
 0x177   :  { %v11681_v29 = vrot.slane %v9126_v13, 1  ;;  %v11983_v52 = vpack.c.bf16 %v8872_v63, %v8867_v28  ;;  %v2123_v27 = vrot.slane %v2111_v35, 2  ;;  %v11680_v18 = vrot.slane %v9140_v55, 2  ;;  %v5678_v63 = vld [vmem:[%s11530_s7 + $0x1e0] sm:$0xfe] }
 0x178   :  { %6101 = vmatpush1.bf16.msra.mxu1 %v11982_v4  ;;  %v2145_v3 = vmul.f32 %v11984_v44, %v6474_v50  ;;  %v2157_v12 = vmul.f32 %v5666_v48, %v6496_v57  ;;  %v2482_v42 = vadd.f32 %v2478_v16, %v2469_v17  ;;  %v9162_v8 = vmul.f32 %v8575_v9, %v6496_v57  ;;  %v9178_v48 = vld [vmem:[%s11530_s7 + $0x1e0] sm:$0xff]  ;;  %v9190_v17 = vld [vmem:[%s11530_s7 + $0x1f0] sm:$0xff] }
 0x179   :  { %6103 = vmatprep.subr.bf16.mxu1 %v11983_v52  ;;  %v2091_v51 = vsel %vm85_vm0, %v2089_v2, %v11681_v29  ;;  %v2191_v28 = vmul.f32 %v5670_v45, %v6532_v6  ;;  %v2125_v5 = vsel %vm121_vm2, %v2123_v27, %v11680_v18  ;;  %v9173_v24 = vmul.f32 %v8575_v9, %v6532_v6  ;;  %v5682_v35 = vld [vmem:[%s11530_s7 + $0x1e0] sm:$0xfc] }
 0x17a   :  { %v2103_v59 = vadd.f32 %v2091_v51, %v2069_v32  ;;  %v2169_v16 = vrot.slane %v2157_v12, 1  ;;  %v11985_v32 = vpack.c.bf16 %v8885_v23, %v8877_v33  ;;  %v2516_v45 = vadd.f32 %v2506_v19, %v2482_v42 }
 0x17b   :  { %v11674_v12 = vrot.slane %v9162_v8, 1  ;;  %v2203_v4 = vrot.slane %v2191_v28, 2  ;;  %v2226_v2 = vmul.f32 %v9178_v48, %v6555_v20  ;;  %v11986_v52 = vpack.c.bf16 %v8895_v47, %v8890_v54  ;;  %v5690_v47 = vld [vmem:[%s11530_s7 + $0x1b0] sm:$0xfe] }
 0x17c   :  { %6105 = vmatpush1.bf16.msra.mxu1 %v11985_v32  ;;  %v2137_v27 = vadd.f32 %v2125_v5, %v2103_v59  ;;  %v11670_v33 = vrot.slane %v9173_v24, 2  ;;  %v2238_v23 = vmul.f32 %v5678_v63, %v6558_v21  ;;  %v9201_v19 = vmul.f32 %v9190_v17, %v6558_v21 }
 0x17d   :  { %6107 = vmatprep.subr.bf16.mxu1 %v11986_v52  ;;  %v2550_v42 = vadd.f32 %v2540_v49, %v2516_v45  ;;  %v2171_v51 = vsel %vm85_vm0, %v2169_v16, %v11674_v12  ;;  %v2272_v28 = vmul.f32 %v5682_v35, %v6599_v11  ;;  %v9209_v54 = vmul.f32 %v9190_v17, %v6599_v11  ;;  %v5694_v16 = vld [vmem:[%s11530_s7 + $0x1b0] sm:$0xfc] }
 0x17e   :  { %11987 = vst [vmem:[#allocation9_spill] sm:$0xff] %v9201_v19  ;;  %v2149_v63 = vadd.f32 %v2145_v3, %v2137_v27  ;;  %v2205_v59 = vsel %vm121_vm2, %v2203_v4, %v11670_v33  ;;  %v2250_v49 = vrot.slane %v2238_v23, 1  ;;  %v11672_v5 = vrot.slane %v9201_v19, 1  ;;  %v9570_v19 = vld [vmem:[%s11530_s7 + $0x250] sm:$0xff] }
 0x17f   :  { %11988 = vst [vmem:[#allocation10_spill] sm:$0xff] %v9209_v54  ;;  %v11989_v35 = vpack.c.bf16 %v8912_v46, %v8907_v53  ;;  %v2554_v32 = vadd.f32 %v2550_v42, %v6386_v26  ;;  %v2284_v45 = vrot.slane %v2272_v28, 2  ;;  %v11671_v3 = vrot.slane %v9209_v54, 2  ;;  %v5702_v53 = vld [vmem:[%s11530_s7 + $0x1e0] sm:$0xfe] }
 0x180   :  { %v2320_v52 = vmul.f32 %v11984_v44, %v6406_v30  ;;  %v2183_v4 = vadd.f32 %v2171_v51, %v2149_v63  ;;  %v2252_v27 = vsel %vm85_vm0, %v2250_v49, %v11672_v5  ;;  %v2328_v23 = vmul.f32 %v5690_v47, %v6426_v36  ;;  %v5706_v28 = vld [vmem:[%s11530_s7 + $0x1e0] sm:$0xfc] }
 0x181   :  { %6109 = vmatpush1.bf16.msra.mxu1 %v11989_v35  ;;  %v9234_v33 = vmul.f32 %v8575_v9, %v6426_v36  ;;  %v2558_v46 = vmax.f32 %v2554_v32, 0.0  ;;  %v2286_v44 = vsel %vm121_vm2, %v2284_v45, %v11671_v3  ;;  %v2362_v42 = vmul.f32 %v5694_v16, %v6450_v43  ;;  %v6198_v47 = vld [vmem:[%s11525_s2 + $0x4] sm:$0xf] }
 0x182   :  { %v9245_v51 = vmul.f32 %v8575_v9, %v6450_v43  ;;  %v2217_v63 = vadd.f32 %v2205_v59, %v2183_v4  ;;  %v2340_v49 = vrot.slane %v2328_v23, 1  ;;  %v2396_v16 = vmul.f32 %v9178_v48, %v6474_v50 }
 0x183   :  { %v11675_v35 = vrot.slane %v9234_v33, 1  ;;  %v6110_v32 = vpack.c.bf16 %v2558_v46, %v2307_v61  ;;  %v2374_v9 = vrot.slane %v2362_v42, 2  ;;  %v2408_v3 = vmul.f32 %v5702_v53, %v6496_v57  ;;  %v5714_v61 = vld [vmem:[%s11530_s7 + $0x210] sm:$0xfe] }
 0x184   :  { %5988 = vmatmul.mubr.msk.f32.vlgmr.msra.gmra.mrb[4].mxu1 %vm4095_vm1, %v6198_v47  ;;  %v11673_v45 = vrot.slane %v9245_v51, 2  ;;  %v2230_v5 = vadd.f32 %v2226_v2, %v2217_v63  ;;  %v9265_v59 = vmul.f32 %v9190_v17, %v6496_v57  ;;  %v2442_v4 = vmul.f32 %v5706_v28, %v6532_v6  ;;  %v9281_v42 = vld [vmem:[%s11530_s7 + $0x210] sm:$0xff] }
 0x185   :  { %4805 = vmatprep.mubr.f32.mxu1 %v11964_v56  ;;  %v2342_v47 = vsel %vm85_vm0, %v2340_v49, %v11675_v35  ;;  %6111 = vmatprep.subr.bf16.mxu1 %v6110_v32  ;;  %v2420_v53 = vrot.slane %v2408_v3, 1  ;;  %v9276_v46 = vmul.f32 %v9190_v17, %v6532_v6  ;;  %v5718_v28 = vld [vmem:[%s11530_s7 + $0x210] sm:$0xfc]  ;;  %v9290_v3 = vld [vmem:[%s11530_s7 + $0x220] sm:$0xff]  ;;  %v2477_v32 = vmul.f32 %v9281_v42, %v6555_v20 }
 0x186   :  { %v2354_v23 = vadd.f32 %v2342_v47, %v2320_v52  ;;  %v2376_v2 = vsel %vm121_vm2, %v2374_v9, %v11673_v45  ;;  %v2264_v63 = vadd.f32 %v2252_v27, %v2230_v5  ;;  %v11676_v52 = vrot.slane %v9265_v59, 1 }
 0x187   :  { %11990 = vst [vmem:[#allocation12_spill] sm:$0xff] %v9276_v46  ;;  %v2454_v49 = vrot.slane %v2442_v4, 2  ;;  %v11678_v47 = vrot.slane %v9276_v46, 2  ;;  %v2489_v45 = vmul.f32 %v5714_v61, %v6558_v21  ;;  %v9298_v12 = vmul.f32 %v9290_v3, %v6558_v21 }
 0x188   :  { %v2388_v9 = vadd.f32 %v2376_v2, %v2354_v23  ;;  %v2298_v5 = vadd.f32 %v2286_v44, %v2264_v63  ;;  %v2422_v27 = vsel %vm85_vm0, %v2420_v53, %v11676_v52  ;;  %v2523_v4 = vmul.f32 %v5718_v28, %v6599_v11  ;;  %v5727_v23 = vld [vmem:[%s11530_s7 + $0x1e8] sm:$0xfe] }
 0x189   :  { %11991 = vst [vmem:[#allocation14_spill] sm:$0xff] %v9298_v12  ;;  %v9306_v35 = vmul.f32 %v9290_v3, %v6599_v11  ;;  %v2456_v2 = vsel %vm121_vm2, %v2454_v49, %v11678_v47  ;;  %v2501_v44 = vrot.slane %v2489_v45, 1  ;;  %v11679_v63 = vrot.slane %v9298_v12, 1  ;;  %v5731_v53 = vld [vmem:[%s11530_s7 + $0x1e8] sm:$0xfc] }
 0x18a   :  { %v2400_v61 = vadd.f32 %v2396_v16, %v2388_v9  ;;  %v9319_v28 = vadd.f32 %v2298_v5, %v6386_v26  ;;  %v2535_v52 = vrot.slane %v2523_v4, 2  ;;  %v2570_v16 = vmul.f32 %v8979_v15, %v6406_v30  ;;  %v5739_v5 = vld [vmem:[%s11530_s7 + $0x218] sm:$0xfe] }
 0x18b   :  { %11992 = vst [vmem:[#allocation8_spill] sm:$0xff] %v9306_v35  ;;  %v11682_v38 = vrot.slane %v9306_v35, 2  ;;  %v2503_v45 = vsel %vm85_vm0, %v2501_v44, %v11679_v63  ;;  %v2578_v49 = vmul.f32 %v5727_v23, %v6426_v36  ;;  %v9330_v47 = vmul.f32 %v8988_v37, %v6426_v36  ;;  %v5743_v23 = vld [vmem:[%s11530_s7 + $0x218] sm:$0xfc] }
 0x18c   :  { %v2434_v9 = vadd.f32 %v2422_v27, %v2400_v61  ;;  %v2306_v4 = vmax.f32 %v9319_v28, 0.0  ;;  %v2612_v27 = vmul.f32 %v5731_v53, %v6450_v43  ;;  %v9342_v61 = vmul.f32 %v8988_v37, %v6450_v43 }
 0x18d   :  { %11993 = vst [vmem:[#allocation11_spill] sm:$0xff] %v9330_v47  ;;  %v2537_v15 = vsel %vm121_vm2, %v2535_v52, %v11682_v38  ;;  %v2592_v63 = vrot.slane %v2578_v49, 1  ;;  %v11684_v18 = vrot.slane %v9330_v47, 1  ;;  %v2646_v28 = vmul.f32 %v9068_v25, %v6474_v50 }
 0x18e   :  { %11994 = vst [vmem:[#allocation16_spill] sm:$0xff] %v9342_v61  ;;  %v2468_v44 = vadd.f32 %v2456_v2, %v2434_v9  ;;  %v2626_v29 = vrot.slane %v2612_v27, 2  ;;  %v11686_v52 = vrot.slane %v9342_v61, 2  ;;  %v2658_v53 = vmul.f32 %v5739_v5, %v6496_v57  ;;  %v5751_v27 = vld [vmem:[%s11530_s7 + $0x248] sm:$0xfe] }
 0x18f   :  { %v9354_v37 = vmul.f32 %v9083_v31, %v6496_v57  ;;  %v2594_v2 = vsel %vm85_vm0, %v2592_v63, %v11684_v18  ;;  %v2692_v9 = vmul.f32 %v5743_v23, %v6532_v6  ;;  %v9362_v49 = vmul.f32 %v9083_v31, %v6532_v6  ;;  %v9374_v63 = vld [vmem:[%s11530_s7 + $0x248] sm:$0xff] }
 0x190   :  { %v2481_v38 = vadd.f32 %v2477_v32, %v2468_v44  ;;  %v2604_v5 = vadd.f32 %v2594_v2, %v2570_v16  ;;  %v2628_v1 = vsel %vm121_vm2, %v2626_v29, %v11686_v52  ;;  %v2672_v32 = vrot.slane %v2658_v53, 1  ;;  %v5755_v23 = vld [vmem:[%s11530_s7 + $0x248] sm:$0xfc]  ;;  %v9383_v29 = vld [vmem:[%s11530_s7 + $0x258] sm:$0xff] }
 0x191   :  { %11995 = vst [vmem:[#allocation17_spill] sm:$0xff] %v9354_v37  ;;  %11996 = vst [vmem:[#allocation18_spill] sm:$0xff] %v9362_v49  ;;  %v11689_v44 = vrot.slane %v9354_v37, 1  ;;  %v2706_v35 = vrot.slane %v2692_v9, 2  ;;  %v11691_v16 = vrot.slane %v9362_v49, 2  ;;  %v2727_v53 = vmul.f32 %v9374_v63, %v6555_v20 }
 0x192   :  { %v2515_v18 = vadd.f32 %v2503_v45, %v2481_v38  ;;  %v2638_v2 = vadd.f32 %v2628_v1, %v2604_v5  ;;  %v2739_v12 = vmul.f32 %v5751_v27, %v6558_v21  ;;  %v9393_v38 = vmul.f32 %v9383_v29, %v6558_v21  ;;  %v5763_v45 = vld [vmem:[%s11530_s7 + $0x218] sm:$0xfe] }
 0x193   :  { %v2674_v52 = vsel %vm85_vm0, %v2672_v32, %v11689_v44  ;;  %v2708_v61 = vsel %vm121_vm2, %v2706_v35, %v11691_v16  ;;  %v2773_v1 = vmul.f32 %v5755_v23, %v6599_v11  ;;  %v9404_v5 = vmul.f32 %v9383_v29, %v6599_v11  ;;  %v5767_v27 = vld [vmem:[%s11530_s7 + $0x218] sm:$0xfc] }
 0x194   :  { %11997 = vst [vmem:[#allocation19_spill] sm:$0xff] %v9393_v38  ;;  %v2549_v9 = vadd.f32 %v2537_v15, %v2515_v18  ;;  %v2650_v32 = vadd.f32 %v2646_v28, %v2638_v2  ;;  %v2753_v44 = vrot.slane %v2739_v12, 1  ;;  %v11694_v37 = vrot.slane %v9393_v38, 1 }
 0x195   :  { %11998 = vst [vmem:[#allocation20_spill] sm:$0xff] %v9404_v5  ;;  %v2819_v18 = vmul.f32 %v9068_v25, %v6406_v30  ;;  %v2787_v35 = vrot.slane %v2773_v1, 2  ;;  %v11696_v23 = vrot.slane %v9404_v5, 2  ;;  %v2827_v16 = vmul.f32 %v5763_v45, %v6426_v36  ;;  %v5775_v25 = vld [vmem:[%s11530_s7 + $0x248] sm:$0xfe] }
 0x196   :  { %v2553_v15 = vadd.f32 %v2549_v9, %v6386_v26  ;;  %v2684_v49 = vadd.f32 %v2674_v52, %v2650_v32  ;;  %v2755_v54 = vsel %vm85_vm0, %v2753_v44, %v11694_v37  ;;  %v9420_v12 = vmul.f32 %v9083_v31, %v6426_v36  ;;  %v5779_v44 = vld [vmem:[%s11530_s7 + $0x248] sm:$0xfc] }
 0x197   :  { %v2861_v28 = vmul.f32 %v5767_v27, %v6450_v43  ;;  %v2789_v45 = vsel %vm121_vm2, %v2787_v35, %v11696_v23  ;;  %v2841_v52 = vrot.slane %v2827_v16, 1  ;;  %v9431_v9 = vmul.f32 %v9083_v31, %v6450_v43 }
 0x198   :  { %11999 = vst [vmem:[#allocation21_spill] sm:$0xff] %v9420_v12  ;;  %v2557_v2 = vmax.f32 %v2553_v15, 0.0  ;;  %v2718_v1 = vadd.f32 %v2708_v61, %v2684_v49  ;;  %v11697_v27 = vrot.slane %v9420_v12, 1  ;;  %v2895_v15 = vmul.f32 %v9374_v63, %v6474_v50 }
 0x199   :  { %12000 = vst [vmem:[#allocation22_spill] sm:$0xff] %v9431_v9  ;;  %v2875_v32 = vrot.slane %v2861_v28, 2  ;;  %v11698_v5 = vrot.slane %v9431_v9, 2  ;;  %v2907_v16 = vmul.f32 %v5775_v25, %v6496_v57  ;;  %v9443_v31 = vmul.f32 %v9383_v29, %v6496_v57 }
 0x19a   :  { %v6112_v37 = vpack.c.bf16 %v2557_v2, %v2306_v4  ;;  %v2731_v35 = vadd.f32 %v2727_v53, %v2718_v1  ;;  %v2843_v61 = vsel %vm85_vm0, %v2841_v52, %v11697_v27  ;;  %v2941_v49 = vmul.f32 %v5779_v44, %v6532_v6  ;;  %v5787_v4 = vld [vmem:[%s11530_s7 + $0x278] sm:$0xfe] }
 0x19b   :  { %12001 = vst [vmem:[#allocation23_spill] sm:$0xff] %v9443_v31  ;;  %v9451_v28 = vmul.f32 %v9383_v29, %v6532_v6  ;;  %v2853_v25 = vadd.f32 %v2843_v61, %v2819_v18  ;;  %v2877_v53 = vsel %vm121_vm2, %v2875_v32, %v11698_v5  ;;  %v2921_v2 = vrot.slane %v2907_v16, 1  ;;  %v9463_v52 = vld [vmem:[%s11530_s7 + $0x278] sm:$0xff]  ;;  %v9472_v18 = vld [vmem:[%s11530_s7 + $0x288] sm:$0xff] }
 0x19c   :  { %6113 = vmatpush1.bf16.msra.mxu1 %v6112_v37  ;;  %v11700_v1 = vrot.slane %v9443_v31, 1  ;;  %v5791_v44 = vld [vmem:[%s11530_s7 + $0x278] sm:$0xfc]  ;;  %v2765_v23 = vadd.f32 %v2755_v54, %v2731_v35  ;;  %v2955_v27 = vrot.slane %v2941_v49, 2  ;;  %v2976_v32 = vmul.f32 %v9463_v52, %v6555_v20  ;;  %v5726_v35 = vld [vmem:[%s11530_s7 + $0x1e0] sm:$0xfe] }
 0x19d   :  { %12002 = vst [vmem:[#allocation24_spill] sm:$0xff] %v9451_v28  ;;  %v11702_v37 = vrot.slane %v9451_v28, 2  ;;  %v2887_v16 = vadd.f32 %v2877_v53, %v2853_v25  ;;  %v2988_v5 = vmul.f32 %v5787_v4, %v6558_v21  ;;  %v9482_v54 = vmul.f32 %v9472_v18, %v6558_v21  ;;  %v5730_v4 = vld [vmem:[%s11530_s7 + $0x1e0] sm:$0xfc]  ;;  %v9506_v28 = vpop.f32.mrb[0].mxu1 }
 0x19e   :  { %v2923_v61 = vsel %vm85_vm0, %v2921_v2, %v11700_v1  ;;  %v2799_v49 = vadd.f32 %v2789_v45, %v2765_v23  ;;  %v3022_v25 = vmul.f32 %v5791_v44, %v6599_v11  ;;  %v9493_v53 = vmul.f32 %v9472_v18, %v6599_v11 }
 0x19f   :  { %12003 = vst [vmem:[#allocation25_spill] sm:$0xff] %v9482_v54  ;;  %v2957_v38 = vsel %vm121_vm2, %v2955_v27, %v11702_v37  ;;  %v2899_v2 = vadd.f32 %v2895_v15, %v2887_v16  ;;  %v3002_v1 = vrot.slane %v2988_v5, 1  ;;  %v11705_v31 = vrot.slane %v9482_v54, 1  ;;  %v5738_v16 = vld [vmem:[%s11530_s7 + $0x210] sm:$0xfe] }
 0x1a0   :  { %12004 = vst [vmem:[#allocation26_spill] sm:$0xff] %v9493_v53  ;;  %v2569_v23 = vmul.f32 %v9178_v48, %v6406_v30  ;;  %v9502_v45 = vadd.f32 %v2799_v49, %v6386_v26  ;;  %v3036_v27 = vrot.slane %v3022_v25, 2  ;;  %v11710_v44 = vrot.slane %v9493_v53, 2  ;;  %v9522_v49 = vpop.f32.mrb[1].mxu1 }
 0x1a1   :  { %v2577_v37 = vmul.f32 %v5726_v35, %v6426_v36  ;;  %v2933_v9 = vadd.f32 %v2923_v61, %v2899_v2  ;;  %v3004_v5 = vsel %vm85_vm0, %v3002_v1, %v11705_v31  ;;  %v9513_v15 = vmul.f32 %v9190_v17, %v6426_v36  ;;  %v5742_v35 = vld [vmem:[%s11530_s7 + $0x210] sm:$0xfc] }
 0x1a2   :  { %v2611_v48 = vmul.f32 %v5730_v4, %v6450_v43  ;;  %v2807_v61 = vmax.f32 %v9502_v45, 0.0  ;;  %v3038_v1 = vsel %vm121_vm2, %v3036_v27, %v11710_v44  ;;  %v9530_v4 = vmul.f32 %v9190_v17, %v6450_v43  ;;  %v9545_v17 = vld [vmem:[%s11530_s7 + $0x240] sm:$0xff] }
 0x1a3   :  { %12005 = vst [vmem:[#allocation27_spill] sm:$0xff] %v9513_v15  ;;  %v2589_v25 = vrot.slane %v2577_v37, 1  ;;  %v2967_v2 = vadd.f32 %v2957_v38, %v2933_v9  ;;  %v11712_v31 = vrot.slane %v9513_v15, 1  ;;  %v2645_v12 = vmul.f32 %v9281_v42, %v6474_v50  ;;  %v5750_v38 = vld [vmem:[%s11530_s7 + $0x240] sm:$0xfe] }
 0x1a4   :  { %v2623_v54 = vrot.slane %v2611_v48, 2  ;;  %v11720_v47 = vrot.slane %v9530_v4, 2  ;;  %v2657_v45 = vmul.f32 %v5738_v16, %v6496_v57  ;;  %v9539_v53 = vmul.f32 %v9290_v3, %v6496_v57 }
 0x1a5   :  { %v2691_v37 = vmul.f32 %v5742_v35, %v6532_v6  ;;  %v2980_v9 = vadd.f32 %v2976_v32, %v2967_v2  ;;  %v2591_v27 = vsel %vm85_vm0, %v2589_v25, %v11712_v31  ;;  %v9555_v48 = vmul.f32 %v9290_v3, %v6532_v6  ;;  %v5754_v35 = vld [vmem:[%s11530_s7 + $0x240] sm:$0xfc] }
 0x1a6   :  { %12006 = vst [vmem:[#allocation28_spill] sm:$0xff] %v9539_v53  ;;  %v2726_v16 = vmul.f32 %v9545_v17, %v6555_v20  ;;  %v2603_v44 = vadd.f32 %v2591_v27, %v2569_v23  ;;  %v2625_v32 = vsel %vm121_vm2, %v2623_v54, %v11720_v47  ;;  %v2669_v2 = vrot.slane %v2657_v45, 1  ;;  %v5762_v45 = vld [vmem:[%s11530_s7 + $0x210] sm:$0xfe] }
 0x1a7   :  { %12007 = vst [vmem:[#allocation29_spill] sm:$0xff] %v9555_v48  ;;  %v11718_v15 = vrot.slane %v9539_v53, 1  ;;  %v3014_v25 = vadd.f32 %v3004_v5, %v2980_v9  ;;  %v2703_v31 = vrot.slane %v2691_v37, 2  ;;  %v11717_v46 = vrot.slane %v9555_v48, 2  ;;  %v5766_v27 = vld [vmem:[%s11530_s7 + $0x210] sm:$0xfc] }
 0x1a8   :  { %v2738_v7 = vmul.f32 %v5750_v38, %v6558_v21  ;;  %v2637_v39 = vadd.f32 %v2625_v32, %v2603_v44  ;;  %v9578_v54 = vmul.f32 %v9570_v19, %v6558_v21  ;;  %v2772_v5 = vmul.f32 %v5754_v35, %v6599_v11 }
 0x1a9   :  { %v2671_v23 = vsel %vm85_vm0, %v2669_v2, %v11718_v15  ;;  %v3048_v37 = vadd.f32 %v3038_v1, %v3014_v25  ;;  %v2705_v38 = vsel %vm121_vm2, %v2703_v31, %v11717_v46  ;;  %v9589_v9 = vmul.f32 %v9570_v19, %v6599_v11 }
 0x1aa   :  { %12008 = vst [vmem:[#allocation30_spill] sm:$0xff] %v9578_v54  ;;  %v2750_v44 = vrot.slane %v2738_v7, 1  ;;  %v2649_v32 = vadd.f32 %v2645_v12, %v2637_v39  ;;  %v11719_v35 = vrot.slane %v9578_v54, 1  ;;  %v2784_v2 = vrot.slane %v2772_v5, 2  ;;  %v5774_v5 = vld [vmem:[%s11530_s7 + $0x240] sm:$0xfe] }
 0x1ab   :  { %12009 = vst [vmem:[#allocation31_spill] sm:$0xff] %v9589_v9  ;;  %v2818_v1 = vmul.f32 %v9281_v42, %v6406_v30  ;;  %v3052_v25 = vadd.f32 %v3048_v37, %v6386_v26  ;;  %v11722_v31 = vrot.slane %v9589_v9, 2  ;;  %v2826_v7 = vmul.f32 %v5762_v45, %v6426_v36 }
 0x1ac   :  { %v9602_v46 = vmul.f32 %v9290_v3, %v6426_v36  ;;  %v2683_v15 = vadd.f32 %v2671_v23, %v2649_v32  ;;  %v2752_v39 = vsel %vm85_vm0, %v2750_v44, %v11719_v35  ;;  %v2860_v12 = vmul.f32 %v5766_v27, %v6450_v43  ;;  %v5778_v44 = vld [vmem:[%s11530_s7 + $0x240] sm:$0xfc] }
 0x1ad   :  { %v9610_v42 = vmul.f32 %v9290_v3, %v6450_v43  ;;  %v3056_v45 = vmax.f32 %v3052_v25, 0.0  ;;  %v2786_v37 = vsel %vm121_vm2, %v2784_v2, %v11722_v31  ;;  %v2838_v23 = vrot.slane %v2826_v7, 1 }
 0x1ae   :  { %v11724_v32 = vrot.slane %v9602_v46, 1  ;;  %v2717_v27 = vadd.f32 %v2705_v38, %v2683_v15  ;;  %v2872_v35 = vrot.slane %v2860_v12, 2  ;;  %v2894_v47 = vmul.f32 %v9545_v17, %v6474_v50  ;;  %v5786_v15 = vld [vmem:[%s11530_s7 + $0x270] sm:$0xfe] }
 0x1af   :  { %12010 = vst [vmem:[#allocation32_spill] sm:$0xff] %v9610_v42  ;;  %v11723_v3 = vrot.slane %v9610_v42, 2  ;;  %v6114_v54 = vpack.c.bf16 %v3056_v45, %v2807_v61  ;;  %v2906_v2 = vmul.f32 %v5774_v5, %v6496_v57  ;;  %v9631_v7 = vmul.f32 %v9570_v19, %v6496_v57  ;;  %v9643_v5 = vld [vmem:[%s11530_s7 + $0x270] sm:$0xff] }
 0x1b0   :  { %v2840_v25 = vsel %vm85_vm0, %v2838_v23, %v11724_v32  ;;  %v2730_v38 = vadd.f32 %v2726_v16, %v2717_v27  ;;  %v2940_v45 = vmul.f32 %v5778_v44, %v6532_v6  ;;  %v5790_v23 = vld [vmem:[%s11530_s7 + $0x270] sm:$0xfc] }
 0x1b1   :  { %12011 = vst [vmem:[#allocation33_spill] sm:$0xff] %v9631_v7  ;;  %v2852_v12 = vadd.f32 %v2840_v25, %v2818_v1  ;;  %v2874_v61 = vsel %vm121_vm2, %v2872_v35, %v11723_v3  ;;  %6115 = vmatprep.subr.bf16.mxu1 %v6114_v54  ;;  %v2918_v31 = vrot.slane %v2906_v2, 1  ;;  %v11726_v16 = vrot.slane %v9631_v7, 1  ;;  %v9658_v3 = vld [vmem:[%s11530_s7 + $0x280] sm:$0xff] }
 0x1b2   :  { %v9651_v1 = vmul.f32 %v9570_v19, %v6532_v6  ;;  %v2975_v35 = vmul.f32 %v9643_v5, %v6555_v20  ;;  %v2764_v44 = vadd.f32 %v2752_v39, %v2730_v38  ;;  %v2952_v25 = vrot.slane %v2940_v45, 2  ;;  %v5799_v38 = vld [vmem:[%s11530_s7 + $0x248] sm:$0xfe] }
 0x1b3   :  { %v2886_v27 = vadd.f32 %v2874_v61, %v2852_v12  ;;  %v2987_v54 = vmul.f32 %v5786_v15, %v6558_v21  ;;  %v2920_v2 = vsel %vm85_vm0, %v2918_v31, %v11726_v16  ;;  %v9667_v9 = vmul.f32 %v9658_v3, %v6558_v21  ;;  %v5803_v31 = vld [vmem:[%s11530_s7 + $0x248] sm:$0xfc] }
 0x1b4   :  { %12012 = vst [vmem:[#allocation34_spill] sm:$0xff] %v9651_v1  ;;  %v11730_v32 = vrot.slane %v9651_v1, 2  ;;  %v3021_v39 = vmul.f32 %v5790_v23, %v6599_v11  ;;  %v2798_v12 = vadd.f32 %v2786_v37, %v2764_v44  ;;  %v9675_v15 = vmul.f32 %v9658_v3, %v6599_v11 }
 0x1b5   :  { %12013 = vst [vmem:[#allocation35_spill] sm:$0xff] %v9667_v9  ;;  %v2898_v61 = vadd.f32 %v2894_v47, %v2886_v27  ;;  %v2999_v45 = vrot.slane %v2987_v54, 1  ;;  %v11729_v23 = vrot.slane %v9667_v9, 1  ;;  %v3068_v37 = vmul.f32 %v9374_v63, %v6406_v30 }
 0x1b6   :  { %12014 = vst [vmem:[#allocation36_spill] sm:$0xff] %v9675_v15  ;;  %v2954_v16 = vsel %vm121_vm2, %v2952_v25, %v11730_v32  ;;  %v3033_v48 = vrot.slane %v3021_v39, 2  ;;  %v9687_v47 = vadd.f32 %v2798_v12, %v6386_v26  ;;  %v11734_v27 = vrot.slane %v9675_v15, 2 }
 0x1b7   :  { %v2932_v44 = vadd.f32 %v2920_v2, %v2898_v61  ;;  %v3076_v54 = vmul.f32 %v5799_v38, %v6426_v36  ;;  %v3001_v1 = vsel %vm85_vm0, %v2999_v45, %v11729_v23  ;;  %v9696_v25 = vmul.f32 %v9383_v29, %v6426_v36  ;;  %v5811_v2 = vld [vmem:[%s11530_s7 + $0x278] sm:$0xfe] }
 0x1b8   :  { %v3110_v39 = vmul.f32 %v5803_v31, %v6450_v43  ;;  %v9701_v63 = vmul.f32 %v9383_v29, %v6450_v43  ;;  %v5815_v38 = vld [vmem:[%s11530_s7 + $0x278] sm:$0xfc]  ;;  %v2806_v12 = vmax.f32 %v9687_v47, 0.0  ;;  %v3035_v45 = vsel %vm121_vm2, %v3033_v48, %v11734_v27  ;;  %v9726_v48 = vld [vmem:[%s11530_s7 + $0x2a8] sm:$0xff] }
 0x1b9   :  { %12015 = vst [vmem:[#allocation37_spill] sm:$0xff] %v9696_v25  ;;  %v2966_v61 = vadd.f32 %v2954_v16, %v2932_v44  ;;  %v3090_v31 = vrot.slane %v3076_v54, 1  ;;  %v11737_v23 = vrot.slane %v9696_v25, 1  ;;  %v3144_v9 = vmul.f32 %v9463_v52, %v6474_v50  ;;  %v5823_v44 = vld [vmem:[%s11530_s7 + $0x2a8] sm:$0xfe] }
 0x1ba   :  { %12016 = vst [vmem:[#allocation38_spill] sm:$0xff] %v9701_v63  ;;  %v3124_v29 = vrot.slane %v3110_v39, 2  ;;  %v11736_v32 = vrot.slane %v9701_v63, 2  ;;  %v3156_v53 = vmul.f32 %v5811_v2, %v6496_v57  ;;  %v9720_v47 = vmul.f32 %v9472_v18, %v6496_v57 }
 0x1bb   :  { %v2979_v7 = vadd.f32 %v2975_v35, %v2966_v61  ;;  %v3190_v16 = vmul.f32 %v5815_v38, %v6532_v6  ;;  %v3092_v35 = vsel %vm85_vm0, %v3090_v31, %v11737_v23  ;;  %v9739_v39 = vmul.f32 %v9472_v18, %v6532_v6  ;;  %v5827_v38 = vld [vmem:[%s11530_s7 + $0x2a8] sm:$0xfc] }
 0x1bc   :  { %12017 = vst [vmem:[#allocation39_spill] sm:$0xff] %v9720_v47  ;;  %v3126_v54 = vsel %vm121_vm2, %v3124_v29, %v11736_v32  ;;  %v3225_v2 = vmul.f32 %v9726_v48, %v6555_v20  ;;  %v3102_v27 = vadd.f32 %v3092_v35, %v3068_v37  ;;  %v3170_v15 = vrot.slane %v3156_v53, 1  ;;  %v9750_v29 = vld [vmem:[%s11530_s7 + $0x2b8] sm:$0xff] }
 0x1bd   :  { %12018 = vst [vmem:[#allocation40_spill] sm:$0xff] %v9739_v39  ;;  %v3013_v61 = vadd.f32 %v3001_v1, %v2979_v7  ;;  %v11742_v31 = vrot.slane %v9720_v47, 1  ;;  %v3204_v32 = vrot.slane %v3190_v16, 2  ;;  %v11741_v23 = vrot.slane %v9739_v39, 2  ;;  %v5835_v37 = vld [vmem:[%s11530_s7 + $0x278] sm:$0xfe] }
 0x1be   :  { %v3237_v63 = vmul.f32 %v5823_v44, %v6558_v21  ;;  %v9756_v25 = vmul.f32 %v9750_v29, %v6558_v21  ;;  %v3136_v7 = vadd.f32 %v3126_v54, %v3102_v27  ;;  %v3271_v1 = vmul.f32 %v5827_v38, %v6599_v11 }
 0x1bf   :  { %v3047_v42 = vadd.f32 %v3035_v45, %v3013_v61  ;;  %v3172_v53 = vsel %vm85_vm0, %v3170_v15, %v11742_v31  ;;  %v3206_v16 = vsel %vm121_vm2, %v3204_v32, %v11741_v23  ;;  %v9771_v27 = vmul.f32 %v9750_v29, %v6599_v11  ;;  %v5839_v15 = vld [vmem:[%s11530_s7 + $0x278] sm:$0xfc] }
 0x1c0   :  { %12019 = vst [vmem:[#allocation41_spill] sm:$0xff] %v9756_v25  ;;  %v3251_v44 = vrot.slane %v3237_v63, 1  ;;  %v11745_v35 = vrot.slane %v9756_v25, 1  ;;  %v3148_v54 = vadd.f32 %v3144_v9, %v3136_v7  ;;  %v3285_v38 = vrot.slane %v3271_v1, 2  ;;  %v5851_v7 = vld [vmem:[%s11530_s7 + $0x2a8] sm:$0xfc] }
 0x1c1   :  { %12020 = vst [vmem:[#allocation42_spill] sm:$0xff] %v9771_v27  ;;  %v3051_v45 = vadd.f32 %v3047_v42, %v6386_v26  ;;  %v3317_v61 = vmul.f32 %v9463_v52, %v6406_v30  ;;  %v11747_v63 = vrot.slane %v9771_v27, 2  ;;  %v3325_v23 = vmul.f32 %v5835_v37, %v6426_v36  ;;  %v5847_v52 = vld [vmem:[%s11530_s7 + $0x2a8] sm:$0xfe] }
 0x1c2   :  { %v3253_v32 = vsel %vm85_vm0, %v3251_v44, %v11745_v35  ;;  %v9786_v31 = vmul.f32 %v9472_v18, %v6426_v36  ;;  %v3182_v47 = vadd.f32 %v3172_v53, %v3148_v54  ;;  %v3359_v9 = vmul.f32 %v5839_v15, %v6450_v43 }
 0x1c3   :  { %v3055_v39 = vmax.f32 %v3051_v45, 0.0  ;;  %v9791_v42 = vmul.f32 %v9472_v18, %v6450_v43  ;;  %v3287_v1 = vsel %vm121_vm2, %v3285_v38, %v11747_v63  ;;  %v3339_v37 = vrot.slane %v3325_v23, 1  ;;  %v9840_v63 = vld [vmem:[%s11530_s7 + $0x2e8] sm:$0xff] }
 0x1c4   :  { %v11750_v53 = vrot.slane %v9786_v31, 1  ;;  %v3393_v44 = vmul.f32 %v9726_v48, %v6474_v50  ;;  %v3216_v15 = vadd.f32 %v3206_v16, %v3182_v47  ;;  %v3373_v45 = vrot.slane %v3359_v9, 2 }
 0x1c5   :  { %12021 = vst [vmem:[#allocation43_spill] sm:$0xff] %v9791_v42  ;;  %v6116_v18 = vpack.c.bf16 %v3055_v39, %v2806_v12  ;;  %v11748_v54 = vrot.slane %v9791_v42, 2  ;;  %v3405_v25 = vmul.f32 %v5847_v52, %v6496_v57  ;;  %v9812_v38 = vmul.f32 %v9750_v29, %v6496_v57  ;;  %v5859_v12 = vld [vmem:[%s11530_s7 + $0x2d8] sm:$0xfe] }
 0x1c6   :  { %v3341_v35 = vsel %vm85_vm0, %v3339_v37, %v11750_v53  ;;  %v3439_v23 = vmul.f32 %v5851_v7, %v6532_v6  ;;  %v3229_v47 = vadd.f32 %v3225_v2, %v3216_v15  ;;  %v9823_v9 = vmul.f32 %v9750_v29, %v6532_v6  ;;  %v9828_v52 = vld [vmem:[%s11530_s7 + $0x2d8] sm:$0xff]  ;;  %v5802_v53 = vld [vmem:[%s11530_s7 + $0x240] sm:$0xfc] }
 0x1c7   :  { %12022 = vst [vmem:[#allocation44_spill] sm:$0xff] %v9812_v38  ;;  %6117 = vmatpush1.bf16.msra.mxu1 %v6116_v18  ;;  %v3351_v39 = vadd.f32 %v3341_v35, %v3317_v61  ;;  %v3375_v16 = vsel %vm121_vm2, %v3373_v45, %v11748_v54  ;;  %v5863_v7 = vld [vmem:[%s11530_s7 + $0x2d8] sm:$0xfc]  ;;  %v3419_v37 = vrot.slane %v3405_v25, 1  ;;  %v11749_v2 = vrot.slane %v9812_v38, 1 }
 0x1c8   :  { %12023 = vst [vmem:[#allocation45_spill] sm:$0xff] %v9823_v9  ;;  %v3453_v35 = vrot.slane %v3439_v23, 2  ;;  %v3474_v61 = vmul.f32 %v9828_v52, %v6555_v20  ;;  %v3263_v18 = vadd.f32 %v3253_v32, %v3229_v47  ;;  %v11754_v45 = vrot.slane %v9823_v9, 2 }
 0x1c9   :  { %v3385_v15 = vadd.f32 %v3375_v16, %v3351_v39  ;;  %v3486_v54 = vmul.f32 %v5859_v12, %v6558_v21  ;;  %v3421_v25 = vsel %vm85_vm0, %v3419_v37, %v11749_v2  ;;  %v9848_v23 = vmul.f32 %v9840_v63, %v6558_v21  ;;  %v5798_v39 = vld [vmem:[%s11530_s7 + $0x240] sm:$0xfe] }
 0x1ca   :  { %v3520_v32 = vmul.f32 %v5863_v7, %v6599_v11  ;;  %v9853_v47 = vmul.f32 %v9840_v63, %v6599_v11  ;;  %v3297_v16 = vadd.f32 %v3287_v1, %v3263_v18  ;;  %v3455_v37 = vsel %vm121_vm2, %v3453_v35, %v11754_v45  ;;  %v5810_v35 = vld [vmem:[%s11530_s7 + $0x270] sm:$0xfe] }
 0x1cb   :  { %12024 = vst [vmem:[#allocation46_spill] sm:$0xff] %v9848_v23  ;;  %v3397_v12 = vadd.f32 %v3393_v44, %v3385_v15  ;;  %v3500_v2 = vrot.slane %v3486_v54, 1  ;;  %v11755_v7 = vrot.slane %v9848_v23, 1  ;;  %v3067_v42 = vmul.f32 %v9545_v17, %v6406_v30 }
 0x1cc   :  { %12025 = vst [vmem:[#allocation47_spill] sm:$0xff] %v9853_v47  ;;  %v3534_v27 = vrot.slane %v3520_v32, 2  ;;  %v11757_v38 = vrot.slane %v9853_v47, 2  ;;  %v9869_v1 = vadd.f32 %v3297_v16, %v6386_v26  ;;  %v3075_v18 = vmul.f32 %v5798_v39, %v6426_v36  ;;  %v5814_v39 = vld [vmem:[%s11530_s7 + $0x270] sm:$0xfc] }
 0x1cd   :  { %v3431_v44 = vadd.f32 %v3421_v25, %v3397_v12  ;;  %v9874_v54 = vmul.f32 %v9570_v19, %v6426_v36  ;;  %v3502_v15 = vsel %vm85_vm0, %v3500_v2, %v11755_v7  ;;  %v3109_v25 = vmul.f32 %v5802_v53, %v6450_v43 }
 0x1ce   :  { %v3536_v17 = vsel %vm121_vm2, %v3534_v27, %v11757_v38  ;;  %v9888_v32 = vmul.f32 %v9570_v19, %v6450_v43  ;;  %v3305_v16 = vmax.f32 %v9869_v1, 0.0  ;;  %v3087_v45 = vrot.slane %v3075_v18, 1 }
 0x1cf   :  { %12026 = vst [vmem:[#allocation48_spill] sm:$0xff] %v9874_v54  ;;  %v3465_v12 = vadd.f32 %v3455_v37, %v3431_v44  ;;  %v11759_v2 = vrot.slane %v9874_v54, 1  ;;  %v3121_v7 = vrot.slane %v3109_v25, 2  ;;  %v3143_v27 = vmul.f32 %v9643_v5, %v6474_v50  ;;  %v5822_v44 = vld [vmem:[%s11530_s7 + $0x2a0] sm:$0xfe] }
 0x1d0   :  { %12027 = vst [vmem:[#allocation49_spill] sm:$0xff] %v9888_v32  ;;  %v11758_v47 = vrot.slane %v9888_v32, 2  ;;  %v3155_v53 = vmul.f32 %v5810_v35, %v6496_v57  ;;  %v9904_v1 = vmul.f32 %v9658_v3, %v6496_v57  ;;  %v3189_v37 = vmul.f32 %v5814_v39, %v6532_v6  ;;  %v5826_v39 = vld [vmem:[%s11530_s7 + $0x2a0] sm:$0xfc] }
 0x1d1   :  { %v3478_v19 = vadd.f32 %v3474_v61, %v3465_v12  ;;  %v3089_v38 = vsel %vm85_vm0, %v3087_v45, %v11759_v2  ;;  %v9915_v25 = vmul.f32 %v9658_v3, %v6532_v6  ;;  %v9920_v45 = vld [vmem:[%s11530_s7 + $0x2a0] sm:$0xff]  ;;  %v3236_v23 = vmul.f32 %v5822_v44, %v6558_v21 }
 0x1d2   :  { %12028 = vst [vmem:[#allocation50_spill] sm:$0xff] %v9904_v1  ;;  %v3101_v18 = vadd.f32 %v3089_v38, %v3067_v42  ;;  %v3123_v35 = vsel %vm121_vm2, %v3121_v7, %v11758_v47  ;;  %v3167_v61 = vrot.slane %v3155_v53, 1  ;;  %v11763_v42 = vrot.slane %v9904_v1, 1  ;;  %v9929_v7 = vld [vmem:[%s11530_s7 + $0x2b0] sm:$0xff] }
 0x1d3   :  { %12029 = vst [vmem:[#allocation51_spill] sm:$0xff] %v9915_v25  ;;  %v3512_v12 = vadd.f32 %v3502_v15, %v3478_v19  ;;  %v3201_v38 = vrot.slane %v3189_v37, 2  ;;  %v3224_v53 = vmul.f32 %v9920_v45, %v6555_v20  ;;  %v11767_v2 = vrot.slane %v9915_v25, 2 }
 0x1d4   :  { %v3135_v47 = vadd.f32 %v3123_v35, %v3101_v18  ;;  %v9937_v32 = vmul.f32 %v9929_v7, %v6558_v21  ;;  %v3169_v19 = vsel %vm85_vm0, %v3167_v61, %v11763_v42  ;;  %v3270_v37 = vmul.f32 %v5826_v39, %v6599_v11  ;;  %v5834_v18 = vld [vmem:[%s11530_s7 + $0x270] sm:$0xfe] }
 0x1d5   :  { %v3546_v15 = vadd.f32 %v3536_v17, %v3512_v12  ;;  %v9945_v9 = vmul.f32 %v9929_v7, %v6599_v11  ;;  %v3203_v35 = vsel %vm121_vm2, %v3201_v38, %v11767_v2  ;;  %v3248_v17 = vrot.slane %v3236_v23, 1  ;;  %v5838_v61 = vld [vmem:[%s11530_s7 + $0x270] sm:$0xfc] }
 0x1d6   :  { %12030 = vst [vmem:[#allocation52_spill] sm:$0xff] %v9937_v32  ;;  %v3147_v44 = vadd.f32 %v3143_v27, %v3135_v47  ;;  %v11766_v12 = vrot.slane %v9937_v32, 1  ;;  %v3282_v42 = vrot.slane %v3270_v37, 2  ;;  %v3316_v54 = vmul.f32 %v9643_v5, %v6406_v30 }
 0x1d7   :  { %12031 = vst [vmem:[#allocation53_spill] sm:$0xff] %v9945_v9  ;;  %v3550_v39 = vadd.f32 %v3546_v15, %v6386_v26  ;;  %v11770_v1 = vrot.slane %v9945_v9, 2  ;;  %v3324_v23 = vmul.f32 %v5834_v18, %v6426_v36  ;;  %v9967_v38 = vmul.f32 %v9658_v3, %v6426_v36  ;;  %v5846_v15 = vld [vmem:[%s11530_s7 + $0x2a0] sm:$0xfe] }
 0x1d8   :  { %v3181_v47 = vadd.f32 %v3169_v19, %v3147_v44  ;;  %v3250_v27 = vsel %vm85_vm0, %v3248_v17, %v11766_v12  ;;  %v3358_v19 = vmul.f32 %v5838_v61, %v6450_v43  ;;  %v9978_v44 = vmul.f32 %v9658_v3, %v6450_v43  ;;  %v5850_v18 = vld [vmem:[%s11530_s7 + $0x2a0] sm:$0xfc] }
 0x1d9   :  { %12032 = vst [vmem:[#allocation54_spill] sm:$0xff] %v9967_v38  ;;  %v3554_v37 = vmax.f32 %v3550_v39, 0.0  ;;  %v3284_v5 = vsel %vm121_vm2, %v3282_v42, %v11770_v1  ;;  %v3336_v12 = vrot.slane %v3324_v23, 1  ;;  %v11772_v2 = vrot.slane %v9967_v38, 1 }
 0x1da   :  { %12033 = vst [vmem:[#allocation55_spill] sm:$0xff] %v9978_v44  ;;  %v3215_v17 = vadd.f32 %v3203_v35, %v3181_v47  ;;  %v3392_v39 = vmul.f32 %v9920_v45, %v6474_v50  ;;  %v3370_v32 = vrot.slane %v3358_v19, 2  ;;  %v11771_v42 = vrot.slane %v9978_v44, 2  ;;  %v5862_v19 = vld [vmem:[%s11530_s7 + $0x2d0] sm:$0xfc] }
 0x1db   :  { %v6118_v9 = vpack.c.bf16 %v3554_v37, %v3305_v16  ;;  %v3404_v61 = vmul.f32 %v5846_v15, %v6496_v57  ;;  %v3338_v3 = vsel %vm85_vm0, %v3336_v12, %v11772_v2  ;;  %v9993_v35 = vmul.f32 %v9929_v7, %v6496_v57  ;;  %v5858_v16 = vld [vmem:[%s11530_s7 + $0x2d0] sm:$0xfe] }
 0x1dc   :  { %v3228_v1 = vadd.f32 %v3224_v53, %v3215_v17  ;;  %v3438_v47 = vmul.f32 %v5850_v18, %v6532_v6  ;;  %v3350_v23 = vadd.f32 %v3338_v3, %v3316_v54  ;;  %v3372_v53 = vsel %vm121_vm2, %v3370_v32, %v11771_v42  ;;  %v10009_v37 = vld [vmem:[%s11530_s7 + $0x2d0] sm:$0xff]  ;;  %v10018_v32 = vld [vmem:[%s11530_s7 + $0x2e0] sm:$0xff] }
 0x1dd   :  { %12034 = vst [vmem:[#allocation56_spill] sm:$0xff] %v9993_v35  ;;  %6119 = vmatprep.subr.bf16.mxu1 %v6118_v9  ;;  %v3416_v15 = vrot.slane %v3404_v61, 1  ;;  %v10004_v12 = vmul.f32 %v9929_v7, %v6532_v6  ;;  %v11774_v54 = vrot.slane %v9993_v35, 1  ;;  %v3473_v17 = vmul.f32 %v10009_v37, %v6555_v20 }
 0x1de   :  { %v3262_v9 = vadd.f32 %v3250_v27, %v3228_v1  ;;  %v3450_v18 = vrot.slane %v3438_v47, 2  ;;  %v3384_v61 = vadd.f32 %v3372_v53, %v3350_v23  ;;  %v3485_v42 = vmul.f32 %v5858_v16, %v6558_v21  ;;  %v5871_v23 = vld [vmem:[%s11530_s7 + $0x2a8] sm:$0xfe] }
 0x1df   :  { %12035 = vst [vmem:[#allocation57_spill] sm:$0xff] %v10004_v12  ;;  %v11776_v3 = vrot.slane %v10004_v12, 2  ;;  %v10026_v2 = vmul.f32 %v10018_v32, %v6558_v21  ;;  %v3418_v27 = vsel %vm85_vm0, %v3416_v15, %v11774_v54  ;;  %v3519_v47 = vmul.f32 %v5862_v19, %v6599_v11  ;;  %v5875_v15 = vld [vmem:[%s11530_s7 + $0x2a8] sm:$0xfc] }
 0x1e0   :  { %v3296_v1 = vadd.f32 %v3284_v5, %v3262_v9  ;;  %v10034_v44 = vmul.f32 %v10018_v32, %v6599_v11  ;;  %v3396_v16 = vadd.f32 %v3392_v39, %v3384_v61  ;;  %v3497_v5 = vrot.slane %v3485_v42, 1 }
 0x1e1   :  { %12036 = vst [vmem:[#allocation58_spill] sm:$0xff] %v10026_v2  ;;  %v3452_v53 = vsel %vm121_vm2, %v3450_v18, %v11776_v3  ;;  %v11777_v9 = vrot.slane %v10026_v2, 1  ;;  %v3531_v54 = vrot.slane %v3519_v47, 2  ;;  %v3566_v39 = vmul.f32 %v9726_v48, %v6406_v30 }
 0x1e2   :  { %12037 = vst [vmem:[#allocation59_spill] sm:$0xff] %v10034_v44  ;;  %v10047_v19 = vadd.f32 %v3296_v1, %v6386_v26  ;;  %v11780_v35 = vrot.slane %v10034_v44, 2  ;;  %v3430_v61 = vadd.f32 %v3418_v27, %v3396_v16  ;;  %v3574_v18 = vmul.f32 %v5871_v23, %v6426_v36  ;;  %v5883_v1 = vld [vmem:[%s11530_s7 + $0x2d8] sm:$0xfe] }
 0x1e3   :  { %v3499_v42 = vsel %vm85_vm0, %v3497_v5, %v11777_v9  ;;  %v10058_v3 = vmul.f32 %v9750_v29, %v6426_v36  ;;  %v3608_v27 = vmul.f32 %v5875_v15, %v6450_v43  ;;  %v10070_v16 = vmul.f32 %v9750_v29, %v6450_v43  ;;  %v5887_v23 = vld [vmem:[%s11530_s7 + $0x2d8] sm:$0xfc] }
 0x1e4   :  { %v3304_v47 = vmax.f32 %v10047_v19, 0.0  ;;  %v3533_v48 = vsel %vm121_vm2, %v3531_v54, %v11780_v35  ;;  %v3464_v5 = vadd.f32 %v3452_v53, %v3430_v61  ;;  %v3588_v9 = vrot.slane %v3574_v18, 1 }
 0x1e5   :  { %12038 = vst [vmem:[#allocation60_spill] sm:$0xff] %v10058_v3  ;;  %12039 = vst [vmem:[#allocation61_spill] sm:$0xff] %v10070_v16  ;;  %v11782_v2 = vrot.slane %v10058_v3, 1  ;;  %v3642_v19 = vmul.f32 %v9828_v52, %v6474_v50  ;;  %v3622_v44 = vrot.slane %v3608_v27, 2  ;;  %v11785_v54 = vrot.slane %v10070_v16, 2 }
 0x1e6   :  { %v3654_v15 = vmul.f32 %v5883_v1, %v6496_v57  ;;  %v10082_v29 = vmul.f32 %v9840_v63, %v6496_v57  ;;  %v3477_v35 = vadd.f32 %v3473_v17, %v3464_v5  ;;  %v3688_v61 = vmul.f32 %v5887_v23, %v6532_v6  ;;  %v5895_v27 = vld [vmem:[%s11530_s7 + $0x308] sm:$0xfe] }
 0x1e7   :  { %v3590_v53 = vsel %vm85_vm0, %v3588_v9, %v11782_v2  ;;  %v10090_v18 = vmul.f32 %v9840_v63, %v6532_v6  ;;  %v3624_v12 = vsel %vm121_vm2, %v3622_v44, %v11785_v54  ;;  %v5891_v9 = vld [vmem:[%s11530_s7 + $0x308] sm:$0xff]  ;;  %v3735_v54 = vmul.f32 %v5895_v27, %v6558_v21  ;;  %v5911_v27 = vld [vmem:[%s11530_s7 + $0x2d8] sm:$0xfc] }
 0x1e8   :  { %12040 = vst [vmem:[#allocation62_spill] sm:$0xff] %v10082_v29  ;;  %v3600_v1 = vadd.f32 %v3590_v53, %v3566_v39  ;;  %v3668_v17 = vrot.slane %v3654_v15, 1  ;;  %v11787_v5 = vrot.slane %v10082_v29, 1  ;;  %v5899_v23 = vld [vmem:[%s11530_s7 + $0x308] sm:$0xfc]  ;;  %v3511_v2 = vadd.f32 %v3499_v42, %v3477_v35  ;;  %v5893_v39 = vld [vmem:[%s11530_s7 + $0x318] sm:$0xff] }
 0x1e9   :  { %12041 = vst [vmem:[#allocation63_spill] sm:$0xff] %v10090_v18  ;;  %v3702_v3 = vrot.slane %v3688_v61, 2  ;;  %v11790_v38 = vrot.slane %v10090_v18, 2  ;;  %v3723_v44 = vmul.f32 %v5891_v9, %v6555_v20  ;;  %v10115_v16 = vmul.f32 %v5893_v39, %v6558_v21  ;;  %v5907_v35 = vld [vmem:[%s11530_s7 + $0x2d8] sm:$0xfe] }
 0x1ea   :  { %v3634_v15 = vadd.f32 %v3624_v12, %v3600_v1  ;;  %v3670_v53 = vsel %vm85_vm0, %v3668_v17, %v11787_v5  ;;  %v3545_v42 = vadd.f32 %v3533_v48, %v3511_v2  ;;  %v3769_v12 = vmul.f32 %v5899_v23, %v6599_v11 }
 0x1eb   :  { %12042 = vst [vmem:[#allocation64_spill] sm:$0xff] %v10115_v16  ;;  %v3704_v61 = vsel %vm121_vm2, %v3702_v3, %v11790_v38  ;;  %v10125_v1 = vmul.f32 %v5893_v39, %v6599_v11  ;;  %v3749_v5 = vrot.slane %v3735_v54, 1  ;;  %v11792_v29 = vrot.slane %v10115_v16, 1 }
 0x1ec   :  { %v3646_v17 = vadd.f32 %v3642_v19, %v3634_v15  ;;  %v3815_v2 = vmul.f32 %v9828_v52, %v6406_v30  ;;  %v3549_v48 = vadd.f32 %v3545_v42, %v6386_v26  ;;  %v3783_v18 = vrot.slane %v3769_v12, 2  ;;  %v5919_v52 = vld [vmem:[%s11530_s7 + $0x308] sm:$0xfe] }
 0x1ed   :  { %12043 = vst [vmem:[#allocation65_spill] sm:$0xff] %v10125_v1  ;;  %v11794_v3 = vrot.slane %v10125_v1, 2  ;;  %v3823_v23 = vmul.f32 %v5907_v35, %v6426_v36  ;;  %v3751_v25 = vsel %vm85_vm0, %v3749_v5, %v11792_v29  ;;  %v10141_v19 = vmul.f32 %v9840_v63, %v6426_v36  ;;  %v5923_v5 = vld [vmem:[%s11530_s7 + $0x308] sm:$0xfc] }
 0x1ee   :  { %v3680_v38 = vadd.f32 %v3670_v53, %v3646_v17  ;;  %v3857_v54 = vmul.f32 %v5911_v27, %v6450_v43  ;;  %v3553_v15 = vmax.f32 %v3549_v48, 0.0  ;;  %v10152_v42 = vmul.f32 %v9840_v63, %v6450_v43 }
 0x1ef   :  { %v3785_v35 = vsel %vm121_vm2, %v3783_v18, %v11794_v3  ;;  %v3837_v53 = vrot.slane %v3823_v23, 1  ;;  %v11796_v27 = vrot.slane %v10141_v19, 1  ;;  %v3891_v29 = vmul.f32 %v5891_v9, %v6474_v50  ;;  %v5931_v9 = vld [vmem:[%s11530_s7 + $0x338] sm:$0xfe] }
 0x1f0   :  { %v3714_v12 = vadd.f32 %v3704_v61, %v3680_v38  ;;  %v3871_v17 = vrot.slane %v3857_v54, 2  ;;  %v6120_v48 = vpack.c.bf16 %v3553_v15, %v3304_v47  ;;  %v11795_v1 = vrot.slane %v10152_v42, 2  ;;  %v5929_v47 = vld [vmem:[%s11530_s7 + $0x348] sm:$0xff] }
 0x1f1   :  { %v3903_v18 = vmul.f32 %v5919_v52, %v6496_v57  ;;  %v10162_v23 = vmul.f32 %v5893_v39, %v6496_v57  ;;  %v3839_v3 = vsel %vm85_vm0, %v3837_v53, %v11796_v27  ;;  %v3937_v38 = vmul.f32 %v5923_v5, %v6532_v6 }
 0x1f2   :  { %v3727_v63 = vadd.f32 %v3723_v44, %v3714_v12  ;;  %v10169_v61 = vmul.f32 %v5893_v39, %v6532_v6  ;;  %6121 = vmatpush1.bf16.msra.mxu1 %v6120_v48  ;;  %v3849_v54 = vadd.f32 %v3839_v3, %v3815_v2  ;;  %v3873_v44 = vsel %vm121_vm2, %v3871_v17, %v11795_v1  ;;  %v5935_v39 = vld [vmem:[%s11530_s7 + $0x338] sm:$0xfc] }
 0x1f3   :  { %12044 = vst [vmem:[#allocation66_spill] sm:$0xff] %v10162_v23  ;;  %v3917_v52 = vrot.slane %v3903_v18, 1  ;;  %v11797_v15 = vrot.slane %v10162_v23, 1  ;;  %v3951_v5 = vrot.slane %v3937_v38, 2  ;;  %v5927_v48 = vld [vmem:[%s11530_s7 + $0x338] sm:$0xff]  ;;  %v3984_v3 = vmul.f32 %v5931_v9, %v6558_v21 }
 0x1f4   :  { %12045 = vst [vmem:[#allocation67_spill] sm:$0xff] %v10169_v61  ;;  %v3761_v53 = vadd.f32 %v3751_v25, %v3727_v63  ;;  %v3883_v2 = vadd.f32 %v3873_v44, %v3849_v54  ;;  %v10190_v17 = vmul.f32 %v5929_v47, %v6558_v21  ;;  %v5870_v18 = vld [vmem:[%s11530_s7 + $0x2a0] sm:$0xfe]  ;;  %v4018_v63 = vmul.f32 %v5935_v39, %v6599_v11 }
 0x1f5   :  { %v3919_v25 = vsel %vm85_vm0, %v3917_v52, %v11797_v15  ;;  %v10200_v38 = vmul.f32 %v5929_v47, %v6599_v11  ;;  %v5874_v9 = vld [vmem:[%s11530_s7 + $0x2a0] sm:$0xfc]  ;;  %v3972_v44 = vmul.f32 %v5927_v48, %v6555_v20  ;;  %v3998_v27 = vrot.slane %v3984_v3, 1 }
 0x1f6   :  { %12046 = vst [vmem:[#allocation68_spill] sm:$0xff] %v10190_v17  ;;  %v3795_v1 = vadd.f32 %v3785_v35, %v3761_v53  ;;  %v3895_v54 = vadd.f32 %v3891_v29, %v3883_v2  ;;  %v11801_v12 = vrot.slane %v10190_v17, 1  ;;  %v12048_v35 = vrot.slane %v10169_v61, 2  ;;  %v5882_v2 = vld [vmem:[%s11530_s7 + $0x2d0] sm:$0xfe] }
 0x1f7   :  { %12047 = vst [vmem:[#allocation69_spill] sm:$0xff] %v10200_v38  ;;  %v4032_v52 = vrot.slane %v4018_v63, 2  ;;  %v11800_v39 = vrot.slane %v10200_v38, 2  ;;  %v3573_v47 = vmul.f32 %v5870_v18, %v6426_v36  ;;  %v3565_v16 = vmul.f32 %v9920_v45, %v6406_v30  ;;  %v5892_v38 = vld [vmem:[%s11530_s7 + $0x310] sm:$0xff] }
 0x1f8   :  { %v3953_v53 = vsel %vm121_vm2, %v3951_v5, %v12048_v35  ;;  %v3929_v15 = vadd.f32 %v3919_v25, %v3895_v54  ;;  %v10216_v29 = vmul.f32 %v9929_v7, %v6426_v36  ;;  %v3607_v48 = vmul.f32 %v5874_v9, %v6450_v43  ;;  %v5886_v5 = vld [vmem:[%s11530_s7 + $0x2d0] sm:$0xfc] }
 0x1f9   :  { %v3799_v3 = vadd.f32 %v3795_v1, %v6386_v26  ;;  %v4000_v45 = vsel %vm85_vm0, %v3998_v27, %v11801_v12  ;;  %v3585_v18 = vrot.slane %v3573_v47, 1  ;;  %v10231_v25 = vmul.f32 %v9929_v7, %v6450_v43  ;;  %v5894_v7 = vld [vmem:[%s11530_s7 + $0x300] sm:$0xfe] }
 0x1fa   :  { %12049 = vst [vmem:[#allocation70_spill] sm:$0xff] %v10216_v29  ;;  %v3963_v63 = vadd.f32 %v3953_v53, %v3929_v15  ;;  %v4034_v9 = vsel %vm121_vm2, %v4032_v52, %v11800_v39  ;;  %v11802_v54 = vrot.slane %v10216_v29, 1  ;;  %v3619_v35 = vrot.slane %v3607_v48, 2 }
 0x1fb   :  { %v11808_v61 = vrot.slane %v10231_v25, 2  ;;  %v3653_v1 = vmul.f32 %v5882_v2, %v6496_v57  ;;  %v10241_v27 = vmul.f32 %v10018_v32, %v6496_v57  ;;  %v3687_v47 = vmul.f32 %v5886_v5, %v6532_v6  ;;  %v5898_v2 = vld [vmem:[%s11530_s7 + $0x300] sm:$0xfc] }
 0x1fc   :  { %v3976_v15 = vadd.f32 %v3972_v44, %v3963_v63  ;;  %v3587_v53 = vsel %vm85_vm0, %v3585_v18, %v11802_v54  ;;  %v3641_v52 = vmul.f32 %v10009_v37, %v6474_v50  ;;  %v10254_v48 = vmul.f32 %v10018_v32, %v6532_v6 }
 0x1fd   :  { %12050 = vst [vmem:[#allocation71_spill] sm:$0xff] %v10241_v27  ;;  %v3599_v5 = vadd.f32 %v3587_v53, %v3565_v16  ;;  %v3621_v44 = vsel %vm121_vm2, %v3619_v35, %v11808_v61  ;;  %v3665_v63 = vrot.slane %v3653_v1, 1  ;;  %v11807_v39 = vrot.slane %v10241_v27, 1  ;;  %v5890_v16 = vld [vmem:[%s11530_s7 + $0x300] sm:$0xff]  ;;  %v5906_v1 = vld [vmem:[%s11530_s7 + $0x2d0] sm:$0xfe] }
 0x1fe   :  { %12051 = vst [vmem:[#allocation72_spill] sm:$0xff] %v10254_v48  ;;  %v4010_v18 = vadd.f32 %v4000_v45, %v3976_v15  ;;  %v3699_v12 = vrot.slane %v3687_v47, 2  ;;  %v11810_v54 = vrot.slane %v10254_v48, 2  ;;  %v3734_v17 = vmul.f32 %v5894_v7, %v6558_v21  ;;  %v5910_v53 = vld [vmem:[%s11530_s7 + $0x2d0] sm:$0xfc] }
 0x1ff   :  { %v3803_v23 = vmax.f32 %v3799_v3, 0.0  ;;  %v3633_v29 = vadd.f32 %v3621_v44, %v3599_v5  ;;  %v10272_v35 = vmul.f32 %v5892_v38, %v6558_v21  ;;  %v3768_v45 = vmul.f32 %v5898_v2, %v6599_v11  ;;  %v5930_v48 = vld [vmem:[%s11530_s7 + $0x330] sm:$0xfe] }
 0x200   :  { %v4044_v47 = vadd.f32 %v4034_v9, %v4010_v18  ;;  %v3667_v7 = vsel %vm85_vm0, %v3665_v63, %v11807_v39  ;;  %v3722_v3 = vmul.f32 %v5890_v16, %v6555_v20  ;;  %v10283_v15 = vmul.f32 %v5892_v38, %v6599_v11 }
 0x201   :  { %12052 = vst [vmem:[#allocation73_spill] sm:$0xff] %v10272_v35  ;;  %v3645_v5 = vadd.f32 %v3641_v52, %v3633_v29  ;;  %v3701_v2 = vsel %vm121_vm2, %v3699_v12, %v11810_v54  ;;  %v3746_v44 = vrot.slane %v3734_v17, 1  ;;  %v3780_v63 = vrot.slane %v3768_v45, 2  ;;  %v5918_v17 = vld [vmem:[%s11530_s7 + $0x300] sm:$0xfe] }
 0x202   :  { %12053 = vst [vmem:[#allocation74_spill] sm:$0xff] %v10283_v15  ;;  %v4048_v18 = vadd.f32 %v4044_v47, %v6386_v26  ;;  %v3822_v39 = vmul.f32 %v5906_v1, %v6426_v36  ;;  %v10296_v61 = vmul.f32 %v10018_v32, %v6426_v36  ;;  %v3814_v29 = vmul.f32 %v10009_v37, %v6406_v30  ;;  %v5922_v37 = vld [vmem:[%s11530_s7 + $0x300] sm:$0xfc] }
 0x203   :  { %v3679_v27 = vadd.f32 %v3667_v7, %v3645_v5  ;;  %v3856_v52 = vmul.f32 %v5910_v53, %v6450_v43  ;;  %v10303_v12 = vmul.f32 %v10018_v32, %v6450_v43  ;;  %v3890_v32 = vmul.f32 %v5890_v16, %v6474_v50 }
 0x204   :  { %v4052_v45 = vmax.f32 %v4048_v18, 0.0  ;;  %v3834_v47 = vrot.slane %v3822_v39, 1  ;;  %v11814_v54 = vrot.slane %v10296_v61, 1  ;;  %v3902_v1 = vmul.f32 %v5918_v17, %v6496_v57  ;;  %v5934_v17 = vld [vmem:[%s11530_s7 + $0x330] sm:$0xfc] }
 0x205   :  { %v3713_v7 = vadd.f32 %v3701_v2, %v3679_v27  ;;  %v3868_v53 = vrot.slane %v3856_v52, 2  ;;  %v11812_v5 = vrot.slane %v10303_v12, 2  ;;  %v10320_v39 = vmul.f32 %v5892_v38, %v6496_v57  ;;  %v5928_v52 = vld [vmem:[%s11530_s7 + $0x340] sm:$0xff] }
 0x206   :  { %v6122_v9 = vpack.c.bf16 %v4052_v45, %v3803_v23  ;;  %v3836_v18 = vsel %vm85_vm0, %v3834_v47, %v11814_v54  ;;  %v3936_v23 = vmul.f32 %v5922_v37, %v6532_v6  ;;  %v12054_v45 = vrot.slane %v10272_v35, 1 }
 0x207   :  { %v3726_v27 = vadd.f32 %v3722_v3, %v3713_v7  ;;  %v3848_v2 = vadd.f32 %v3836_v18, %v3814_v29  ;;  %v3870_v16 = vsel %vm121_vm2, %v3868_v53, %v11812_v5  ;;  %v3914_v29 = vrot.slane %v3902_v1, 1 }
 0x208   :  { %6123 = vmatprep.subr.bf16.mxu1 %v6122_v9  ;;  %v3748_v3 = vsel %vm85_vm0, %v3746_v44, %v12054_v45  ;;  %v11813_v47 = vrot.slane %v10320_v39, 1  ;;  %v10340_v7 = vmul.f32 %v5892_v38, %v6532_v6  ;;  %v3948_v53 = vrot.slane %v3936_v23, 2  ;;  %v5926_v44 = vld [vmem:[%s11530_s7 + $0x330] sm:$0xff] }
 0x209   :  { %v3882_v37 = vadd.f32 %v3870_v16, %v3848_v2  ;;  %v3983_v18 = vmul.f32 %v5930_v48, %v6558_v21  ;;  %v10351_v1 = vmul.f32 %v5928_v52, %v6558_v21  ;;  %v4017_v38 = vmul.f32 %v5934_v17, %v6599_v11 }
 0x20a   :  { %v3916_v5 = vsel %vm85_vm0, %v3914_v29, %v11813_v47  ;;  %v11818_v9 = vrot.slane %v10340_v7, 2  ;;  %v3760_v45 = vadd.f32 %v3748_v3, %v3726_v27  ;;  %v12056_v2 = vrot.slane %v10283_v15, 2  ;;  %v4059_v29 = vld [vmem:[%s11528_s5] sm:$0xf] }
 0x20b   :  { %12055 = vst [vmem:[#allocation75_spill] sm:$0xff] %v10351_v1  ;;  %v3894_v16 = vadd.f32 %v3890_v32, %v3882_v37  ;;  %v10358_v23 = vmul.f32 %v5928_v52, %v6599_v11  ;;  %v3995_v54 = vrot.slane %v3983_v18, 1  ;;  %v11817_v17 = vrot.slane %v10351_v1, 1 }
 0x20c   :  { %v3782_v48 = vsel %vm121_vm2, %v3780_v63, %v12056_v2  ;;  %v3950_v47 = vsel %vm121_vm2, %v3948_v53, %v11818_v9  ;;  %v3971_v3 = vmul.f32 %v5926_v44, %v6555_v20  ;;  %v6238_v15 = vmov 0   ;;  %v5211_v2 = vld [vmem:[%s11529_s6] sm:$0xff] }
 0x20d   :  { %12057 = vst [vmem:[#allocation76_spill] sm:$0xff] %v10358_v23  ;;  %v3928_v27 = vadd.f32 %v3916_v5, %v3894_v16  ;;  %6191 = vset.pattern.permute.xlu0 %v6238_v15  ;;  %6192 = vset.pattern.permute.xlu1 %v6238_v15  ;;  %v4029_v63 = vrot.slane %v4017_v38, 2  ;;  %v11816_v32 = vrot.slane %v10358_v23, 2  ;;  %v3794_v52 = vadd.f32 %v3782_v48, %v3760_v45 }
 0x20e   :  { %4246 = vperm.xlu0 %6191, %v4059_v29   ;;  %v3997_v53 = vsel %vm85_vm0, %v3995_v54, %v11817_v17  ;;  %v6199_v29 = vld [vmem:[%s11525_s2] sm:$0xf] }
 0x20f   :  { %v3962_v37 = vadd.f32 %v3950_v47, %v3928_v27  ;;  %v4031_v18 = vsel %vm121_vm2, %v4029_v63, %v11816_v32  ;;  %v3798_v15 = vadd.f32 %v3794_v52, %v6386_v26  ;;  %v6025_v47 = vld [vmem:[%s11528_s5 + $0x4] sm:$0xf] }
 0x211   :  { %v3975_v5 = vadd.f32 %v3971_v3, %v3962_v37  ;;  %v3802_v45 = vmax.f32 %v3798_v15, 0.0 }
 0x212   :  { %5216 = vperm.xlu0 %6191, %v5211_v2  }
 0x213   :  { %v4009_v44 = vadd.f32 %v3997_v53, %v3975_v5  ;;  %v5657_v53 = vld [vmem:[%s11530_s7 + $0x1a8] sm:$0x1] }
 0x214   :  { %v2082_v5 = vmul.f32 %v5657_v53, %v6426_v36 }
 0x215   :  { %v4043_v38 = vadd.f32 %v4031_v18, %v4009_v44  ;;  %v5693_v18 = vld [vmem:[%s11530_s7 + $0x1d8] sm:$0x1] }
 0x216   :  { %5249 = vperm.xlu0 %6191, %v6025_v47   ;;  %v2333_v15 = vmul.f32 %v5693_v18, %v6426_v36  ;;  %v2097_v44 = vrot.slane %v2082_v5, 1  ;;  %v5697_v47 = vld [vmem:[%s11530_s7 + $0x1d8] sm:$0x3]  ;;  %v5660_v5 = vld [vmem:[%s11530_s7 + $0x1a0] sm:$0x3]  ;;  %v6201_v18 = vld [vmem:[%s11530_s7 + $0x1c8] sm:$0xff] }
 0x217   :  { %v4047_v48 = vadd.f32 %v4043_v38, %v6386_v26  ;;  %v5656_v38 = vld [vmem:[%s11530_s7 + $0x1a0] sm:$0x1]  ;;  %v2115_v32 = vmul.f32 %v5660_v5, %v6450_v43  ;;  %v5709_v5 = vld [vmem:[%s11530_s7 + $0x208] sm:$0x3] }
 0x218   :  { %v2081_v53 = vmul.f32 %v5656_v38, %v6426_v36  ;;  %v12060_v38 = vrot.slane %v8946_v62, 2  ;;  %v5673_v62 = vld [vmem:[%s11530_s7 + $0x1d8] sm:$0x3] }
 0x219   :  { %v4051_v16 = vmax.f32 %v4047_v48, 0.0 }
 0x21b   :  { %v6124_v54 = vpack.c.bf16 %v4051_v16, %v3802_v45  ;;  %v6200_v45 = vld [vmem:[%s11530_s7 + $0x198] sm:$0xff]  ;;  %v2348_v16 = vrot.slane %v2333_v15, 1 }
 0x21c   :  { %v2072_v48 = vmul.f32 %v6200_v45, %v6406_v30 }
 0x21d   :  { %6125 = vmatpush1.bf16.msra.mxu1 %v6124_v54  ;;  %v2367_v54 = vmul.f32 %v5697_v47, %v6450_v43 }
 0x21f   :  { %v2382_v47 = vrot.slane %v2367_v54, 2  ;;  %v2148_v54 = vmul.f32 %v6201_v18, %v6474_v50 }
 0x220   :  { %5989 = vmatmul.mubr.msk.f32.vlgmr.msra.gmra.mrb[4].mxu1 %vm4095_vm1, %v6199_v29  ;;  %v4239_v27 = vpop.f32.mrb[0].mxu0  ;;  %v12058_v29 = vrot.slane %v8941_v10, 1  ;;  %v5669_v10 = vld [vmem:[%s11530_s7 + $0x1d8] sm:$0x1] }
 0x221   :  { %5340 = vmatprep.mubr.f32.mxu1 %v11964_v56  ;;  %v10389_v3 = vadd.f32 %v4239_v27, %v9506_v28  ;;  %v4241_v63 = vpop.f32.mrb[1].mxu0  ;;  %v5661_v28 = vld [vmem:[%s11530_s7 + $0x1a8] sm:$0x3] }
 0x222   :  { %v4242_v52 = vadd.f32 %v4241_v63, %v9522_v49  ;;  %v2116_v49 = vmul.f32 %v5661_v28, %v6450_v43  ;;  %v2098_v27 = vsel %vm85_vm0, %v12058_v29, %v2097_v44  ;;  %v2323_v28 = vmul.f32 %v6201_v18, %v6406_v30  ;;  %v5705_v29 = vld [vmem:[%s11530_s7 + $0x208] sm:$0x1] }
 0x223   :  { %v2106_v15 = vadd.f32 %v2098_v27, %v2072_v48  ;;  %v12059_v44 = vrot.slane %v9026_v41, 1  ;;  %v2095_v48 = vrot.slane %v2081_v53, 1  ;;  %v5692_v27 = vld [vmem:[%s11530_s7 + $0x1d0] sm:$0x1]  ;;  %v2162_v41 = vmul.f32 %v5669_v10, %v6496_v57 }
 0x224   :  { %v2131_v63 = vrot.slane %v2116_v49, 2  ;;  %v2413_v53 = vmul.f32 %v5705_v29, %v6496_v57  ;;  %v2332_v10 = vmul.f32 %v5692_v27, %v6426_v36 }
 0x225   :  { %v2349_v49 = vsel %vm85_vm0, %v12059_v44, %v2348_v16 }
 0x226   :  { %v2132_v45 = vsel %vm121_vm2, %v12060_v38, %v2131_v63  ;;  %v2357_v17 = vadd.f32 %v2349_v49, %v2323_v28  ;;  %v12061_v63 = vrot.slane %v9031_v0, 2  ;;  %v6202_v28 = vld [vmem:[%s11530_s7 + $0x190] sm:$0xff]  ;;  %v12062_v0 = vrot.slane %v9126_v13, 1 }
 0x227   :  { %v2140_v16 = vadd.f32 %v2132_v45, %v2106_v15  ;;  %v2071_v18 = vmul.f32 %v6202_v28, %v6406_v30  ;;  %v2129_v15 = vrot.slane %v2115_v32, 2  ;;  %v2177_v38 = vrot.slane %v2162_v41, 1  ;;  %v5696_v13 = vld [vmem:[%s11530_s7 + $0x1d0] sm:$0x3] }
 0x228   :  { %v2383_v44 = vsel %vm121_vm2, %v12061_v63, %v2382_v47  ;;  %v2096_v49 = vsel %vm85_vm0, %v12062_v0, %v2095_v48  ;;  %v5668_v47 = vld [vmem:[%s11530_s7 + $0x1d0] sm:$0x1]  ;;  %v2196_v45 = vmul.f32 %v5673_v62, %v6532_v6  ;;  %v10469_v63 = vld [vmem:[%s11530_s7 + $0x1f8] sm:$0xff]  ;;  %v2428_v27 = vrot.slane %v2413_v53, 1 }
 0x229   :  { %v2391_v29 = vadd.f32 %v2383_v44, %v2357_v17  ;;  %v2399_v32 = vmul.f32 %v10469_v63, %v6474_v50  ;;  %v2152_v48 = vadd.f32 %v2148_v54, %v2140_v16  ;;  %v2447_v41 = vmul.f32 %v5709_v5, %v6532_v6 }
 0x22a   :  { %v2105_v17 = vadd.f32 %v2096_v49, %v2071_v18  ;;  %v12063_v62 = vrot.slane %v9140_v55, 2  ;;  %v2161_v0 = vmul.f32 %v5668_v47, %v6496_v57  ;;  %v2346_v9 = vrot.slane %v2332_v10, 1  ;;  %v5959_v47 = vld [vmem:[%s11526_s3 + $0x18] sm:$0xff] }
 0x22b   :  { %v2366_v16 = vmul.f32 %v5696_v13, %v6450_v43  ;;  %v12064_v53 = vrot.slane %v8960_v14, 1  ;;  %v2211_v5 = vrot.slane %v2196_v45, 2  ;;  %v2403_v18 = vadd.f32 %v2399_v32, %v2391_v29 }
 0x22c   :  { %v2130_v44 = vsel %vm121_vm2, %v12063_v62, %v2129_v15  ;;  %v5672_v15 = vld [vmem:[%s11530_s7 + $0x1d0] sm:$0x3]  ;;  %v2462_v49 = vrot.slane %v2447_v41, 2  ;;  %v12066_v32 = vrot.slane %v9234_v33, 1 }
 0x22d   :  { %v2178_v55 = vsel %vm85_vm0, %v12064_v53, %v2177_v38  ;;  %v5717_v38 = vld [vmem:[%s11530_s7 + $0x238] sm:$0x1]  ;;  %v2195_v29 = vmul.f32 %v5672_v15, %v6532_v6  ;;  %v12068_v53 = vrot.slane %v9063_v40, 2  ;;  %v12069_v15 = vrot.slane %v9162_v8, 1 }
 0x22e   :  { %v2347_v13 = vsel %vm85_vm0, %v12066_v32, %v2346_v9  ;;  %v5685_v9 = vld [vmem:[%s11530_s7 + $0x208] sm:$0x3] }
 0x22f   :  { %v2277_v8 = vmul.f32 %v5685_v9, %v6599_v11 }
 0x245   :  { %v4426_v37 = vpop.f32.mrb[2].mxu1 }
 0x246   :  { %v4428_v2 = vpop.f32.mrb[3].mxu1 }
 0x28d   :  { %v10477_v28 = vpop.permute.xlu0 %4246 }
 0x28e   :  { %v4250_v23 = vadd.f32 %v10477_v28, %v4242_v52  ;;  %v4431_v1 = vadd.f32 %v4426_v37, %v10477_v28  ;;  %v4432_v35 = vadd.f32 %v4428_v2, %v10477_v28  ;;  %v4249_v54 = vadd.f32 %v10477_v28, %v10389_v3  ;;  %v5681_v37 = vld [vmem:[%s11530_s7 + $0x208] sm:$0x1] }
 0x28f   :  { %v12065_v2 = vrot.slane %v9052_v34, 1  ;;  %v2243_v62 = vmul.f32 %v5681_v37, %v6558_v21  ;;  %v5680_v37 = vld [vmem:[%s11530_s7 + $0x200] sm:$0x1] }
 0x290   :  { %v4252_v52 = vmax.f32 %v4250_v23, 0.0  ;;  %v4434_v10 = vmax.f32 %v4432_v35, 0.0  ;;  %v4433_v14 = vmax.f32 %v4431_v1, 0.0  ;;  %v2139_v23 = vadd.f32 %v2130_v44, %v2105_v17  ;;  %v6204_v35 = vld [vmem:[%s11530_s7 + $0x1c0] sm:$0xff] }
 0x291   :  { %v2429_v3 = vsel %vm85_vm0, %v12065_v2, %v2428_v27  ;;  %v2147_v45 = vmul.f32 %v6204_v35, %v6474_v50  ;;  %v2322_v34 = vmul.f32 %v6204_v35, %v6406_v30  ;;  %v2175_v1 = vrot.slane %v2161_v0, 1  ;;  %v5704_v44 = vld [vmem:[%s11530_s7 + $0x200] sm:$0x1] }
 0x292   :  { %5962 = vmatprep.subr.msk.mxu0 %vm4449_vm3, %v4434_v10  ;;  %v2380_v27 = vrot.slane %v2366_v16, 2  ;;  %v4251_v41 = vmax.f32 %v4249_v54, 0.0  ;;  %v2186_v17 = vadd.f32 %v2178_v55, %v2152_v48  ;;  %v12067_v0 = vrot.slane %v8974_v60, 2  ;;  %v5960_v54 = vld [vmem:[%s11526_s3 + $0x20] sm:$0xff]  ;;  %v5721_v55 = vld [vmem:[%s11530_s7 + $0x238] sm:$0x3] }
 0x293   :  { %5963 = vmatpush1.msk.msra.mxu0 %vm4449_vm3, %v4433_v14  ;;  %v2437_v16 = vadd.f32 %v2429_v3, %v2403_v18  ;;  %v2494_v48 = vmul.f32 %v5717_v38, %v6558_v21  ;;  %v2463_v60 = vsel %vm121_vm2, %v12068_v53, %v2462_v49  ;;  %v2356_v18 = vadd.f32 %v2347_v13, %v2322_v34  ;;  %v5708_v38 = vld [vmem:[%s11530_s7 + $0x200] sm:$0x3] }
 0x294   :  { %5967 = vmatprep.subr.msk.mxu0 %vm4449_vm3, %v4252_v52  ;;  %5964 = vmatmul.mubr.msk.f32.vlgmr.msra.gmra.mrb[2].mxu0 %vm4439_vm4, %v5959_v47  ;;  %v2212_v33 = vsel %vm121_vm2, %v12067_v0, %v2211_v5  ;;  %v2151_v5 = vadd.f32 %v2147_v45, %v2139_v23  ;;  %v2176_v52 = vsel %vm85_vm0, %v12069_v15, %v2175_v1  ;;  %v2209_v10 = vrot.slane %v2195_v29, 2  ;;  %v5729_v1 = vld [vmem:[%s11530_s7 + $0x208] sm:$0x1]  ;;  %v4253_v15 = vld [vmem:[%s11526_s3] sm:$0xff] }
 0x295   :  { %5968 = vmatpush1.msk.msra.mxu0 %vm4449_vm3, %v4251_v41  ;;  %4526 = vmatprep.mubr.f32.mxu0 %v11964_v56  ;;  %v12070_v2 = vrot.slane %v9245_v51, 2  ;;  %v2412_v3 = vmul.f32 %v5704_v44, %v6496_v57  ;;  %v2220_v49 = vadd.f32 %v2212_v33, %v2186_v17  ;;  %v2229_v14 = vmul.f32 %v10469_v63, %v6555_v20  ;;  %v10562_v51 = vld [vmem:[%s11530_s7 + $0x228] sm:$0xff]  ;;  %v10578_v41 = vld [vmem:[%s11530_s7 + $0x1f0] sm:$0xff] }
 0x296   :  { %v2258_v47 = vrot.slane %v2243_v62, 1  ;;  %v2471_v23 = vadd.f32 %v2463_v60, %v2437_v16  ;;  %v2480_v35 = vmul.f32 %v10562_v51, %v6555_v20  ;;  %v2509_v45 = vrot.slane %v2494_v48, 1  ;;  %v5961_v29 = vld [vmem:[%s11526_s3 + $0x28] sm:$0x3] }
 0x297   :  { %v2381_v40 = vsel %vm121_vm2, %v12070_v2, %v2380_v27  ;;  %v2528_v34 = vmul.f32 %v5721_v55, %v6599_v11  ;;  %v2185_v32 = vadd.f32 %v2176_v52, %v2151_v5  ;;  %v2242_v13 = vmul.f32 %v5680_v37, %v6558_v21 }
 0x298   :  { %5965 = vmatmul.mubr.msk.f32.gmra.mrb[4].mxu0 %vm4439_vm4, %v5960_v54  ;;  %v2390_v27 = vadd.f32 %v2381_v40, %v2356_v18  ;;  %v2398_v17 = vmul.f32 %v10578_v41, %v6474_v50  ;;  %v12071_v62 = vrot.slane %v9173_v24, 2  ;;  %v2426_v0 = vrot.slane %v2412_v3, 1  ;;  %v5684_v54 = vld [vmem:[%s11530_s7 + $0x200] sm:$0x3] }
 0x299   :  { %4532 = vmatprep.mubr.f32.mxu0 %v11964_v56  ;;  %v2446_v33 = vmul.f32 %v5708_v38, %v6532_v6  ;;  %v2233_v9 = vadd.f32 %v2229_v14, %v2220_v49  ;;  %v12072_v16 = vrot.slane %v8996_v58, 1  ;;  %v2582_v53 = vmul.f32 %v5729_v1, %v6426_v36  ;;  %v5733_v58 = vld [vmem:[%s11530_s7 + $0x208] sm:$0x3]  ;;  %v5716_v14 = vld [vmem:[%s11530_s7 + $0x230] sm:$0x1]  ;;  %v12077_v1 = vld [vmem:[#allocation15_spill] sm:$0xff] }
 0x29a   :  { %v2210_v44 = vsel %vm121_vm2, %v12071_v62, %v2209_v10  ;;  %v2292_v60 = vrot.slane %v2277_v8, 2  ;;  %v2484_v24 = vadd.f32 %v2480_v35, %v2471_v23  ;;  %v12073_v55 = vrot.slane %v9093_v22, 1  ;;  %v12075_v23 = vld [vmem:[#allocation13_spill] sm:$0xff] }
 0x29b   :  { %v2259_v48 = vsel %vm85_vm0, %v12072_v16, %v2258_v47  ;;  %v2543_v18 = vrot.slane %v2528_v34, 2  ;;  %v2219_v52 = vadd.f32 %v2210_v44, %v2185_v32  ;;  %v2228_v10 = vmul.f32 %v10578_v41, %v6555_v20 }
 0x29c   :  { %5966 = vmatmul.mubr.msk.f32.gmra.mrb[6].mxu0 %vm4439_vm4, %v5961_v29  ;;  %v2510_v5 = vsel %vm85_vm0, %v12073_v55, %v2509_v45  ;;  %v2256_v37 = vrot.slane %v2242_v13, 1  ;;  %v2402_v2 = vadd.f32 %v2398_v17, %v2390_v27  ;;  %v2276_v22 = vmul.f32 %v5684_v54, %v6599_v11  ;;  %v12079_v27 = vld [vmem:[#allocation9_spill] sm:$0xff] }
 0x29d   :  { %4618 = vmatprep.mubr.f32.mxu0 %v11964_v56  ;;  %v12074_v40 = vrot.slane %v9265_v59, 1  ;;  %v2460_v49 = vrot.slane %v2446_v33, 2  ;;  %v2597_v47 = vrot.slane %v2582_v53, 1  ;;  %v2616_v8 = vmul.f32 %v5733_v58, %v6450_v43  ;;  %v4254_v59 = vld [vmem:[%s11526_s3 + $0x8] sm:$0xff]  ;;  %v5720_v53 = vld [vmem:[%s11530_s7 + $0x230] sm:$0x3] }
 0x29e   :  { %v2267_v38 = vadd.f32 %v2259_v48, %v2233_v9  ;;  %v12076_v35 = vrot.slane %v12075_v23, 2  ;;  %v2518_v34 = vadd.f32 %v2510_v5, %v2484_v24  ;;  %v12078_v29 = vrot.slane %v12077_v1, 2  ;;  %v12081_v33 = vld [vmem:[#allocation12_spill] sm:$0xff]  ;;  %v5741_v58 = vld [vmem:[%s11530_s7 + $0x238] sm:$0x1] }
 0x29f   :  { %v2427_v3 = vsel %vm85_vm0, %v12074_v40, %v2426_v0  ;;  %v2232_v13 = vadd.f32 %v2228_v10, %v2219_v52  ;;  %v12080_v17 = vrot.slane %v12079_v27, 1  ;;  %v2290_v0 = vrot.slane %v2276_v22, 2  ;;  %v10654_v52 = vld [vmem:[%s11531_s8 + $0x188] sm:$0xff]  ;;  %v10659_v10 = vld [vmem:[%s11531_s8 + $0x198] sm:$0xff]  ;;  %v10664_v40 = vld [vmem:[%s11530_s7 + $0x220] sm:$0xff] }
 0x2a0   :  { %5969 = vmatmul.mubr.msk.f32.vlgmr.msra.gmra.mrb[2].mxu0 %vm4439_vm4, %v4253_v15  ;;  %v2293_v45 = vsel %vm121_vm2, %v12076_v35, %v2292_v60  ;;  %v2544_v32 = vsel %vm121_vm2, %v12078_v29, %v2543_v18  ;;  %v2436_v44 = vadd.f32 %v2427_v3, %v2402_v2  ;;  %v12082_v9 = vrot.slane %v12081_v33, 2  ;;  %v12083_v60 = vld [vmem:[#allocation11_spill] sm:$0xff]  ;;  %v4255_v15 = vld [vmem:[%s11526_s3 + $0x10] sm:$0x3] }
 0x2a1   :  { %4624 = vmatprep.mubr.f32.mxu0 %v11964_v56  ;;  %v2257_v62 = vsel %vm85_vm0, %v12080_v17, %v2256_v37  ;;  %v2493_v48 = vmul.f32 %v5716_v14, %v6558_v21  ;;  %v2572_v54 = vmul.f32 %v10469_v63, %v6406_v30  ;;  %v12084_v24 = vrot.slane %v12083_v60, 1  ;;  %v5765_v63 = vld [vmem:[%s11530_s7 + $0x238] sm:$0x1]  ;;  %v10675_v35 = vld [vmem:[%s11531_s8 + $0x180] sm:$0xff]  ;;  %v10715_v33 = vld [vmem:[%s11531_s8 + $0x1b0] sm:$0xff] }
 0x2a2   :  { %v2461_v16 = vsel %vm121_vm2, %v12082_v9, %v2460_v49  ;;  %v2631_v5 = vrot.slane %v2616_v8, 2  ;;  %v2301_v18 = vadd.f32 %v2293_v45, %v2267_v38  ;;  %v2552_v37 = vadd.f32 %v2544_v32, %v2518_v34  ;;  %v12085_v49 = vld [vmem:[#allocation10_spill] sm:$0xff]  ;;  %v10680_v45 = vld [vmem:[%s11531_s8 + $0x190] sm:$0xff]  ;;  %v10685_v34 = vld [vmem:[%s11531_s8 + $0x1a8] sm:$0xff] }
 0x2a3   :  { %v2598_v55 = vsel %vm85_vm0, %v12084_v24, %v2597_v47  ;;  %v2266_v2 = vadd.f32 %v2257_v62, %v2232_v13  ;;  %v2470_v22 = vadd.f32 %v2461_v16, %v2436_v44  ;;  %v2479_v3 = vmul.f32 %v10664_v40, %v6555_v20  ;;  %v5769_v13 = vld [vmem:[%s11530_s7 + $0x238] sm:$0x3]  ;;  %v10705_v62 = vld [vmem:[%s11531_s8 + $0x1a0] sm:$0xff]  ;;  %v10720_v9 = vld [vmem:[%s11531_s8 + $0x1c8] sm:$0xff] }
 0x2a4   :  { %5970 = vmatmul.mubr.msk.f32.gmra.mrb[4].mxu0 %vm4439_vm4, %v4254_v59  ;;  %v12086_v14 = vrot.slane %v12085_v49, 2  ;;  %v2507_v8 = vrot.slane %v2493_v48, 1  ;;  %v2527_v38 = vmul.f32 %v5720_v53, %v6599_v11  ;;  %v2606_v23 = vadd.f32 %v2598_v55, %v2572_v54  ;;  %v12087_v59 = vld [vmem:[#allocation16_spill] sm:$0xff]  ;;  %v10700_v17 = vld [vmem:[%s11531_s8 + $0x1b8] sm:$0xff]  ;;  %12089 = vst [vmem:[#allocation13_spill] sm:$0xff] %v10705_v62  ;;  %12090 = vst [vmem:[#allocation15_spill] sm:$0xff] %v10720_v9 }
 0x2a5   :  { %4630 = vmatprep.mubr.f32.mxu0 %v11964_v56  ;;  %v12088_v1 = vrot.slane %v12087_v59, 2  ;;  %v2662_v32 = vmul.f32 %v5741_v58, %v6496_v57  ;;  %v5745_v44 = vld [vmem:[%s11530_s7 + $0x238] sm:$0x3]  ;;  %v2305_v48 = vadd.f32 %v2301_v18, %v6386_v26  ;;  %v2556_v54 = vadd.f32 %v2552_v37, %v6386_v26  ;;  %v10732_v24 = vld [vmem:[%s11531_s8 + $0x1c0] sm:$0xff]  ;;  %v10737_v55 = vld [vmem:[%s11531_s8 + $0x1d0] sm:$0xff] }
 0x2a6   :  { %v2291_v47 = vsel %vm121_vm2, %v12086_v14, %v2290_v0  ;;  %v2831_v0 = vmul.f32 %v5765_v63, %v6426_v36  ;;  %v10725_v16 = vld [vmem:[%s11531_s8 + $0x1d8] sm:$0xff]  ;;  %v2483_v60 = vadd.f32 %v2479_v3, %v2470_v22  ;;  %12092 = vst [vmem:[#allocation12_spill] sm:$0xff] %v10732_v24  ;;  %12093 = vst [vmem:[#allocation11_spill] sm:$0xff] %v10737_v55  ;;  %v5764_v3 = vld [vmem:[%s11530_s7 + $0x230] sm:$0x1] }
 0x2a7   :  { %v2632_v29 = vsel %vm121_vm2, %v12088_v1, %v2631_v5  ;;  %12091 = vst [vmem:[#allocation9_spill] sm:$0xff] %v10725_v16  ;;  %v2300_v53 = vadd.f32 %v2291_v47, %v2266_v2  ;;  %v12094_v5 = vld [vmem:[#allocation14_spill] sm:$0xff]  ;;  %v2648_v37 = vmul.f32 %v10562_v51, %v6474_v50  ;;  %v5753_v2 = vld [vmem:[%s11530_s7 + $0x268] sm:$0x1]  ;;  %v2677_v49 = vrot.slane %v2662_v32, 1  ;;  %v10784_v1 = vld [vmem:[%s11531_s8 + $0x1f0] sm:$0xff] }
 0x2a8   :  { %5971 = vmatmul.mubr.msk.f32.gmra.mrb[6].mxu0 %vm4439_vm4, %v4255_v15  ;;  %v12095_v58 = vrot.slane %v12094_v5, 1  ;;  %v2541_v15 = vrot.slane %v2527_v38, 2  ;;  %v2640_v18 = vadd.f32 %v2632_v29, %v2606_v23  ;;  %v2696_v14 = vmul.f32 %v5745_v44, %v6532_v6  ;;  %v5757_v38 = vld [vmem:[%s11530_s7 + $0x268] sm:$0x3]  ;;  %v10770_v32 = vld [vmem:[%s11531_s8 + $0x1f8] sm:$0xff]  ;;  %12099 = vst [vmem:[#allocation77_spill] sm:$0xff] %v10784_v1 }
 0x2a9   :  { %4899 = vmatprep.mubr.f32.mxu0 %v11964_v56  ;;  %v2846_v23 = vrot.slane %v2831_v0, 1  ;;  %v2865_v59 = vmul.f32 %v5769_v13, %v6450_v43  ;;  %v10765_v29 = vld [vmem:[%s11531_s8 + $0x1e8] sm:$0xff]  ;;  %12097 = vst [vmem:[#allocation16_spill] sm:$0xff] %v10770_v32  ;;  %v2309_v44 = vmax.f32 %v2305_v48, 0.0  ;;  %v5728_v13 = vld [vmem:[%s11530_s7 + $0x200] sm:$0x1]  ;;  %v10787_v48 = vadd.f32 %v2300_v53, %v6386_v26 }
 0x2aa   :  { %v2508_v63 = vsel %vm85_vm0, %v12095_v58, %v2507_v8  ;;  %12096 = vst [vmem:[#allocation10_spill] sm:$0xff] %v10765_v29  ;;  %v2743_v58 = vmul.f32 %v5753_v2, %v6558_v21  ;;  %v10779_v0 = vld [vmem:[%s11531_s8 + $0x1e0] sm:$0xff]  ;;  %v2560_v8 = vmax.f32 %v2556_v54, 0.0  ;;  %v2652_v47 = vadd.f32 %v2648_v37, %v2640_v18  ;;  %v12103_v22 = vld [vmem:[#allocation17_spill] sm:$0xff]  ;;  %v5777_v53 = vld [vmem:[%s11530_s7 + $0x268] sm:$0x1] }
 0x2ab   :  { %v2517_v5 = vadd.f32 %v2508_v63, %v2483_v60  ;;  %12098 = vst [vmem:[#allocation14_spill] sm:$0xff] %v10779_v0  ;;  %12100 = vst [vmem:[#allocation78_spill] sm:$0xff] %v10787_v48  ;;  %v12101_v60 = vld [vmem:[#allocation8_spill] sm:$0xff]  ;;  %v12104_v27 = vrot.slane %v12103_v22, 1  ;;  %v2711_v55 = vrot.slane %v2696_v14, 2  ;;  %v2777_v9 = vmul.f32 %v5757_v38, %v6599_v11  ;;  %v12105_v18 = vld [vmem:[#allocation21_spill] sm:$0xff] }
 0x2ac   :  { %v12102_v63 = vrot.slane %v12101_v60, 2  ;;  %v2821_v54 = vmul.f32 %v10562_v51, %v6406_v30  ;;  %v12106_v37 = vrot.slane %v12105_v18, 1  ;;  %v2880_v22 = vrot.slane %v2865_v59, 2  ;;  %v12108_v51 = vld [vmem:[#allocation18_spill] sm:$0xff] }
 0x2ad   :  { %v2678_v24 = vsel %vm85_vm0, %v12104_v27, %v2677_v49  ;;  %v5781_v27 = vld [vmem:[%s11530_s7 + $0x268] sm:$0x3]  ;;  %v2581_v49 = vmul.f32 %v5728_v13, %v6426_v36  ;;  %v2758_v38 = vrot.slane %v2743_v58, 1  ;;  %v2830_v18 = vmul.f32 %v5764_v3, %v6426_v36  ;;  %v5768_v13 = vld [vmem:[%s11530_s7 + $0x230] sm:$0x3] }
 0x2ae   :  { %v2542_v2 = vsel %vm121_vm2, %v12102_v63, %v2541_v15  ;;  %v2847_v60 = vsel %vm85_vm0, %v12106_v37, %v2846_v23  ;;  %v5732_v63 = vld [vmem:[%s11530_s7 + $0x200] sm:$0x3]  ;;  %v10819_v15 = vpack.c.bf16 %v2560_v8, %v2309_v44  ;;  %v2686_v59 = vadd.f32 %v2678_v24, %v2652_v47  ;;  %v5801_v3 = vld [vmem:[%s11530_s7 + $0x268] sm:$0x1]  ;;  %v6208_v24 = vld [vmem:[%s11530_s7 + $0x258] sm:$0xff] }
 0x2af   :  { %v2551_v14 = vadd.f32 %v2542_v2, %v2517_v5  ;;  %v2911_v37 = vmul.f32 %v5777_v53, %v6496_v57  ;;  %v12109_v5 = vrot.slane %v12108_v51, 2  ;;  %v2792_v2 = vrot.slane %v2777_v9, 2  ;;  %v12110_v8 = vld [vmem:[#allocation22_spill] sm:$0xff] }
 0x2b0   :  { %12107 = vst [vmem:[#allocation8_spill] sm:$0xff] %v10819_v15  ;;  %v2855_v0 = vadd.f32 %v2847_v60, %v2821_v54  ;;  %v2945_v1 = vmul.f32 %v5781_v27, %v6532_v6  ;;  %v2729_v47 = vmul.f32 %v6208_v24, %v6555_v20  ;;  %v12111_v44 = vrot.slane %v12110_v8, 2  ;;  %v12113_v54 = vld [vmem:[#allocation19_spill] sm:$0xff] }
 0x2b1   :  { %v2712_v58 = vsel %vm121_vm2, %v12109_v5, %v2711_v55  ;;  %v2595_v51 = vrot.slane %v2581_v49, 1  ;;  %v2615_v9 = vmul.f32 %v5732_v63, %v6450_v43  ;;  %v10842_v55 = vadd.f32 %v2551_v14, %v6386_v26  ;;  %v5789_v5 = vld [vmem:[%s11530_s7 + $0x298] sm:$0x1] }
 0x2b2   :  { %v2881_v53 = vsel %vm121_vm2, %v12111_v44, %v2880_v22  ;;  %v12114_v60 = vrot.slane %v12113_v54, 1  ;;  %v2844_v23 = vrot.slane %v2830_v18, 1  ;;  %v2864_v15 = vmul.f32 %v5768_v13, %v6450_v43  ;;  %v5793_v14 = vld [vmem:[%s11530_s7 + $0x298] sm:$0x3]  ;;  %v12115_v44 = vld [vmem:[#allocation20_spill] sm:$0xff]  ;;  %v12117_v13 = vld [vmem:[#allocation27_spill] sm:$0xff] }
 0x2b3   :  { %12112 = vst [vmem:[#allocation17_spill] sm:$0xff] %v10842_v55  ;;  %v2720_v8 = vadd.f32 %v2712_v58, %v2686_v59  ;;  %v2897_v22 = vmul.f32 %v6208_v24, %v6474_v50  ;;  %v2926_v49 = vrot.slane %v2911_v37, 1  ;;  %v3080_v63 = vmul.f32 %v5801_v3, %v6426_v36  ;;  %v5805_v59 = vld [vmem:[%s11530_s7 + $0x268] sm:$0x3] }
 0x2b4   :  { %v2759_v27 = vsel %vm85_vm0, %v12114_v60, %v2758_v38  ;;  %v12116_v54 = vrot.slane %v12115_v44, 2  ;;  %v2889_v60 = vadd.f32 %v2881_v53, %v2855_v0  ;;  %v2960_v48 = vrot.slane %v2945_v1, 2  ;;  %v12122_v55 = vld [vmem:[#allocation24_spill] sm:$0xff] }
 0x2b5   :  { %v2571_v18 = vmul.f32 %v10578_v41, %v6406_v30  ;;  %v2992_v37 = vmul.f32 %v5789_v5, %v6558_v21  ;;  %v12118_v58 = vrot.slane %v12117_v13, 1  ;;  %v2629_v3 = vrot.slane %v2615_v9, 2 }
 0x2b6   :  { %v2793_v38 = vsel %vm121_vm2, %v12116_v54, %v2792_v2  ;;  %v5740_v2 = vld [vmem:[%s11530_s7 + $0x230] sm:$0x1]  ;;  %v2820_v1 = vmul.f32 %v10664_v40, %v6406_v30  ;;  %v3026_v0 = vmul.f32 %v5793_v14, %v6599_v11  ;;  %v12119_v53 = vrot.slane %v9602_v46, 1  ;;  %v12120_v54 = vld [vmem:[#allocation23_spill] sm:$0xff] }
 0x2b7   :  { %v2596_v29 = vsel %vm85_vm0, %v12118_v58, %v2595_v51  ;;  %v2878_v44 = vrot.slane %v2864_v15, 2  ;;  %v5776_v51 = vld [vmem:[%s11530_s7 + $0x260] sm:$0x1]  ;;  %v2733_v9 = vadd.f32 %v2729_v47, %v2720_v8  ;;  %v12121_v13 = vrot.slane %v12120_v54, 1 }
 0x2b8   :  { %v2845_v5 = vsel %vm85_vm0, %v12119_v53, %v2844_v23  ;;  %v3095_v32 = vrot.slane %v3080_v63, 1  ;;  %v3114_v16 = vmul.f32 %v5805_v59, %v6450_v43  ;;  %v2901_v41 = vadd.f32 %v2897_v22, %v2889_v60  ;;  %v5837_v23 = vld [vmem:[%s11530_s7 + $0x298] sm:$0x1]  ;;  %v5744_v22 = vld [vmem:[%s11530_s7 + $0x230] sm:$0x3]  ;;  %v12125_v60 = vld [vmem:[#allocation32_spill] sm:$0xff] }
 0x2b9   :  { %v2927_v58 = vsel %vm85_vm0, %v12121_v13, %v2926_v49  ;;  %v12123_v14 = vrot.slane %v12122_v55, 2  ;;  %v2605_v62 = vadd.f32 %v2596_v29, %v2571_v18  ;;  %v2661_v15 = vmul.f32 %v5740_v2, %v6496_v57  ;;  %v12127_v2 = vld [vmem:[#allocation37_spill] sm:$0xff] }
 0x2ba   :  { %v3007_v47 = vrot.slane %v2992_v37, 1  ;;  %v12124_v8 = vrot.slane %v9530_v4, 2  ;;  %v2854_v63 = vadd.f32 %v2845_v5, %v2820_v1  ;;  %v2910_v55 = vmul.f32 %v5776_v51, %v6496_v57  ;;  %v5780_v4 = vld [vmem:[%s11530_s7 + $0x260] sm:$0x3] }
 0x2bb   :  { %v2961_v46 = vsel %vm121_vm2, %v12123_v14, %v2960_v48  ;;  %v3041_v48 = vrot.slane %v3026_v0, 2  ;;  %v2647_v29 = vmul.f32 %v10664_v40, %v6474_v50  ;;  %v12126_v18 = vrot.slane %v12125_v60, 2  ;;  %v12129_v14 = vld [vmem:[#allocation25_spill] sm:$0xff]  ;;  %v12133_v60 = vld [vmem:[#allocation38_spill] sm:$0xff] }
 0x2bc   :  { %v2630_v49 = vsel %vm121_vm2, %v12124_v8, %v2629_v3  ;;  %v3070_v37 = vmul.f32 %v6208_v24, %v6406_v30  ;;  %v2767_v3 = vadd.f32 %v2759_v27, %v2733_v9  ;;  %v12128_v53 = vrot.slane %v12127_v2, 1  ;;  %v5841_v24 = vld [vmem:[%s11530_s7 + $0x298] sm:$0x3]  ;;  %v6210_v9 = vld [vmem:[%s11530_s7 + $0x288] sm:$0xff] }
 0x2bd   :  { %v2879_v59 = vsel %vm121_vm2, %v12126_v18, %v2878_v44  ;;  %v3129_v5 = vrot.slane %v3114_v16, 2  ;;  %v3329_v0 = vmul.f32 %v5837_v23, %v6426_v36  ;;  %v2935_v51 = vadd.f32 %v2927_v58, %v2901_v41  ;;  %v5813_v44 = vld [vmem:[%s11530_s7 + $0x298] sm:$0x1]  ;;  %v10922_v16 = vld [vmem:[%s11530_s7 + $0x250] sm:$0xff] }
 0x2be   :  { %v3096_v1 = vsel %vm85_vm0, %v12128_v53, %v3095_v32  ;;  %v2639_v40 = vadd.f32 %v2630_v49, %v2605_v62  ;;  %v2675_v54 = vrot.slane %v2661_v15, 1  ;;  %v2695_v13 = vmul.f32 %v5744_v22, %v6532_v6  ;;  %v12131_v8 = vld [vmem:[#allocation26_spill] sm:$0xff] }
 0x2bf   :  { %v2888_v27 = vadd.f32 %v2879_v59, %v2854_v63  ;;  %v2896_v62 = vmul.f32 %v10922_v16, %v6474_v50  ;;  %v2924_v32 = vrot.slane %v2910_v55, 1  ;;  %v2944_v41 = vmul.f32 %v5780_v4, %v6532_v6  ;;  %v5817_v4 = vld [vmem:[%s11530_s7 + $0x298] sm:$0x3] }
 0x2c0   :  { %v2978_v58 = vmul.f32 %v6210_v9, %v6555_v20  ;;  %v12130_v15 = vrot.slane %v12129_v14, 1  ;;  %v12132_v49 = vrot.slane %v12131_v8, 2  ;;  %v3104_v63 = vadd.f32 %v3096_v1, %v3070_v37  ;;  %v12135_v8 = vld [vmem:[#allocation28_spill] sm:$0xff] }
 0x2c1   :  { %v12134_v55 = vrot.slane %v12133_v60, 2  ;;  %v3160_v59 = vmul.f32 %v5813_v44, %v6496_v57  ;;  %v3344_v2 = vrot.slane %v3329_v0, 1  ;;  %v3363_v53 = vmul.f32 %v5841_v24, %v6450_v43 }
 0x2c2   :  { %v3008_v23 = vsel %vm85_vm0, %v12130_v15, %v3007_v47  ;;  %v10937_v22 = vsel %vm121_vm2, %v12132_v49, %v3041_v48  ;;  %v2801_v47 = vadd.f32 %v2793_v38, %v2767_v3  ;;  %v2969_v14 = vadd.f32 %v2961_v46, %v2935_v51  ;;  %v12137_v49 = vld [vmem:[#allocation33_spill] sm:$0xff]  ;;  %v5756_v38 = vld [vmem:[%s11530_s7 + $0x260] sm:$0x3] }
 0x2c3   :  { %v3130_v18 = vsel %vm121_vm2, %v12134_v55, %v3129_v5  ;;  %v2651_v15 = vadd.f32 %v2647_v29, %v2639_v40  ;;  %v12136_v48 = vrot.slane %v12135_v8, 1  ;;  %v2709_v1 = vrot.slane %v2695_v13, 2  ;;  %v5752_v5 = vld [vmem:[%s11530_s7 + $0x260] sm:$0x1]  ;;  %v5788_v46 = vld [vmem:[%s11530_s7 + $0x290] sm:$0x1] }
 0x2c4   :  { %v2900_v44 = vadd.f32 %v2896_v62, %v2888_v27  ;;  %v12138_v60 = vrot.slane %v12137_v49, 1  ;;  %v2958_v0 = vrot.slane %v2944_v41, 2  ;;  %v3138_v29 = vadd.f32 %v3130_v18, %v3104_v63  ;;  %v5825_v49 = vld [vmem:[%s11530_s7 + $0x2c8] sm:$0x1] }
 0x2c5   :  { %v2676_v37 = vsel %vm85_vm0, %v12136_v48, %v2675_v54  ;;  %v3146_v3 = vmul.f32 %v6210_v9, %v6474_v50  ;;  %v3194_v51 = vmul.f32 %v5817_v4, %v6532_v6  ;;  %v3319_v40 = vmul.f32 %v6210_v9, %v6406_v30  ;;  %v5849_v9 = vld [vmem:[%s11530_s7 + $0x2c8] sm:$0x1]  ;;  %v12141_v4 = vld [vmem:[#allocation29_spill] sm:$0xff] }
 0x2c6   :  { %v2925_v55 = vsel %vm85_vm0, %v12138_v60, %v2924_v32  ;;  %v2728_v54 = vmul.f32 %v10922_v16, %v6555_v20  ;;  %v3175_v13 = vrot.slane %v3160_v59, 1  ;;  %v12139_v24 = vrot.slane %v9786_v31, 1  ;;  %v5800_v59 = vld [vmem:[%s11530_s7 + $0x260] sm:$0x1] }
 0x2c7   :  { %v3378_v62 = vrot.slane %v3363_v53, 2  ;;  %v10971_v32 = vadd.f32 %v2801_v47, %v6386_v26  ;;  %v2982_v41 = vadd.f32 %v2978_v58, %v2969_v14  ;;  %v2685_v63 = vadd.f32 %v2676_v37, %v2651_v15  ;;  %v5792_v14 = vld [vmem:[%s11530_s7 + $0x290] sm:$0x3]  ;;  %v12143_v15 = vld [vmem:[#allocation34_spill] sm:$0xff]  ;;  %v12145_v60 = vld [vmem:[#allocation39_spill] sm:$0xff] }
 0x2c8   :  { %v3345_v27 = vsel %vm85_vm0, %v12139_v24, %v3344_v2  ;;  %v2742_v18 = vmul.f32 %v5752_v5, %v6558_v21  ;;  %v12142_v31 = vrot.slane %v12141_v4, 2  ;;  %v2776_v53 = vmul.f32 %v5756_v38, %v6599_v11 }
 0x2c9   :  { %12140 = vst [vmem:[#allocation21_spill] sm:$0xff] %v10971_v32  ;;  %v2934_v47 = vadd.f32 %v2925_v55, %v2900_v44  ;;  %v2991_v58 = vmul.f32 %v5788_v46, %v6558_v21  ;;  %v12144_v8 = vrot.slane %v12143_v15, 2  ;;  %v3150_v37 = vadd.f32 %v3146_v3, %v3138_v29  ;;  %v12147_v55 = vld [vmem:[#allocation43_spill] sm:$0xff] }
 0x2ca   :  { %v2710_v2 = vsel %vm121_vm2, %v12142_v31, %v2709_v1  ;;  %v3209_v5 = vrot.slane %v3194_v51, 2  ;;  %v3353_v1 = vadd.f32 %v3345_v27, %v3319_v40  ;;  %v12146_v38 = vrot.slane %v12145_v60, 1  ;;  %v5853_v40 = vld [vmem:[%s11530_s7 + $0x2c8] sm:$0x3] }
 0x2cb   :  { %v2959_v48 = vsel %vm121_vm2, %v12144_v8, %v2958_v0  ;;  %v12148_v46 = vrot.slane %v12147_v55, 2  ;;  %v3409_v4 = vmul.f32 %v5849_v9, %v6496_v57  ;;  %v3079_v31 = vmul.f32 %v5800_v59, %v6426_v36  ;;  %v12149_v9 = vld [vmem:[#allocation40_spill] sm:$0xff] }
 0x2cc   :  { %v3176_v44 = vsel %vm85_vm0, %v12146_v38, %v3175_v13  ;;  %v3016_v0 = vadd.f32 %v3008_v23, %v2982_v41  ;;  %v2719_v29 = vadd.f32 %v2710_v2, %v2685_v63  ;;  %v2756_v3 = vrot.slane %v2742_v18, 1  ;;  %v5804_v13 = vld [vmem:[%s11530_s7 + $0x260] sm:$0x3] }
 0x2cd   :  { %v3379_v24 = vsel %vm121_vm2, %v12148_v46, %v3378_v62  ;;  %v3025_v51 = vmul.f32 %v5792_v14, %v6599_v11  ;;  %v2968_v27 = vadd.f32 %v2959_v48, %v2934_v47  ;;  %v11012_v62 = vld [vmem:[%s11530_s7 + $0x280] sm:$0xff]  ;;  %v3005_v41 = vrot.slane %v2991_v58, 1  ;;  %v11023_v47 = vld [vmem:[%s11530_s7 + $0x2b8] sm:$0xff]  ;;  %v5829_v58 = vld [vmem:[%s11530_s7 + $0x2c8] sm:$0x3] }
 0x2ce   :  { %v2977_v23 = vmul.f32 %v11012_v62, %v6555_v20  ;;  %v3241_v63 = vmul.f32 %v5825_v49, %v6558_v21  ;;  %v3184_v18 = vadd.f32 %v3176_v44, %v3150_v37  ;;  %v12150_v59 = vrot.slane %v12149_v9, 2 }
 0x2cf   :  { %v3387_v14 = vadd.f32 %v3379_v24, %v3353_v1  ;;  %v3395_v15 = vmul.f32 %v11023_v47, %v6474_v50  ;;  %v3424_v8 = vrot.slane %v3409_v4, 1  ;;  %v3443_v48 = vmul.f32 %v5853_v40, %v6532_v6  ;;  %v12151_v1 = vld [vmem:[#allocation30_spill] sm:$0xff]  ;;  %v12153_v24 = vld [vmem:[#allocation35_spill] sm:$0xff] }
 0x2d0   :  { %v3210_v2 = vsel %vm121_vm2, %v12150_v59, %v3209_v5  ;;  %v3093_v37 = vrot.slane %v3079_v31, 1  ;;  %v3113_v49 = vmul.f32 %v5804_v13, %v6450_v43  ;;  %v2732_v5 = vadd.f32 %v2728_v54, %v2719_v29  ;;  %v5861_v31 = vld [vmem:[%s11530_s7 + $0x2f8] sm:$0x1] }
 0x2d1   :  { %v12152_v60 = vrot.slane %v12151_v1, 1  ;;  %v2790_v44 = vrot.slane %v2776_v53, 2  ;;  %v3039_v55 = vrot.slane %v3025_v51, 2  ;;  %v2981_v46 = vadd.f32 %v2977_v23, %v2968_v27  ;;  %v5865_v53 = vld [vmem:[%s11530_s7 + $0x2f8] sm:$0x3]  ;;  %v12155_v51 = vld [vmem:[#allocation44_spill] sm:$0xff] }
 0x2d2   :  { %v12154_v9 = vrot.slane %v12153_v24, 1  ;;  %v3227_v4 = vmul.f32 %v11023_v47, %v6555_v20  ;;  %v3256_v32 = vrot.slane %v3241_v63, 1  ;;  %v3218_v54 = vadd.f32 %v3210_v2, %v3184_v18 }
 0x2d3   :  { %v2757_v38 = vsel %vm85_vm0, %v12152_v60, %v2756_v3  ;;  %v3275_v29 = vmul.f32 %v5829_v58, %v6599_v11  ;;  %v3399_v40 = vadd.f32 %v3395_v15, %v3387_v14  ;;  %v3069_v3 = vmul.f32 %v10922_v16, %v6406_v30  ;;  %v12159_v15 = vld [vmem:[#allocation31_spill] sm:$0xff]  ;;  %v5812_v16 = vld [vmem:[%s11530_s7 + $0x290] sm:$0x1] }
 0x2d4   :  { %v3006_v59 = vsel %vm85_vm0, %v12154_v9, %v3005_v41  ;;  %v12156_v13 = vrot.slane %v12155_v51, 1  ;;  %v3458_v23 = vrot.slane %v3443_v48, 2  ;;  %v12157_v41 = vld [vmem:[#allocation48_spill] sm:$0xff]  ;;  %v3127_v18 = vrot.slane %v3113_v49, 2  ;;  %v5824_v9 = vld [vmem:[%s11530_s7 + $0x2c0] sm:$0x1] }
 0x2d5   :  { %v12158_v63 = vrot.slane %v12157_v41, 1  ;;  %v3050_v2 = vadd.f32 %v10937_v22, %v3016_v0  ;;  %v2766_v14 = vadd.f32 %v2757_v38, %v2732_v5  ;;  %v12160_v58 = vrot.slane %v12159_v15, 2  ;;  %v12163_v0 = vld [vmem:[#allocation41_spill] sm:$0xff] }
 0x2d6   :  { %v3425_v27 = vsel %vm85_vm0, %v12156_v13, %v3424_v8  ;;  %v3490_v24 = vmul.f32 %v5861_v31, %v6558_v21  ;;  %v5816_v8 = vld [vmem:[%s11530_s7 + $0x290] sm:$0x3]  ;;  %v3015_v48 = vadd.f32 %v3006_v59, %v2981_v46  ;;  %v12164_v5 = vrot.slane %v12163_v0, 1 }
 0x2d7   :  { %v3094_v1 = vsel %vm85_vm0, %v12158_v63, %v3093_v37  ;;  %v2791_v60 = vsel %vm121_vm2, %v12160_v58, %v2790_v44  ;;  %v12161_v37 = vld [vmem:[#allocation36_spill] sm:$0xff]  ;;  %v3524_v44 = vmul.f32 %v5865_v53, %v6599_v11  ;;  %v5836_v31 = vld [vmem:[%s11530_s7 + $0x290] sm:$0x1]  ;;  %v3231_v51 = vadd.f32 %v3227_v4, %v3218_v54  ;;  %v5828_v54 = vld [vmem:[%s11530_s7 + $0x2c0] sm:$0x3] }
 0x2d8   :  { %v12162_v49 = vrot.slane %v12161_v37, 2  ;;  %v3257_v38 = vsel %vm85_vm0, %v12164_v5, %v3256_v32  ;;  %v3290_v46 = vrot.slane %v3275_v29, 2  ;;  %v3433_v59 = vadd.f32 %v3425_v27, %v3399_v40  ;;  %v12165_v41 = vld [vmem:[#allocation45_spill] sm:$0xff]  ;;  %v11102_v27 = vld [vmem:[%s11530_s7 + $0x2e8] sm:$0xff] }
 0x2d9   :  { %v3103_v13 = vadd.f32 %v3094_v1, %v3069_v3  ;;  %v12167_v15 = vld [vmem:[#allocation49_spill] sm:$0xff]  ;;  %v3159_v58 = vmul.f32 %v5812_v16, %v6496_v57  ;;  %v3193_v37 = vmul.f32 %v5816_v8, %v6532_v6  ;;  %v3505_v0 = vrot.slane %v3490_v24, 1  ;;  %v5909_v8 = vld [vmem:[%s11530_s7 + $0x2f8] sm:$0x1] }
 0x2da   :  { %v3040_v22 = vsel %vm121_vm2, %v12162_v49, %v3039_v55  ;;  %v12166_v55 = vrot.slane %v12165_v41, 2  ;;  %v12168_v32 = vrot.slane %v12167_v15, 2  ;;  %v11088_v49 = vadd.f32 %v3050_v2, %v6386_v26  ;;  %v12175_v15 = vld [vmem:[#allocation47_spill] sm:$0xff] }
 0x2db   :  { %v3240_v4 = vmul.f32 %v5824_v9, %v6558_v21  ;;  %v3328_v29 = vmul.f32 %v5836_v31, %v6426_v36  ;;  %v11095_v40 = vadd.f32 %v2791_v60, %v2766_v14  ;;  %v11097_v3 = vadd.f32 %v3040_v22, %v3015_v48  ;;  %v5873_v60 = vld [vmem:[%s11530_s7 + $0x2c8] sm:$0x1]  ;;  %v12171_v48 = vld [vmem:[#allocation42_spill] sm:$0xff] }
 0x2dc   :  { %v3459_v63 = vsel %vm121_vm2, %v12166_v55, %v3458_v23  ;;  %v3128_v53 = vsel %vm121_vm2, %v12168_v32, %v3127_v18  ;;  %v3476_v23 = vmul.f32 %v11102_v27, %v6555_v20  ;;  %v3539_v1 = vrot.slane %v3524_v44, 2  ;;  %v5840_v18 = vld [vmem:[%s11530_s7 + $0x290] sm:$0x3]  ;;  %v12173_v31 = vld [vmem:[#allocation46_spill] sm:$0xff] }
 0x2dd   :  { %12169 = vst [vmem:[#allocation18_spill] sm:$0xff] %v11095_v40  ;;  %12170 = vst [vmem:[#allocation22_spill] sm:$0xff] %v11097_v3  ;;  %v3265_v2 = vadd.f32 %v3257_v38, %v3231_v51  ;;  %v3467_v24 = vadd.f32 %v3459_v63, %v3433_v59  ;;  %v3137_v16 = vadd.f32 %v3128_v53, %v3103_v13  ;;  %v12172_v22 = vrot.slane %v12171_v48, 2  ;;  %v5848_v63 = vld [vmem:[%s11530_s7 + $0x2c0] sm:$0x1]  ;;  %v6214_v53 = vld [vmem:[%s11530_s7 + $0x2b0] sm:$0xff] }
 0x2de   :  { %v3145_v14 = vmul.f32 %v11012_v62, %v6474_v50  ;;  %v3173_v44 = vrot.slane %v3159_v58, 1  ;;  %v3207_v9 = vrot.slane %v3193_v37, 2  ;;  %v3274_v38 = vmul.f32 %v5828_v54, %v6599_v11  ;;  %v5913_v48 = vld [vmem:[%s11530_s7 + $0x2f8] sm:$0x3] }
 0x2df   :  { %v3291_v5 = vsel %vm121_vm2, %v12172_v22, %v3290_v46  ;;  %v12174_v51 = vrot.slane %v12173_v31, 1  ;;  %v3254_v13 = vrot.slane %v3240_v4, 1  ;;  %v3342_v41 = vrot.slane %v3328_v29, 1  ;;  %v12178_v22 = vld [vmem:[#allocation50_spill] sm:$0xff] }
 0x2e0   :  { %v3362_v55 = vmul.f32 %v5840_v18, %v6450_v43  ;;  %v12176_v32 = vrot.slane %v12175_v15, 2  ;;  %v11137_v58 = vmul.f32 %v6214_v53, %v6555_v20  ;;  %v3578_v37 = vmul.f32 %v5873_v60, %v6426_v36  ;;  %v5889_v40 = vld [vmem:[%s11530_s7 + $0x2f8] sm:$0x3] }
 0x2e1   :  { %v3506_v59 = vsel %vm85_vm0, %v12174_v51, %v3505_v0  ;;  %v5877_v0 = vld [vmem:[%s11530_s7 + $0x2c8] sm:$0x3]  ;;  %v3827_v4 = vmul.f32 %v5909_v8, %v6426_v36  ;;  %v11144_v54 = vadd.f32 %v3291_v5, %v3265_v2  ;;  %v3480_v29 = vadd.f32 %v3476_v23, %v3467_v24  ;;  %v12180_v51 = vld [vmem:[#allocation51_spill] sm:$0xff]  ;;  %v12184_v5 = vld [vmem:[#allocation54_spill] sm:$0xff] }
 0x2e2   :  { %v11131_v46 = vsel %vm121_vm2, %v12176_v32, %v3539_v1  ;;  %v3149_v1 = vadd.f32 %v3145_v14, %v3137_v16  ;;  %v3318_v18 = vmul.f32 %v11012_v62, %v6406_v30  ;;  %v12179_v31 = vrot.slane %v12178_v22, 1  ;;  %v5852_v23 = vld [vmem:[%s11530_s7 + $0x2c0] sm:$0x3]  ;;  %v12182_v24 = vld [vmem:[#allocation52_spill] sm:$0xff] }
 0x2e3   :  { %12177 = vst [vmem:[#allocation19_spill] sm:$0xff] %v11144_v54  ;;  %v12181_v15 = vrot.slane %v12180_v51, 2  ;;  %v3288_v8 = vrot.slane %v3274_v38, 2  ;;  %v3408_v2 = vmul.f32 %v5848_v63, %v6496_v57  ;;  %v5872_v62 = vld [vmem:[%s11530_s7 + $0x2c0] sm:$0x1]  ;;  %v12183_v16 = vrot.slane %v12182_v24, 1 }
 0x2e4   :  { %v3174_v60 = vsel %vm85_vm0, %v12179_v31, %v3173_v44  ;;  %v12185_v44 = vrot.slane %v12184_v5, 1  ;;  %v3376_v38 = vrot.slane %v3362_v55, 2  ;;  %v5860_v63 = vld [vmem:[%s11530_s7 + $0x2f0] sm:$0x1]  ;;  %v3612_v22 = vmul.f32 %v5877_v0, %v6450_v43 }
 0x2e5   :  { %v3208_v32 = vsel %vm121_vm2, %v12181_v15, %v3207_v9  ;;  %v11167_v14 = vsel %vm85_vm0, %v12183_v16, %v3254_v13  ;;  %v11177_v31 = vmul.f32 %v6214_v53, %v6474_v50  ;;  %v3593_v51 = vrot.slane %v3578_v37, 1  ;;  %v12186_v55 = vld [vmem:[#allocation53_spill] sm:$0xff] }
 0x2e6   :  { %v3343_v9 = vsel %vm85_vm0, %v12185_v44, %v3342_v41  ;;  %v3842_v15 = vrot.slane %v3827_v4, 1  ;;  %v3861_v24 = vmul.f32 %v5913_v48, %v6450_v43  ;;  %v11180_v13 = vadd.f32 %v3506_v59, %v3480_v29  ;;  %v5876_v59 = vld [vmem:[%s11530_s7 + $0x2c0] sm:$0x3] }
 0x2e7   :  { %v3183_v16 = vadd.f32 %v3174_v60, %v3149_v1  ;;  %v11183_v5 = vmul.f32 %v5852_v23, %v6532_v6  ;;  %v3577_v41 = vmul.f32 %v5872_v62, %v6426_v36  ;;  %v12187_v44 = vrot.slane %v12186_v55, 2  ;;  %v12189_v4 = vld [vmem:[#allocation55_spill] sm:$0xff]  ;;  %v12191_v62 = vld [vmem:[#allocation60_spill] sm:$0xff] }
 0x2e8   :  { %v3352_v0 = vadd.f32 %v3343_v9, %v3318_v18  ;;  %v3422_v3 = vrot.slane %v3408_v2, 1  ;;  %v11192_v37 = vmul.f32 %v5860_v63, %v6558_v21  ;;  %v12190_v29 = vrot.slane %v12189_v4, 2  ;;  %v5885_v18 = vld [vmem:[%s11530_s7 + $0x2f8] sm:$0x1]  ;;  %v6215_v2 = vld [vmem:[%s11530_s7 + $0x2e0] sm:$0xff] }
 0x2e9   :  { %v11189_v54 = vsel %vm121_vm2, %v12187_v44, %v3288_v8  ;;  %v3568_v48 = vmul.f32 %v11023_v47, %v6406_v30  ;;  %v3627_v60 = vrot.slane %v3612_v22, 2  ;;  %v3817_v8 = vmul.f32 %v11102_v27, %v6406_v30  ;;  %v5921_v55 = vld [vmem:[%s11530_s7 + $0x328] sm:$0x1] }
 0x2ea   :  { %12188 = vst [vmem:[#allocation20_spill] sm:$0xff] %v11189_v54  ;;  %v3377_v1 = vsel %vm121_vm2, %v12190_v29, %v3376_v38  ;;  %v11211_v23 = vmul.f32 %v6215_v2, %v6555_v20  ;;  %v12192_v9 = vrot.slane %v12191_v62, 1  ;;  %v12193_v47 = vrot.slane %v10141_v19, 1  ;;  %v5908_v62 = vld [vmem:[%s11530_s7 + $0x2f0] sm:$0x1] }
 0x2eb   :  { %v3876_v22 = vrot.slane %v3861_v24, 2  ;;  %v3217_v44 = vadd.f32 %v3208_v32, %v3183_v16  ;;  %v3591_v29 = vrot.slane %v3577_v41, 1  ;;  %v3611_v54 = vmul.f32 %v5876_v59, %v6450_v43  ;;  %v5912_v19 = vld [vmem:[%s11530_s7 + $0x2f0] sm:$0x3] }
 0x2ec   :  { %v3594_v38 = vsel %vm85_vm0, %v12192_v9, %v3593_v51  ;;  %v3843_v63 = vsel %vm85_vm0, %v12193_v47, %v3842_v15  ;;  %v3386_v51 = vadd.f32 %v3377_v1, %v3352_v0  ;;  %v12194_v15 = vld [vmem:[#allocation56_spill] sm:$0xff]  ;;  %v3503_v32 = vrot.slane %v11192_v37, 1  ;;  %v12196_v47 = vld [vmem:[#allocation61_spill] sm:$0xff] }
 0x2ed   :  { %v12195_v24 = vrot.slane %v12194_v15, 1  ;;  %v3658_v16 = vmul.f32 %v5885_v18, %v6496_v57  ;;  %v3602_v41 = vadd.f32 %v3594_v38, %v3568_v48  ;;  %v12197_v59 = vrot.slane %v12196_v47, 2 }
 0x2ee   :  { %v3851_v26 = vadd.f32 %v3843_v63, %v3817_v8  ;;  %v3907_v0 = vmul.f32 %v5921_v55, %v6496_v57  ;;  %v12198_v1 = vrot.slane %v10152_v42, 2  ;;  %v3567_v37 = vmul.f32 %v6214_v53, %v6406_v30  ;;  %v12199_v8 = vld [vmem:[#allocation70_spill] sm:$0xff]  ;;  %v5884_v53 = vld [vmem:[%s11530_s7 + $0x2f0] sm:$0x1] }
 0x2ef   :  { %v3423_v9 = vsel %vm85_vm0, %v12195_v24, %v3422_v3  ;;  %v3628_v4 = vsel %vm121_vm2, %v12197_v59, %v3627_v60  ;;  %v3826_v18 = vmul.f32 %v5908_v62, %v6426_v36  ;;  %v3860_v48 = vmul.f32 %v5912_v19, %v6450_v43  ;;  %v5864_v60 = vld [vmem:[%s11530_s7 + $0x2f0] sm:$0x3] }
 0x2f0   :  { %v3877_v3 = vsel %vm121_vm2, %v12198_v1, %v3876_v22  ;;  %v3644_v38 = vmul.f32 %v11102_v27, %v6474_v50  ;;  %v12200_v63 = vrot.slane %v12199_v8, 1  ;;  %v3625_v42 = vrot.slane %v3611_v54, 2  ;;  %v5920_v27 = vld [vmem:[%s11530_s7 + $0x320] sm:$0x1]  ;;  %v6216_v54 = vld [vmem:[%s11530_s7 + $0x318] sm:$0xff] }
 0x2f1   :  { %v3816_v36 = vmul.f32 %v6215_v2, %v6406_v30  ;;  %v3673_v22 = vrot.slane %v3658_v16, 1  ;;  %v3692_v43 = vmul.f32 %v5889_v40, %v6532_v6  ;;  %v3840_v62 = vrot.slane %v3826_v18, 1  ;;  %v5925_v30 = vld [vmem:[%s11530_s7 + $0x328] sm:$0x3] }
 0x2f2   :  { %v3592_v55 = vsel %vm85_vm0, %v12200_v63, %v3591_v29  ;;  %v3874_v19 = vrot.slane %v3860_v48, 2  ;;  %v3636_v15 = vadd.f32 %v3628_v4, %v3602_v41  ;;  %v3885_v24 = vadd.f32 %v3877_v3, %v3851_v26 }
 0x2f3   :  { %v3893_v29 = vmul.f32 %v6216_v54, %v6474_v50  ;;  %v3922_v47 = vrot.slane %v3907_v0, 1  ;;  %v11272_v40 = vmul.f32 %v5864_v60, %v6599_v11  ;;  %v3601_v16 = vadd.f32 %v3592_v55, %v3567_v37  ;;  %v5888_v0 = vld [vmem:[%s11530_s7 + $0x2f0] sm:$0x3] }
 0x2f4   :  { %v3657_v59 = vmul.f32 %v5884_v53, %v6496_v57  ;;  %v12201_v4 = vrot.slane %v10296_v61, 1  ;;  %v12202_v41 = vrot.slane %v10231_v25, 2  ;;  %v12203_v18 = vrot.slane %v10303_v12, 2  ;;  %v12204_v61 = vld [vmem:[#allocation62_spill] sm:$0xff] }
 0x2f5   :  { %v3906_v37 = vmul.f32 %v5920_v27, %v6496_v57  ;;  %v3398_v60 = vadd.f32 %v11177_v31, %v3386_v51  ;;  %v12205_v8 = vrot.slane %v12204_v61, 1  ;;  %v3707_v25 = vrot.slane %v3692_v43, 2  ;;  %v12206_v12 = vld [vmem:[#allocation66_spill] sm:$0xff]  ;;  %v5897_v31 = vld [vmem:[%s11530_s7 + $0x328] sm:$0x1]  ;;  %v6217_v27 = vld [vmem:[%s11530_s7 + $0x310] sm:$0xff] }
 0x2f6   :  { %v3841_v26 = vsel %vm85_vm0, %v12201_v4, %v3840_v62  ;;  %v3626_v1 = vsel %vm121_vm2, %v12202_v41, %v3625_v42  ;;  %v3875_v48 = vsel %vm121_vm2, %v12203_v18, %v3874_v19  ;;  %v3941_v55 = vmul.f32 %v5925_v30, %v6532_v6  ;;  %v5924_v42 = vld [vmem:[%s11530_s7 + $0x320] sm:$0x3]  ;;  %v12211_v41 = vld [vmem:[#allocation58_spill] sm:$0xff] }
 0x2f7   :  { %v3850_v3 = vadd.f32 %v3841_v26, %v3816_v36  ;;  %v3674_v63 = vsel %vm85_vm0, %v12205_v8, %v3673_v22  ;;  %v3648_v53 = vadd.f32 %v3644_v38, %v3636_v15  ;;  %v3897_v36 = vadd.f32 %v3893_v29, %v3885_v24 }
 0x2f8   :  { %v12207_v62 = vrot.slane %v12206_v12, 1  ;;  %v3643_v57 = vmul.f32 %v6215_v2, %v6474_v50  ;;  %v3635_v51 = vadd.f32 %v3626_v1, %v3601_v16  ;;  %v3691_v22 = vmul.f32 %v5888_v0, %v6532_v6  ;;  %v12209_v16 = vld [vmem:[#allocation57_spill] sm:$0xff] }
 0x2f9   :  { %v3884_v43 = vadd.f32 %v3875_v48, %v3850_v3  ;;  %v3892_v38 = vmul.f32 %v6217_v27, %v6474_v50  ;;  %v11309_v15 = vadd.f32 %v11137_v58, %v3217_v44  ;;  %v3671_v24 = vrot.slane %v3657_v59, 1  ;;  %v4807_v3 = vpop.f32.mrb[4].mxu1  ;;  %v12213_v44 = vld [vmem:[#allocation63_spill] sm:$0xff] }
 0x2fa   :  { %v3923_v19 = vsel %vm85_vm0, %v12207_v62, %v3922_v47  ;;  %v3920_v29 = vrot.slane %v3906_v37, 1  ;;  %v3940_v2 = vmul.f32 %v5924_v42, %v6532_v6  ;;  %v3432_v47 = vadd.f32 %v3423_v9, %v3398_v60  ;;  %v4809_v37 = vpop.f32.mrb[5].mxu1 }
 0x2fb   :  { %v12208_v30 = vrot.slane %v11183_v5, 2  ;;  %v12210_v4 = vrot.slane %v12209_v16, 2  ;;  %v12212_v1 = vrot.slane %v12211_v41, 1  ;;  %v3956_v50 = vrot.slane %v3941_v55, 2  ;;  %v5933_v5 = vld [vmem:[%s11530_s7 + $0x358] sm:$0x1] }
 0x2fc   :  { %v3682_v58 = vadd.f32 %v3674_v63, %v3648_v53  ;;  %v12214_v59 = vrot.slane %v12213_v44, 2  ;;  %v3739_v6 = vmul.f32 %v5897_v31, %v6558_v21  ;;  %v3931_v9 = vadd.f32 %v3923_v19, %v3897_v36  ;;  %v12215_v63 = vld [vmem:[#allocation71_spill] sm:$0xff]  ;;  %v5990_v16 = vld [vmem:[%s11526_s3 + $0x30] sm:$0xff] }
 0x2fd   :  { %v3457_v26 = vsel %vm121_vm2, %v12210_v4, %v12208_v30  ;;  %v11320_v0 = vsel %vm85_vm0, %v12212_v1, %v3503_v32  ;;  %v4812_v48 = vadd.f32 %v4807_v3, %v10477_v28  ;;  %v3647_v60 = vadd.f32 %v3643_v57, %v3635_v51  ;;  %v12218_v57 = vld [vmem:[#allocation67_spill] sm:$0xff] }
 0x2fe   :  { %v3708_v18 = vsel %vm121_vm2, %v12214_v59, %v3707_v25  ;;  %v3705_v32 = vrot.slane %v3691_v22, 2  ;;  %v3896_v61 = vadd.f32 %v3892_v38, %v3884_v43  ;;  %v4813_v8 = vadd.f32 %v4809_v37, %v10477_v28  ;;  %v5896_v25 = vld [vmem:[%s11530_s7 + $0x320] sm:$0x1]  ;;  %v5932_v43 = vld [vmem:[%s11530_s7 + $0x350] sm:$0x1] }
 0x2ff   :  { %v12216_v55 = vrot.slane %v12215_v63, 1  ;;  %v12217_v53 = vrot.slane %v10320_v39, 1  ;;  %v3954_v12 = vrot.slane %v3940_v2, 2  ;;  %v3466_v62 = vadd.f32 %v3457_v26, %v3432_v47  ;;  %v5901_v39 = vld [vmem:[%s11530_s7 + $0x328] sm:$0x3] }
 0x300   :  { %v3725_v19 = vmul.f32 %v6216_v54, %v6555_v20  ;;  %v12219_v31 = vrot.slane %v12218_v57, 2  ;;  %v3988_v22 = vmul.f32 %v5933_v5, %v6558_v21  ;;  %v4815_v38 = vmax.f32 %v4813_v8, 0.0  ;;  %v6218_v54 = vld [vmem:[%s11530_s7 + $0x348] sm:$0xff]  ;;  %v5937_v2 = vld [vmem:[%s11530_s7 + $0x358] sm:$0x3] }
 0x301   :  { %v3672_v42 = vsel %vm85_vm0, %v12216_v55, %v3671_v24  ;;  %v3921_v36 = vsel %vm85_vm0, %v12217_v53, %v3920_v29  ;;  %v3716_v24 = vadd.f32 %v3708_v18, %v3682_v58  ;;  %v3754_v30 = vrot.slane %v3739_v6, 1  ;;  %v12228_v57 = vld [vmem:[#allocation68_spill] sm:$0xff] }
 0x302   :  { %v3957_v51 = vsel %vm121_vm2, %v12219_v31, %v3956_v50  ;;  %v3974_v29 = vmul.f32 %v6218_v54, %v6555_v20  ;;  %v4814_v47 = vmax.f32 %v4812_v48, 0.0  ;;  %v3681_v4 = vadd.f32 %v3672_v42, %v3647_v60  ;;  %5993 = vmatprep.subr.msk.mxu0 %vm4449_vm3, %v4815_v38  ;;  %v12220_v50 = vld [vmem:[#allocation72_spill] sm:$0xff] }
 0x303   :  { %v3738_v26 = vmul.f32 %v5896_v25, %v6558_v21  ;;  %v3930_v41 = vadd.f32 %v3921_v36, %v3896_v61  ;;  %v3965_v1 = vadd.f32 %v3957_v51, %v3931_v9  ;;  %v12221_v3 = vrot.slane %v12220_v50, 2  ;;  %v5900_v9 = vld [vmem:[%s11530_s7 + $0x320] sm:$0x3] }
 0x304   :  { %v12222_v44 = vrot.slane %v10340_v7, 2  ;;  %v3987_v18 = vmul.f32 %v5932_v43, %v6558_v21  ;;  %5994 = vmatpush1.msk.msra.mxu0 %vm4449_vm3, %v4814_v47  ;;  %v3479_v6 = vadd.f32 %v11211_v23, %v3466_v62  ;;  %v3773_v5 = vmul.f32 %v5901_v39, %v6599_v11  ;;  %v5936_v7 = vld [vmem:[%s11530_s7 + $0x350] sm:$0x3]  ;;  %v6219_v25 = vld [vmem:[%s11530_s7 + $0x340] sm:$0xff] }
 0x305   :  { %v3706_v58 = vsel %vm121_vm2, %v12221_v3, %v3705_v32  ;;  %v4003_v48 = vrot.slane %v3988_v22, 1  ;;  %v4022_v37 = vmul.f32 %v5937_v2, %v6599_v11  ;;  %v12223_v21 = vpack.c.bf16 %v10659_v10, %v10654_v52  ;;  %5995 = vmatmul.mubr.msk.f32.vlgmr.msra.gmra.mrb[2].mxu0 %vm4439_vm4, %v5990_v16  ;;  %v12224_v32 = vld [vmem:[#allocation64_spill] sm:$0xff]  ;;  %v5991_v52 = vld [vmem:[%s11526_s3 + $0x38] sm:$0xff]  ;;  %v12237_v2 = vld [vmem:[#allocation9_spill] sm:$0xff] }
 0x306   :  { %v3955_v59 = vsel %vm121_vm2, %v12222_v44, %v3954_v12  ;;  %v3537_v23 = vrot.slane %v11272_v40, 2  ;;  %v3729_v60 = vadd.f32 %v3725_v19, %v3716_v24  ;;  %v12225_v61 = vrot.slane %v12224_v32, 1  ;;  %4905 = vmatprep.mubr.f32.mxu0 %v11964_v56  ;;  %v5992_v24 = vld [vmem:[%s11526_s3 + $0x40] sm:$0x3]  ;;  %v12243_v44 = vld [vmem:[#allocation18_spill] sm:$0xff]  ;;  %v12250_v32 = vld [vmem:[#allocation20_spill] sm:$0xff] }
 0x307   :  { %6127 = vmatprep.subr.bf16.mxu0 %v12223_v21  ;;  %v3724_v63 = vmul.f32 %v6217_v27, %v6555_v20  ;;  %v12226_v55 = vpack.c.bf16 %v10680_v45, %v10675_v35  ;;  %v3715_v10 = vadd.f32 %v3706_v58, %v3681_v4  ;;  %v3752_v42 = vrot.slane %v3738_v26, 1  ;;  %v12238_v47 = vld [vmem:[#allocation15_spill] sm:$0xff] }
 0x308   :  { %v3755_v8 = vsel %vm85_vm0, %v12225_v61, %v3754_v30  ;;  %v3964_v40 = vadd.f32 %v3955_v59, %v3930_v41  ;;  %v3973_v53 = vmul.f32 %v6219_v25, %v6555_v20  ;;  %v12227_v27 = vpack.c.bf16 %v10700_v17, %v10685_v34  ;;  %v12230_v17 = vld [vmem:[#allocation59_spill] sm:$0xff]  ;;  %v12234_v30 = vld [vmem:[#allocation21_spill] sm:$0xff]  ;;  %v12255_v25 = vld [vmem:[#allocation10_spill] sm:$0xff] }
 0x309   :  { %6129 = vmatpush1.bf16.msra.mxu0 %v12226_v55  ;;  %v3978_v35 = vadd.f32 %v3974_v29, %v3965_v1  ;;  %v3772_v45 = vmul.f32 %v5900_v9, %v6599_v11  ;;  %v4001_v36 = vrot.slane %v3987_v18, 1  ;;  %v4021_v12 = vmul.f32 %v5936_v7, %v6599_v11  ;;  %v12240_v26 = vld [vmem:[#allocation75_spill] sm:$0xff]  ;;  %v12244_v18 = vld [vmem:[#allocation65_spill] sm:$0xff]  ;;  %v12248_v7 = vld [vmem:[#allocation22_spill] sm:$0xff] }
 0x30a   :  { %6131 = vmatprep.subr.bf16.mxu0 %v12227_v27  ;;  %v3548_v62 = vadd.f32 %v11131_v46, %v11180_v13  ;;  %v3788_v19 = vrot.slane %v3773_v5, 2  ;;  %v12229_v31 = vrot.slane %v12228_v57, 1  ;;  %v4037_v22 = vrot.slane %v4022_v37, 2  ;;  %5996 = vmatmul.mubr.msk.f32.gmra.mrb[4].mxu0 %vm4439_vm4, %v5991_v52  ;;  %v12232_v46 = vld [vmem:[#allocation13_spill] sm:$0xff]  ;;  %v12242_v58 = vld [vmem:[#allocation7_spill] sm:$0xff] }
 0x30b   :  { %v3264_v20 = vadd.f32 %v11167_v14, %v11309_v15  ;;  %v3513_v34 = vadd.f32 %v11320_v0, %v3479_v6  ;;  %v12231_v43 = vrot.slane %v12230_v17, 2  ;;  %v3763_v38 = vadd.f32 %v3755_v8, %v3729_v60  ;;  %4911 = vmatprep.mubr.f32.mxu0 %v11964_v56  ;;  %v12235_v15 = vld [vmem:[#allocation73_spill] sm:$0xff]  ;;  %v12251_v8 = vld [vmem:[#allocation11_spill] sm:$0xff] }
 0x30c   :  { %v4004_v51 = vsel %vm85_vm0, %v12229_v31, %v4003_v48  ;;  %v12233_v13 = vpack.c.bf16 %v10715_v33, %v12232_v46  ;;  %v2809_v39 = vmax.f32 %v12234_v30, 0.0  ;;  %v3728_v14 = vadd.f32 %v3724_v63, %v3715_v10  ;;  %v12246_v48 = vld [vmem:[#allocation69_spill] sm:$0xff]  ;;  %v12252_v63 = vld [vmem:[#allocation12_spill] sm:$0xff]  ;;  %v12261_v31 = vld [vmem:[#allocation78_spill] sm:$0xff] }
 0x30d   :  { %v3538_v11 = vsel %vm121_vm2, %v12231_v43, %v3537_v23  ;;  %v12236_v0 = vrot.slane %v12235_v15, 1  ;;  %v3977_v29 = vadd.f32 %v3973_v53, %v3964_v40  ;;  %v12239_v16 = vpack.c.bf16 %v12237_v2, %v12238_v47  ;;  %v12249_v23 = vld [vmem:[#allocation19_spill] sm:$0xff]  ;;  %v12254_v40 = vld [vmem:[#allocation16_spill] sm:$0xff]  ;;  %v12265_v46 = vld [vmem:[#allocation77_spill] sm:$0xff] }
 0x30e   :  { %6133 = vmatpush1.bf16.msra.mxu0 %v12233_v13  ;;  %v4012_v33 = vadd.f32 %v4004_v51, %v3978_v35  ;;  %v3786_v4 = vrot.slane %v3772_v45, 2  ;;  %v12241_v41 = vrot.slane %v12240_v26, 1  ;;  %v4035_v50 = vrot.slane %v4021_v12, 2  ;;  %v12257_v45 = vld [vmem:[#allocation74_spill] sm:$0xff]  ;;  %v6220_v47 = vld [vmem:[%s11525_s2 + $0x4] sm:$0xf] }
 0x30f   :  { %v3753_v54 = vsel %vm85_vm0, %v12236_v0, %v3752_v42  ;;  %6135 = vmatprep.subr.bf16.mxu0 %v12239_v16  ;;  %v3058_v3 = vmax.f32 %v11088_v49, 0.0  ;;  %v2804_v59 = vadd.f32 %v12243_v44, %v12242_v58  ;;  %v12245_v6 = vrot.slane %v12244_v18, 2  ;;  %5997 = vmatmul.mubr.msk.f32.gmra.mrb[6].mxu0 %vm4439_vm4, %v5992_v24  ;;  %v12266_v13 = vld [vmem:[#allocation14_spill] sm:$0xff]  ;;  %v12268_v0 = vld [vmem:[#allocation8_spill] sm:$0xff] }
 0x310   :  { %v4002_v1 = vsel %vm85_vm0, %v12241_v41, %v4001_v36  ;;  %v12247_v37 = vrot.slane %v12246_v48, 2  ;;  %v3053_v21 = vadd.f32 %v12248_v7, %v12242_v58  ;;  %v3303_v60 = vadd.f32 %v12249_v23, %v12242_v58  ;;  %5021 = vmatprep.mubr.f32.mxu0 %v11964_v56  ;;  %v5212_v48 = vld [vmem:[%s11529_s6 + $0x8] sm:$0xff] }
 0x311   :  { %v3789_v5 = vsel %vm121_vm2, %v12245_v6, %v3788_v19  ;;  %v3552_v49 = vadd.f32 %v3548_v62, %v12242_v58  ;;  %v3298_v61 = vadd.f32 %v12250_v32, %v3264_v20  ;;  %v12253_v55 = vpack.c.bf16 %v12251_v8, %v12252_v63  ;;  %v12259_v62 = vld [vmem:[#allocation76_spill] sm:$0xff]  ;;  %5221 = vperm.xlu1 %6192, %v5212_v48   ;;  %v6017_v8 = vld [vmem:[%s11526_s3 + $0x50] sm:$0xff] }
 0x312   :  { %v4038_v9 = vsel %vm121_vm2, %v12247_v37, %v4037_v22  ;;  %v3547_v52 = vadd.f32 %v3538_v11, %v3513_v34  ;;  %v3762_v10 = vadd.f32 %v3753_v54, %v3728_v14  ;;  %v4011_v42 = vadd.f32 %v4002_v1, %v3977_v29  ;;  %v12263_v22 = vld [vmem:[#allocation17_spill] sm:$0xff] }
 0x313   :  { %6137 = vmatpush1.bf16.msra.mxu0 %v12253_v55  ;;  %v12256_v53 = vpack.c.bf16 %v12254_v40, %v12255_v25  ;;  %v3797_v27 = vadd.f32 %v3789_v5, %v3763_v38  ;;  %v4046_v35 = vadd.f32 %v4038_v9, %v4012_v33  ;;  %v12258_v36 = vrot.slane %v12257_v45, 2  ;;  %v5213_v37 = vld [vmem:[%s11529_s6 + $0x10] sm:$0x3]  ;;  %v6029_v9 = vld [vmem:[%s11528_s5 + $0x8] sm:$0xf] }
 0x314   :  { %v12260_v19 = vrot.slane %v12259_v62, 2  ;;  %v12262_v51 = vmax.f32 %v12261_v31, 0.0  ;;  %v12264_v20 = vmax.f32 %v12263_v22, 0.0  ;;  %v6146_v17 = vpack.c.bf16 %v3058_v3, %v2809_v39 }
 0x315   :  { %6139 = vmatprep.subr.bf16.mxu0 %v12256_v53  ;;  %v3787_v12 = vsel %vm121_vm2, %v12258_v36, %v3786_v4  ;;  %v2808_v43 = vmax.f32 %v2804_v59, 0.0  ;;  %v3057_v11 = vmax.f32 %v3053_v21, 0.0  ;;  %v12267_v38 = vpack.c.bf16 %v12265_v46, %v12266_v13  ;;  %5226 = vperm.xlu1 %6192, %v5213_v37   ;;  %v5241_v46 = vld [vmem:[%s11532_s9] sm:$0x3] }
 0x316   :  { %v4036_v57 = vsel %vm121_vm2, %v12260_v19, %v4035_v50  ;;  %v6144_v34 = vpack.c.bf16 %v12264_v20, %v12262_v51  ;;  %v3302_v24 = vadd.f32 %v3298_v61, %v12242_v58  ;;  %v3551_v30 = vadd.f32 %v3547_v52, %v12242_v58  ;;  %v6016_v61 = vld [vmem:[%s11526_s3 + $0x48] sm:$0xff]  ;;  %v5217_v52 = vpop.permute.xlu0 %5216 }
 0x317   :  { %6141 = vmatpush1.bf16.msra.mxu0 %v12267_v38  ;;  %v3796_v14 = vadd.f32 %v3787_v12, %v3762_v10  ;;  %v4045_v15 = vadd.f32 %v4036_v57, %v4011_v42  ;;  %v3307_v54 = vmax.f32 %v3303_v60, 0.0  ;;  %v3556_v29 = vmax.f32 %v3552_v49, 0.0 }
 0x318   :  { %6143 = vmatprep.subr.bf16.mxu0 %v12268_v0  ;;  %v3801_v2 = vadd.f32 %v3797_v27, %v12242_v58  ;;  %v4050_v39 = vadd.f32 %v4046_v35, %v12242_v58  ;;  %v6148_v16 = vpack.c.bf16 %v3057_v11, %v2808_v43  ;;  %v3306_v33 = vmax.f32 %v3302_v24, 0.0  ;;  %v5244_v43 = vld [vmem:[%s11527_s4] sm:$0xf] }
 0x319   :  { %v3555_v4 = vmax.f32 %v3551_v30, 0.0  ;;  %v3800_v26 = vadd.f32 %v3796_v14, %v12242_v58  ;;  %v4049_v41 = vadd.f32 %v4045_v15, %v12242_v58  ;;  %v6150_v1 = vpack.c.bf16 %v3556_v29, %v3307_v54  ;;  %v6221_v58 = vld [vmem:[%s11525_s2] sm:$0xf]  ;;  %5351 = vperm.xlu1 %6192, %v6029_v9  }
 0x31a   :  { %6014 = vmatmul.mubr.msk.f32.vlgmr.msra.gmra.mrb[8].mxu0 %vm4095_vm1, %v6220_v47  ;;  %v3805_v50 = vmax.f32 %v3801_v2, 0.0  ;;  %v4054_v3 = vmax.f32 %v4050_v39, 0.0  ;;  %v5253_v11 = vlaneseq  ;;  %v5242_v13 = vmul.f32 0.015625, %v5241_v46  ;;  %v5250_v54 = vpop.permute.xlu0 %5249 }
 0x31b   :  { %6145 = vmatpush1.bf16.msra.mxu0 %v6144_v34  ;;  %5092 = vmatprep.mubr.f32.mxu0 %v11964_v56  ;;  %v6152_v44 = vpack.c.bf16 %v3555_v4, %v3306_v33  ;;  %v3804_v59 = vmax.f32 %v3800_v26, 0.0  ;;  %v4053_v18 = vmax.f32 %v4049_v41, 0.0 }
 0x31c   :  { %6147 = vmatprep.subr.bf16.mxu0 %v6146_v17  ;;  %v6154_v6 = vpack.c.bf16 %v4054_v3, %v3805_v50  ;;  %v5254_v38 = vshrl.u32 %v5253_v11, 7  ;;  %v6024_v24 = vadd.f32 -0.5, %v5242_v13 }
 0x31d   :  { %v6156_v5 = vpack.c.bf16 %v4053_v18, %v3804_v59 }
 0x31e   :  { %v5255_v30 = vsub.s32 0, %v5254_v38  ;;  %v5259_v14 = vsub.s32 1, %v5254_v38 }
 0x31f   :  { %6149 = vmatpush1.bf16.msra.mxu0 %v6148_v16 }
 0x320   :  { %6151 = vmatprep.subr.bf16.mxu0 %v6150_v1  ;;  %v5256_v15 = vrot.slane %v6024_v24, %v5255_v30  ;;  %v5260_v0 = vrot.slane %v6024_v24, %v5259_v14 }
 0x322   :  { %v5263_v29 = vmul.f32 %v5256_v15, %v5250_v54  ;;  %v5264_v2 = vmul.f32 %v5260_v0, %v5250_v54 }
 0x323   :  { %6153 = vmatpush1.bf16.msra.mxu0 %v6152_v44 }
 0x324   :  { %6155 = vmatprep.subr.bf16.mxu0 %v6154_v6 }
 0x327   :  { %6157 = vmatpush1.bf16.msra.mxu0 %v6156_v5 }
 0x32a   :  { %6015 = vmatmul.mubr.msk.f32.vlgmr.msra.gmra.mrb[8].mxu0 %vm4095_vm1, %v6221_v58 }
 0x32b   :  { %5186 = vmatprep.mubr.f32.mxu0 %v11964_v56 }
 0x390   :  { %v5222_v42 = vpop.permute.xlu1 %5221 }
 0x394   :  { %v5227_v57 = vpop.permute.xlu1 %5226 }
 0x398   :  { %v5352_v33 = vpop.permute.xlu1 %5351 }
 0x3fd   :  { %v5094_v7 = vpop.f32.mrb[8].mxu0 }
 0x3fe   :  { %v5099_v21 = vadd.f32 %v5094_v7, %v10477_v28  ;;  %v5096_v23 = vpop.f32.mrb[9].mxu0 }
 0x3ff   :  { %v5100_v60 = vadd.f32 %v5096_v23, %v10477_v28  ;;  %v6018_v28 = vld [vmem:[%s11526_s3 + $0x58] sm:$0x3] }
 0x400   :  { %v5101_v32 = vmax.f32 %v5099_v21, 0.0 }
 0x401   :  { %v5102_v49 = vmax.f32 %v5100_v60, 0.0 }
 0x403   :  { %6019 = vmatprep.subr.msk.mxu0 %vm4449_vm3, %v5102_v49 }
 0x404   :  { %6020 = vmatpush1.msk.msra.mxu0 %vm4449_vm3, %v5101_v32 }
 0x405   :  { %6021 = vmatmul.mubr.msk.f32.vlgmr.msra.gmra.mrb[2].mxu0 %vm4439_vm4, %v6016_v61 }
 0x406   :  { %5192 = vmatprep.mubr.f32.mxu0 %v11964_v56 }
 0x409   :  { %6022 = vmatmul.mubr.msk.f32.gmra.mrb[4].mxu0 %vm4439_vm4, %v6017_v8 }
 0x40a   :  { %5198 = vmatprep.mubr.f32.mxu0 %v11964_v56 }
 0x40d   :  { %6023 = vmatmul.mubr.msk.f32.gmra.mrb[6].mxu0 %vm4439_vm4, %v6018_v28 }
 0x4d8   :  { %v5188_v63 = vpop.f32.mrb[2].mxu0 }
 0x4d9   :  { %v5190_v55 = vpop.f32.mrb[3].mxu0  ;;  %v5229_v10 = vadd.f32 %v5217_v52, %v5188_v63 }
 0x4da   :  { %v5230_v40 = vadd.f32 %v5217_v52, %v5190_v55 }
 0x4db   :  { %v5235_v45 = vmax.f32 %v5229_v10, 0.0 }
 0x4dc   :  { %v5194_v25 = vpop.f32.mrb[4].mxu0  ;;  %v5236_v12 = vmax.f32 %v5230_v40, 0.0 }
 0x4dd   :  { %v5231_v53 = vadd.f32 %v5222_v42, %v5194_v25  ;;  %v5196_v27 = vpop.f32.mrb[5].mxu0 }
 0x4de   :  { %v5232_v35 = vadd.f32 %v5222_v42, %v5196_v27 }
 0x4df   :  { %v5237_v36 = vmax.f32 %v5231_v53, 0.0 }
 0x4e0   :  { %v5238_v56 = vmax.f32 %v5232_v35, 0.0  ;;  %v5200_v62 = vpop.f32.mrb[6].mxu0 }
 0x4e1   :  { %v6160_v19 = vpack.c.bf16 %v5237_v36, %v5235_v45  ;;  %v5202_v31 = vpop.f32.mrb[7].mxu0  ;;  %v5233_v20 = vadd.f32 %v5227_v57, %v5200_v62 }
 0x4e2   :  { %v6158_v51 = vpack.c.bf16 %v5238_v56, %v5236_v12  ;;  %v5234_v22 = vadd.f32 %v5227_v57, %v5202_v31 }
 0x4e3   :  { %v5239_v17 = vmax.f32 %v5233_v20, 0.0 }
 0x4e4   :  { %v5240_v34 = vmax.f32 %v5234_v22, 0.0  ;;  %6159 = vmatprep.subr.bf16.mxu1 %v6158_v51 }
 0x4e5   :  { %6161 = vmatpush1.bf16.msra.mxu1 %v6160_v19 }
 0x4e6   :  { %6026 = vmatprep.subr.msk.mxu1 %vm5269_vm5, %v5240_v34 }
 0x4e9   :  { %6027 = vmatpush1.msk.msra.mxu1 %vm5269_vm5, %v5239_v17 }
 0x4ea   :  { %6028 = vmatmul.mubr.msk.f32.vlgmr.msra.gmra.mrb[6].mxu1 %vm5265_vm6, %v5244_v43 }
 0x5bd   :  { %v5342_v39 = vpop.f32.mrb[6].mxu1 }
 0x5be   :  { %v5343_v47 = vadd.f32 %v5342_v39, %v5263_v29  ;;  %v5344_v16 = vpop.f32.mrb[7].mxu1 }
 0x5bf   :  { %v5345_v4 = vadd.f32 %v5344_v16, %v5264_v2 }
 0x5c0   :  { %v5354_v26 = vadd.f32 %v5352_v33, %v5343_v47 }
 0x5c1   :  { %v5355_v41 = vadd.f32 %v5352_v33, %v5345_v4 }
 0x5c3   :  { %v5358_v1 = vcombine.low %v5354_v26, %v5355_v41 }
 0x5c5   :  { %5360 = vst [vmem:[%s11533_s10] sm:$0xff] %v5358_v1 }
 0x5c6   :  { %5365 = vsyncpa [#allocation5], 1 }

</bundles_post_ra>
